<compile_context>
chip_gen: v7x
topology: tpu7x:2x2x1
jax: 0.10.0
libtpu: 0.0.40
codegen_flags: <defaults>
</compile_context>

<pallas_src>
import math
from functools import partial

import jax
import jax.numpy as jnp
import numpy as np
from jax.experimental import pallas as pl
from jax.experimental.pallas import tpu as pltpu

jax.config.update("jax_default_matmul_precision", "highest")


# ----------------------------------------------------------------------------
# elementwise helpers (used inside kernels and in the pure-JAX reference)
# ----------------------------------------------------------------------------
def _elu(x):
    # clamp exp argument so the discarded jnp.where branch never produces inf
    return jnp.where(x > 0, x, jnp.exp(jnp.minimum(x, 0.0)) - 1.0)


def _concat_elu(x):
    # concat_elu(x) = elu(cat([x, -x], channel_axis)); channel axis is last.
    return jnp.concatenate([_elu(x), _elu(-x)], axis=-1)


# ----------------------------------------------------------------------------
# Pallas kernels
# ----------------------------------------------------------------------------
def _gated_conv_ln_kernel(x_ref, wc_ref, bc_ref, wg_ref, bg_ref,
                          g1_ref, b1_ref, o_ref, *, H, Wp, C, eps):
    """Fused GatedConv(3x3 WN-conv + 1x1 gate) + residual + LayerNorm.

    x_ref : (1, Npad, C) zero-padded input, flattened (H+4, W+2) spatial.
    wc_ref: (9*2C, C)    conv weight, tap-major (kh*3+kw) with 2C inputs each.
    wg_ref: (2C, 2C)     1x1 gate weight (in, out).
    Output rows are the H*(W+2) contiguous flattened rows covering the valid
    image; the width-padding columns hold garbage and are sliced off outside.
    """
    Nout = H * Wp
    x = x_ref[0]                                      # (Npad, C)
    # concat_elu computed once on the padded buffer (not 9x per tap).
    ce = _concat_elu(x)                               # (Npad, 2C)
    # 9 shifted contiguous row-slices laid side-by-side -> one wide-K matmul.
    taps = []
    for kh in range(3):
        for kw in range(3):
            start = (kh + 1) * Wp + kw - 1            # static offset
            taps.append(ce[start:start + Nout, :])
    wide = jnp.concatenate(taps, axis=-1)             # (Nout, 18C)
    h = jnp.dot(wide, wc_ref[...],
                preferred_element_type=jnp.float32) + bc_ref[...]
    # 1x1 gate: concat_elu(h) @ Wg == elu(h) @ Wg_top + elu(-h) @ Wg_bot
    wg = wg_ref[...]
    g = (jnp.dot(_elu(h), wg[:C, :], preferred_element_type=jnp.float32)
         + jnp.dot(_elu(-h), wg[C:, :], preferred_element_type=jnp.float32)
         + bg_ref[...])
    y = g[:, :C] * jax.nn.sigmoid(g[:, C:]) + x[2 * Wp:2 * Wp + Nout, :]
    # LayerNorm over channels
    mu = jnp.mean(y, axis=-1, keepdims=True)
    var = jnp.mean(jnp.square(y - mu), axis=-1, keepdims=True)
    o_ref[0] = (y - mu) * jax.lax.rsqrt(var + eps) * g1_ref[...] + b1_ref[...]


def _gated_attn_ln_kernel(x_ref, pos_ref, wp_ref, wg_ref, bg_ref,
                          g2_ref, b2_ref, o_ref, *, C, num_heads, eps):
    """Fused gated multi-head self-attention + residual + LayerNorm.

    x_ref: (1, S, C) (LN1 output, also the residual); pos_ref: (S, C);
    wp_ref: (C, 3C) [k|v|q]; wg_ref: (C, 2C); bg_ref: (1, 2C).
    """
    d = C // num_heads
    scale = d ** (-0.5)
    x1 = x_ref[0]                                     # residual (S, C)
    x = x1 + pos_ref[...]
    qkv = jnp.dot(x, wp_ref[...], preferred_element_type=jnp.float32)
    k = qkv[:, :C]
    v = qkv[:, C:2 * C]
    q = qkv[:, 2 * C:] * scale
    # TODO(synk): flash-style KV tiling for large S; full (S,S) logits per
    # head are fine at the small spatial sizes exercised here.
    heads = []
    for hh in range(num_heads):
        sl = slice(hh * d, (hh + 1) * d)
        s = jax.lax.dot_general(q[:, sl], k[:, sl], (((1,), (1,)), ((), ())),
                                preferred_element_type=jnp.float32)  # (S, S)
        s = s - jnp.max(s, axis=-1, keepdims=True)
        p = jnp.exp(s)
        p = p * pl.reciprocal(jnp.sum(p, axis=-1, keepdims=True), approx=True)
        heads.append(jnp.dot(p, v[:, sl], preferred_element_type=jnp.float32))
    attn = jnp.concatenate(heads, axis=-1)            # (S, C)
    # single gate matmul at K = C (instead of num_heads matmuls at K = d)
    g = jnp.dot(attn, wg_ref[...], preferred_element_type=jnp.float32) + bg_ref[...]
    y = g[:, :C] * jax.nn.sigmoid(g[:, C:]) + x1
    mu = jnp.mean(y, axis=-1, keepdims=True)
    var = jnp.mean(jnp.square(y - mu), axis=-1, keepdims=True)
    o_ref[0] = (y - mu) * jax.lax.rsqrt(var + eps) * g2_ref[...] + b2_ref[...]


# ----------------------------------------------------------------------------
# Wrappers (glue: layout, padding, pallas_call plumbing)
# ----------------------------------------------------------------------------
def gated_conv_ln(x_nhwc, p, eps=1e-5):
    B, H, W, C = x_nhwc.shape
    Wp = W + 2
    Npad = (H + 4) * Wp
    Nout = H * Wp
    # Single padded copy (2 rows top/bottom for tap-shift headroom, 1 col L/R).
    xpad = jnp.pad(x_nhwc, ((0, 0), (2, 2), (1, 1), (0, 0))).reshape(B, Npad, C)
    wc = p['conv_w'].reshape(9 * 2 * C, C)            # HWIO -> (9*2C, C)
    out = pl.pallas_call(
        partial(_gated_conv_ln_kernel, H=H, Wp=Wp, C=C, eps=eps),
        out_shape=jax.ShapeDtypeStruct((B, Nout, C), jnp.float32),
        grid=(B,),
        in_specs=[
            pl.BlockSpec((1, Npad, C), lambda b: (b, 0, 0)),
            pl.BlockSpec((9 * 2 * C, C), lambda b: (0, 0)),
            pl.BlockSpec((1, C), lambda b: (0, 0)),
            pl.BlockSpec((2 * C, 2 * C), lambda b: (0, 0)),
            pl.BlockSpec((1, 2 * C), lambda b: (0, 0)),
            pl.BlockSpec((1, C), lambda b: (0, 0)),
            pl.BlockSpec((1, C), lambda b: (0, 0)),
        ],
        out_specs=pl.BlockSpec((1, Nout, C), lambda b: (b, 0, 0)),
        compiler_params=pltpu.CompilerParams(dimension_semantics=("parallel",)),
    )(xpad, wc, p['conv_b'].reshape(1, C),
      p['gate_conv_w'], p['gate_conv_b'].reshape(1, 2 * C),
      p['ln1_g'].reshape(1, C), p['ln1_b'].reshape(1, C))
    # drop the width-padding columns
    return out.reshape(B, H, Wp, C)[:, :, 1:W + 1, :]
    # TODO(synk): add an HW row-tile grid axis (halo'd) for very large H*W*C
    # so per-step VMEM stays within v7x's 64 MiB.


def gated_attn_ln(x1_nhwc, p, num_heads, eps=1e-5):
    B, H, W, C = x1_nhwc.shape
    S = H * W
    x1 = x1_nhwc.reshape(B, S, C)
    pos = get_pos_enc(S, C)
    out = pl.pallas_call(
        partial(_gated_attn_ln_kernel, C=C, num_heads=num_heads, eps=eps),
        out_shape=jax.ShapeDtypeStruct((B, S, C), jnp.float32),
        grid=(B,),
        in_specs=[
            pl.BlockSpec((1, S, C), lambda b: (b, 0, 0)),
            pl.BlockSpec((S, C), lambda b: (0, 0)),
            pl.BlockSpec((C, 3 * C), lambda b: (0, 0)),
            pl.BlockSpec((C, 2 * C), lambda b: (0, 0)),
            pl.BlockSpec((1, 2 * C), lambda b: (0, 0)),
            pl.BlockSpec((1, C), lambda b: (0, 0)),
            pl.BlockSpec((1, C), lambda b: (0, 0)),
        ],
        out_specs=pl.BlockSpec((1, S, C), lambda b: (b, 0, 0)),
        compiler_params=pltpu.CompilerParams(dimension_semantics=("parallel",)),
    )(x1, pos, p['attn_in_w'], p['attn_gate_w'],
      p['attn_gate_b'].reshape(1, 2 * C),
      p['ln2_g'].reshape(1, C), p['ln2_b'].reshape(1, C))
    return out.reshape(B, H, W, C)


def conv_attn_block(x_nchw, p, num_heads):
    """ConvAttnBlock.forward (use_attn=True, aux=None, drop_prob=0)."""
    x = jnp.transpose(x_nchw, (0, 2, 3, 1))           # NCHW -> NHWC
    x1 = gated_conv_ln(x, p)                          # GatedConv + res + LN1
    x2 = gated_attn_ln(x1, p, num_heads)              # GatedAttn + res + LN2
    return jnp.transpose(x2, (0, 3, 1, 2))            # NHWC -> NCHW


# ----------------------------------------------------------------------------
# Parameter construction (deterministic, weight-norm reparameterization)
# ----------------------------------------------------------------------------
def get_pos_enc(seq_len, num_channels):
    position = jnp.arange(seq_len, dtype=jnp.float32)
    num_timescales = num_channels // 2
    log_inc = math.log(10000.0) / (num_timescales - 1)
    inv_ts = jnp.exp(jnp.arange(num_timescales, dtype=jnp.float32) * -log_inc)
    scaled_time = position[:, None] * inv_ts[None, :]
    enc = jnp.concatenate([jnp.sin(scaled_time), jnp.cos(scaled_time)], axis=1)
    if num_channels % 2:
        enc = jnp.pad(enc, ((0, 0), (0, num_channels % 2)))
    return enc  # (S, C)


def _wn_conv(v, g):      # v: (O, I, kh, kw), g: (O,)
    norm = jnp.sqrt(jnp.sum(v * v, axis=(1, 2, 3), keepdims=True))
    return v * (g.reshape(-1, 1, 1, 1) / norm)


def _wn_linear(v, g):    # v: (O, I), g: (O,)
    norm = jnp.sqrt(jnp.sum(v * v, axis=1, keepdims=True))
    return v * (g.reshape(-1, 1) / norm)


def make_params(ks, C):
    # GatedConv.conv : WNConv2d(2C -> C, 3x3, pad 1)
    conv_v = jax.random.normal(ks[0], (C, 2 * C, 3, 3), jnp.float32) * 0.1
    conv_g = jax.random.uniform(ks[1], (C,), minval=0.5, maxval=1.5)
    conv_w_oihw = _wn_conv(conv_v, conv_g)
    conv_w_hwio = jnp.transpose(conv_w_oihw, (2, 3, 1, 0))       # (3,3,2C,C)
    conv_b = jax.random.normal(ks[2], (C,), jnp.float32) * 0.1
    # GatedConv.gate : WNConv2d(2C -> 2C, 1x1)
    gcv = jax.random.normal(ks[3], (2 * C, 2 * C, 1, 1), jnp.float32) * 0.1
    gcg = jax.random.uniform(ks[4], (2 * C,), minval=0.5, maxval=1.5)
    gate_conv_w = _wn_conv(gcv, gcg)[:, :, 0, 0].T               # (in=2C, out=2C)
    gate_conv_b = jax.random.normal(ks[5], (2 * C,), jnp.float32) * 0.1
    # GatedAttn.in_proj : weight_norm(Linear(C -> 3C, bias=False))
    ipv = jax.random.normal(ks[6], (3 * C, C), jnp.float32) * 0.2
    ipg = jax.random.uniform(ks[7], (3 * C,), minval=0.5, maxval=1.5)
    attn_in_w = _wn_linear(ipv, ipg).T                           # (C, 3C)
    # GatedAttn.gate : weight_norm(Linear(C -> 2C))
    glv = jax.random.normal(ks[8], (2 * C, C), jnp.float32) * 0.2
    glg = jax.random.uniform(ks[9], (2 * C,), minval=0.5, maxval=1.5)
    attn_gate_w = _wn_linear(glv, glg).T                         # (C, 2C)
    attn_gate_b = jax.random.normal(ks[10], (2 * C,), jnp.float32) * 0.1
    return {
        'conv_w': conv_w_hwio, 'conv_b': conv_b,
        'gate_conv_w': gate_conv_w, 'gate_conv_b': gate_conv_b,
        'ln1_g': jnp.ones((C,), jnp.float32), 'ln1_b': jnp.zeros((C,), jnp.float32),
        'ln2_g': jnp.ones((C,), jnp.float32), 'ln2_b': jnp.zeros((C,), jnp.float32),
        'attn_in_w': attn_in_w, 'attn_gate_w': attn_gate_w, 'attn_gate_b': attn_gate_b,
    }


# ----------------------------------------------------------------------------
# Pure-JAX reference (mirrors the PyTorch forward) for correctness checking
# ----------------------------------------------------------------------------
def reference_forward(x_nchw, p, num_heads):
    B, C, H, W = x_nchw.shape
    x = jnp.transpose(x_nchw, (0, 2, 3, 1))                      # NHWC
    # GatedConv
    ce = _concat_elu(x)
    h = jax.lax.conv_general_dilated(
        ce, p['conv_w'], window_strides=(1, 1), padding='SAME',
        dimension_numbers=('NHWC', 'HWIO', 'NHWC')) + p['conv_b']
    ce2 = _concat_elu(h)
    g = jnp.einsum('bhwi,io->bhwo', ce2, p['gate_conv_w']) + p['gate_conv_b']
    a, bgt = jnp.split(g, 2, axis=-1)
    x1 = a * jax.nn.sigmoid(bgt) + x

    def ln(y, gamma, beta, eps=1e-5):
        mu = y.mean(-1, keepdims=True)
        var = ((y - mu) ** 2).mean(-1, keepdims=True)
        return (y - mu) / jnp.sqrt(var + eps) * gamma + beta

    x1n = ln(x1, p['ln1_g'], p['ln1_b'])
    # GatedAttn
    S = H * W
    d = C // num_heads
    xs = x1n.reshape(B, S, C) + get_pos_enc(S, C)[None]
    qkv = jnp.einsum('bsc,cd->bsd', xs, p['attn_in_w'])
    mem, qq = qkv[..., :2 * C], qkv[..., 2 * C:]
    k, v = mem[..., :C], mem[..., C:]
    sh = lambda t: t.reshape(B, S, num_heads, d).transpose(0, 2, 1, 3)
    q = sh(qq) * d ** (-0.5)
    w = jax.nn.softmax(jnp.einsum('bhsd,bhtd->bhst', q, sh(k)), axis=-1)
    attn = jnp.einsum('bhst,bhtd->bhsd', w, sh(v))
    attn = attn.transpose(0, 2, 1, 3).reshape(B, H, W, C)
    g2 = jnp.einsum('bhwc,cd->bhwd', attn, p['attn_gate_w']) + p['attn_gate_b']
    a2, b2 = jnp.split(g2, 2, axis=-1)
    x2 = ln(a2 * jax.nn.sigmoid(b2) + x1n, p['ln2_g'], p['ln2_b'])
    return jnp.transpose(x2, (0, 3, 1, 2))


# ----------------------------------------------------------------------------
if __name__ == "__main__":
    B, C, H, W = 2, 8, 16, 16        # num_channels=8 (divisible by 4 heads)
    num_heads = 4                     # GatedAttn default
    key = jax.random.PRNGKey(0)
    ks = jax.random.split(key, 12)
    params = make_params(ks, C)
    x = jax.random.normal(ks[11], (B, C, H, W), dtype=jnp.float32)

    out = conv_attn_block(x, params, num_heads)
    out = jax.block_until_ready(out)

    ref = reference_forward(x, params, num_heads)
    np.testing.assert_allclose(np.asarray(out), np.asarray(ref),
                               rtol=2e-3, atol=2e-3)
    print("KERNEL_OK")
</pallas_src>

<mosaic_0001>
module attributes {stable_mosaic.version = 11 : i64} {
  func.func @_gated_conv_ln_kernel(%arg0: i32, %arg1: memref<1x360x8xf32, #tpu.memory_space<vmem>>, %arg2: memref<144x8xf32, #tpu.memory_space<vmem>>, %arg3: memref<1x8xf32, #tpu.memory_space<vmem>>, %arg4: memref<16x16xf32, #tpu.memory_space<vmem>>, %arg5: memref<1x16xf32, #tpu.memory_space<vmem>>, %arg6: memref<1x8xf32, #tpu.memory_space<vmem>>, %arg7: memref<1x8xf32, #tpu.memory_space<vmem>>, %arg8: memref<1x288x8xf32, #tpu.memory_space<vmem>>) attributes {dimension_semantics = [#tpu.dimension_semantics<parallel>], iteration_bounds = array<i64: 2>, scalar_prefetch = 0 : i64, scratch_operands = 0 : i64, tpu.core_type = #tpu.core_type<tc>, window_params = [{transform_indices = @transform_0, window_bounds = array<i64: 1, 360, 8>}, {pipeline_mode = #tpu.pipeline_mode<synchronous>, transform_indices = @transform_1, window_bounds = array<i64: 144, 8>}, {pipeline_mode = #tpu.pipeline_mode<synchronous>, transform_indices = @transform_2, window_bounds = array<i64: 1, 8>}, {pipeline_mode = #tpu.pipeline_mode<synchronous>, transform_indices = @transform_3, window_bounds = array<i64: 16, 16>}, {pipeline_mode = #tpu.pipeline_mode<synchronous>, transform_indices = @transform_4, window_bounds = array<i64: 1, 16>}, {pipeline_mode = #tpu.pipeline_mode<synchronous>, transform_indices = @transform_5, window_bounds = array<i64: 1, 8>}, {pipeline_mode = #tpu.pipeline_mode<synchronous>, transform_indices = @transform_6, window_bounds = array<i64: 1, 8>}, {transform_indices = @transform_7, window_bounds = array<i64: 1, 288, 8>}]} {
    %c0 = arith.constant 0 : index
    %c0_0 = arith.constant 0 : index
    %c0_1 = arith.constant 0 : index
    %0 = vector.load %arg1[%c0, %c0_0, %c0_1] : memref<1x360x8xf32, #tpu.memory_space<vmem>>, vector<1x360x8xf32>
    %1 = vector.shape_cast %0 : vector<1x360x8xf32> to vector<360x8xf32>
    %cst = arith.constant 0.000000e+00 : f32
    %2 = vector.broadcast %cst : f32 to vector<360x8xf32>
    %3 = arith.cmpf ogt, %1, %2 : vector<360x8xf32>
    %cst_2 = arith.constant 0.000000e+00 : f32
    %4 = vector.broadcast %cst_2 : f32 to vector<360x8xf32>
    %5 = arith.minimumf %1, %4 : vector<360x8xf32>
    %6 = math.exp %5 : vector<360x8xf32>
    %cst_3 = arith.constant 1.000000e+00 : f32
    %7 = vector.broadcast %cst_3 : f32 to vector<360x8xf32>
    %8 = arith.subf %6, %7 : vector<360x8xf32>
    %9 = arith.select %3, %1, %8 : vector<360x8xi1>, vector<360x8xf32>
    %cst_4 = arith.constant 0.000000e+00 : f32
    %10 = vector.broadcast %cst_4 : f32 to vector<360x8xf32>
    %11 = arith.subf %10, %1 : vector<360x8xf32>
    %cst_5 = arith.constant 0.000000e+00 : f32
    %12 = vector.broadcast %cst_5 : f32 to vector<360x8xf32>
    %13 = arith.cmpf ogt, %11, %12 : vector<360x8xf32>
    %cst_6 = arith.constant 0.000000e+00 : f32
    %14 = vector.broadcast %cst_6 : f32 to vector<360x8xf32>
    %15 = arith.minimumf %11, %14 : vector<360x8xf32>
    %16 = math.exp %15 : vector<360x8xf32>
    %cst_7 = arith.constant 1.000000e+00 : f32
    %17 = vector.broadcast %cst_7 : f32 to vector<360x8xf32>
    %18 = arith.subf %16, %17 : vector<360x8xf32>
    %19 = arith.select %13, %11, %18 : vector<360x8xi1>, vector<360x8xf32>
    %20 = tpu.concatenate %9, %19 in 1 : vector<360x8xf32>, vector<360x8xf32> -> vector<360x16xf32>
    %21 = vector.extract_strided_slice %20 {offsets = [17, 0], sizes = [288, 16], strides = [1, 1]} : vector<360x16xf32> to vector<288x16xf32>
    %22 = vector.extract_strided_slice %20 {offsets = [18, 0], sizes = [288, 16], strides = [1, 1]} : vector<360x16xf32> to vector<288x16xf32>
    %23 = vector.extract_strided_slice %20 {offsets = [19, 0], sizes = [288, 16], strides = [1, 1]} : vector<360x16xf32> to vector<288x16xf32>
    %24 = vector.extract_strided_slice %20 {offsets = [35, 0], sizes = [288, 16], strides = [1, 1]} : vector<360x16xf32> to vector<288x16xf32>
    %25 = vector.extract_strided_slice %20 {offsets = [36, 0], sizes = [288, 16], strides = [1, 1]} : vector<360x16xf32> to vector<288x16xf32>
    %26 = vector.extract_strided_slice %20 {offsets = [37, 0], sizes = [288, 16], strides = [1, 1]} : vector<360x16xf32> to vector<288x16xf32>
    %27 = vector.extract_strided_slice %20 {offsets = [53, 0], sizes = [288, 16], strides = [1, 1]} : vector<360x16xf32> to vector<288x16xf32>
    %28 = vector.extract_strided_slice %20 {offsets = [54, 0], sizes = [288, 16], strides = [1, 1]} : vector<360x16xf32> to vector<288x16xf32>
    %29 = vector.extract_strided_slice %20 {offsets = [55, 0], sizes = [288, 16], strides = [1, 1]} : vector<360x16xf32> to vector<288x16xf32>
    %30 = tpu.concatenate %21, %22, %23, %24, %25, %26, %27, %28, %29 in 1 : vector<288x16xf32>, vector<288x16xf32>, vector<288x16xf32>, vector<288x16xf32>, vector<288x16xf32>, vector<288x16xf32>, vector<288x16xf32>, vector<288x16xf32>, vector<288x16xf32> -> vector<288x144xf32>
    %c0_8 = arith.constant 0 : index
    %c0_9 = arith.constant 0 : index
    %31 = vector.load %arg2[%c0_8, %c0_9] : memref<144x8xf32, #tpu.memory_space<vmem>>, vector<144x8xf32>
    %cst_10 = arith.constant dense<0.000000e+00> : vector<288x8xf32>
    %32 = tpu.matmul %30, %31, %cst_10 {dimension_numbers = #tpu.dot_dimension_numbers<[1], [0], [0], [1], [0, 0, 1, 1], [], []>, precision = #tpu.contract_precision<fp32>} : vector<288x144xf32>, vector<144x8xf32>, vector<288x8xf32> -> vector<288x8xf32>
    %c0_11 = arith.constant 0 : index
    %c0_12 = arith.constant 0 : index
    %33 = vector.load %arg3[%c0_11, %c0_12] : memref<1x8xf32, #tpu.memory_space<vmem>>, vector<1x8xf32>
    %34 = vector.broadcast %33 : vector<1x8xf32> to vector<288x8xf32>
    %35 = arith.addf %32, %34 : vector<288x8xf32>
    %c0_13 = arith.constant 0 : index
    %c0_14 = arith.constant 0 : index
    %36 = vector.load %arg4[%c0_13, %c0_14] : memref<16x16xf32, #tpu.memory_space<vmem>>, vector<16x16xf32>
    %cst_15 = arith.constant 0.000000e+00 : f32
    %37 = vector.broadcast %cst_15 : f32 to vector<288x8xf32>
    %38 = arith.cmpf ogt, %35, %37 : vector<288x8xf32>
    %cst_16 = arith.constant 0.000000e+00 : f32
    %39 = vector.broadcast %cst_16 : f32 to vector<288x8xf32>
    %40 = arith.minimumf %35, %39 : vector<288x8xf32>
    %41 = math.exp %40 : vector<288x8xf32>
    %cst_17 = arith.constant 1.000000e+00 : f32
    %42 = vector.broadcast %cst_17 : f32 to vector<288x8xf32>
    %43 = arith.subf %41, %42 : vector<288x8xf32>
    %44 = arith.select %38, %35, %43 : vector<288x8xi1>, vector<288x8xf32>
    %45 = vector.extract_strided_slice %36 {offsets = [0, 0], sizes = [8, 16], strides = [1, 1]} : vector<16x16xf32> to vector<8x16xf32>
    %cst_18 = arith.constant dense<0.000000e+00> : vector<288x16xf32>
    %46 = tpu.matmul %44, %45, %cst_18 {dimension_numbers = #tpu.dot_dimension_numbers<[1], [0], [0], [1], [0, 0, 1, 1], [], []>, precision = #tpu.contract_precision<fp32>} : vector<288x8xf32>, vector<8x16xf32>, vector<288x16xf32> -> vector<288x16xf32>
    %cst_19 = arith.constant 0.000000e+00 : f32
    %47 = vector.broadcast %cst_19 : f32 to vector<288x8xf32>
    %48 = arith.subf %47, %35 : vector<288x8xf32>
    %cst_20 = arith.constant 0.000000e+00 : f32
    %49 = vector.broadcast %cst_20 : f32 to vector<288x8xf32>
    %50 = arith.cmpf ogt, %48, %49 : vector<288x8xf32>
    %cst_21 = arith.constant 0.000000e+00 : f32
    %51 = vector.broadcast %cst_21 : f32 to vector<288x8xf32>
    %52 = arith.minimumf %48, %51 : vector<288x8xf32>
    %53 = math.exp %52 : vector<288x8xf32>
    %cst_22 = arith.constant 1.000000e+00 : f32
    %54 = vector.broadcast %cst_22 : f32 to vector<288x8xf32>
    %55 = arith.subf %53, %54 : vector<288x8xf32>
    %56 = arith.select %50, %48, %55 : vector<288x8xi1>, vector<288x8xf32>
    %57 = vector.extract_strided_slice %36 {offsets = [8, 0], sizes = [8, 16], strides = [1, 1]} : vector<16x16xf32> to vector<8x16xf32>
    %cst_23 = arith.constant dense<0.000000e+00> : vector<288x16xf32>
    %58 = tpu.matmul %56, %57, %cst_23 {dimension_numbers = #tpu.dot_dimension_numbers<[1], [0], [0], [1], [0, 0, 1, 1], [], []>, precision = #tpu.contract_precision<fp32>} : vector<288x8xf32>, vector<8x16xf32>, vector<288x16xf32> -> vector<288x16xf32>
    %59 = arith.addf %46, %58 : vector<288x16xf32>
    %c0_24 = arith.constant 0 : index
    %c0_25 = arith.constant 0 : index
    %60 = vector.load %arg5[%c0_24, %c0_25] : memref<1x16xf32, #tpu.memory_space<vmem>>, vector<1x16xf32>
    %61 = vector.broadcast %60 : vector<1x16xf32> to vector<288x16xf32>
    %62 = arith.addf %59, %61 : vector<288x16xf32>
    %63 = vector.extract_strided_slice %62 {offsets = [0, 0], sizes = [288, 8], strides = [1, 1]} : vector<288x16xf32> to vector<288x8xf32>
    %64 = vector.extract_strided_slice %62 {offsets = [0, 8], sizes = [288, 8], strides = [1, 1]} : vector<288x16xf32> to vector<288x8xf32>
    %65 = arith.negf %64 : vector<288x8xf32>
    %66 = math.exp %65 : vector<288x8xf32>
    %cst_26 = arith.constant 1.000000e+00 : f32
    %67 = vector.broadcast %cst_26 : f32 to vector<288x8xf32>
    %68 = arith.addf %67, %66 : vector<288x8xf32>
    %69 = arith.divf %67, %68 : vector<288x8xf32>
    %70 = arith.mulf %63, %69 : vector<288x8xf32>
    %71 = vector.extract_strided_slice %1 {offsets = [36, 0], sizes = [288, 8], strides = [1, 1]} : vector<360x8xf32> to vector<288x8xf32>
    %72 = arith.addf %70, %71 : vector<288x8xf32>
    %cst_27 = arith.constant dense<0.000000e+00> : vector<288xf32>
    %73 = vector.multi_reduction <add>, %72, %cst_27 [1] : vector<288x8xf32> to vector<288xf32>
    %74 = vector.shape_cast %73 : vector<288xf32> to vector<288x1xf32>
    %cst_28 = arith.constant 8.000000e+00 : f32
    %75 = vector.broadcast %cst_28 : f32 to vector<288x1xf32>
    %76 = arith.divf %74, %75 : vector<288x1xf32>
    %77 = vector.broadcast %76 : vector<288x1xf32> to vector<288x8xf32>
    %78 = arith.subf %72, %77 : vector<288x8xf32>
    %79 = arith.mulf %78, %78 : vector<288x8xf32>
    %cst_29 = arith.constant dense<0.000000e+00> : vector<288xf32>
    %80 = vector.multi_reduction <add>, %79, %cst_29 [1] : vector<288x8xf32> to vector<288xf32>
    %81 = vector.shape_cast %80 : vector<288xf32> to vector<288x1xf32>
    %cst_30 = arith.constant 8.000000e+00 : f32
    %82 = vector.broadcast %cst_30 : f32 to vector<288x1xf32>
    %83 = arith.divf %81, %82 : vector<288x1xf32>
    %84 = vector.broadcast %76 : vector<288x1xf32> to vector<288x8xf32>
    %85 = arith.subf %72, %84 : vector<288x8xf32>
    %cst_31 = arith.constant 9.99999974E-6 : f32
    %86 = vector.broadcast %cst_31 : f32 to vector<288x1xf32>
    %87 = arith.addf %83, %86 : vector<288x1xf32>
    %88 = math.rsqrt %87 : vector<288x1xf32>
    %89 = vector.broadcast %88 : vector<288x1xf32> to vector<288x8xf32>
    %90 = arith.mulf %85, %89 : vector<288x8xf32>
    %c0_32 = arith.constant 0 : index
    %c0_33 = arith.constant 0 : index
    %91 = vector.load %arg6[%c0_32, %c0_33] : memref<1x8xf32, #tpu.memory_space<vmem>>, vector<1x8xf32>
    %92 = vector.broadcast %91 : vector<1x8xf32> to vector<288x8xf32>
    %93 = arith.mulf %90, %92 : vector<288x8xf32>
    %c0_34 = arith.constant 0 : index
    %c0_35 = arith.constant 0 : index
    %94 = vector.load %arg7[%c0_34, %c0_35] : memref<1x8xf32, #tpu.memory_space<vmem>>, vector<1x8xf32>
    %95 = vector.broadcast %94 : vector<1x8xf32> to vector<288x8xf32>
    %96 = arith.addf %93, %95 : vector<288x8xf32>
    %c0_36 = arith.constant 0 : index
    %c0_37 = arith.constant 0 : index
    %c0_38 = arith.constant 0 : index
    %97 = vector.load %arg8[%c0_36, %c0_37, %c0_38] : memref<1x288x8xf32, #tpu.memory_space<vmem>>, vector<1x288x8xf32>
    %98 = vector.shape_cast %97 : vector<1x288x8xf32> to vector<288x8xf32>
    %99 = vector.shape_cast %96 : vector<288x8xf32> to vector<1x288x8xf32>
    tpu.vector_store %arg8[%c0_36, %c0_37, %c0_38], %99 {strides = array<i32>} : memref<1x288x8xf32, #tpu.memory_space<vmem>>, vector<1x288x8xf32>,
    return
  }
  func.func @transform_0(%arg0: i32) -> (i32, i32, i32) {
    %c0_i32 = arith.constant 0 : i32
    %c0_i32_0 = arith.constant 0 : i32
    %c0_i32_1 = arith.constant 0 : i32
    return %arg0, %c0_i32, %c0_i32_0 : i32, i32, i32
  }
  func.func @transform_1(%arg0: i32) -> (i32, i32) {
    %c0_i32 = arith.constant 0 : i32
    %c0_i32_0 = arith.constant 0 : i32
    %c0_i32_1 = arith.constant 0 : i32
    return %c0_i32, %c0_i32_0 : i32, i32
  }
  func.func @transform_2(%arg0: i32) -> (i32, i32) {
    %c0_i32 = arith.constant 0 : i32
    %c0_i32_0 = arith.constant 0 : i32
    %c0_i32_1 = arith.constant 0 : i32
    return %c0_i32, %c0_i32_0 : i32, i32
  }
  func.func @transform_3(%arg0: i32) -> (i32, i32) {
    %c0_i32 = arith.constant 0 : i32
    %c0_i32_0 = arith.constant 0 : i32
    %c0_i32_1 = arith.constant 0 : i32
    return %c0_i32, %c0_i32_0 : i32, i32
  }
  func.func @transform_4(%arg0: i32) -> (i32, i32) {
    %c0_i32 = arith.constant 0 : i32
    %c0_i32_0 = arith.constant 0 : i32
    %c0_i32_1 = arith.constant 0 : i32
    return %c0_i32, %c0_i32_0 : i32, i32
  }
  func.func @transform_5(%arg0: i32) -> (i32, i32) {
    %c0_i32 = arith.constant 0 : i32
    %c0_i32_0 = arith.constant 0 : i32
    %c0_i32_1 = arith.constant 0 : i32
    return %c0_i32, %c0_i32_0 : i32, i32
  }
  func.func @transform_6(%arg0: i32) -> (i32, i32) {
    %c0_i32 = arith.constant 0 : i32
    %c0_i32_0 = arith.constant 0 : i32
    %c0_i32_1 = arith.constant 0 : i32
    return %c0_i32, %c0_i32_0 : i32, i32
  }
  func.func @transform_7(%arg0: i32) -> (i32, i32, i32) {
    %c0_i32 = arith.constant 0 : i32
    %c0_i32_0 = arith.constant 0 : i32
    %c0_i32_1 = arith.constant 0 : i32
    return %arg0, %c0_i32, %c0_i32_0 : i32, i32, i32
  }
}

</mosaic_0001>

<bundles_post_ra>
// kernel: tpu_custom_call.1
= control target key start
LH: loop header
LB: loop body
LE: loop exit
PB: predicated region body
PF: predicated region fallthrough
CT: control target
= control target key end

     0   :  { %s14351_s24 = smov 0   ;;  %s21816_s0 = inlined_call_operand.vmem [shape: f32[2,360,8], index: 0, kind: input, shape index: {}]   ;;  %s21817_s1 = inlined_call_operand.vmem [shape: f32[144,8], index: 1, kind: input, shape index: {}]   ;;  %s21818_s2 = inlined_call_operand.vmem [shape: f32[1,8], index: 2, kind: input, shape index: {}]   ;;  %s21819_s3 = inlined_call_operand.vmem [shape: f32[16,16], index: 3, kind: input, shape index: {}]   ;;  %s21820_s4 = inlined_call_operand.vmem [shape: f32[1,16], index: 4, kind: input, shape index: {}]   ;;  %s21821_s5 = inlined_call_operand.vmem [shape: f32[1,8], index: 5, kind: input, shape index: {}]   ;;  %s21822_s6 = inlined_call_operand.vmem [shape: f32[1,8], index: 6, kind: input, shape index: {}]   ;;  %s21823_s7 = inlined_call_operand.vmem [shape: f32[2,288,8], index: 7, kind: output, shape index: {}]  }
   0x1 LB: > { %s11406_s25 = sadd.s32 4294967295, %s14299_s24   ;;  %p11410_p0 = scmp.ge.s32.totalorder %s14299_s24, 1  ;;  %s14299_s24 = sphi %s14351_s24, %s17_s24  }
   0x2   : > { %p237_p1 = scmp.lt.s32.totalorder %s14299_s24, 3 }
   0x4   : > { %p238_p2 = pnand %p11410_p0, %p237_p1 }
   0x6   : > { %241 = sbr.rel (%p238_p2) target bundleno = 3309 (0xced), region = 48 }
   0xd   : > { %p269_p3 = scmp.lt.s32.totalorder %s11406_s25, 1  ;;  %s14301_s30 = smov 8  }
   0xe   : > { %s14302_s8 = smov 16   ;;  %s14303_s9 = smov 32  }
   0xf   : > { %s23738_s25 = smov (!%p269_p3, %s11406_s25), 1  ;;  %s14304_s10 = smov 48  }
  0x10   : > { %s13679_s26 = smul.u32 360, %s23738_s25  ;;  %s14305_s11 = smov 64  }
  0x11   : > { %s14306_s12 = smov 80   ;;  %s14307_s13 = smov 96  }
  0x12   : > { %s14365_s29 = scalar_lea.vmem %s21816_s0, %s13679_s26  ;;  %s14308_s14 = smov 112  }
  0x13   : > { %v14368_v0 = vld [vmem:[%s14365_s29 + $0x20] sm:$0xff]  ;;  %v14371_v1 = vld [vmem:[%s14365_s29 + $0x10] sm:$0xff]  ;;  %v14374_v2 = vld [vmem:[%s14365_s29 + $0x28] sm:$0xff]  ;;  %s14310_s17 = smov 120  }
  0x14   : > { %v14377_v3 = vsub.f32 0.0, %v14368_v0  ;;  %v14380_v4 = vsub.f32 0.0, %v14371_v1  ;;  %v14383_v5 = vsub.f32 0.0, %v14374_v2  ;;  %v14386_v6 = vld [vmem:[%s14365_s29 + $0x18] sm:$0xff]  ;;  %v14389_v7 = vld [vmem:[%s14365_s29 + $0x30] sm:$0xff]  ;;  %v14408_v16 = vld [vmem:[%s14365_s29 + $0x40] sm:$0xff] }
  0x15   : > { %v14392_v8 = vld [vmem:[%s14365_s29 + $0x38] sm:$0xff]  ;;  %v14395_v9 = vsub.f32 0.0, %v14386_v6  ;;  %v14398_v10 = vsub.f32 0.0, %v14389_v7  ;;  %v14411_v17 = vld [vmem:[%s14365_s29 + $0x48] sm:$0xff]  ;;  %v14414_v18 = vld [vmem:[%s14365_s29 + $0x50] sm:$0xff]  ;;  %v14422_v27 = vsub.f32 0.0, %v14408_v16 }
  0x16   : > { %v14401_v11 = vsub.f32 0.0, %v14392_v8  ;;  %v650_v12 = vmin.f32 %v14377_v3, 0.0  ;;  %v648_v13 = vmin.f32 %v14380_v4, 0.0  ;;  %v651_v14 = vmin.f32 %v14383_v5, 0.0  ;;  %v14418_v22 = vld [vmem:[%s14365_s29 + $0x58] sm:$0xff]  ;;  %v14435_v33 = vld [vmem:[%s14365_s29 + $0x60] sm:$0xff] }
  0x17   : > { %v649_v15 = vmin.f32 %v14395_v9, 0.0  ;;  %v652_v21 = vmin.f32 %v14398_v10, 0.0  ;;  %v14425_v28 = vsub.f32 0.0, %v14411_v17  ;;  %v14428_v30 = vsub.f32 0.0, %v14414_v18  ;;  %v290_v36 = vld [vmem:[%s14365_s29 + $0x68] sm:$0xff]  ;;  %v292_v37 = vld [vmem:[%s14365_s29 + $0x78] sm:$0xff] }
  0x18   : > { %v693_v19 = vmul.f32 1.442695, %v650_v12  ;;  %v689_v20 = vmul.f32 1.442695, %v648_v13  ;;  %v695_v23 = vmul.f32 1.442695, %v651_v14 }
  0x19   : > { %v691_v24 = vmul.f32 1.442695, %v649_v15  ;;  %v653_v25 = vmin.f32 %v14401_v11, 0.0  ;;  %v697_v26 = vmul.f32 1.442695, %v652_v21  ;;  %v14431_v31 = vsub.f32 0.0, %v14418_v22 }
  0x1a   : > { %13699 = vpow2.f32 %v693_v19  ;;  %v654_v32 = vmin.f32 %v14422_v27, 0.0  ;;  %v655_v34 = vmin.f32 %v14425_v28, 0.0  ;;  %v656_v35 = vmin.f32 %v14428_v30, 0.0  ;;  %v294_v45 = vld [vmem:[%s14365_s29 + $0x88] sm:$0xff]  ;;  %v291_v49 = vld [vmem:[%s14365_s29 + $0x70] sm:$0xff]  ;;  %v296_v54 = vld [vmem:[%s14365_s29 + $0x98] sm:$0xff] }
  0x1b   : > { %13701 = vpow2.f32 %v689_v20  ;;  %v699_v29 = vmul.f32 1.442695, %v653_v25  ;;  %v657_v39 = vmin.f32 %v14431_v31, 0.0  ;;  %v14443_v41 = vsub.f32 0.0, %v14435_v33  ;;  %v298_v21 = vld [vmem:[%s14365_s29 + $0xa8] sm:$0xff] }
  0x1c   : > { %13703 = vpow2.f32 %v695_v23  ;;  %v701_v38 = vmul.f32 1.442695, %v654_v32  ;;  %v703_v40 = vmul.f32 1.442695, %v655_v34  ;;  %v14445_v43 = vsub.f32 0.0, %v290_v36  ;;  %v293_v32 = vld [vmem:[%s14365_s29 + $0x80] sm:$0xff] }
  0x1d   : > { %13705 = vpow2.f32 %v691_v24  ;;  %v707_v42 = vmul.f32 1.442695, %v657_v39  ;;  %v14447_v44 = vsub.f32 0.0, %v292_v37  ;;  %v705_v46 = vmul.f32 1.442695, %v656_v35  ;;  %v300_v37 = vld [vmem:[%s14365_s29 + $0xb8] sm:$0xff] }
  0x1e   : > { %13707 = vpow2.f32 %v697_v26  ;;  %v658_v47 = vmin.f32 %v14443_v41, 0.0  ;;  %v659_v48 = vmin.f32 %v14445_v43, 0.0  ;;  %vm609_vm0 = vcmp.gt.f32.partialorder %v14377_v3, 0.0 }
  0x1f   : > { %13709 = vpow2.f32 %v699_v29  ;;  %v14454_v50 = vsub.f32 0.0, %v294_v45  ;;  %vm607_vm1 = vcmp.gt.f32.partialorder %v14380_v4, 0.0  ;;  %v661_v53 = vmin.f32 %v14447_v44, 0.0 }
  0x20   : > { %13711 = vpow2.f32 %v701_v38  ;;  %v711_v52 = vmul.f32 1.442695, %v659_v48  ;;  %v709_v57 = vmul.f32 1.442695, %v658_v47  ;;  %v14459_v58 = vsub.f32 0.0, %v291_v49 }
  0x21   : > { %13713 = vpow2.f32 %v703_v40  ;;  %vm610_vm2 = vcmp.gt.f32.partialorder %v14383_v5, 0.0  ;;  %vm608_vm3 = vcmp.gt.f32.partialorder %v14395_v9, 0.0  ;;  %v663_v12 = vmin.f32 %v14454_v50, 0.0 }
  0x22   : > { %13715 = vpow2.f32 %v707_v42  ;;  %v14467_v13 = vsub.f32 0.0, %v296_v54  ;;  %v715_v20 = vmul.f32 1.442695, %v661_v53  ;;  %v660_v24 = vmin.f32 %v14459_v58, 0.0  ;;  %v295_v42 = vld [vmem:[%s14365_s29 + $0x90] sm:$0xff] }
  0x23   : > { %13717 = vpow2.f32 %v705_v46  ;;  %vm612_vm4 = vcmp.gt.f32.partialorder %v14401_v11, 0.0  ;;  %vm611_vm5 = vcmp.gt.f32.partialorder %v14398_v10, 0.0  ;;  %v14486_v36 = vsub.f32 0.0, %v298_v21 }
  0x24   : > { %v13700_v51 = vpop.eup %13699  ;;  %13719 = vpow2.f32 %v711_v52  ;;  %v665_v35 = vmin.f32 %v14467_v13, 0.0  ;;  %v719_v38 = vmul.f32 1.442695, %v663_v12  ;;  %v14492_v40 = vsub.f32 0.0, %v293_v32 }
  0x25   : > { %v13702_v55 = vpop.eup %13701  ;;  %v11456_v56 = vadd.f32 -1.0, %v13700_v51  ;;  %13721 = vpow2.f32 %v709_v57  ;;  %vm614_vm6 = vcmp.gt.f32.partialorder %v14425_v28, 0.0  ;;  %v14497_v48 = vsub.f32 0.0, %v300_v37  ;;  %v303_v37 = vld [vmem:[%s14365_s29 + $0xd0] sm:$0xff] }
  0x26   : > { %v13704_v59 = vpop.eup %13703  ;;  %v11454_v60 = vadd.f32 -1.0, %v13702_v55  ;;  %13723 = vpow2.f32 %v715_v20  ;;  %vm613_vm7 = vcmp.gt.f32.partialorder %v14422_v27, 0.0  ;;  %v723_v51 = vmul.f32 1.442695, %v665_v35  ;;  %v302_v20 = vld [vmem:[%s14365_s29 + $0xc8] sm:$0xff] }
  0x27   : > { %v13706_v61 = vpop.eup %13705  ;;  %v814_v62 = vsel %vm609_vm0, %v14377_v3, %v11456_v56  ;;  %v11457_v63 = vadd.f32 -1.0, %v13704_v59  ;;  %v662_v52 = vmin.f32 %v14492_v40, 0.0  ;;  %v14503_v53 = vsub.f32 0.0, %v295_v42  ;;  %v301_v56 = vld [vmem:[%s14365_s29 + $0xc0] sm:$0xff] }
  0x28   : > { %v13708_v14 = vpop.eup %13707  ;;  %898 = vrot.lane.b32.xlu1 %v814_v62, %s14301_s30  ;;  %v812_v15 = vsel %vm607_vm1, %v14380_v4, %v11454_v60  ;;  %v11455_v19 = vadd.f32 -1.0, %v13706_v61  ;;  %vm616_vm8 = vcmp.gt.f32.partialorder %v14431_v31, 0.0  ;;  %v669_v61 = vmin.f32 %v14497_v48, 0.0  ;;  %v297_v62 = vld [vmem:[%s14365_s29 + $0xa0] sm:$0xff] }
  0x29   : > { %v13710_v23 = vpop.eup %13709  ;;  %894 = vrot.lane.b32.xlu0 %v812_v15, %s14301_s30  ;;  %v815_v3 = vsel %vm610_vm2, %v14383_v5, %v11457_v63  ;;  %v11458_v26 = vadd.f32 -1.0, %v13708_v14  ;;  %v713_v5 = vmul.f32 1.442695, %v660_v24  ;;  %v717_v55 = vmul.f32 1.442695, %v662_v52 }
  0x2a   : > { %v13712_v25 = vpop.eup %13711  ;;  %v813_v4 = vsel %vm608_vm3, %v14395_v9, %v11455_v19  ;;  %v11459_v29 = vadd.f32 -1.0, %v13710_v23  ;;  %vm615_vm9 = vcmp.gt.f32.partialorder %v14428_v30, 0.0  ;;  %v664_v14 = vmin.f32 %v14503_v53, 0.0 }
  0x2b   : > { %v13714_v34 = vpop.eup %13713  ;;  %13725 = vpow2.f32 %v713_v5  ;;  %v816_v46 = vsel %vm611_vm5, %v14398_v10, %v11458_v26  ;;  %v11460_v47 = vadd.f32 -1.0, %v13712_v25  ;;  %vm618_vm10 = vcmp.gt.f32.partialorder %v14445_v43, 0.0 }
  0x2c   : > { %900 = vrot.lane.b32.xlu1 %v815_v3, %s14301_s30  ;;  %v817_v9 = vsel %vm612_vm4, %v14401_v11, %v11459_v29  ;;  %v11461_v39 = vadd.f32 -1.0, %v13714_v34  ;;  %v13716_v45 = vpop.eup %13715  ;;  %v667_v11 = vmin.f32 %v14486_v36, 0.0  ;;  %13727 = vpow2.f32 %v719_v38 }
  0x2d   : > { %896 = vrot.lane.b32.xlu0 %v813_v4, %s14301_s30  ;;  %v13718_v49 = vpop.eup %13717  ;;  %v11463_v54 = vadd.f32 -1.0, %v13716_v45  ;;  %v818_v59 = vsel %vm613_vm7, %v14422_v27, %v11460_v47  ;;  %13729 = vpow2.f32 %v723_v51  ;;  %v299_v27 = vld [vmem:[%s14365_s29 + $0xb0] sm:$0xff]  ;;  %v14522_v21 = vsub.f32 0.0, %v297_v62 }
  0x2e   : > { %v819_v10 = vsel %vm614_vm6, %v14425_v28, %v11461_v39  ;;  %v13720_v57 = vpop.eup %13719  ;;  %v11462_v60 = vadd.f32 -1.0, %v13718_v49  ;;  %v727_v12 = vmul.f32 1.442695, %v667_v11  ;;  %13731 = vpow2.f32 %v717_v55  ;;  %v304_v11 = vld [vmem:[%s14365_s29 + $0xd8] sm:$0xff] }
  0x2f   : > { %v13722_v63 = vpop.eup %13721  ;;  %v14514_v28 = vsub.f32 0.0, %v301_v56  ;;  %v821_v15 = vsel %vm616_vm8, %v14431_v31, %v11463_v54  ;;  %v11465_v19 = vadd.f32 -1.0, %v13720_v57  ;;  %v731_v25 = vmul.f32 1.442695, %v669_v61  ;;  %v305_v61 = vld [vmem:[%s14365_s29 + $0xe0] sm:$0xff] }
  0x30   : > { %904 = vrot.lane.b32.xlu1 %v817_v9, %s14301_s30  ;;  %v13724_v23 = vpop.eup %13723  ;;  %v820_v3 = vsel %vm615_vm9, %v14428_v30, %v11462_v60  ;;  %v11464_v24 = vadd.f32 -1.0, %v13722_v63  ;;  %v721_v4 = vmul.f32 1.442695, %v664_v14  ;;  %vm617_vm11 = vcmp.gt.f32.partialorder %v14443_v41, 0.0 }
  0x31   : > { %902 = vrot.lane.b32.xlu0 %v816_v46, %s14301_s30  ;;  %13733 = vpow2.f32 %v727_v12  ;;  %v666_v29 = vmin.f32 %v14522_v21, 0.0  ;;  %v14527_v31 = vsub.f32 0.0, %v299_v27  ;;  %v670_v32 = vmin.f32 %v14514_v28, 0.0 }
  0x32   : > { %13735 = vpow2.f32 %v721_v4  ;;  %v14531_v34 = vsub.f32 0.0, %v302_v20  ;;  %v823_v30 = vsel %vm618_vm10, %v14445_v43, %v11465_v19  ;;  %vm620_vm12 = vcmp.gt.f32.partialorder %v14447_v44, 0.0 }
  0x33   : > { %v11467_v35 = vadd.f32 -1.0, %v13724_v23  ;;  %v725_v5 = vmul.f32 1.442695, %v666_v29  ;;  %v822_v9 = vsel %vm617_vm11, %v14443_v41, %v11464_v24  ;;  %13737 = vpow2.f32 %v731_v25 }
  0x34   : > { %908 = vrot.lane.b32.xlu1 %v819_v10, %s14301_s30  ;;  %v668_v42 = vmin.f32 %v14527_v31, 0.0  ;;  %vm619_vm13 = vcmp.gt.f32.partialorder %v14459_v58, 0.0  ;;  %v733_v45 = vmul.f32 1.442695, %v670_v32  ;;  %v671_v43 = vmin.f32 %v14531_v34, 0.0 }
  0x35   : > { %906 = vrot.lane.b32.xlu0 %v818_v59, %s14301_s30  ;;  %v13726_v26 = vpop.eup %13725  ;;  %13739 = vpow2.f32 %v725_v5  ;;  %v14544_v46 = vsub.f32 0.0, %v303_v37  ;;  %v825_v41 = vsel %vm620_vm12, %v14447_v44, %v11467_v35  ;;  %vm622_vm14 = vcmp.gt.f32.partialorder %v14454_v50, 0.0 }
  0x36   : > { %v13728_v38 = vpop.eup %13727  ;;  %v11466_v39 = vadd.f32 -1.0, %v13726_v26  ;;  %v729_v47 = vmul.f32 1.442695, %v668_v42  ;;  %vm621_vm15 = vcmp.gt.f32.partialorder %v14492_v40, 0.0  ;;  %v735_v55 = vmul.f32 1.442695, %v671_v43 }
  0x37   : > { %v13730_v49 = vpop.eup %13729  ;;  %v11469_v51 = vadd.f32 -1.0, %v13728_v38  ;;  %v672_v56 = vmin.f32 %v14544_v46, 0.0  ;;  %v14556_v57 = vsub.f32 0.0, %v304_v11  ;;  %vm624_vm0 = vcmp.gt.f32.partialorder %v14467_v13, 0.0 }
  0x38   : > { %912 = vrot.lane.b32.xlu1 %v821_v15, %s14301_s30  ;;  %v13732_v52 = vpop.eup %13731  ;;  %v824_v10 = vsel %vm619_vm13, %v14459_v58, %v11466_v39  ;;  %13741 = vpow2.f32 %v729_v47  ;;  %v11471_v60 = vadd.f32 -1.0, %v13730_v49  ;;  %vm623_vm1 = vcmp.gt.f32.partialorder %v14503_v53, 0.0 }
  0x39   : > { %910 = vrot.lane.b32.xlu0 %v820_v3, %s14301_s30  ;;  %v11468_v54 = vadd.f32 -1.0, %v13732_v52  ;;  %13743 = vpow2.f32 %v733_v45  ;;  %v827_v59 = vsel %vm622_vm14, %v14454_v50, %v11469_v51  ;;  %v737_v14 = vmul.f32 1.442695, %v672_v56 }
  0x3a   : > { %13745 = vpow2.f32 %v735_v55  ;;  %v673_v27 = vmin.f32 %v14556_v57, 0.0  ;;  %v592_v50 = vsub.f32 0.0, %v305_v61  ;;  %v829_v19 = vsel %vm624_vm0, %v14467_v13, %v11471_v60 }
  0x3b   : > { %v13734_v44 = vpop.eup %13733  ;;  %v826_v62 = vsel %vm621_vm15, %v14492_v40, %v11468_v54  ;;  %vm626_vm2 = vcmp.gt.f32.partialorder %v14486_v36, 0.0  ;;  %vm625_vm3 = vcmp.gt.f32.partialorder %v14522_v21, 0.0  ;;  %13747 = vpow2.f32 %v737_v14 }
  0x3c   : > { %916 = vrot.lane.b32.xlu1 %v823_v30, %s14301_s30  ;;  %v13736_v58 = vpop.eup %13735  ;;  %v11473_v20 = vadd.f32 -1.0, %v13734_v44  ;;  %v739_v24 = vmul.f32 1.442695, %v673_v27  ;;  %v674_v25 = vmin.f32 %v592_v50, 0.0  ;;  %vm628_vm4 = vcmp.gt.f32.partialorder %v14497_v48, 0.0 }
  0x3d   : > { %914 = vrot.lane.b32.xlu0 %v822_v9, %s14301_s30  ;;  %v11470_v63 = vadd.f32 -1.0, %v13736_v58  ;;  %v13738_v12 = vpop.eup %13737  ;;  %vm627_vm5 = vcmp.gt.f32.partialorder %v14527_v31, 0.0  ;;  %vm629_vm6 = vcmp.gt.f32.partialorder %v14514_v28, 0.0  ;;  %vm630_vm7 = vcmp.gt.f32.partialorder %v14531_v34, 0.0 }
  0x3e   : > { %v831_v4 = vsel %vm626_vm2, %v14486_v36, %v11473_v20  ;;  %v11475_v26 = vadd.f32 -1.0, %v13738_v12  ;;  %13749 = vpow2.f32 %v739_v24  ;;  %v741_v32 = vmul.f32 1.442695, %v674_v25 }
  0x3f   : > { %v13740_v15 = vpop.eup %13739  ;;  %v828_v40 = vsel %vm623_vm1, %v14503_v53, %v11470_v63  ;;  %vm631_vm8 = vcmp.gt.f32.partialorder %v14544_v46, 0.0  ;;  %vm632_vm9 = vcmp.gt.f32.partialorder %v14556_v57, 0.0  ;;  %vm633_vm10 = vcmp.gt.f32.partialorder %v592_v50, 0.0 }
  0x40   : > { %920 = vrot.lane.b32.xlu1 %v825_v41, %s14301_s30  ;;  %v11472_v23 = vadd.f32 -1.0, %v13740_v15  ;;  %v833_v30 = vsel %vm628_vm4, %v14497_v48, %v11475_v26  ;;  %13751 = vpow2.f32 %v741_v32  ;;  %v363_v47 = vmin.f32 %v14368_v0, 0.0 }
  0x41   : > { %918 = vrot.lane.b32.xlu0 %v824_v10, %s14301_s30  ;;  %v361_v49 = vmin.f32 %v14371_v1, 0.0  ;;  %v362_v41 = vmin.f32 %v14386_v6, 0.0  ;;  %v364_v11 = vmin.f32 %v14374_v2, 0.0  ;;  %v366_v52 = vmin.f32 %v14392_v8, 0.0 }
  0x42   : > { %v13742_v3 = vpop.eup %13741  ;;  %v830_v29 = vsel %vm625_vm3, %v14522_v21, %v11472_v23  ;;  %v365_v54 = vmin.f32 %v14389_v7, 0.0  ;;  %v367_v44 = vmin.f32 %v14408_v16, 0.0  ;;  %vm322_vm11 = vcmp.gt.f32.partialorder %v14368_v0, 0.0 }
  0x43   : > { %v13744_v13 = vpop.eup %13743  ;;  %v11474_v53 = vadd.f32 -1.0, %v13742_v3  ;;  %v402_v51 = vmul.f32 1.442695, %v361_v49  ;;  %v404_v10 = vmul.f32 1.442695, %v362_v41  ;;  %vm320_vm12 = vcmp.gt.f32.partialorder %v14371_v1, 0.0 }
  0x44   : > { %924 = vrot.lane.b32.xlu1 %v827_v59, %s14301_s30  ;;  %v11476_v35 = vadd.f32 -1.0, %v13744_v13  ;;  %v13746_v36 = vpop.eup %13745  ;;  %v408_v55 = vmul.f32 1.442695, %v364_v11  ;;  %v412_v56 = vmul.f32 1.442695, %v366_v52  ;;  %vm321_vm13 = vcmp.gt.f32.partialorder %v14386_v6, 0.0 }
  0x45   : > { %922 = vrot.lane.b32.xlu0 %v826_v62, %s14301_s30  ;;  %v832_v5 = vsel %vm627_vm5, %v14527_v31, %v11474_v53  ;;  %v11477_v37 = vadd.f32 -1.0, %v13746_v36  ;;  %v13748_v38 = vpop.eup %13747  ;;  %v414_v59 = vmul.f32 1.442695, %v367_v44  ;;  %vm1017_vm14 = vcmask 64512  }
  0x46   : > { %v834_v21 = vsel %vm629_vm6, %v14514_v28, %v11476_v35  ;;  %v11478_v9 = vadd.f32 -1.0, %v13748_v38  ;;  %vm323_vm15 = vcmp.gt.f32.partialorder %v14374_v2, 0.0  ;;  %vm325_vm0 = vcmp.gt.f32.partialorder %v14392_v8, 0.0 }
  0x47   : > { %v835_v48 = vsel %vm630_vm7, %v14531_v34, %v11477_v37  ;;  %vm324_vm1 = vcmp.gt.f32.partialorder %v14389_v7, 0.0  ;;  %vm1096_vm2 = vcmask 1046528   ;;  %vm326_vm3 = vcmp.gt.f32.partialorder %v14408_v16, 0.0 }
  0x48   : > { %928 = vrot.lane.b32.xlu1 %v829_v19, %s14301_s30  ;;  %v13750_v39 = vpop.eup %13749  ;;  %v836_v31 = vsel %vm631_vm8, %v14544_v46, %v11478_v9  ;;  %v406_v46 = vmul.f32 1.442695, %v363_v47  ;;  %vm1281_vm4 = vcmask 1045504   ;;  %vm2255_vm5 = vcmask 1041408  }
  0x49   : > { %926 = vrot.lane.b32.xlu0 %v828_v40, %s14301_s30  ;;  %v11479_v42 = vadd.f32 -1.0, %v13750_v39  ;;  %vm1583_vm6 = vcmask 1044480   ;;  %vm2329_vm7 = vcmask 130048   ;;  %vm1768_vm8 = vcmask 1043456  }
  0x4a   : > { %v13752_v28 = vpop.eup %13751  ;;  %13753 = vpow2.f32 %v406_v46 }
  0x4b   : > { %v837_v45 = vsel %vm632_vm9, %v14556_v57, %v11479_v42  ;;  %v11480_v43 = vadd.f32 -1.0, %v13752_v28  ;;  %13755 = vpow2.f32 %v402_v51  ;;  %v410_v57 = vmul.f32 1.442695, %v365_v54 }
  0x4c   : > { %932 = vrot.lane.b32.xlu1 %v831_v4, %s14301_s30  ;;  %13757 = vpow2.f32 %v404_v10  ;;  %vm2070_vm9 = vcmask 1042432  }
  0x4d   : > { %930 = vrot.lane.b32.xlu0 %v830_v29, %s14301_s30  ;;  %v838_v34 = vsel %vm633_vm10, %v592_v50, %v11480_v43  ;;  %13759 = vpow2.f32 %v408_v55  ;;  %vm327_vm10 = vcmp.gt.f32.partialorder %v14411_v17, 0.0 }
  0x4e   : > { %13761 = vpow2.f32 %v412_v56 }
  0x4f   : > { %13763 = vpow2.f32 %v410_v57 }
  0x50   : > { %936 = vrot.lane.b32.xlu1 %v833_v30, %s14301_s30  ;;  %13765 = vpow2.f32 %v414_v59  ;;  %v368_v59 = vmin.f32 %v14411_v17, 0.0 }
  0x51   : > { %934 = vrot.lane.b32.xlu0 %v832_v5, %s14301_s30 }
  0x54   : > { %938 = vrot.lane.b32.xlu1 %v834_v21, %s14301_s30  ;;  %v13754_v60 = vpop.eup %13753 }
  0x55   : > { %v13756_v61 = vpop.eup %13755  ;;  %v11415_v58 = vadd.f32 -1.0, %v13754_v60 }
  0x56   : > { %v13758_v62 = vpop.eup %13757  ;;  %v11413_v63 = vadd.f32 -1.0, %v13756_v61 }
  0x57   : > { %v13760_v12 = vpop.eup %13759  ;;  %v527_v27 = vsel %vm322_vm11, %v14368_v0, %v11415_v58  ;;  %v11414_v50 = vadd.f32 -1.0, %v13758_v62  ;;  %vm328_vm11 = vcmp.gt.f32.partialorder %v14414_v18, 0.0 }
  0x58   : > { %940 = vrot.lane.b32.xlu1 %v835_v48, %s14301_s30  ;;  %v13762_v14 = vpop.eup %13761  ;;  %v525_v40 = vsel %vm320_vm12, %v14371_v1, %v11413_v63  ;;  %v11416_v3 = vadd.f32 -1.0, %v13760_v12 }
  0x59   : > { %v13764_v15 = vpop.eup %13763  ;;  %v11418_v24 = vadd.f32 -1.0, %v13762_v14  ;;  %v526_v25 = vsel %vm321_vm13, %v14386_v6, %v11414_v50  ;;  %v416_v50 = vmul.f32 1.442695, %v368_v59 }
  0x5a   : > { %v11417_v4 = vadd.f32 -1.0, %v13764_v15  ;;  %v13766_v0 = vpop.eup %13765  ;;  %v528_v53 = vsel %vm323_vm15, %v14374_v2, %v11416_v3 }
  0x5b   : > { %v530_v6 = vsel %vm325_vm0, %v14392_v8, %v11418_v24  ;;  %v11419_v5 = vadd.f32 -1.0, %v13766_v0  ;;  %13767 = vpow2.f32 %v416_v50  ;;  %v2602_v50 = vld [vmem:[%s21817_s1 + $0x38] sm:$0xff] }
  0x5c   : > { %942 = vrot.lane.b32.xlu1 %v836_v31, %s14301_s30  ;;  %v529_v36 = vsel %vm324_vm1, %v14389_v7, %v11417_v4 }
  0x60   : > { %944 = vrot.lane.b32.xlu1 %v837_v45, %s14301_s30  ;;  %v531_v45 = vsel %vm326_vm3, %v14408_v16, %v11419_v5 }
  0x64   : > { %946 = vrot.lane.b32.xlu1 %v838_v34, %s14301_s30 }
  0x9a   : > { %v899_v19 = vpop.permute.xlu1 %898 }
  0x9b   : > { %v895_v20 = vpop.permute.xlu0 %894  ;;  %v14609_v23 = vsel %vm1017_vm14, %v527_v27, %v899_v19 }
  0x9c   : > { %v14615_v26 = vsel %vm1017_vm14, %v525_v40, %v895_v20  ;;  %v1100_v29 = vrot.slane %v14609_v23, 1  ;;  %v1285_v37 = vrot.slane %v14609_v23, 2  ;;  %v1584_v52 = vrot.slane %v14609_v23, 3 }
  0x9d   : > { %v1097_v30 = vrot.slane %v14615_v26, 1  ;;  %v1282_v42 = vrot.slane %v14615_v26, 2  ;;  %v1769_v61 = vrot.slane %v14609_v23, 4 }
  0x9e   : > { %v901_v13 = vpop.permute.xlu1 %900 }
  0x9f   : > { %v897_v1 = vpop.permute.xlu0 %896  ;;  %v14638_v7 = vsel %vm1017_vm14, %v528_v53, %v901_v13 }
  0xa0   : > { %v14621_v32 = vsel %vm1017_vm14, %v526_v25, %v897_v1  ;;  %v1287_v46 = vrot.slane %v14638_v7, 2  ;;  %v1585_v55 = vrot.slane %v14638_v7, 3  ;;  %v1102_v60 = vrot.slane %v14638_v7, 1 }
  0xa1   : > { %v1098_v35 = vrot.slane %v14621_v32, 1  ;;  %v1283_v2 = vrot.slane %v14621_v32, 2  ;;  %v1770_v12 = vrot.slane %v14638_v7, 4 }
  0xa2   : > { %v905_v21 = vpop.permute.xlu1 %904  ;;  %v1288_v54 = vsel %vm1281_vm4, %v1285_v37, %v1287_v46  ;;  %v1586_v62 = vsel %vm1583_vm6, %v1584_v52, %v1585_v55  ;;  %v1103_v19 = vsel %vm1096_vm2, %v1100_v29, %v1102_v60 }
  0xa3   : > { %v903_v38 = vpop.permute.xlu0 %902  ;;  %v1101_v8 = vsel %vm1096_vm2, %v1098_v35, %v1100_v29  ;;  %v1099_v48 = vsel %vm1096_vm2, %v1097_v30, %v1098_v35  ;;  %v14635_v9 = vsel %vm1017_vm14, %v530_v6, %v905_v21  ;;  %v1286_v47 = vsel %vm1281_vm4, %v1283_v2, %v1285_v37 }
  0xa4   : > { %v14641_v39 = vsel %vm1017_vm14, %v529_v36, %v903_v38  ;;  %1172 = vrot.lane.b32.xlu0 %v1101_v8, %s14302_s8  ;;  %1170 = vrot.lane.b32.xlu1 %v1099_v48, %s14302_s8  ;;  %v2257_v31 = vrot.slane %v14635_v9, 6  ;;  %v1284_v49 = vsel %vm1281_vm4, %v1282_v42, %v1283_v2  ;;  %v1771_v20 = vsel %vm1768_vm8, %v1769_v61, %v1770_v12  ;;  %v13768_v36 = vpop.eup %13767  ;;  %v2595_v8 = vld [vmem:[%s21817_s1] sm:$0xff]  ;;  %v2596_v48 = vld [vmem:[%s21817_s1 + $0x8] sm:$0xff] }
  0xa5   : > { %v2256_v28 = vrot.slane %v14641_v39, 6  ;;  %v1289_v43 = vrot.slane %v14641_v39, 2  ;;  %v1587_v56 = vrot.slane %v14641_v39, 3  ;;  %v1772_v40 = vrot.slane %v14641_v39, 4 }
  0xa6   : > { %v1774_v0 = vrot.slane %v14635_v9, 4  ;;  %v1291_v53 = vrot.slane %v14635_v9, 2  ;;  %v2071_v6 = vrot.slane %v14641_v39, 5  ;;  %v2072_v30 = vrot.slane %v14635_v9, 5  ;;  %v909_v59 = vpop.permute.xlu1 %908 }
  0xa7   : > { %v907_v34 = vpop.permute.xlu0 %906  ;;  %v2258_v51 = vsel %vm2255_vm5, %v2256_v28, %v2257_v31  ;;  %v14665_v11 = vsel %vm1281_vm4, %v1287_v46, %v1289_v43  ;;  %v1588_v63 = vsel %vm1583_vm6, %v1585_v55, %v1587_v56  ;;  %v1773_v4 = vsel %vm1768_vm8, %v1770_v12, %v1772_v40  ;;  %v2598_v46 = vld [vmem:[%s21817_s1 + $0x18] sm:$0xff] }
  0xa8   : > { %v14656_v41 = vsel %vm1017_vm14, %v531_v45, %v907_v34  ;;  %1357 = vrot.lane.b32.xlu0 %v1286_v47, %s14303_s9  ;;  %1355 = vrot.lane.b32.xlu1 %v1284_v49, %s14303_s9  ;;  %v2660_v10 = vrot.slane %v2258_v51, 1  ;;  %v14721_v29 = vsel %vm1768_vm8, %v1772_v40, %v1774_v0  ;;  %v369_v35 = vmin.f32 %v14414_v18, 0.0  ;;  %v2597_v49 = vld [vmem:[%s21817_s1 + $0x10] sm:$0xff]  ;;  %v2599_v51 = vld [vmem:[%s21817_s1 + $0x20] sm:$0xff] }
  0xa9   : > { %v2259_v16 = vrot.slane %v14656_v41, 6  ;;  %v1776_v24 = vrot.slane %v14656_v41, 4  ;;  %v14734_v5 = vsel %vm1281_vm4, %v1289_v43, %v1291_v53  ;;  %v2073_v21 = vsel %vm2070_vm9, %v2071_v6, %v2072_v30 }
  0xaa   : > { %v2074_v37 = vrot.slane %v14656_v41, 5  ;;  %v1104_v2 = vrot.slane %v14641_v39, 1  ;;  %v418_v38 = vmul.f32 1.442695, %v369_v35  ;;  %v1589_v42 = vrot.slane %v14635_v9, 3 }
  0xab   : > { %v14674_v57 = vsel %vm2255_vm5, %v2257_v31, %v2259_v16  ;;  %v14718_v1 = vsel %vm1768_vm8, %v1774_v0, %v1776_v24  ;;  %v11420_v31 = vadd.f32 -1.0, %v13768_v36  ;;  %v21836_v43 = vmov 0.0|0.0   ;;  %v2603_v36 = vld [vmem:[%s21817_s1 + $0x40] sm:$0xff] }
  0xac   : > { %1474 = vrot.lane.b32.xlu0 %v14665_v11, %s14304_s10  ;;  %1472 = vrot.lane.b32.xlu1 %v1288_v54, %s14304_s10  ;;  %v2661_v44 = vrot.slane %v14674_v57, 1  ;;  %v2075_v28 = vsel %vm2070_vm9, %v2072_v30, %v2074_v37  ;;  %v1105_v45 = vsel %vm1096_vm2, %v1102_v60, %v1104_v2  ;;  %v2912_v34 = vand.u32 4294901760, %v2595_v8 }
  0xad   : > { %12725 = vmatprep.subr.bf16.mxu0 %v21836_v43  ;;  %v2915_v47 = vand.u32 4294901760, %v2596_v48  ;;  %13769 = vpow2.f32 %v418_v38  ;;  %v532_v55 = vsel %vm327_vm10, %v14411_v17, %v11420_v31  ;;  %v1293_v60 = vrot.slane %v14656_v41, 2  ;;  %v2601_v17 = vld [vmem:[%s21817_s1 + $0x30] sm:$0xff] }
  0xae   : > { %v2662_v58 = vsel %vm1096_vm2, %v2660_v10, %v2661_v44  ;;  %v14770_v10 = vsub.f32 %v2595_v8, %v2912_v34  ;;  %v2918_v61 = vand.u32 4294901760, %v2597_v49  ;;  %v2924_v12 = vand.u32 4294901760, %v2599_v51 }
  0xaf   : > { %v2839_v14 = vsel %vm2329_vm7, %v2662_v58, 0  ;;  %v14768_v52 = vpack.c.bf16 %v2915_v47, %v2912_v34  ;;  %v2921_v58 = vand.u32 4294901760, %v2598_v46  ;;  %v2930_v0 = vand.u32 4294901760, %v2601_v17 }
  0xb0   : > { %1657 = vrot.lane.b32.xlu0 %v1586_v62, %s14305_s11  ;;  %1659 = vrot.lane.b32.xlu1 %v1588_v63, %s14305_s11  ;;  %v14694_v27 = vand.u32 4294901760, %v2839_v14  ;;  %22597 = vst [vmem:[#allocation5_spill] sm:$0xff] %v14770_v10  ;;  %v2600_v62 = vld [vmem:[%s21817_s1 + $0x28] sm:$0xff]  ;;  %v1590_v63 = vsel %vm1583_vm6, %v1587_v56, %v1589_v42  ;;  %v14799_v56 = vsel %vm1017_vm14, %v532_v55, %v909_v59  ;;  %v2933_v35 = vand.u32 4294901760, %v2602_v50 }
  0xb1   : > { %22596 = vst [vmem:[#allocation4_spill] sm:$0xff] %v14768_v52  ;;  %12727 = vmatpush1.bf16.msra.mxu0 %v14768_v52  ;;  %v2927_v40 = vand.u32 4294901760, %v2600_v62  ;;  %v370_v38 = vmin.f32 %v14418_v22, 0.0  ;;  %v21826_v31 = vrot.slane %v14799_v56, 5 }
  0xb2   : > { %22594 = vst [vmem:[#allocation2_spill] sm:$0xff] %v14694_v27  ;;  %v14697_v15 = vsub.f32 %v2839_v14, %v14694_v27  ;;  %v14793_v14 = vpack.c.bf16 %v2921_v58, %v2918_v61  ;;  %12728 = vmatprep.subr.bf16.mxu0 %v21836_v43  ;;  %v14834_v8 = vsub.f32 %v2602_v50, %v2933_v35 }
  0xb3   : > { %v14816_v6 = vpack.c.bf16 %v2927_v40, %v2924_v12  ;;  %v14818_v30 = vsub.f32 %v2600_v62, %v2927_v40  ;;  %v420_v59 = vmul.f32 1.442695, %v370_v38  ;;  %v2077_v62 = vsel %vm2070_vm9, %v2074_v37, %v21826_v31  ;;  %v2610_v37 = vld [vmem:[%s21817_s1 + $0x78] sm:$0xff] }
  0xb4   : > { %22595 = vst [vmem:[#allocation3_spill] sm:$0xff] %v14697_v15  ;;  %1174 = vrot.lane.b32.xlu0 %v1103_v19, %s14302_s8  ;;  %1842 = vrot.lane.b32.xlu1 %v1771_v20, %s14306_s12  ;;  %v21824_v3 = vand.u32 4294901760, %v14697_v15  ;;  %22599 = vst [vmem:[#allocation7_spill] sm:$0xff] %v14793_v14  ;;  %v14802_v19 = vsub.f32 %v2597_v49, %v2918_v61  ;;  %v14804_v20 = vsub.f32 %v2598_v46, %v2921_v58  ;;  %v2606_v49 = vld [vmem:[%s21817_s1 + $0x58] sm:$0xff]  ;;  %v14873_v58 = vpop.permute.xlu1 %912 }
  0xb5   : > { %12730 = vmatpush1.bf16.msra.mxu0 %v14793_v14  ;;  %22603 = vst [vmem:[#allocation11_spill] sm:$0xff] %v14816_v6  ;;  %22604 = vst [vmem:[#allocation12_spill] sm:$0xff] %v14818_v30  ;;  %13771 = vpow2.f32 %v420_v59 }
  0xb6   : > { %v2996_v25 = vsub.f32 %v14697_v15, %v21824_v3  ;;  %22600 = vst [vmem:[#allocation8_spill] sm:$0xff] %v14802_v19  ;;  %22601 = vst [vmem:[#allocation9_spill] sm:$0xff] %v14804_v20  ;;  %12731 = vmatprep.subr.bf16.mxu0 %v21836_v43 }
  0xb7   : > { %22606 = vst [vmem:[#allocation14_spill] sm:$0xff] %v14834_v8 }
  0xb8   : > { %1844 = vrot.lane.b32.xlu0 %v1773_v4, %s14306_s12  ;;  %1359 = vrot.lane.b32.xlu1 %v1288_v54, %s14303_s9  ;;  %v2997_v13 = vand.u32 4294901760, %v2996_v25  ;;  %v14772_v54 = vsub.f32 %v2596_v48, %v2915_v47  ;;  %v1778_v25 = vrot.slane %v14799_v56, 4  ;;  %v14812_v4 = vsub.f32 %v2599_v51, %v2924_v12  ;;  %v13770_v48 = vpop.eup %13769  ;;  %v2608_v51 = vld [vmem:[%s21817_s1 + $0x68] sm:$0xff] }
  0xb9   : > { %12733 = vmatpush1.bf16.msra.mxu0 %v14816_v6  ;;  %v14853_v47 = vpack.c.bf16 %v2933_v35, %v2930_v0  ;;  %v11421_v55 = vadd.f32 -1.0, %v13770_v48  ;;  %v21827_v12 = vrot.slane %v14799_v56, 2  ;;  %v2951_v35 = vand.u32 4294901760, %v2608_v51 }
  0xba   : > { %2998 = vmatprep.mubr.f32.mxu0 %v2997_v13  ;;  %22598 = vst [vmem:[#allocation6_spill] sm:$0xff] %v14772_v54  ;;  %22602 = vst [vmem:[#allocation10_spill] sm:$0xff] %v14812_v4  ;;  %v1106_v13 = vrot.slane %v14635_v9, 1  ;;  %v14845_v34 = vsel %vm1768_vm8, %v1776_v24, %v1778_v25  ;;  %12734 = vmatprep.subr.bf16.mxu0 %v21836_v43 }
  0xbb   : > { %22607 = vst [vmem:[#allocation15_spill] sm:$0xff] %v14853_v47  ;;  %v14901_v48 = vsub.f32 %v2608_v51, %v2951_v35  ;;  %v911_v51 = vpop.permute.xlu0 %910 }
  0xbc   : > { %1959 = vrot.lane.b32.xlu0 %v14721_v29, %s14307_s13  ;;  %1961 = vrot.lane.b32.xlu1 %v14718_v1, %s14307_s13  ;;  %v1107_v22 = vsel %vm1096_vm2, %v1104_v2, %v1106_v13  ;;  %v2607_v2 = vld [vmem:[%s21817_s1 + $0x60] sm:$0xff] }
  0xbd   : > { %12736 = vmatpush1.bf16.msra.mxu0 %v14853_v47  ;;  %22614 = vst [vmem:[#allocation22_spill] sm:$0xff] %v14901_v48 }
  0xbe   : > { %12737 = vmatprep.subr.bf16.mxu0 %v21836_v43 }
  0xc0   : > { %1476 = vrot.lane.b32.xlu0 %v14734_v5, %s14304_s10  ;;  %2144 = vrot.lane.b32.xlu1 %v2073_v21, %s14308_s14  ;;  %v14830_v21 = vsub.f32 %v2601_v17, %v2930_v0  ;;  %v2945_v17 = vand.u32 4294901760, %v2606_v49  ;;  %v2948_v0 = vand.u32 4294901760, %v2607_v2 }
  0xc2   : > { %22605 = vst [vmem:[#allocation13_spill] sm:$0xff] %v14830_v21  ;;  %v14899_v38 = vsub.f32 %v2607_v2, %v2948_v0  ;;  %v2957_v2 = vand.u32 4294901760, %v2610_v37 }
  0xc4   : > { %2146 = vrot.lane.b32.xlu0 %v2075_v28, %s14308_s14  ;;  %1176 = vrot.lane.b32.xlu1 %v1105_v45, %s14302_s8  ;;  %v2936_v28 = vand.u32 4294901760, %v2603_v36  ;;  %22613 = vst [vmem:[#allocation21_spill] sm:$0xff] %v14899_v38 }
  0xc6   : > { %v14861_v24 = vsub.f32 %v2603_v36, %v2936_v28  ;;  %v2609_v36 = vld [vmem:[%s21817_s1 + $0x70] sm:$0xff] }
  0xc8   : > { %1661 = vrot.lane.b32.xlu0 %v1590_v63, %s14305_s11  ;;  %1361 = vrot.lane.b32.xlu1 %v14665_v11, %s14303_s9  ;;  %v14809_v11 = vsel %vm1281_vm4, %v1291_v53, %v1293_v60  ;;  %v2604_v53 = vld [vmem:[%s21817_s1 + $0x48] sm:$0xff]  ;;  %22608 = vst [vmem:[#allocation16_spill] sm:$0xff] %v14861_v24  ;;  %v21825_v63 = vrot.slane %v14656_v41, 3 }
  0xc9   : > { %v2939_v45 = vand.u32 4294901760, %v2604_v53 }
  0xca   : > { %v1592_v59 = vsel %vm1583_vm6, %v1589_v42, %v21825_v63  ;;  %v14936_v42 = vsub.f32 %v2610_v37, %v2957_v2 }
  0xcb   : > { %v14863_v46 = vsub.f32 %v2604_v53, %v2939_v45  ;;  %v14883_v50 = vpack.c.bf16 %v2939_v45, %v2936_v28  ;;  %v14896_v53 = vsub.f32 %v2606_v49, %v2945_v17  ;;  %v2611_v28 = vld [vmem:[%s21817_s1 + $0x80] sm:$0xff]  ;;  %v2612_v45 = vld [vmem:[%s21817_s1 + $0x88] sm:$0xff]  ;;  %v2954_v49 = vand.u32 4294901760, %v2609_v36 }
  0xcc   : > { %1846 = vrot.lane.b32.xlu0 %v14721_v29, %s14306_s12  ;;  %1478 = vrot.lane.b32.xlu1 %v14809_v11, %s14304_s10  ;;  %v2605_v29 = vld [vmem:[%s21817_s1 + $0x50] sm:$0xff]  ;;  %22617 = vst [vmem:[#allocation25_spill] sm:$0xff] %v14936_v42  ;;  %v2960_v63 = vand.u32 4294901760, %v2611_v28  ;;  %v2963_v31 = vand.u32 4294901760, %v2612_v45 }
  0xcd   : > { %22609 = vst [vmem:[#allocation17_spill] sm:$0xff] %v14863_v46  ;;  %v2942_v61 = vand.u32 4294901760, %v2605_v29  ;;  %22610 = vst [vmem:[#allocation18_spill] sm:$0xff] %v14883_v50  ;;  %12739 = vmatpush1.bf16.msra.mxu0 %v14883_v50  ;;  %v14934_v3 = vsub.f32 %v2609_v36, %v2954_v49 }
  0xce   : > { %22612 = vst [vmem:[#allocation20_spill] sm:$0xff] %v14896_v53  ;;  %12740 = vmatprep.subr.bf16.mxu0 %v21836_v43  ;;  %v15164_v53 = vld [vmem:[%s14365_s29 + $0x80] sm:$0xff] }
  0xcf   : > { %v14885_v40 = vsub.f32 %v2605_v29, %v2942_v61  ;;  %v21829_v29 = vrot.slane %v14799_v56, 6  ;;  %22616 = vst [vmem:[#allocation24_spill] sm:$0xff] %v14934_v3 }
  0xd0   : > { %1963 = vrot.lane.b32.xlu0 %v14845_v34, %s14307_s13  ;;  %1178 = vrot.lane.b32.xlu1 %v1107_v22, %s14302_s8  ;;  %v14913_v22 = vpop.permute.xlu1 %916 }
  0xd1   : > { %22611 = vst [vmem:[#allocation19_spill] sm:$0xff] %v14885_v40 }
  0xd4   : > { %2148 = vrot.lane.b32.xlu0 %v2077_v62, %s14308_s14  ;;  %1363 = vrot.lane.b32.xlu1 %v14734_v5, %s14303_s9  ;;  %v533_v5 = vsel %vm328_vm11, %v14414_v18, %v11421_v55  ;;  %v14925_v62 = vsel %vm1281_vm4, %v1293_v60, %v21827_v12  ;;  %v1108_v18 = vrot.slane %v14656_v41, 1  ;;  %v14929_v55 = vpack.c.bf16 %v2945_v17, %v2942_v61  ;;  %v14943_v61 = vpop.permute.xlu1 %920 }
  0xd5   : > { %v371_v60 = vmin.f32 %v14435_v33, 0.0  ;;  %v14941_v12 = vsel %vm1017_vm14, %v533_v5, %v911_v51  ;;  %v14945_v17 = vsub.f32 %v2611_v28, %v2960_v63  ;;  %v14954_v33 = vpack.c.bf16 %v2951_v35, %v2948_v0 }
  0xd6   : > { %22615 = vst [vmem:[#allocation23_spill] sm:$0xff] %v14929_v55  ;;  %v1109_v36 = vsel %vm1096_vm2, %v1106_v13, %v1108_v18  ;;  %v1780_v37 = vrot.slane %v14941_v12, 4  ;;  %12742 = vmatpush1.bf16.msra.mxu0 %v14929_v55  ;;  %v14961_v5 = vsel %vm2255_vm5, %v2259_v16, %v21829_v29  ;;  %v13772_v16 = vpop.eup %13771  ;;  %v2078_v35 = vrot.slane %v14941_v12, 5 }
  0xd7   : > { %22618 = vst [vmem:[#allocation26_spill] sm:$0xff] %v14945_v17  ;;  %22620 = vst [vmem:[#allocation28_spill] sm:$0xff] %v14954_v33  ;;  %v21828_v13 = vrot.slane %v14961_v5, 1  ;;  %v422_v28 = vmul.f32 1.442695, %v371_v60  ;;  %12743 = vmatprep.subr.bf16.mxu0 %v21836_v43  ;;  %v1297_v51 = vrot.slane %v14941_v12, 2  ;;  %v14984_v60 = vpack.c.bf16 %v2957_v2, %v2954_v49 }
  0xd8   : > { %1663 = vrot.lane.b32.xlu0 %v1592_v59, %s14305_s11  ;;  %1480 = vrot.lane.b32.xlu1 %v14925_v62, %s14304_s10  ;;  %v14947_v59 = vsub.f32 %v2612_v45, %v2963_v31  ;;  %v306_v45 = vld [vmem:[%s14365_s29 + $0xe8] sm:$0xff]  ;;  %v14990_v57 = vpop.permute.xlu1 %924  ;;  %v22623_v2 = vrot.slane %v14799_v56, 2  ;;  %v1112_v50 = vrot.slane %v14941_v12, 1  ;;  %v1595_v47 = vrot.slane %v14941_v12, 3 }
  0xd9   : > { %v14974_v0 = vsel %vm1096_vm2, %v2661_v44, %v21828_v13  ;;  %22621 = vst [vmem:[#allocation29_spill] sm:$0xff] %v14984_v60  ;;  %v14992_v44 = vsub.f32 0.0, %v306_v45  ;;  %13773 = vpow2.f32 %v422_v28  ;;  %v22622_v13 = vrot.slane %v14799_v56, 5  ;;  %v14223_v28 = vld [vmem:[%s14365_s29 + $0x58] sm:$0xff] }
  0xda   : > { %22619 = vst [vmem:[#allocation27_spill] sm:$0xff] %v14947_v59  ;;  %12745 = vmatpush1.bf16.msra.mxu0 %v14954_v33  ;;  %v1298_v29 = vsel %vm1281_vm4, %v22623_v2, %v1297_v51  ;;  %v15004_v45 = vpack.c.bf16 %v2963_v31, %v2960_v63  ;;  %vm329_vm12 = vcmp.gt.f32.partialorder %v14223_v28, 0.0  ;;  %v22625_v33 = vrot.slane %v14656_v41, 3 }
  0xdb   : > { %12746 = vmatprep.subr.bf16.mxu0 %v21836_v43  ;;  %v2079_v49 = vsel %vm2070_vm9, %v22622_v13, %v2078_v35  ;;  %vm634_vm15 = vcmp.gt.f32.partialorder %v14992_v44, 0.0 }
  0xdc   : > { %1848 = vrot.lane.b32.xlu0 %v14718_v1, %s14306_s12  ;;  %1180 = vrot.lane.b32.xlu1 %v1109_v36, %s14302_s8  ;;  %v14979_v1 = vsel %vm1768_vm8, %v1778_v25, %v1780_v37  ;;  %v11422_v25 = vadd.f32 -1.0, %v13772_v16  ;;  %v1593_v36 = vrot.slane %v14799_v56, 3  ;;  %22624 = vst [vmem:[#allocation30_spill] sm:$0xff] %v15004_v45  ;;  %v675_v16 = vmin.f32 %v14992_v44, 0.0  ;;  %v15011_v13 = vpop.permute.xlu1 %928 }
  0xde   : > { %12748 = vmatpush1.bf16.msra.mxu0 %v14984_v60  ;;  %v534_v2 = vsel %vm329_vm12, %v14223_v28, %v11422_v25  ;;  %v1594_v60 = vsel %vm1583_vm6, %v22625_v33, %v1593_v36  ;;  %v743_v63 = vmul.f32 1.442695, %v675_v16  ;;  %v15026_v25 = vld [vmem:[%s14365_s29 + $0x68] sm:$0xff] }
  0xdf   : > { %12749 = vmatprep.subr.bf16.mxu0 %v21836_v43  ;;  %v372_v33 = vmin.f32 %v15026_v25, 0.0  ;;  %vm331_vm0 = vcmp.gt.f32.partialorder %v15026_v25, 0.0 }
  0xe0   : > { %1965 = vrot.lane.b32.xlu0 %v14979_v1, %s14307_s13  ;;  %1365 = vrot.lane.b32.xlu1 %v14809_v11, %s14303_s9  ;;  %v1110_v11 = vrot.slane %v14799_v56, 1  ;;  %13775 = vpow2.f32 %v743_v63 }
  0xe2   : > { %v1111_v31 = vsel %vm1096_vm2, %v1108_v18, %v1110_v11  ;;  %12751 = vmatpush1.bf16.msra.mxu0 %v15004_v45 }
  0xe3   : > { %12752 = vmatprep.subr.bf16.mxu0 %v21836_v43  ;;  %v13774_v18 = vpop.eup %13773 }
  0xe4   : > { %2150 = vrot.lane.b32.xlu0 %v2079_v49, %s14308_s14  ;;  %1482 = vrot.lane.b32.xlu1 %v1298_v29, %s14304_s10  ;;  %v15023_v49 = vsel %vm1017_vm14, %v534_v2, %v14873_v58  ;;  %v307_v58 = vld [vmem:[%s14365_s29 + $0xf0] sm:$0xff]  ;;  %v11423_v16 = vadd.f32 -1.0, %v13774_v18  ;;  %v424_v2 = vmul.f32 1.442695, %v372_v33  ;;  %v1113_v18 = vsel %vm1096_vm2, %v1110_v11, %v1112_v50 }
  0xe5   : > { %v1782_v28 = vrot.slane %v15023_v49, 4  ;;  %v1299_v45 = vrot.slane %v15023_v49, 2  ;;  %v2080_v55 = vrot.slane %v15023_v49, 5  ;;  %v1114_v59 = vrot.slane %v15023_v49, 1 }
  0xe6   : > { %13777 = vpow2.f32 %v424_v2 }
  0xe7   : > { %v15042_v43 = vsel %vm1281_vm4, %v1297_v51, %v1299_v45  ;;  %v915_v51 = vpop.permute.xlu0 %914  ;;  %v2081_v33 = vsel %vm2070_vm9, %v2078_v35, %v2080_v55 }
  0xe8   : > { %1665 = vrot.lane.b32.xlu0 %v1594_v60, %s14305_s11  ;;  %1182 = vrot.lane.b32.xlu1 %v1111_v31, %s14302_s8  ;;  %v15035_v60 = vpop.permute.xlu1 %932  ;;  %v15039_v31 = vsel %vm1768_vm8, %v1780_v37, %v1782_v28 }
  0xec   : > { %1850 = vrot.lane.b32.xlu0 %v14845_v34, %s14306_s12  ;;  %1367 = vrot.lane.b32.xlu1 %v14925_v62, %s14303_s9  ;;  %v14225_v34 = vld [vmem:[%s14365_s29 + $0x60] sm:$0xff]  ;;  %v15051_v62 = vsub.f32 0.0, %v307_v58  ;;  %v15053_v37 = vpop.permute.xlu1 %936  ;;  %v13776_v58 = vpop.eup %13775 }
  0xed   : > { %vm330_vm13 = vcmp.gt.f32.partialorder %v14225_v34, 0.0 }
  0xee   : > { %v535_v63 = vsel %vm330_vm13, %v14225_v34, %v11423_v16  ;;  %v676_v6 = vmin.f32 %v15051_v62, 0.0  ;;  %v1596_v16 = vsel %vm1583_vm6, %v1593_v36, %v1595_v47  ;;  %vm635_vm1 = vcmp.gt.f32.partialorder %v15051_v62, 0.0 }
  0xef   : > { %v15062_v2 = vsel %vm1017_vm14, %v535_v63, %v915_v51  ;;  %vm334_vm13 = vcmp.gt.f32.partialorder %v15164_v53, 0.0 }
  0xf0   : > { %1967 = vrot.lane.b32.xlu0 %v15039_v31, %s14307_s13  ;;  %1484 = vrot.lane.b32.xlu1 %v15042_v43, %s14304_s10  ;;  %v1301_v34 = vrot.slane %v15062_v2, 2  ;;  %v15068_v35 = vpop.permute.xlu1 %938  ;;  %v745_v11 = vmul.f32 1.442695, %v676_v6  ;;  %v1784_v36 = vrot.slane %v15062_v2, 4  ;;  %v13778_v51 = vpop.eup %13777  ;;  %v2082_v27 = vrot.slane %v15062_v2, 5 }
  0xf1   : > { %v1116_v38 = vrot.slane %v15062_v2, 1 }
  0xf2   : > { %v15076_v63 = vsel %vm1281_vm4, %v1299_v45, %v1301_v34  ;;  %13779 = vpow2.f32 %v745_v11  ;;  %v11424_v45 = vadd.f32 -1.0, %v13778_v51  ;;  %v15090_v15 = vsel %vm1768_vm8, %v1782_v28, %v1784_v36 }
  0xf3   : > { %v2083_v28 = vsel %vm2070_vm9, %v2080_v55, %v2082_v27  ;;  %v1115_v11 = vsel %vm1096_vm2, %v1112_v50, %v1114_v59 }
  0xf4   : > { %2152 = vrot.lane.b32.xlu0 %v2081_v33, %s14308_s14  ;;  %1184 = vrot.lane.b32.xlu1 %v1113_v18, %s14302_s8  ;;  %v11481_v33 = vadd.f32 -1.0, %v13776_v58  ;;  %v15071_v18 = vld [vmem:[%s14365_s29 + $0x70] sm:$0xff]  ;;  %v15087_v52 = vpop.permute.xlu1 %940 }
  0xf5   : > { %v373_v14 = vmin.f32 %v15071_v18, 0.0  ;;  %vm332_vm3 = vcmp.gt.f32.partialorder %v15071_v18, 0.0 }
  0xf6   : > { %v839_v6 = vsel %vm634_vm15, %v14992_v44, %v11481_v33  ;;  %v536_v44 = vsel %vm331_vm0, %v15026_v25, %v11424_v45  ;;  %v1597_v33 = vrot.slane %v15023_v49, 3  ;;  %vm2367_vm15 = vcmask 261120  }
  0xf7   : > { %v426_v58 = vmul.f32 1.442695, %v373_v14  ;;  %vm2405_vm0 = vcmask 392192  }
  0xf8   : > { %1667 = vrot.lane.b32.xlu0 %v1596_v16, %s14305_s11  ;;  %1369 = vrot.lane.b32.xlu1 %v1298_v29, %s14303_s9  ;;  %v15079_v16 = vpop.permute.xlu0 %918  ;;  %v308_v29 = vld [vmem:[%s14365_s29 + $0xf8] sm:$0xff]  ;;  %v15108_v51 = vpop.permute.xlu1 %942  ;;  %v1598_v55 = vsel %vm1583_vm6, %v1595_v47, %v1597_v33 }
  0xf9   : > { %v15100_v14 = vsub.f32 0.0, %v308_v29  ;;  %13781 = vpow2.f32 %v426_v58  ;;  %v15113_v58 = vsel %vm1017_vm14, %v536_v44, %v14913_v22 }
  0xfa   : > { %v1303_v50 = vrot.slane %v15113_v58, 2  ;;  %v1786_v44 = vrot.slane %v15113_v58, 4  ;;  %v2084_v48 = vrot.slane %v15113_v58, 5  ;;  %v21868_v21 = vrot.slane %v15113_v58, 1 }
  0xfb   : > { %vm636_vm10 = vcmp.gt.f32.partialorder %v15100_v14, 0.0 }
  0xfc   : > { %1852 = vrot.lane.b32.xlu0 %v14979_v1, %s14306_s12  ;;  %1486 = vrot.lane.b32.xlu1 %v15076_v63, %s14304_s10  ;;  %v15095_v1 = vpop.permute.xlu0 %922  ;;  %v13780_v29 = vpop.eup %13779  ;;  %v15130_v47 = vsel %vm1281_vm4, %v1301_v34, %v1303_v50  ;;  %v15142_v34 = vsel %vm1768_vm8, %v1784_v36, %v1786_v44 }
  0xfd   : > { %v15126_v22 = vpop.permute.xlu1 %944 }
 0x100   : > { %1969 = vrot.lane.b32.xlu0 %v15090_v15, %s14307_s13  ;;  %948 = vrot.lane.b32.xlu1 %v839_v6, %s14301_s30  ;;  %v677_v6 = vmin.f32 %v15100_v14, 0.0  ;;  %v15115_v25 = vpop.permute.xlu0 %926 }
 0x102   : > { %v747_v45 = vmul.f32 1.442695, %v677_v6  ;;  %v309_v6 = vld [vmem:[%s14365_s29 + $0x100] sm:$0xff] }
 0x104   : > { %2154 = vrot.lane.b32.xlu0 %v2083_v28, %s14308_s14  ;;  %1186 = vrot.lane.b32.xlu1 %v1115_v11, %s14302_s8  ;;  %v11482_v28 = vadd.f32 -1.0, %v13780_v29  ;;  %v15123_v11 = vld [vmem:[%s14365_s29 + $0x78] sm:$0xff]  ;;  %v15133_v42 = vpop.permute.xlu0 %930  ;;  %13783 = vpow2.f32 %v747_v45  ;;  %v2085_v45 = vsel %vm2070_vm9, %v2082_v27, %v2084_v48 }
 0x105   : > { %v374_v17 = vmin.f32 %v15123_v11, 0.0  ;;  %vm333_vm11 = vcmp.gt.f32.partialorder %v15123_v11, 0.0 }
 0x107   : > { %v428_v29 = vmul.f32 1.442695, %v374_v17 }
 0x108   : > { %1669 = vrot.lane.b32.xlu0 %v1598_v55, %s14305_s11  ;;  %1371 = vrot.lane.b32.xlu1 %v15042_v43, %s14303_s9  ;;  %v13782_v55 = vpop.eup %13781  ;;  %v840_v43 = vsel %vm635_vm1, %v15051_v62, %v11482_v28  ;;  %v15152_v62 = vsub.f32 0.0, %v309_v6  ;;  %v15154_v17 = vpop.permute.xlu0 %934  ;;  %v1117_v28 = vsel %vm1096_vm2, %v1114_v59, %v1116_v38  ;;  %v375_v6 = vmin.f32 %v15164_v53, 0.0 }
 0x109   : > { %v11425_v3 = vadd.f32 -1.0, %v13782_v55  ;;  %13785 = vpow2.f32 %v428_v29  ;;  %v1599_v55 = vrot.slane %v15062_v2, 3  ;;  %vm2443_vm1 = vcmask 523264  }
 0x10a   : > { %v430_v40 = vmul.f32 1.442695, %v375_v6  ;;  %vm637_vm12 = vcmp.gt.f32.partialorder %v15152_v62, 0.0 }
 0x10b   : > { %v537_v36 = vsel %vm332_vm3, %v15071_v18, %v11425_v3  ;;  %v1600_v18 = vsel %vm1583_vm6, %v1597_v33, %v1599_v55  ;;  %vm22061_vm3 = vcmask 654336  }
 0x10c   : > { %1854 = vrot.lane.b32.xlu0 %v15039_v31, %s14306_s12  ;;  %1488 = vrot.lane.b32.xlu1 %v15130_v47, %s14304_s10  ;;  %v15150_v31 = vpop.permute.xlu1 %946  ;;  %v15169_v3 = vsel %vm1017_vm14, %v537_v36, %v15079_v16 }
 0x10d   : > { %v21866_v33 = vrot.slane %v15169_v3, 4 }
 0x10e   : > { %v13784_v29 = vpop.eup %13783 }
 0x10f   : > { %v11483_v46 = vadd.f32 -1.0, %v13784_v29 }
 0x110   : > { %1971 = vrot.lane.b32.xlu0 %v15142_v34, %s14307_s13  ;;  %950 = vrot.lane.b32.xlu1 %v840_v43, %s14301_s30  ;;  %v678_v43 = vmin.f32 %v15152_v62, 0.0 }
 0x113   : > { %v13786_v8 = vpop.eup %13785 }
 0x114   : > { %2156 = vrot.lane.b32.xlu0 %v2085_v45, %s14308_s14  ;;  %1188 = vrot.lane.b32.xlu1 %v1117_v28, %s14302_s8  ;;  %v1305_v45 = vrot.slane %v15169_v3, 2  ;;  %v749_v28 = vmul.f32 1.442695, %v678_v43  ;;  %v310_v43 = vld [vmem:[%s14365_s29 + $0x108] sm:$0xff] }
 0x116   : > { %v15171_v27 = vpop.permute.xlu0 %1172  ;;  %v15173_v59 = vpop.permute.xlu1 %1170  ;;  %v15186_v36 = vsel %vm1281_vm4, %v1303_v50, %v1305_v45  ;;  %13787 = vpow2.f32 %v749_v28  ;;  %v11426_v50 = vadd.f32 -1.0, %v13786_v8  ;;  %v1119_v28 = vsel %vm1096_vm2, %v1116_v38, %v21868_v21 }
 0x117   : > { %13789 = vpow2.f32 %v430_v40 }
 0x118   : > { %1671 = vrot.lane.b32.xlu0 %v1600_v18, %s14305_s11  ;;  %1373 = vrot.lane.b32.xlu1 %v15076_v63, %s14303_s9  ;;  %v841_v63 = vsel %vm636_vm10, %v15100_v14, %v11483_v46  ;;  %v15202_v18 = vsel %vm1768_vm8, %v1786_v44, %v21866_v33  ;;  %v15210_v46 = vsub.f32 0.0, %v310_v43  ;;  %v538_v14 = vsel %vm333_vm11, %v15123_v11, %v11426_v50  ;;  %v15230_v50 = vld [vmem:[%s14365_s29 + $0x88] sm:$0xff] }
 0x119   : > { %v1601_v33 = vrot.slane %v15113_v58, 3  ;;  %v15227_v11 = vsel %vm1017_vm14, %v538_v14, %v14943_v61  ;;  %vm2519_vm10 = vcmask 785408   ;;  %vm2557_vm11 = vcmask 916480  }
 0x11a   : > { %v15180_v24 = vpop.permute.xlu0 %1357  ;;  %v15182_v16 = vpop.permute.xlu1 %1355 }
 0x11c   : > { %1856 = vrot.lane.b32.xlu0 %v15090_v15, %s14306_s12  ;;  %1490 = vrot.lane.b32.xlu1 %v15186_v36, %s14304_s10  ;;  %v21867_v15 = vrot.slane %v15169_v3, 5 }
 0x11e   : > { %v15195_v6 = vpop.permute.xlu0 %1474  ;;  %v15197_v29 = vpop.permute.xlu1 %1472  ;;  %v2087_v44 = vsel %vm2070_vm9, %v2084_v48, %v21867_v15  ;;  %v376_v48 = vmin.f32 %v15230_v50, 0.0 }
 0x120   : > { %1973 = vrot.lane.b32.xlu0 %v15202_v18, %s14307_s13  ;;  %952 = vrot.lane.b32.xlu1 %v841_v63, %s14301_s30  ;;  %v679_v63 = vmin.f32 %v15210_v46, 0.0  ;;  %v13788_v43 = vpop.eup %13787  ;;  %v432_v30 = vmul.f32 1.442695, %v376_v48  ;;  %v21879_v48 = vrot.slane %v15227_v11, 5 }
 0x121   : > { %v13790_v21 = vpop.eup %13789  ;;  %v11484_v14 = vadd.f32 -1.0, %v13788_v43 }
 0x122   : > { %v1658_v8 = vpop.permute.xlu0 %1657  ;;  %v15212_v40 = vpop.permute.xlu1 %1659  ;;  %v751_v61 = vmul.f32 1.442695, %v679_v63  ;;  %v11427_v4 = vadd.f32 -1.0, %v13790_v21 }
 0x123   : > { %v842_v21 = vsel %vm637_vm12, %v15152_v62, %v11484_v14  ;;  %vm638_vm12 = vcmp.gt.f32.partialorder %v15210_v46, 0.0 }
 0x124   : > { %2158 = vrot.lane.b32.xlu0 %v2087_v44, %s14308_s14  ;;  %1190 = vrot.lane.b32.xlu1 %v1119_v28, %s14302_s8  ;;  %v1602_v44 = vsel %vm1583_vm6, %v1599_v55, %v1601_v33  ;;  %v1307_v28 = vrot.slane %v15227_v11, 2  ;;  %13791 = vpow2.f32 %v751_v61  ;;  %v539_v63 = vsel %vm334_vm13, %v15164_v53, %v11427_v4 }
 0x125   : > { %13793 = vpow2.f32 %v432_v30  ;;  %v22626_v61 = vrot.slane %v15169_v3, 4  ;;  %v21878_v30 = vrot.slane %v15169_v3, 1  ;;  %v21875_v4 = vrot.slane %v14941_v12, 6 }
 0x126   : > { %v15233_v15 = vpop.permute.xlu0 %1174  ;;  %v1843_v38 = vpop.permute.xlu1 %1842  ;;  %v15249_v55 = vsel %vm1281_vm4, %v1305_v45, %v1307_v28  ;;  %vm335_vm13 = vcmp.gt.f32.partialorder %v15230_v50, 0.0 }
 0x128   : > { %1673 = vrot.lane.b32.xlu0 %v1602_v44, %s14305_s11  ;;  %1375 = vrot.lane.b32.xlu1 %v15130_v47, %s14303_s9  ;;  %v21873_v44 = vrot.slane %v15227_v11, 4  ;;  %v311_v47 = vld [vmem:[%s14365_s29 + $0x110] sm:$0xff] }
 0x12a   : > { %v1845_v20 = vpop.permute.xlu0 %1844  ;;  %v15242_v19 = vpop.permute.xlu1 %1359  ;;  %v15268_v62 = vsel %vm1768_vm8, %v22626_v61, %v21873_v44  ;;  %v2841_v61 = vsel %vm2329_vm7, %v14974_v0, 0 }
 0x12c   : > { %1858 = vrot.lane.b32.xlu0 %v15142_v34, %s14306_s12  ;;  %1492 = vrot.lane.b32.xlu1 %v15249_v55, %s14304_s10  ;;  %v2330_v34 = vsel %vm2329_vm7, %v14615_v26, %v15173_v59  ;;  %v15277_v26 = vsub.f32 0.0, %v311_v47  ;;  %v2331_v59 = vsel %vm2329_vm7, %v14621_v32, %v15171_v27  ;;  %v22627_v32 = vrot.slane %v15169_v3, 5 }
 0x12d   : > { %v2368_v53 = vsel %vm2367_vm15, %v2330_v34, %v15182_v16  ;;  %v2369_v16 = vsel %vm2367_vm15, %v2331_v59, %v15180_v24  ;;  %v22628_v24 = vrot.slane %v15113_v58, 1  ;;  %v21877_v47 = vrot.slane %v15169_v3, 3 }
 0x12e   : > { %v1960_v43 = vpop.permute.xlu0 %1959  ;;  %v1962_v45 = vpop.permute.xlu1 %1961  ;;  %v2406_v14 = vsel %vm2405_vm0, %v2368_v53, %v15197_v29  ;;  %v2089_v27 = vsel %vm2070_vm9, %v22627_v32, %v21879_v48  ;;  %v2407_v29 = vsel %vm2405_vm0, %v2369_v16, %v15195_v6  ;;  %v15310_v6 = vand.u32 4294901760, %v2841_v61 }
 0x12f   : > { %v2444_v34 = vsel %vm2443_vm1, %v2406_v14, %v1658_v8  ;;  %v1121_v8 = vsel %vm1096_vm2, %v22628_v24, %v21878_v30  ;;  %v2445_v53 = vsel %vm2443_vm1, %v2407_v29, %v15212_v40  ;;  %v15317_v32 = vsel %vm1017_vm14, %v539_v63, %v15095_v1 }
 0x130   : > { %1975 = vrot.lane.b32.xlu0 %v15268_v62, %s14307_s13  ;;  %954 = vrot.lane.b32.xlu1 %v842_v21, %s14301_s30  ;;  %v2482_v0 = vsel %vm22061_vm3, %v2444_v34, %v1843_v38  ;;  %22629 = vst [vmem:[#allocation31_spill] sm:$0xff] %v15310_v6  ;;  %v680_v38 = vmin.f32 %v15277_v26, 0.0  ;;  %v2483_v14 = vsel %vm22061_vm3, %v2445_v53, %v1845_v20  ;;  %v13792_v34 = vpop.eup %13791  ;;  %v22630_v1 = vrot.slane %v14799_v56, 6  ;;  %v15346_v53 = vld [vmem:[%s14365_s29 + $0x90] sm:$0xff] }
 0x131   : > { %v2520_v59 = vsel %vm2519_vm10, %v2482_v0, %v1960_v43  ;;  %v2521_v40 = vsel %vm2519_vm10, %v2483_v14, %v1962_v45  ;;  %v1604_v20 = vsel %vm1583_vm6, %v1601_v33, %v21877_v47  ;;  %v13794_v45 = vpop.eup %13793  ;;  %v15343_v33 = vsub.f32 %v2841_v61, %v15310_v6 }
 0x132   : > { %v15289_v44 = vpop.permute.xlu0 %1476  ;;  %v2145_v21 = vpop.permute.xlu1 %2144  ;;  %v15336_v63 = vsel %vm2255_vm5, %v22630_v1, %v21875_v4  ;;  %v11485_v14 = vadd.f32 -1.0, %v13792_v34  ;;  %v21880_v34 = vrot.slane %v15317_v32, 4  ;;  %v312_v4 = vld [vmem:[%s14365_s29 + $0x118] sm:$0xff]  ;;  %v21884_v30 = vrot.slane %v15317_v32, 5 }
 0x133   : > { %v2558_v16 = vsel %vm2557_vm11, %v2520_v59, %v2145_v21  ;;  %v21876_v21 = vrot.slane %v15317_v32, 2  ;;  %22631 = vst [vmem:[#allocation32_spill] sm:$0xff] %v15343_v33  ;;  %v377_v59 = vmin.f32 %v15346_v53, 0.0 }
 0x134   : > { %2160 = vrot.lane.b32.xlu0 %v2089_v27, %s14308_s14  ;;  %1192 = vrot.lane.b32.xlu1 %v1121_v8, %s14302_s8  ;;  %v2657_v0 = vrot.slane %v2558_v16, 1  ;;  %v753_v8 = vmul.f32 1.442695, %v680_v38 }
 0x135   : > { %v15363_v38 = vsel %vm1281_vm4, %v1307_v28, %v21876_v21  ;;  %v434_v1 = vmul.f32 1.442695, %v377_v59  ;;  %v11428_v28 = vadd.f32 -1.0, %v13794_v45  ;;  %v21888_v45 = vrot.slane %v15227_v11, 1 }
 0x136   : > { %v2147_v43 = vpop.permute.xlu0 %2146  ;;  %v15320_v27 = vpop.permute.xlu1 %1176  ;;  %13795 = vpow2.f32 %v753_v8  ;;  %v22635_v8 = vrot.slane %v15227_v11, 4 }
 0x137   : > { %v15323_v29 = vsel %vm2557_vm11, %v2521_v40, %v2147_v43  ;;  %13797 = vpow2.f32 %v434_v1 }
 0x138   : > { %v21874_v24 = vrot.slane %v15323_v29, 1  ;;  %1675 = vrot.lane.b32.xlu0 %v1604_v20, %s14305_s11  ;;  %1377 = vrot.lane.b32.xlu1 %v15186_v36, %s14303_s9  ;;  %v21882_v36 = vrot.slane %v15336_v63, 1  ;;  %v21881_v20 = vand.u32 4294901760, %v15343_v33 }
 0x13a   : > { %v2659_v16 = vsel %vm1096_vm2, %v2657_v0, %v21874_v24  ;;  %v1662_v40 = vpop.permute.xlu0 %1661  ;;  %v15352_v43 = vpop.permute.xlu1 %1361  ;;  %v843_v24 = vsel %vm638_vm12, %v15210_v46, %v11485_v14  ;;  %v15390_v46 = vsel %vm1768_vm8, %v22635_v8, %v21880_v34  ;;  %v15400_v14 = vsub.f32 0.0, %v312_v4 }
 0x13b   : > { %v15356_v61 = vand.u32 4294901760, %v2659_v16  ;;  %v21885_v34 = vrot.slane %v15023_v49, 6  ;;  %vm639_vm12 = vcmp.gt.f32.partialorder %v15277_v26, 0.0 }
 0x13c   : > { %1860 = vrot.lane.b32.xlu0 %v15202_v18, %s14306_s12  ;;  %1494 = vrot.lane.b32.xlu1 %v15363_v38, %s14304_s10  ;;  %v22634_v18 = vrot.slane %v14961_v5, 1  ;;  %v3011_v5 = vsub.f32 %v15343_v33, %v21881_v20 }
 0x13d   : > { %22632 = vst [vmem:[#allocation33_spill] sm:$0xff] %v15356_v61  ;;  %v15372_v0 = vsub.f32 %v2659_v16, %v15356_v61  ;;  %v2332_v16 = vsel %vm2329_vm7, %v14609_v23, %v15233_v15  ;;  %v22636_v23 = vrot.slane %v15227_v11, 5 }
 0x13e   : > { %v1847_v21 = vpop.permute.xlu0 %1846  ;;  %v15376_v47 = vpop.permute.xlu1 %1478  ;;  %v2670_v48 = vsel %vm1096_vm2, %v22634_v18, %v21882_v36  ;;  %v2370_v20 = vsel %vm2367_vm15, %v2332_v16, %v15242_v19  ;;  %v21887_v19 = vrot.slane %v15227_v11, 3 }
 0x13f   : > { %22633 = vst [vmem:[#allocation34_spill] sm:$0xff] %v15372_v0  ;;  %v21883_v59 = vand.u32 4294901760, %v15372_v0  ;;  %v2843_v8 = vsel %vm2329_vm7, %v2670_v48, 0  ;;  %v2091_v15 = vsel %vm2070_vm9, %v22636_v23, %v21884_v30  ;;  %v2408_v1 = vsel %vm2405_vm0, %v2370_v20, %v15289_v44 }
 0x140   : > { %1977 = vrot.lane.b32.xlu0 %v15390_v46, %s14307_s13  ;;  %956 = vrot.lane.b32.xlu1 %v843_v24, %s14301_s30  ;;  %v540_v24 = vsel %vm335_vm13, %v15230_v50, %v11428_v28  ;;  %v22637_v48 = vrot.slane %v15169_v3, 1  ;;  %v2446_v16 = vsel %vm2443_vm1, %v2408_v1, %v1662_v40  ;;  %v15431_v23 = vand.u32 4294901760, %v2843_v8  ;;  %v13796_v30 = vpop.eup %13795 }
 0x141   : > { %v3002_v18 = vsub.f32 %v15372_v0, %v21883_v59  ;;  %v3012_v59 = vand.u32 4294901760, %v3011_v5  ;;  %v681_v44 = vmin.f32 %v15400_v14, 0.0  ;;  %v2484_v20 = vsel %vm22061_vm3, %v2446_v16, %v1847_v21  ;;  %v15466_v16 = vld [vmem:[%s14365_s29 + $0x98] sm:$0xff] }
 0x142   : > { %v1964_v4 = vpop.permute.xlu0 %1963  ;;  %v15413_v36 = vpop.permute.xlu1 %1178  ;;  %v1123_v50 = vsel %vm1096_vm2, %v22637_v48, %v21888_v45  ;;  %22638 = vst [vmem:[#allocation35_spill] sm:$0xff] %v15431_v23  ;;  %v22639_v21 = vrot.slane %v15169_v3, 3  ;;  %v22647_v0 = vrot.slane %v15336_v63, 1  ;;  %vm336_vm13 = vcmp.gt.f32.partialorder %v15346_v53, 0.0 }
 0x143   : > { %v3003_v28 = vand.u32 4294901760, %v3002_v18  ;;  %v15437_v18 = vsel %vm1017_vm14, %v540_v24, %v14990_v57  ;;  %v2522_v40 = vsel %vm2519_vm10, %v2484_v20, %v1964_v4  ;;  %v22640_v57 = vrot.slane %v14941_v12, 6 }
 0x144   : > { %2162 = vrot.lane.b32.xlu0 %v2091_v15, %s14308_s14  ;;  %1194 = vrot.lane.b32.xlu1 %v1123_v50, %s14302_s8  ;;  %v1606_v48 = vsel %vm1583_vm6, %v22639_v21, %v21887_v19  ;;  %v21889_v50 = vrot.slane %v15437_v18, 2  ;;  %v15463_v4 = vsub.f32 %v2843_v8, %v15431_v23  ;;  %v378_v20 = vmin.f32 %v15466_v16, 0.0  ;;  %v13798_v8 = vpop.eup %13797 }
 0x145   : > { %3004 = vmatmul.mubr.f32.vlgmr.msra.gmra.mrb[0].mxu0 %v3003_v28  ;;  %v15456_v24 = vsel %vm2255_vm5, %v22640_v57, %v21885_v34  ;;  %v755_v28 = vmul.f32 1.442695, %v681_v44 }
 0x146   : > { %v2149_v1 = vpop.permute.xlu0 %2148  ;;  %3013 = vmatprep.mubr.f32.mxu0 %v3012_v59  ;;  %v15440_v15 = vpop.permute.xlu1 %1363  ;;  %22641 = vst [vmem:[#allocation36_spill] sm:$0xff] %v15463_v4  ;;  %v22650_v63 = vand.u32 4294901760, %v15463_v4  ;;  %v22665_v23 = vrot.slane %v15456_v24, 1 }
 0x147   : > { %v15443_v5 = vsel %vm2557_vm11, %v2522_v40, %v2149_v1  ;;  %v11486_v40 = vadd.f32 -1.0, %v13796_v30  ;;  %v22642_v1 = vrot.slane %v15323_v29, 1  ;;  %v22644_v30 = vrot.slane %v15317_v32, 2 }
 0x148   : > { %v21886_v59 = vrot.slane %v15443_v5, 1  ;;  %1677 = vrot.lane.b32.xlu0 %v1606_v48, %s14305_s11  ;;  %1379 = vrot.lane.b32.xlu1 %v15249_v55, %s14303_s9  ;;  %13799 = vpow2.f32 %v755_v28  ;;  %v313_v55 = vld [vmem:[%s14365_s29 + $0x120] sm:$0xff]  ;;  %v22648_v28 = vrot.slane %v15437_v18, 4 }
 0x149   : > { %v15485_v34 = vsel %vm1281_vm4, %v22644_v30, %v21889_v50  ;;  %v844_v45 = vsel %vm639_vm12, %v15277_v26, %v11486_v40  ;;  %v11429_v30 = vadd.f32 -1.0, %v13798_v8  ;;  %v15522_v8 = vsub.f32 0.0, %v313_v55 }
 0x14a   : > { %v2664_v21 = vsel %vm1096_vm2, %v22642_v1, %v21886_v59  ;;  %v1664_v48 = vpop.permute.xlu0 %1663  ;;  %v15474_v57 = vpop.permute.xlu1 %1480  ;;  %v436_v59 = vmul.f32 1.442695, %v378_v20  ;;  %v22649_v20 = vrot.slane %v15317_v32, 4  ;;  %v22654_v40 = vrot.slane %v15227_v11, 1 }
 0x14b   : > { %v15478_v44 = vand.u32 4294901760, %v2664_v21  ;;  %vm640_vm12 = vcmp.gt.f32.partialorder %v15400_v14, 0.0 }
 0x14c   : > { %1862 = vrot.lane.b32.xlu0 %v15268_v62, %s14306_s12  ;;  %1496 = vrot.lane.b32.xlu1 %v15485_v34, %s14304_s10  ;;  %v22646_v62 = vrot.slane %v15456_v24, 1  ;;  %v15512_v26 = vsel %vm1768_vm8, %v22649_v20, %v22648_v28  ;;  %13801 = vpow2.f32 %v436_v59  ;;  %v22651_v59 = vrot.slane %v15437_v18, 5 }
 0x14d   : > { %22643 = vst [vmem:[#allocation37_spill] sm:$0xff] %v15478_v44  ;;  %v15494_v19 = vsub.f32 %v2664_v21, %v15478_v44 }
 0x14e   : > { %v1849_v50 = vpop.permute.xlu0 %1848  ;;  %v15498_v33 = vpop.permute.xlu1 %1180  ;;  %v2674_v1 = vsel %vm1096_vm2, %v22647_v0, %v22646_v62  ;;  %v3026_v0 = vsub.f32 %v15463_v4, %v22650_v63  ;;  %v2333_v62 = vsel %vm2329_vm7, %v14638_v7, %v15320_v27  ;;  %v22652_v7 = vrot.slane %v15317_v32, 5 }
 0x14f   : > { %22645 = vst [vmem:[#allocation38_spill] sm:$0xff] %v15494_v19  ;;  %v21894_v21 = vand.u32 4294901760, %v15494_v19  ;;  %v2845_v20 = vsel %vm2329_vm7, %v2674_v1, 0  ;;  %v2371_v63 = vsel %vm2367_vm15, %v2333_v62, %v15352_v43  ;;  %v22653_v1 = vrot.slane %v15317_v32, 1 }
 0x150   : > { %1979 = vrot.lane.b32.xlu0 %v15512_v26, %s14307_s13  ;;  %958 = vrot.lane.b32.xlu1 %v844_v45, %s14301_s30  ;;  %v541_v45 = vsel %vm336_vm13, %v15346_v53, %v11429_v30  ;;  %v2093_v27 = vsel %vm2070_vm9, %v22652_v7, %v22651_v59  ;;  %v21898_v43 = vrot.slane %v15317_v32, 3  ;;  %v3027_v4 = vand.u32 4294901760, %v3026_v0 }
 0x151   : > { %v3017_v28 = vsub.f32 %v15494_v19, %v21894_v21  ;;  %v2409_v21 = vsel %vm2405_vm0, %v2371_v63, %v15376_v47  ;;  %v1125_v53 = vsel %vm1096_vm2, %v22654_v40, %v22653_v1  ;;  %v15553_v59 = vand.u32 4294901760, %v2845_v20  ;;  %v314_v19 = vld [vmem:[%s14365_s29 + $0x128] sm:$0xff] }
 0x152   : > { %v1966_v55 = vpop.permute.xlu0 %1965  ;;  %v15535_v29 = vpop.permute.xlu1 %1365  ;;  %v2447_v62 = vsel %vm2443_vm1, %v2409_v21, %v1664_v48  ;;  %v682_v47 = vmin.f32 %v15522_v8, 0.0  ;;  %v15559_v40 = vsel %vm1017_vm14, %v541_v45, %v15115_v25  ;;  %v22657_v25 = vrot.slane %v15062_v2, 6 }
 0x153   : > { %v3018_v30 = vand.u32 4294901760, %v3017_v28  ;;  %22655 = vst [vmem:[#allocation39_spill] sm:$0xff] %v15553_v59  ;;  %v2485_v63 = vsel %vm22061_vm3, %v2447_v62, %v1849_v50  ;;  %v13800_v7 = vpop.eup %13799  ;;  %v22656_v50 = vrot.slane %v15227_v11, 3  ;;  %v21901_v1 = vrot.slane %v15559_v40, 2  ;;  %v15588_v62 = vld [vmem:[%s14365_s29 + $0xa0] sm:$0xff] }
 0x154   : > { %2164 = vrot.lane.b32.xlu0 %v2093_v27, %s14308_s14  ;;  %1196 = vrot.lane.b32.xlu1 %v1125_v53, %s14302_s8  ;;  %v2523_v48 = vsel %vm2519_vm10, %v2485_v63, %v1966_v55  ;;  %v22658_v45 = vrot.slane %v15023_v49, 6  ;;  %v15585_v53 = vsub.f32 %v2845_v20, %v15553_v59  ;;  %v379_v63 = vmin.f32 %v15588_v62, 0.0 }
 0x155   : > { %3019 = vmatmul.mubr.f32.gmra.mrb[2].mxu0 %v3018_v30  ;;  %v1608_v27 = vsel %vm1583_vm6, %v22656_v50, %v21898_v43  ;;  %v757_v30 = vmul.f32 1.442695, %v682_v47  ;;  %vm337_vm13 = vcmp.gt.f32.partialorder %v15466_v16, 0.0 }
 0x156   : > { %v2151_v21 = vpop.permute.xlu0 %2150  ;;  %3028 = vmatprep.mubr.f32.mxu0 %v3027_v4  ;;  %v15562_v28 = vpop.permute.xlu1 %1482  ;;  %v15578_v55 = vsel %vm2255_vm5, %v22658_v45, %v22657_v25  ;;  %22659 = vst [vmem:[#allocation40_spill] sm:$0xff] %v15585_v53 }
 0x157   : > { %v15565_v0 = vsel %vm2557_vm11, %v2523_v48, %v2151_v21  ;;  %v11487_v48 = vadd.f32 -1.0, %v13800_v7  ;;  %v22660_v21 = vrot.slane %v15443_v5, 1  ;;  %v13802_v20 = vpop.eup %13801  ;;  %v22662_v7 = vrot.slane %v15437_v18, 2 }
 0x158   : > { %v21897_v4 = vrot.slane %v15565_v0, 1  ;;  %1679 = vrot.lane.b32.xlu0 %v1608_v27, %s14305_s11  ;;  %1381 = vrot.lane.b32.xlu1 %v15363_v38, %s14303_s9  ;;  %13803 = vpow2.f32 %v757_v30  ;;  %v22666_v30 = vrot.slane %v15559_v40, 4 }
 0x159   : > { %v15607_v45 = vsel %vm1281_vm4, %v22662_v7, %v21901_v1  ;;  %v845_v38 = vsel %vm640_vm12, %v15400_v14, %v11487_v48  ;;  %v11430_v7 = vadd.f32 -1.0, %v13802_v20  ;;  %v15644_v20 = vsub.f32 0.0, %v314_v19 }
 0x15a   : > { %v2668_v50 = vsel %vm1096_vm2, %v22660_v21, %v21897_v4  ;;  %v1666_v27 = vpop.permute.xlu0 %1665  ;;  %v15596_v25 = vpop.permute.xlu1 %1182  ;;  %v438_v4 = vmul.f32 1.442695, %v379_v63  ;;  %v22667_v63 = vrot.slane %v15437_v18, 4  ;;  %v22672_v48 = vrot.slane %v15317_v32, 1 }
 0x15b   : > { %v15600_v47 = vand.u32 4294901760, %v2668_v50  ;;  %vm641_vm12 = vcmp.gt.f32.partialorder %v15522_v8, 0.0 }
 0x15c   : > { %1864 = vrot.lane.b32.xlu0 %v15390_v46, %s14306_s12  ;;  %1498 = vrot.lane.b32.xlu1 %v15607_v45, %s14304_s10  ;;  %v22664_v46 = vrot.slane %v15578_v55, 1  ;;  %v15634_v14 = vsel %vm1768_vm8, %v22667_v63, %v22666_v30  ;;  %13805 = vpow2.f32 %v438_v4  ;;  %v22669_v4 = vrot.slane %v15559_v40, 5 }
 0x15d   : > { %22661 = vst [vmem:[#allocation41_spill] sm:$0xff] %v15600_v47  ;;  %v15616_v43 = vsub.f32 %v2668_v50, %v15600_v47  ;;  %v22683_v47 = vrot.slane %v15578_v55, 1 }
 0x15e   : > { %v1851_v1 = vpop.permute.xlu0 %1850  ;;  %v15620_v59 = vpop.permute.xlu1 %1367  ;;  %v2678_v21 = vsel %vm1096_vm2, %v22665_v23, %v22664_v46  ;;  %v22668_v23 = vand.u32 4294901760, %v15585_v53  ;;  %v2334_v46 = vsel %vm2329_vm7, %v14641_v39, %v15413_v36  ;;  %v22670_v39 = vrot.slane %v15437_v18, 5 }
 0x15f   : > { %22663 = vst [vmem:[#allocation42_spill] sm:$0xff] %v15616_v43  ;;  %v21906_v50 = vand.u32 4294901760, %v15616_v43  ;;  %v2847_v63 = vsel %vm2329_vm7, %v2678_v21, 0  ;;  %v22671_v21 = vrot.slane %v15437_v18, 1 }
 0x160   : > { %1981 = vrot.lane.b32.xlu0 %v15634_v14, %s14307_s13  ;;  %960 = vrot.lane.b32.xlu1 %v845_v38, %s14301_s30  ;;  %v3041_v24 = vsub.f32 %v15585_v53, %v22668_v23  ;;  %v542_v38 = vsel %vm337_vm13, %v15466_v16, %v11430_v7  ;;  %v2372_v23 = vsel %vm2367_vm15, %v2334_v46, %v15440_v15  ;;  %v21910_v15 = vrot.slane %v15437_v18, 3 }
 0x161   : > { %v3032_v30 = vsub.f32 %v15616_v43, %v21906_v50  ;;  %v2095_v36 = vsel %vm2070_vm9, %v22670_v39, %v22669_v4  ;;  %v2410_v50 = vsel %vm2405_vm0, %v2372_v23, %v15474_v57  ;;  %v1127_v16 = vsel %vm1096_vm2, %v22672_v48, %v22671_v21  ;;  %v315_v43 = vld [vmem:[%s14365_s29 + $0x130] sm:$0xff] }
 0x162   : > { %v1968_v19 = vpop.permute.xlu0 %1967  ;;  %v15657_v5 = vpop.permute.xlu1 %1484  ;;  %v2448_v46 = vsel %vm2443_vm1, %v2410_v50, %v1666_v27  ;;  %v3042_v53 = vand.u32 4294901760, %v3041_v24  ;;  %v15675_v4 = vand.u32 4294901760, %v2847_v63  ;;  %v683_v57 = vmin.f32 %v15644_v20, 0.0 }
 0x163   : > { %v3033_v7 = vand.u32 4294901760, %v3032_v30  ;;  %v2486_v23 = vsel %vm22061_vm3, %v2448_v46, %v1851_v1  ;;  %v13804_v39 = vpop.eup %13803  ;;  %v15681_v48 = vsel %vm1017_vm14, %v542_v38, %v15011_v13  ;;  %v22674_v1 = vrot.slane %v15317_v32, 3  ;;  %v15710_v46 = vld [vmem:[%s14365_s29 + $0xa8] sm:$0xff] }
 0x164   : > { %2166 = vrot.lane.b32.xlu0 %v2095_v36, %s14308_s14  ;;  %1198 = vrot.lane.b32.xlu1 %v1127_v16, %s14302_s8  ;;  %22673 = vst [vmem:[#allocation43_spill] sm:$0xff] %v15675_v4  ;;  %v2524_v27 = vsel %vm2519_vm10, %v2486_v23, %v1968_v19  ;;  %v21913_v21 = vrot.slane %v15681_v48, 2  ;;  %v22675_v13 = vrot.slane %v15113_v58, 6  ;;  %v22676_v38 = vrot.slane %v15062_v2, 6 }
 0x165   : > { %3034 = vmatmul.mubr.f32.gmra.mrb[4].mxu0 %v3033_v7  ;;  %v1610_v36 = vsel %vm1583_vm6, %v22674_v1, %v21910_v15  ;;  %v15707_v16 = vsub.f32 %v2847_v63, %v15675_v4  ;;  %v759_v7 = vmul.f32 1.442695, %v683_v57  ;;  %v380_v23 = vmin.f32 %v15710_v46, 0.0 }
 0x166   : > { %v2153_v50 = vpop.permute.xlu0 %2152  ;;  %3043 = vmatprep.mubr.f32.mxu0 %v3042_v53  ;;  %v15684_v30 = vpop.permute.xlu1 %1184  ;;  %v15700_v19 = vsel %vm2255_vm5, %v22676_v38, %v22675_v13  ;;  %vm338_vm13 = vcmp.gt.f32.partialorder %v15588_v62, 0.0 }
 0x167   : > { %v15687_v24 = vsel %vm2557_vm11, %v2524_v27, %v2153_v50  ;;  %22677 = vst [vmem:[#allocation44_spill] sm:$0xff] %v15707_v16  ;;  %v11488_v27 = vadd.f32 -1.0, %v13804_v39  ;;  %v22678_v50 = vrot.slane %v15565_v0, 1  ;;  %v13806_v63 = vpop.eup %13805  ;;  %v22680_v39 = vrot.slane %v15559_v40, 2 }
 0x168   : > { %v21909_v53 = vrot.slane %v15687_v24, 1  ;;  %1681 = vrot.lane.b32.xlu0 %v1610_v36, %s14305_s11  ;;  %1383 = vrot.lane.b32.xlu1 %v15485_v34, %s14303_s9  ;;  %13807 = vpow2.f32 %v759_v7  ;;  %v22684_v7 = vrot.slane %v15681_v48, 4  ;;  %v22686_v55 = vand.u32 4294901760, %v15707_v16 }
 0x169   : > { %v15729_v38 = vsel %vm1281_vm4, %v22680_v39, %v21913_v21  ;;  %v846_v34 = vsel %vm641_vm12, %v15522_v8, %v11488_v27  ;;  %v11431_v39 = vadd.f32 -1.0, %v13806_v63  ;;  %v15766_v63 = vsub.f32 0.0, %v315_v43 }
 0x16a   : > { %v2672_v1 = vsel %vm1096_vm2, %v22678_v50, %v21909_v53  ;;  %v1668_v36 = vpop.permute.xlu0 %1667  ;;  %v15718_v13 = vpop.permute.xlu1 %1369  ;;  %v440_v53 = vmul.f32 1.442695, %v380_v23  ;;  %v22685_v23 = vrot.slane %v15559_v40, 4  ;;  %v22690_v27 = vrot.slane %v15437_v18, 1 }
 0x16b   : > { %v15722_v57 = vand.u32 4294901760, %v2672_v1  ;;  %vm642_vm12 = vcmp.gt.f32.partialorder %v15644_v20, 0.0 }
 0x16c   : > { %1866 = vrot.lane.b32.xlu0 %v15512_v26, %s14306_s12  ;;  %1500 = vrot.lane.b32.xlu1 %v15729_v38, %s14304_s10  ;;  %v22682_v26 = vrot.slane %v15700_v19, 1  ;;  %v15756_v8 = vsel %vm1768_vm8, %v22685_v23, %v22684_v7  ;;  %13809 = vpow2.f32 %v440_v53  ;;  %v22687_v53 = vrot.slane %v15681_v48, 5 }
 0x16d   : > { %22679 = vst [vmem:[#allocation45_spill] sm:$0xff] %v15722_v57  ;;  %v15738_v15 = vsub.f32 %v2672_v1, %v15722_v57  ;;  %v22701_v57 = vrot.slane %v15700_v19, 1 }
 0x16e   : > { %v1853_v21 = vpop.permute.xlu0 %1852  ;;  %v15742_v4 = vpop.permute.xlu1 %1486  ;;  %v2682_v50 = vsel %vm1096_vm2, %v22683_v47, %v22682_v26  ;;  %v3056_v47 = vsub.f32 %v15707_v16, %v22686_v55  ;;  %v2335_v26 = vsel %vm2329_vm7, %v14635_v9, %v15498_v33  ;;  %v22688_v9 = vrot.slane %v15559_v40, 5 }
 0x16f   : > { %22681 = vst [vmem:[#allocation46_spill] sm:$0xff] %v15738_v15  ;;  %v21918_v1 = vand.u32 4294901760, %v15738_v15  ;;  %v2849_v23 = vsel %vm2329_vm7, %v2682_v50, 0  ;;  %v2373_v55 = vsel %vm2367_vm15, %v2335_v26, %v15535_v29  ;;  %v22689_v50 = vrot.slane %v15559_v40, 1 }
 0x170   : > { %1983 = vrot.lane.b32.xlu0 %v15756_v8, %s14307_s13  ;;  %962 = vrot.lane.b32.xlu1 %v846_v34, %s14301_s30  ;;  %v543_v34 = vsel %vm338_vm13, %v15588_v62, %v11431_v39  ;;  %v2097_v33 = vsel %vm2070_vm9, %v22688_v9, %v22687_v53  ;;  %v21922_v29 = vrot.slane %v15559_v40, 3  ;;  %v3057_v16 = vand.u32 4294901760, %v3056_v47 }
 0x171   : > { %v3047_v7 = vsub.f32 %v15738_v15, %v21918_v1  ;;  %v2411_v1 = vsel %vm2405_vm0, %v2373_v55, %v15562_v28  ;;  %v1129_v62 = vsel %vm1096_vm2, %v22690_v27, %v22689_v50  ;;  %v15797_v53 = vand.u32 4294901760, %v2849_v23  ;;  %v316_v15 = vld [vmem:[%s14365_s29 + $0x138] sm:$0xff] }
 0x172   : > { %v1970_v43 = vpop.permute.xlu0 %1969  ;;  %v15779_v0 = vpop.permute.xlu1 %948  ;;  %v2449_v26 = vsel %vm2443_vm1, %v2411_v1, %v1668_v36  ;;  %v684_v28 = vmin.f32 %v15766_v63, 0.0  ;;  %v15803_v27 = vsel %vm1017_vm14, %v543_v34, %v15133_v42  ;;  %v22693_v42 = vrot.slane %v15169_v3, 6 }
 0x173   : > { %v3048_v39 = vand.u32 4294901760, %v3047_v7  ;;  %22691 = vst [vmem:[#allocation47_spill] sm:$0xff] %v15797_v53  ;;  %v2487_v55 = vsel %vm22061_vm3, %v2449_v26, %v1853_v21  ;;  %v13808_v9 = vpop.eup %13807  ;;  %v22692_v21 = vrot.slane %v15437_v18, 3  ;;  %v21925_v50 = vrot.slane %v15803_v27, 2  ;;  %v15832_v26 = vld [vmem:[%s14365_s29 + $0xb0] sm:$0xff] }
 0x174   : > { %2168 = vrot.lane.b32.xlu0 %v2097_v33, %s14308_s14  ;;  %1200 = vrot.lane.b32.xlu1 %v1129_v62, %s14302_s8  ;;  %v2525_v36 = vsel %vm2519_vm10, %v2487_v55, %v1970_v43  ;;  %v22694_v34 = vrot.slane %v15113_v58, 6  ;;  %v15829_v62 = vsub.f32 %v2849_v23, %v15797_v53  ;;  %v381_v55 = vmin.f32 %v15832_v26, 0.0 }
 0x175   : > { %3049 = vmatmul.mubr.f32.gmra.mrb[6].mxu0 %v3048_v39  ;;  %v1612_v33 = vsel %vm1583_vm6, %v22692_v21, %v21922_v29  ;;  %v761_v39 = vmul.f32 1.442695, %v684_v28  ;;  %vm339_vm13 = vcmp.gt.f32.partialorder %v15710_v46, 0.0 }
 0x176   : > { %v2155_v1 = vpop.permute.xlu0 %2154  ;;  %3058 = vmatprep.mubr.f32.mxu0 %v3057_v16  ;;  %v15806_v7 = vpop.permute.xlu1 %1186  ;;  %v15822_v43 = vsel %vm2255_vm5, %v22694_v34, %v22693_v42  ;;  %22695 = vst [vmem:[#allocation48_spill] sm:$0xff] %v15829_v62  ;;  %v22704_v19 = vand.u32 4294901760, %v15829_v62 }
 0x177   : > { %v15809_v47 = vsel %vm2557_vm11, %v2525_v36, %v2155_v1  ;;  %v11489_v36 = vadd.f32 -1.0, %v13808_v9  ;;  %v22696_v1 = vrot.slane %v15687_v24, 1  ;;  %v13810_v23 = vpop.eup %13809  ;;  %v22698_v9 = vrot.slane %v15681_v48, 2 }
 0x178   : > { %v21921_v16 = vrot.slane %v15809_v47, 1  ;;  %1683 = vrot.lane.b32.xlu0 %v1612_v33, %s14305_s11  ;;  %1385 = vrot.lane.b32.xlu1 %v15607_v45, %s14303_s9  ;;  %13811 = vpow2.f32 %v761_v39  ;;  %v22702_v39 = vrot.slane %v15803_v27, 4 }
 0x179   : > { %v15851_v34 = vsel %vm1281_vm4, %v22698_v9, %v21925_v50  ;;  %v847_v45 = vsel %vm642_vm12, %v15644_v20, %v11489_v36  ;;  %v11432_v9 = vadd.f32 -1.0, %v13810_v23  ;;  %v15888_v23 = vsub.f32 0.0, %v316_v15 }
 0x17a   : > { %v2676_v21 = vsel %vm1096_vm2, %v22696_v1, %v21921_v16  ;;  %v1670_v33 = vpop.permute.xlu0 %1669  ;;  %v15840_v42 = vpop.permute.xlu1 %1371  ;;  %v442_v16 = vmul.f32 1.442695, %v381_v55  ;;  %v22703_v55 = vrot.slane %v15681_v48, 4  ;;  %v22708_v36 = vrot.slane %v15559_v40, 1 }
 0x17b   : > { %v15844_v28 = vand.u32 4294901760, %v2676_v21  ;;  %vm643_vm12 = vcmp.gt.f32.partialorder %v15766_v63, 0.0 }
 0x17c   : > { %1868 = vrot.lane.b32.xlu0 %v15634_v14, %s14306_s12  ;;  %1502 = vrot.lane.b32.xlu1 %v15851_v34, %s14304_s10  ;;  %v22700_v14 = vrot.slane %v15822_v43, 1  ;;  %v15878_v20 = vsel %vm1768_vm8, %v22703_v55, %v22702_v39  ;;  %13813 = vpow2.f32 %v442_v16  ;;  %v22705_v16 = vrot.slane %v15803_v27, 5 }
 0x17d   : > { %22697 = vst [vmem:[#allocation49_spill] sm:$0xff] %v15844_v28  ;;  %v15860_v29 = vsub.f32 %v2676_v21, %v15844_v28  ;;  %v22719_v28 = vrot.slane %v15822_v43, 1 }
 0x17e   : > { %v1855_v50 = vpop.permute.xlu0 %1854  ;;  %v15864_v53 = vpop.permute.xlu1 %1488  ;;  %v2686_v1 = vsel %vm1096_vm2, %v22701_v57, %v22700_v14  ;;  %v3071_v57 = vsub.f32 %v15829_v62, %v22704_v19  ;;  %v2336_v14 = vsel %vm2329_vm7, %v14656_v41, %v15596_v25  ;;  %v22706_v41 = vrot.slane %v15681_v48, 5 }
 0x17f   : > { %22699 = vst [vmem:[#allocation50_spill] sm:$0xff] %v15860_v29  ;;  %v21930_v21 = vand.u32 4294901760, %v15860_v29  ;;  %v2851_v55 = vsel %vm2329_vm7, %v2686_v1, 0  ;;  %v2374_v19 = vsel %vm2367_vm15, %v2336_v14, %v15620_v59  ;;  %v22707_v1 = vrot.slane %v15681_v48, 1 }
 0x180   : > { %1985 = vrot.lane.b32.xlu0 %v15878_v20, %s14307_s13  ;;  %964 = vrot.lane.b32.xlu1 %v847_v45, %s14301_s30  ;;  %v544_v45 = vsel %vm339_vm13, %v15710_v46, %v11432_v9  ;;  %v2099_v25 = vsel %vm2070_vm9, %v22706_v41, %v22705_v16  ;;  %v21934_v59 = vrot.slane %v15681_v48, 3  ;;  %v3072_v62 = vand.u32 4294901760, %v3071_v57 }
 0x181   : > { %v3062_v39 = vsub.f32 %v15860_v29, %v21930_v21  ;;  %v2412_v21 = vsel %vm2405_vm0, %v2374_v19, %v15657_v5  ;;  %v1131_v46 = vsel %vm1096_vm2, %v22708_v36, %v22707_v1  ;;  %v15919_v16 = vand.u32 4294901760, %v2851_v55  ;;  %v317_v29 = vld [vmem:[%s14365_s29 + $0x140] sm:$0xff] }
 0x182   : > { %v1972_v15 = vpop.permute.xlu0 %1971  ;;  %v15901_v24 = vpop.permute.xlu1 %950  ;;  %v2450_v14 = vsel %vm2443_vm1, %v2412_v21, %v1670_v33  ;;  %v685_v5 = vmin.f32 %v15888_v23, 0.0  ;;  %v15925_v36 = vsel %vm1017_vm14, %v544_v45, %v15035_v60  ;;  %v22711_v60 = vrot.slane %v15227_v11, 6 }
 0x183   : > { %v3063_v9 = vand.u32 4294901760, %v3062_v39  ;;  %22709 = vst [vmem:[#allocation51_spill] sm:$0xff] %v15919_v16  ;;  %v2488_v19 = vsel %vm22061_vm3, %v2450_v14, %v1855_v50  ;;  %v13812_v41 = vpop.eup %13811  ;;  %v22710_v50 = vrot.slane %v15559_v40, 3  ;;  %v21937_v1 = vrot.slane %v15925_v36, 2  ;;  %v15954_v14 = vld [vmem:[%s14365_s29 + $0xb8] sm:$0xff] }
 0x184   : > { %2170 = vrot.lane.b32.xlu0 %v2099_v25, %s14308_s14  ;;  %1202 = vrot.lane.b32.xlu1 %v1131_v46, %s14302_s8  ;;  %v2526_v33 = vsel %vm2519_vm10, %v2488_v19, %v1972_v15  ;;  %v22712_v45 = vrot.slane %v15169_v3, 6  ;;  %v15951_v46 = vsub.f32 %v2851_v55, %v15919_v16  ;;  %v382_v19 = vmin.f32 %v15954_v14, 0.0 }
 0x185   : > { %3064 = vmatmul.mubr.f32.gmra.mrb[8].mxu0 %v3063_v9  ;;  %v1614_v25 = vsel %vm1583_vm6, %v22710_v50, %v21934_v59  ;;  %v763_v9 = vmul.f32 1.442695, %v685_v5  ;;  %vm340_vm13 = vcmp.gt.f32.partialorder %v15832_v26, 0.0 }
 0x186   : > { %v2157_v21 = vpop.permute.xlu0 %2156  ;;  %3073 = vmatprep.mubr.f32.mxu0 %v3072_v62  ;;  %v15928_v39 = vpop.permute.xlu1 %1188  ;;  %v15944_v15 = vsel %vm2255_vm5, %v22712_v45, %v22711_v60  ;;  %22713 = vst [vmem:[#allocation52_spill] sm:$0xff] %v15951_v46  ;;  %v22722_v43 = vand.u32 4294901760, %v15951_v46 }
 0x187   : > { %v15931_v57 = vsel %vm2557_vm11, %v2526_v33, %v2157_v21  ;;  %v11490_v33 = vadd.f32 -1.0, %v13812_v41  ;;  %v22714_v21 = vrot.slane %v15809_v47, 1  ;;  %v13814_v55 = vpop.eup %13813  ;;  %v22716_v41 = vrot.slane %v15803_v27, 2 }
 0x188   : > { %v21933_v62 = vrot.slane %v15931_v57, 1  ;;  %1685 = vrot.lane.b32.xlu0 %v1614_v25, %s14305_s11  ;;  %1387 = vrot.lane.b32.xlu1 %v15729_v38, %s14303_s9  ;;  %13815 = vpow2.f32 %v763_v9  ;;  %v22720_v9 = vrot.slane %v15925_v36, 4 }
 0x189   : > { %v15973_v45 = vsel %vm1281_vm4, %v22716_v41, %v21937_v1  ;;  %v848_v38 = vsel %vm643_vm12, %v15766_v63, %v11490_v33  ;;  %v11433_v41 = vadd.f32 -1.0, %v13814_v55  ;;  %v16010_v55 = vsub.f32 0.0, %v317_v29 }
 0x18a   : > { %v2680_v50 = vsel %vm1096_vm2, %v22714_v21, %v21933_v62  ;;  %v1672_v25 = vpop.permute.xlu0 %1671  ;;  %v15962_v60 = vpop.permute.xlu1 %1373  ;;  %v444_v62 = vmul.f32 1.442695, %v382_v19  ;;  %v22721_v19 = vrot.slane %v15803_v27, 4  ;;  %v22726_v33 = vrot.slane %v15681_v48, 1 }
 0x18b   : > { %v15966_v5 = vand.u32 4294901760, %v2680_v50  ;;  %vm644_vm12 = vcmp.gt.f32.partialorder %v15888_v23, 0.0 }
 0x18c   : > { %1870 = vrot.lane.b32.xlu0 %v15756_v8, %s14306_s12  ;;  %1504 = vrot.lane.b32.xlu1 %v15973_v45, %s14304_s10  ;;  %v22718_v8 = vrot.slane %v15944_v15, 1  ;;  %v16000_v63 = vsel %vm1768_vm8, %v22721_v19, %v22720_v9  ;;  %13817 = vpow2.f32 %v444_v62  ;;  %v22723_v62 = vrot.slane %v15925_v36, 5 }
 0x18d   : > { %22715 = vst [vmem:[#allocation53_spill] sm:$0xff] %v15966_v5  ;;  %v15982_v59 = vsub.f32 %v2680_v50, %v15966_v5  ;;  %v22737_v5 = vrot.slane %v15944_v15, 1 }
 0x18e   : > { %v1857_v1 = vpop.permute.xlu0 %1856  ;;  %v15986_v16 = vpop.permute.xlu1 %1490  ;;  %v2690_v21 = vsel %vm1096_vm2, %v22719_v28, %v22718_v8  ;;  %v3086_v28 = vsub.f32 %v15951_v46, %v22722_v43  ;;  %v2337_v8 = vsel %vm2329_vm7, %v14799_v56, %v15684_v30  ;;  %v22724_v56 = vrot.slane %v15803_v27, 5 }
 0x18f   : > { %22717 = vst [vmem:[#allocation54_spill] sm:$0xff] %v15982_v59  ;;  %v21942_v50 = vand.u32 4294901760, %v15982_v59  ;;  %v2853_v19 = vsel %vm2329_vm7, %v2690_v21, 0  ;;  %v2375_v43 = vsel %vm2367_vm15, %v2337_v8, %v15718_v13  ;;  %v22725_v21 = vrot.slane %v15803_v27, 1 }
 0x190   : > { %1987 = vrot.lane.b32.xlu0 %v16000_v63, %s14307_s13  ;;  %966 = vrot.lane.b32.xlu1 %v848_v38, %s14301_s30  ;;  %v545_v38 = vsel %vm340_vm13, %v15832_v26, %v11433_v41  ;;  %v2101_v30 = vsel %vm2070_vm9, %v22724_v56, %v22723_v62  ;;  %v21946_v13 = vrot.slane %v15803_v27, 3  ;;  %v3087_v46 = vand.u32 4294901760, %v3086_v28 }
 0x191   : > { %v3077_v9 = vsub.f32 %v15982_v59, %v21942_v50  ;;  %v2413_v50 = vsel %vm2405_vm0, %v2375_v43, %v15742_v4  ;;  %v1133_v26 = vsel %vm1096_vm2, %v22726_v33, %v22725_v21  ;;  %v16041_v62 = vand.u32 4294901760, %v2853_v19  ;;  %v318_v59 = vld [vmem:[%s14365_s29 + $0x148] sm:$0xff] }
 0x192   : > { %v1974_v29 = vpop.permute.xlu0 %1973  ;;  %v16023_v47 = vpop.permute.xlu1 %952  ;;  %v2451_v8 = vsel %vm2443_vm1, %v2413_v50, %v1672_v25  ;;  %v686_v4 = vmin.f32 %v16010_v55, 0.0  ;;  %v16047_v33 = vsel %vm1017_vm14, %v545_v38, %v15154_v17  ;;  %v22729_v17 = vrot.slane %v15317_v32, 6 }
 0x193   : > { %v3078_v41 = vand.u32 4294901760, %v3077_v9  ;;  %22727 = vst [vmem:[#allocation55_spill] sm:$0xff] %v16041_v62  ;;  %v2489_v43 = vsel %vm22061_vm3, %v2451_v8, %v1857_v1  ;;  %v13816_v56 = vpop.eup %13815  ;;  %v22728_v1 = vrot.slane %v15681_v48, 3  ;;  %v21949_v21 = vrot.slane %v16047_v33, 2  ;;  %v16076_v8 = vld [vmem:[%s14365_s29 + $0xc0] sm:$0xff] }
 0x194   : > { %2172 = vrot.lane.b32.xlu0 %v2101_v30, %s14308_s14  ;;  %1204 = vrot.lane.b32.xlu1 %v1133_v26, %s14302_s8  ;;  %v2527_v25 = vsel %vm2519_vm10, %v2489_v43, %v1974_v29  ;;  %v22730_v38 = vrot.slane %v15227_v11, 6  ;;  %v16073_v26 = vsub.f32 %v2853_v19, %v16041_v62  ;;  %v383_v43 = vmin.f32 %v16076_v8, 0.0 }
 0x195   : > { %3079 = vmatmul.mubr.f32.gmra.mrb[10].mxu0 %v3078_v41  ;;  %v1616_v30 = vsel %vm1583_vm6, %v22728_v1, %v21946_v13  ;;  %v765_v41 = vmul.f32 1.442695, %v686_v4  ;;  %vm341_vm13 = vcmp.gt.f32.partialorder %v15954_v14, 0.0 }
 0x196   : > { %v2159_v50 = vpop.permute.xlu0 %2158  ;;  %3088 = vmatprep.mubr.f32.mxu0 %v3087_v46  ;;  %v16050_v9 = vpop.permute.xlu1 %1190  ;;  %v16066_v29 = vsel %vm2255_vm5, %v22730_v38, %v22729_v17  ;;  %22731 = vst [vmem:[#allocation56_spill] sm:$0xff] %v16073_v26  ;;  %v22740_v15 = vand.u32 4294901760, %v16073_v26 }
 0x197   : > { %v16053_v28 = vsel %vm2557_vm11, %v2527_v25, %v2159_v50  ;;  %v11491_v25 = vadd.f32 -1.0, %v13816_v56  ;;  %v22732_v50 = vrot.slane %v15931_v57, 1  ;;  %v13818_v19 = vpop.eup %13817  ;;  %v22734_v56 = vrot.slane %v15925_v36, 2 }
 0x198   : > { %v21945_v46 = vrot.slane %v16053_v28, 1  ;;  %1687 = vrot.lane.b32.xlu0 %v1616_v30, %s14305_s11  ;;  %1389 = vrot.lane.b32.xlu1 %v15851_v34, %s14303_s9  ;;  %13819 = vpow2.f32 %v765_v41  ;;  %v22738_v41 = vrot.slane %v16047_v33, 4 }
 0x199   : > { %v16095_v38 = vsel %vm1281_vm4, %v22734_v56, %v21949_v21  ;;  %v849_v34 = vsel %vm644_vm12, %v15888_v23, %v11491_v25  ;;  %v11434_v56 = vadd.f32 -1.0, %v13818_v19  ;;  %v16132_v19 = vsub.f32 0.0, %v318_v59 }
 0x19a   : > { %v2684_v1 = vsel %vm1096_vm2, %v22732_v50, %v21945_v46  ;;  %v1674_v30 = vpop.permute.xlu0 %1673  ;;  %v16084_v17 = vpop.permute.xlu1 %1375  ;;  %v446_v46 = vmul.f32 1.442695, %v383_v43  ;;  %v22739_v43 = vrot.slane %v15925_v36, 4  ;;  %v22744_v25 = vrot.slane %v15803_v27, 1 }
 0x19b   : > { %v16088_v4 = vand.u32 4294901760, %v2684_v1  ;;  %vm645_vm12 = vcmp.gt.f32.partialorder %v16010_v55, 0.0 }
 0x19c   : > { %1872 = vrot.lane.b32.xlu0 %v15878_v20, %s14306_s12  ;;  %1506 = vrot.lane.b32.xlu1 %v16095_v38, %s14304_s10  ;;  %v22736_v20 = vrot.slane %v16066_v29, 1  ;;  %v16122_v23 = vsel %vm1768_vm8, %v22739_v43, %v22738_v41  ;;  %13821 = vpow2.f32 %v446_v46  ;;  %v22741_v46 = vrot.slane %v16047_v33, 5 }
 0x19d   : > { %22733 = vst [vmem:[#allocation57_spill] sm:$0xff] %v16088_v4  ;;  %v16104_v13 = vsub.f32 %v2684_v1, %v16088_v4 }
 0x19e   : > { %v1859_v21 = vpop.permute.xlu0 %1858  ;;  %v16108_v62 = vpop.permute.xlu1 %1492  ;;  %v2694_v50 = vsel %vm1096_vm2, %v22737_v5, %v22736_v20  ;;  %v3101_v5 = vsub.f32 %v16073_v26, %v22740_v15  ;;  %v2338_v20 = vsel %vm2329_vm7, %v14941_v12, %v15806_v7  ;;  %v22742_v12 = vrot.slane %v15925_v36, 5 }
 0x19f   : > { %22735 = vst [vmem:[#allocation58_spill] sm:$0xff] %v16104_v13  ;;  %v21954_v1 = vand.u32 4294901760, %v16104_v13  ;;  %v2855_v43 = vsel %vm2329_vm7, %v2694_v50, 0  ;;  %v2376_v15 = vsel %vm2367_vm15, %v2338_v20, %v15840_v42  ;;  %v22743_v50 = vrot.slane %v15925_v36, 1 }
 0x1a0   : > { %1989 = vrot.lane.b32.xlu0 %v16122_v23, %s14307_s13  ;;  %968 = vrot.lane.b32.xlu1 %v849_v34, %s14301_s30  ;;  %v546_v34 = vsel %vm341_vm13, %v15954_v14, %v11434_v56  ;;  %v2103_v7 = vsel %vm2070_vm9, %v22742_v12, %v22741_v46  ;;  %v21958_v42 = vrot.slane %v15925_v36, 3  ;;  %v3102_v26 = vand.u32 4294901760, %v3101_v5 }
 0x1a1   : > { %v3092_v41 = vsub.f32 %v16104_v13, %v21954_v1  ;;  %v2414_v1 = vsel %vm2405_vm0, %v2376_v15, %v15864_v53  ;;  %v1135_v14 = vsel %vm1096_vm2, %v22744_v25, %v22743_v50  ;;  %v16163_v46 = vand.u32 4294901760, %v2855_v43  ;;  %v319_v13 = vld [vmem:[%s14365_s29 + $0x150] sm:$0xff] }
 0x1a2   : > { %v1976_v59 = vpop.permute.xlu0 %1975  ;;  %v16145_v57 = vpop.permute.xlu1 %954  ;;  %v2452_v20 = vsel %vm2443_vm1, %v2414_v1, %v1674_v30  ;;  %v687_v53 = vmin.f32 %v16132_v19, 0.0  ;;  %v16169_v25 = vsel %vm1017_vm14, %v546_v34, %v15053_v37  ;;  %v22747_v37 = vrot.slane %v15437_v18, 6 }
 0x1a3   : > { %v3093_v56 = vand.u32 4294901760, %v3092_v41  ;;  %22745 = vst [vmem:[#allocation59_spill] sm:$0xff] %v16163_v46  ;;  %v2490_v15 = vsel %vm22061_vm3, %v2452_v20, %v1859_v21  ;;  %v13820_v12 = vpop.eup %13819  ;;  %v22746_v21 = vrot.slane %v15803_v27, 3  ;;  %v21961_v50 = vrot.slane %v16169_v25, 2  ;;  %v16198_v20 = vld [vmem:[%s14365_s29 + $0xc8] sm:$0xff] }
 0x1a4   : > { %2174 = vrot.lane.b32.xlu0 %v2103_v7, %s14308_s14  ;;  %1206 = vrot.lane.b32.xlu1 %v1135_v14, %s14302_s8  ;;  %v2528_v30 = vsel %vm2519_vm10, %v2490_v15, %v1976_v59  ;;  %v22748_v34 = vrot.slane %v15317_v32, 6  ;;  %v16195_v14 = vsub.f32 %v2855_v43, %v16163_v46  ;;  %v384_v15 = vmin.f32 %v16198_v20, 0.0 }
 0x1a5   : > { %3094 = vmatmul.mubr.f32.gmra.mrb[12].mxu0 %v3093_v56  ;;  %v1618_v7 = vsel %vm1583_vm6, %v22746_v21, %v21958_v42  ;;  %v767_v56 = vmul.f32 1.442695, %v687_v53  ;;  %vm342_vm13 = vcmp.gt.f32.partialorder %v16076_v8, 0.0  ;;  %v22755_v46 = vrot.slane %v16066_v29, 1 }
 0x1a6   : > { %v2161_v1 = vpop.permute.xlu0 %2160  ;;  %3103 = vmatprep.mubr.f32.mxu0 %v3102_v26  ;;  %v16172_v41 = vpop.permute.xlu1 %1192  ;;  %v16188_v59 = vsel %vm2255_vm5, %v22748_v34, %v22747_v37  ;;  %22749 = vst [vmem:[#allocation60_spill] sm:$0xff] %v16195_v14  ;;  %v22758_v29 = vand.u32 4294901760, %v16195_v14 }
 0x1a7   : > { %v16175_v5 = vsel %vm2557_vm11, %v2528_v30, %v2161_v1  ;;  %v11492_v30 = vadd.f32 -1.0, %v13820_v12  ;;  %v22750_v1 = vrot.slane %v16053_v28, 1  ;;  %v13822_v43 = vpop.eup %13821  ;;  %v22752_v12 = vrot.slane %v16047_v33, 2 }
 0x1a8   : > { %v21957_v26 = vrot.slane %v16175_v5, 1  ;;  %1689 = vrot.lane.b32.xlu0 %v1618_v7, %s14305_s11  ;;  %1391 = vrot.lane.b32.xlu1 %v15973_v45, %s14303_s9  ;;  %13823 = vpow2.f32 %v767_v56  ;;  %v22756_v56 = vrot.slane %v16169_v25, 4 }
 0x1a9   : > { %v16217_v34 = vsel %vm1281_vm4, %v22752_v12, %v21961_v50  ;;  %v850_v45 = vsel %vm645_vm12, %v16010_v55, %v11492_v30  ;;  %v11435_v12 = vadd.f32 -1.0, %v13822_v43  ;;  %vm646_vm12 = vcmp.gt.f32.partialorder %v16132_v19, 0.0 }
 0x1aa   : > { %v2688_v21 = vsel %vm1096_vm2, %v22750_v1, %v21957_v26  ;;  %v1676_v7 = vpop.permute.xlu0 %1675  ;;  %v16206_v37 = vpop.permute.xlu1 %1377  ;;  %v448_v26 = vmul.f32 1.442695, %v384_v15  ;;  %v22757_v15 = vrot.slane %v16047_v33, 4 }
 0x1ab   : > { %v16210_v53 = vand.u32 4294901760, %v2688_v21 }
 0x1ac   : > { %1874 = vrot.lane.b32.xlu0 %v16000_v63, %s14306_s12  ;;  %1508 = vrot.lane.b32.xlu1 %v16217_v34, %s14304_s10  ;;  %v22754_v63 = vrot.slane %v16188_v59, 1  ;;  %13825 = vpow2.f32 %v448_v26 }
 0x1ad   : > { %22751 = vst [vmem:[#allocation61_spill] sm:$0xff] %v16210_v53  ;;  %v16226_v42 = vsub.f32 %v2688_v21, %v16210_v53  ;;  %v16243_v21 = vsel %vm1768_vm8, %v22757_v15, %v22756_v56  ;;  %v2339_v56 = vsel %vm2329_vm7, %v15023_v49, %v15928_v39  ;;  %v22774_v53 = vrot.slane %v16188_v59, 1 }
 0x1ae   : > { %v1861_v50 = vpop.permute.xlu0 %1860  ;;  %v16231_v28 = vpop.permute.xlu1 %1494  ;;  %v2698_v1 = vsel %vm1096_vm2, %v22755_v46, %v22754_v63  ;;  %v3116_v46 = vsub.f32 %v16195_v14, %v22758_v29  ;;  %v16254_v63 = vsub.f32 0.0, %v319_v13  ;;  %v2377_v13 = vsel %vm2367_vm15, %v2339_v56, %v15962_v60 }
 0x1af   : > { %22753 = vst [vmem:[#allocation62_spill] sm:$0xff] %v16226_v42  ;;  %v21964_v43 = vand.u32 4294901760, %v16226_v42  ;;  %v2857_v30 = vsel %vm2329_vm7, %v2698_v1, 0  ;;  %v2415_v39 = vsel %vm2405_vm0, %v2377_v13, %v15986_v16  ;;  %v22760_v1 = vrot.slane %v16047_v33, 5 }
 0x1b0   : > { %1991 = vrot.lane.b32.xlu0 %v16243_v21, %s14307_s13  ;;  %970 = vrot.lane.b32.xlu1 %v850_v45, %s14301_s30  ;;  %v547_v45 = vsel %vm342_vm13, %v16076_v8, %v11435_v12  ;;  %v22761_v8 = vrot.slane %v16047_v33, 1  ;;  %v22762_v12 = vrot.slane %v15925_v36, 1  ;;  %v2453_v55 = vsel %vm2443_vm1, %v2415_v39, %v1676_v7 }
 0x1b1   : > { %v3107_v15 = vsub.f32 %v16226_v42, %v21964_v43  ;;  %v22759_v43 = vrot.slane %v16169_v25, 5  ;;  %v3117_v16 = vand.u32 4294901760, %v3116_v46  ;;  %v16287_v13 = vand.u32 4294901760, %v2857_v30 }
 0x1b2   : > { %v1978_v26 = vpop.permute.xlu0 %1977  ;;  %v16269_v29 = vpop.permute.xlu1 %956  ;;  %v1137_v60 = vsel %vm1096_vm2, %v22762_v12, %v22761_v8  ;;  %v688_v49 = vmin.f32 %v16254_v63, 0.0  ;;  %v16293_v8 = vsel %vm1017_vm14, %v547_v45, %v15068_v35  ;;  %v22764_v39 = vrot.slane %v16047_v33, 3 }
 0x1b3   : > { %v2105_v14 = vsel %vm2070_vm9, %v22760_v1, %v22759_v43  ;;  %v3108_v56 = vand.u32 4294901760, %v3107_v15  ;;  %22763 = vst [vmem:[#allocation63_spill] sm:$0xff] %v16287_v13  ;;  %v2491_v43 = vsel %vm22061_vm3, %v2453_v55, %v1861_v50  ;;  %v13824_v1 = vpop.eup %13823  ;;  %v22765_v50 = vrot.slane %v15925_v36, 3 }
 0x1b4   : > { %2176 = vrot.lane.b32.xlu0 %v2105_v14, %s14308_s14  ;;  %1208 = vrot.lane.b32.xlu1 %v1137_v60, %s14302_s8  ;;  %v2529_v7 = vsel %vm2519_vm10, %v2491_v43, %v1978_v26  ;;  %v21972_v12 = vrot.slane %v16293_v8, 2  ;;  %v22766_v35 = vrot.slane %v15559_v40, 6  ;;  %v22767_v45 = vrot.slane %v15437_v18, 6  ;;  %v16322_v43 = vld [vmem:[%s14365_s29 + $0xd0] sm:$0xff] }
 0x1b5   : > { %3109 = vmatmul.mubr.f32.gmra.mrb[14].mxu0 %v3108_v56  ;;  %v1620_v55 = vsel %vm1583_vm6, %v22765_v50, %v22764_v39  ;;  %v16319_v56 = vsub.f32 %v2857_v30, %v16287_v13  ;;  %v22769_v39 = vrot.slane %v16175_v5, 1  ;;  %v21982_v5 = vrot.slane %v16293_v8, 5 }
 0x1b6   : > { %v2163_v15 = vpop.permute.xlu0 %2162  ;;  %3118 = vmatprep.mubr.f32.mxu0 %v3117_v16  ;;  %v16296_v14 = vpop.permute.xlu1 %1194  ;;  %v16312_v26 = vsel %vm2255_vm5, %v22767_v45, %v22766_v35  ;;  %v769_v16 = vmul.f32 1.442695, %v688_v49  ;;  %vm343_vm13 = vcmp.gt.f32.partialorder %v16198_v20, 0.0 }
 0x1b7   : > { %v16299_v46 = vsel %vm2557_vm11, %v2529_v7, %v2163_v15  ;;  %22768 = vst [vmem:[#allocation64_spill] sm:$0xff] %v16319_v56  ;;  %v385_v7 = vmin.f32 %v16322_v43, 0.0  ;;  %v11493_v15 = vadd.f32 -1.0, %v13824_v1  ;;  %v13826_v30 = vpop.eup %13825  ;;  %v22771_v1 = vrot.slane %v16169_v25, 2 }
 0x1b8   : > { %v21967_v60 = vrot.slane %v16299_v46, 1  ;;  %1691 = vrot.lane.b32.xlu0 %v1620_v55, %s14305_s11  ;;  %1393 = vrot.lane.b32.xlu1 %v16095_v38, %s14303_s9  ;;  %13827 = vpow2.f32 %v769_v16  ;;  %v11436_v13 = vadd.f32 -1.0, %v13826_v30  ;;  %v22775_v16 = vrot.slane %v16293_v8, 4 }
 0x1b9   : > { %v16341_v45 = vsel %vm1281_vm4, %v22771_v1, %v21972_v12  ;;  %v851_v42 = vsel %vm646_vm12, %v16132_v19, %v11493_v15  ;;  %v21981_v15 = vrot.slane %v16169_v25, 1  ;;  %vm647_vm12 = vcmp.gt.f32.partialorder %v16254_v63, 0.0 }
 0x1ba   : > { %v2692_v50 = vsel %vm1096_vm2, %v22769_v39, %v21967_v60  ;;  %v1678_v35 = vpop.permute.xlu0 %1677  ;;  %v16330_v55 = vpop.permute.xlu1 %1379  ;;  %v21977_v39 = vand.u32 4294901760, %v16319_v56  ;;  %v450_v60 = vmul.f32 1.442695, %v385_v7  ;;  %v22776_v7 = vrot.slane %v16169_v25, 4 }
 0x1bb   : > { %v16334_v49 = vand.u32 4294901760, %v2692_v50 }
 0x1bc   : > { %1876 = vrot.lane.b32.xlu0 %v16122_v23, %s14306_s12  ;;  %1510 = vrot.lane.b32.xlu1 %v16341_v45, %s14304_s10  ;;  %v22773_v23 = vrot.slane %v16312_v26, 1  ;;  %v16367_v19 = vsel %vm1768_vm8, %v22776_v7, %v22775_v16  ;;  %v3131_v59 = vsub.f32 %v16319_v56, %v21977_v39  ;;  %13829 = vpow2.f32 %v450_v60 }
 0x1bd   : > { %22770 = vst [vmem:[#allocation65_spill] sm:$0xff] %v16334_v49  ;;  %v16350_v38 = vsub.f32 %v2692_v50, %v16334_v49 }
 0x1be   : > { %v1863_v1 = vpop.permute.xlu0 %1862  ;;  %v16353_v12 = vpop.permute.xlu1 %1496  ;;  %v2702_v4 = vsel %vm1096_vm2, %v22774_v53, %v22773_v23  ;;  %v2340_v53 = vsel %vm2329_vm7, %v15062_v2, %v16050_v9  ;;  %v22777_v2 = vrot.slane %v16169_v25, 5 }
 0x1bf   : > { %22772 = vst [vmem:[#allocation66_spill] sm:$0xff] %v16350_v38  ;;  %v21978_v50 = vand.u32 4294901760, %v16350_v38  ;;  %v2859_v23 = vsel %vm2329_vm7, %v2702_v4, 0  ;;  %v2378_v7 = vsel %vm2367_vm15, %v2340_v53, %v16084_v17  ;;  %v21983_v17 = vrot.slane %v16169_v25, 3  ;;  %v16404_v53 = vld [vmem:[%s14365_s29 + $0xd8] sm:$0xff] }
 0x1c0   : > { %1993 = vrot.lane.b32.xlu0 %v16367_v19, %s14307_s13  ;;  %972 = vrot.lane.b32.xlu1 %v851_v42, %s14301_s30  ;;  %v548_v42 = vsel %vm343_vm13, %v16198_v20, %v11436_v13  ;;  %v2107_v9 = vsel %vm2070_vm9, %v22777_v2, %v21982_v5  ;;  %v2416_v4 = vsel %vm2405_vm0, %v2378_v7, %v16108_v62  ;;  %v22778_v20 = vrot.slane %v16047_v33, 1  ;;  %v16413_v2 = vld [vmem:[%s14365_s29 + $0xe0] sm:$0xff] }
 0x1c1   : > { %v3122_v30 = vsub.f32 %v16350_v38, %v21978_v50  ;;  %v386_v16 = vmin.f32 %v16404_v53, 0.0  ;;  %v2454_v56 = vsel %vm2443_vm1, %v2416_v4, %v1678_v35  ;;  %v3132_v62 = vand.u32 4294901760, %v3131_v59 }
 0x1c2   : > { %v1980_v39 = vpop.permute.xlu0 %1979  ;;  %v16388_v60 = vpop.permute.xlu1 %958  ;;  %v1139_v13 = vsel %vm1096_vm2, %v22778_v20, %v21981_v15  ;;  %v16410_v7 = vand.u32 4294901760, %v2859_v23  ;;  %v387_v20 = vmin.f32 %v16413_v2, 0.0  ;;  %v16419_v5 = vsel %vm1017_vm14, %v548_v42, %v15087_v52 }
 0x1c3   : > { %v3123_v50 = vand.u32 4294901760, %v3122_v30  ;;  %v2492_v30 = vsel %vm22061_vm3, %v2454_v56, %v1863_v1  ;;  %v13828_v15 = vpop.eup %13827  ;;  %v21985_v1 = vrot.slane %v16419_v5, 2  ;;  %v22781_v52 = vrot.slane %v15681_v48, 6 }
 0x1c4   : > { %2178 = vrot.lane.b32.xlu0 %v2107_v9, %s14308_s14  ;;  %1210 = vrot.lane.b32.xlu1 %v1139_v13, %s14302_s8  ;;  %22779 = vst [vmem:[#allocation67_spill] sm:$0xff] %v16410_v7  ;;  %v2530_v35 = vsel %vm2519_vm10, %v2492_v30, %v1980_v39  ;;  %v22780_v13 = vrot.slane %v16047_v33, 3  ;;  %v452_v42 = vmul.f32 1.442695, %v386_v16  ;;  %v16445_v30 = vsub.f32 %v2859_v23, %v16410_v7 }
 0x1c5   : > { %3124 = vmatmul.mubr.f32.gmra.mrb[16].mxu0 %v3123_v50  ;;  %v22782_v50 = vrot.slane %v15559_v40, 6  ;;  %vm344_vm13 = vcmp.gt.f32.partialorder %v16322_v43, 0.0 }
 0x1c6   : > { %v2165_v9 = vpop.permute.xlu0 %2164  ;;  %3133 = vmatprep.mubr.f32.mxu0 %v3132_v62  ;;  %v16422_v4 = vpop.permute.xlu1 %1196  ;;  %v1622_v56 = vsel %vm1583_vm6, %v22780_v13, %v21983_v17  ;;  %22783 = vst [vmem:[#allocation68_spill] sm:$0xff] %v16445_v30  ;;  %v22784_v13 = vrot.slane %v16299_v46, 1  ;;  %13831 = vpow2.f32 %v452_v42 }
 0x1c7   : > { %v16425_v59 = vsel %vm2557_vm11, %v2530_v35, %v2165_v9  ;;  %v16438_v39 = vsel %vm2255_vm5, %v22782_v50, %v22781_v52  ;;  %v454_v35 = vmul.f32 1.442695, %v387_v20  ;;  %v11494_v9 = vadd.f32 -1.0, %v13828_v15  ;;  %v13830_v17 = vpop.eup %13829 }
 0x1c8   : > { %v21984_v62 = vrot.slane %v16425_v59, 1  ;;  %1693 = vrot.lane.b32.xlu0 %v1622_v56, %s14305_s11  ;;  %1395 = vrot.lane.b32.xlu1 %v16217_v34, %s14303_s9  ;;  %v22786_v15 = vrot.slane %v16293_v8, 2  ;;  %v21990_v20 = vand.u32 4294901760, %v16445_v30  ;;  %v11437_v56 = vadd.f32 -1.0, %v13830_v17 }
 0x1c9   : > { %13833 = vpow2.f32 %v454_v35  ;;  %v22788_v46 = vrot.slane %v16438_v39, 1  ;;  %v22790_v35 = vrot.slane %v16419_v5, 4 }
 0x1ca   : > { %v2696_v52 = vsel %vm1096_vm2, %v22784_v13, %v21984_v62  ;;  %v1680_v50 = vpop.permute.xlu0 %1679  ;;  %v16452_v16 = vpop.permute.xlu1 %1381  ;;  %v16463_v23 = vsel %vm1281_vm4, %v22786_v15, %v21985_v1  ;;  %v852_v62 = vsel %vm647_vm12, %v16254_v63, %v11494_v9  ;;  %v549_v17 = vsel %vm344_vm13, %v16322_v43, %v11437_v56 }
 0x1cb   : > { %v16456_v34 = vand.u32 4294901760, %v2696_v52  ;;  %vm345_vm12 = vcmp.gt.f32.partialorder %v16404_v53, 0.0  ;;  %vm346_vm13 = vcmp.gt.f32.partialorder %v16413_v2, 0.0 }
 0x1cc   : > { %1878 = vrot.lane.b32.xlu0 %v16243_v21, %s14306_s12  ;;  %1512 = vrot.lane.b32.xlu1 %v16463_v23, %s14304_s10  ;;  %v22789_v21 = vrot.slane %v16312_v26, 1  ;;  %v3146_v26 = vsub.f32 %v16445_v30, %v21990_v20  ;;  %v22792_v20 = vrot.slane %v16419_v5, 5 }
 0x1cd   : > { %22785 = vst [vmem:[#allocation69_spill] sm:$0xff] %v16456_v34  ;;  %v16472_v13 = vsub.f32 %v2696_v52, %v16456_v34  ;;  %v22791_v52 = vrot.slane %v16293_v8, 4 }
 0x1ce   : > { %v1865_v15 = vpop.permute.xlu0 %1864  ;;  %v16475_v1 = vpop.permute.xlu1 %1498  ;;  %v2706_v38 = vsel %vm1096_vm2, %v22789_v21, %v22788_v46  ;;  %v2341_v46 = vsel %vm2329_vm7, %v15113_v58, %v16172_v41  ;;  %v22793_v58 = vrot.slane %v16293_v8, 5  ;;  %v3147_v30 = vand.u32 4294901760, %v3146_v26 }
 0x1cf   : > { %22787 = vst [vmem:[#allocation70_spill] sm:$0xff] %v16472_v13  ;;  %v16489_v63 = vsel %vm1768_vm8, %v22791_v52, %v22790_v35  ;;  %v21991_v9 = vand.u32 4294901760, %v16472_v13  ;;  %v2861_v35 = vsel %vm2329_vm7, %v2706_v38, 0  ;;  %v22794_v38 = vrot.slane %v16293_v8, 1 }
 0x1d0   : > { %1995 = vrot.lane.b32.xlu0 %v16489_v63, %s14307_s13  ;;  %974 = vrot.lane.b32.xlu1 %v852_v62, %s14301_s30  ;;  %v2379_v62 = vsel %vm2367_vm15, %v2341_v46, %v16206_v37  ;;  %v2109_v41 = vsel %vm2070_vm9, %v22793_v58, %v22792_v20  ;;  %v22795_v52 = vrot.slane %v16169_v25, 1  ;;  %v21996_v37 = vrot.slane %v16293_v8, 3 }
 0x1d1   : > { %v3137_v21 = vsub.f32 %v16472_v13, %v21991_v9  ;;  %v2417_v9 = vsel %vm2405_vm0, %v2379_v62, %v16231_v28  ;;  %v16528_v20 = vand.u32 4294901760, %v2861_v35  ;;  %v13832_v62 = vpop.eup %13831  ;;  %v16533_v58 = vsel %vm1017_vm14, %v549_v17, %v15108_v51  ;;  %v16615_v13 = vld [vmem:[%s14365_s29 + $0xe8] sm:$0xff] }
 0x1d2   : > { %v1982_v42 = vpop.permute.xlu0 %1981  ;;  %v16510_v7 = vpop.permute.xlu1 %960  ;;  %v1141_v43 = vsel %vm1096_vm2, %v22795_v52, %v22794_v38  ;;  %v2455_v46 = vsel %vm2443_vm1, %v2417_v9, %v1680_v50  ;;  %v21994_v38 = vrot.slane %v16533_v58, 2  ;;  %v22798_v51 = vrot.slane %v15803_v27, 6 }
 0x1d3   : > { %v3138_v56 = vand.u32 4294901760, %v3137_v21  ;;  %22796 = vst [vmem:[#allocation71_spill] sm:$0xff] %v16528_v20  ;;  %v2493_v28 = vsel %vm22061_vm3, %v2455_v46, %v1865_v15  ;;  %v13834_v9 = vpop.eup %13833  ;;  %v22797_v15 = vrot.slane %v16169_v25, 3 }
 0x1d4   : > { %2180 = vrot.lane.b32.xlu0 %v2109_v41, %s14308_s14  ;;  %1212 = vrot.lane.b32.xlu1 %v1141_v43, %s14302_s8  ;;  %v2531_v21 = vsel %vm2519_vm10, %v2493_v28, %v1982_v42  ;;  %v22799_v42 = vrot.slane %v15681_v48, 6  ;;  %v16559_v43 = vsub.f32 %v2861_v35, %v16528_v20  ;;  %v11439_v46 = vadd.f32 -1.0, %v13834_v9 }
 0x1d5   : > { %3139 = vmatmul.mubr.f32.gmra.mrb[18].mxu0 %v3138_v56  ;;  %v1624_v26 = vsel %vm1583_vm6, %v22797_v15, %v21996_v37  ;;  %v11438_v56 = vadd.f32 -1.0, %v13832_v62  ;;  %v22801_v28 = vrot.slane %v16425_v59, 1  ;;  %v22803_v35 = vrot.slane %v16419_v5, 2 }
 0x1d6   : > { %v2167_v52 = vpop.permute.xlu0 %2166  ;;  %3148 = vmatprep.mubr.f32.mxu0 %v3147_v30  ;;  %v16536_v50 = vpop.permute.xlu1 %1198  ;;  %v16552_v30 = vsel %vm2255_vm5, %v22799_v42, %v22798_v51  ;;  %22800 = vst [vmem:[#allocation72_spill] sm:$0xff] %v16559_v43  ;;  %v21999_v9 = vrot.slane %v16533_v58, 4  ;;  %v22805_v37 = vrot.slane %v16438_v39, 1  ;;  %v22806_v51 = vrot.slane %v16419_v5, 4 }
 0x1d7   : > { %v16539_v41 = vsel %vm2557_vm11, %v2531_v21, %v2167_v52  ;;  %v16578_v62 = vsel %vm1281_vm4, %v22803_v35, %v21994_v38  ;;  %v550_v35 = vsel %vm345_vm12, %v16404_v53, %v11438_v56  ;;  %v551_v38 = vsel %vm346_vm13, %v16413_v2, %v11439_v46 }
 0x1d8   : > { %v21995_v17 = vrot.slane %v16539_v41, 1  ;;  %1695 = vrot.lane.b32.xlu0 %v1624_v26, %s14305_s11  ;;  %1397 = vrot.lane.b32.xlu1 %v16341_v45, %s14303_s9  ;;  %v22000_v45 = vrot.slane %v16552_v30, 1  ;;  %v1813_v59 = vsel %vm1768_vm8, %v22806_v51, %v21999_v9  ;;  %v22807_v53 = vrot.slane %v16533_v58, 3  ;;  %v16624_v9 = vld [vmem:[%s14365_s29 + $0xf0] sm:$0xff] }
 0x1d9   : > { %v388_v39 = vmin.f32 %v16615_v13, 0.0  ;;  %vm347_vm12 = vcmp.gt.f32.partialorder %v16615_v13, 0.0  ;;  %vm348_vm13 = vcmp.gt.f32.partialorder %v16624_v9, 0.0 }
 0x1da   : > { %v2700_v21 = vsel %vm1096_vm2, %v22801_v28, %v21995_v17  ;;  %v1682_v52 = vpop.permute.xlu0 %1681  ;;  %v16568_v15 = vpop.permute.xlu1 %1383  ;;  %v1625_v28 = vrot.slane %v16419_v5, 3 }
 0x1db   : > { %v16571_v26 = vand.u32 4294901760, %v2700_v21 }
 0x1dc   : > { %1880 = vrot.lane.b32.xlu0 %v16367_v19, %s14306_s12  ;;  %1514 = vrot.lane.b32.xlu1 %v16578_v62, %s14304_s10  ;;  %v1628_v56 = vsel %vm1583_vm6, %v1625_v28, %v22807_v53  ;;  %v389_v53 = vmin.f32 %v16624_v9, 0.0 }
 0x1dd   : > { %22802 = vst [vmem:[#allocation73_spill] sm:$0xff] %v16571_v26  ;;  %v16588_v42 = vsub.f32 %v2700_v21, %v16571_v26  ;;  %v2710_v21 = vsel %vm1096_vm2, %v22805_v37, %v22000_v45  ;;  %v22808_v37 = vand.u32 4294901760, %v16559_v43  ;;  %v2342_v45 = vsel %vm2329_vm7, %v15169_v3, %v16296_v14 }
 0x1de   : > { %v1867_v19 = vpop.permute.xlu0 %1866  ;;  %v16597_v17 = vpop.permute.xlu1 %1500  ;;  %v2863_v20 = vsel %vm2329_vm7, %v2710_v21, 0  ;;  %v16637_v26 = vsel %vm1017_vm14, %v550_v35, %v15126_v22  ;;  %v22809_v21 = vrot.slane %v16533_v58, 5 }
 0x1df   : > { %22804 = vst [vmem:[#allocation74_spill] sm:$0xff] %v16588_v42  ;;  %v22007_v46 = vand.u32 4294901760, %v16588_v42  ;;  %v3161_v51 = vsub.f32 %v16559_v43, %v22808_v37  ;;  %v16641_v37 = vsel %vm1017_vm14, %v551_v38, %v15150_v31  ;;  %v2380_v43 = vsel %vm2367_vm15, %v2342_v45, %v16330_v55 }
 0x1e0   : > { %1997 = vrot.lane.b32.xlu0 %v1813_v59, %s14307_s13  ;;  %1699 = vrot.lane.b32.xlu1 %v1628_v56, %s14305_s11  ;;  %v22810_v56 = vrot.slane %v16419_v5, 5  ;;  %v456_v31 = vmul.f32 1.442695, %v388_v39  ;;  %v16658_v45 = vand.u32 4294901760, %v2863_v20  ;;  %v1814_v34 = vrot.slane %v16637_v26, 4 }
 0x1e1   : > { %v3152_v2 = vsub.f32 %v16588_v42, %v22007_v46  ;;  %v2418_v46 = vsel %vm2405_vm0, %v2380_v43, %v16353_v12  ;;  %v22013_v42 = vrot.slane %v16641_v37, 4  ;;  %v3162_v55 = vand.u32 4294901760, %v3161_v51 }
 0x1e2   : > { %v1984_v3 = vpop.permute.xlu0 %1983  ;;  %v16645_v14 = vpop.permute.xlu1 %962  ;;  %v2111_v22 = vsel %vm2070_vm9, %v22810_v56, %v22809_v21  ;;  %v2456_v38 = vsel %vm2443_vm1, %v2418_v46, %v1682_v52  ;;  %22811 = vst [vmem:[#allocation75_spill] sm:$0xff] %v16658_v45  ;;  %v458_v12 = vmul.f32 1.442695, %v389_v53  ;;  %v22812_v52 = vrot.slane %v16293_v8, 3 }
 0x1e3   : > { %v3153_v35 = vand.u32 4294901760, %v3152_v2  ;;  %v2494_v43 = vsel %vm22061_vm3, %v2456_v38, %v1867_v19  ;;  %v16674_v19 = vsel %vm1768_vm8, %v1814_v34, %v22013_v42  ;;  %v22012_v51 = vrot.slane %v16641_v37, 5 }
 0x1e4   : > { %2182 = vrot.lane.b32.xlu0 %v2111_v22, %s14308_s14  ;;  %1884 = vrot.lane.b32.xlu1 %v1813_v59, %s14306_s12  ;;  %v2532_v2 = vsel %vm2519_vm10, %v2494_v43, %v1984_v3  ;;  %v1626_v46 = vsel %vm1583_vm6, %v22812_v52, %v1625_v28  ;;  %v22813_v53 = vrot.slane %v15925_v36, 6  ;;  %v22814_v3 = vrot.slane %v15803_v27, 6 }
 0x1e5   : > { %3154 = vmatmul.mubr.f32.gmra.mrb[20].mxu0 %v3153_v35  ;;  %13835 = vpow2.f32 %v456_v31  ;;  %v16689_v22 = vsub.f32 %v2863_v20, %v16658_v45  ;;  %v2112_v35 = vrot.slane %v16637_v26, 5  ;;  %v22816_v38 = vrot.slane %v16539_v41, 1 }
 0x1e6   : > { %v2169_v56 = vpop.permute.xlu0 %2168  ;;  %3163 = vmatprep.mubr.f32.mxu0 %v3162_v55  ;;  %v16663_v39 = vpop.permute.xlu1 %1200  ;;  %v16682_v21 = vsel %vm2255_vm5, %v22814_v3, %v22813_v53  ;;  %13837 = vpow2.f32 %v458_v12  ;;  %v22014_v12 = vrot.slane %v16533_v58, 1 }
 0x1e7   : > { %v16669_v59 = vsel %vm2557_vm11, %v2532_v2, %v2169_v56  ;;  %22815 = vst [vmem:[#allocation76_spill] sm:$0xff] %v16689_v22  ;;  %v22015_v2 = vrot.slane %v16682_v21, 1  ;;  %v2115_v20 = vsel %vm2070_vm9, %v2112_v35, %v22012_v51  ;;  %v22019_v41 = vand.u32 4294901760, %v16689_v22 }
 0x1e8   : > { %v22016_v28 = vrot.slane %v16669_v59, 1  ;;  %1697 = vrot.lane.b32.xlu0 %v1626_v46, %s14305_s11  ;;  %2001 = vrot.lane.b32.xlu1 %v16674_v19, %s14307_s13  ;;  %v1142_v46 = vrot.slane %v16419_v5, 1 }
 0x1ea   : > { %v2704_v55 = vsel %vm1096_vm2, %v22816_v38, %v22016_v28  ;;  %v1684_v31 = vpop.permute.xlu0 %1683  ;;  %v16697_v43 = vpop.permute.xlu1 %1385  ;;  %v22819_v38 = vrot.slane %v16552_v30, 1  ;;  %v3176_v30 = vsub.f32 %v16689_v22, %v22019_v41 }
 0x1eb   : > { %v16700_v56 = vand.u32 4294901760, %v2704_v55 }
 0x1ec   : > { %1882 = vrot.lane.b32.xlu0 %v16489_v63, %s14306_s12  ;;  %2186 = vrot.lane.b32.xlu1 %v2115_v20, %s14308_s14  ;;  %v2714_v51 = vsel %vm1096_vm2, %v22819_v38, %v22015_v2  ;;  %v22820_v63 = vrot.slane %v16533_v58, 4 }
 0x1ed   : > { %22817 = vst [vmem:[#allocation77_spill] sm:$0xff] %v16700_v56  ;;  %v16711_v52 = vsub.f32 %v2704_v55, %v16700_v56  ;;  %v1145_v55 = vsel %vm1096_vm2, %v1142_v46, %v22014_v12 }
 0x1ee   : > { %v1869_v53 = vpop.permute.xlu0 %1868  ;;  %v16714_v3 = vpop.permute.xlu1 %1502  ;;  %v16724_v20 = vsel %vm1768_vm8, %v22820_v63, %v1814_v34  ;;  %v2343_v34 = vsel %vm2329_vm7, %v15227_v11, %v16422_v4  ;;  %v2865_v63 = vsel %vm2329_vm7, %v2714_v51, 0  ;;  %v22822_v11 = vrot.slane %v16533_v58, 5 }
 0x1ef   : > { %22818 = vst [vmem:[#allocation78_spill] sm:$0xff] %v16711_v52  ;;  %v22022_v42 = vand.u32 4294901760, %v16711_v52  ;;  %v13836_v12 = vpop.eup %13835  ;;  %v22025_v51 = vrot.slane %v16641_v37, 2 }
 0x1f0   : > { %1999 = vrot.lane.b32.xlu0 %v16724_v20, %s14307_s13  ;;  %1216 = vrot.lane.b32.xlu1 %v1145_v55, %s14302_s8  ;;  %v2381_v55 = vsel %vm2367_vm15, %v2343_v34, %v16452_v16  ;;  %v13838_v41 = vpop.eup %13837  ;;  %v2113_v4 = vsel %vm2070_vm9, %v22822_v11, %v2112_v35  ;;  %v3177_v16 = vand.u32 4294901760, %v3176_v30  ;;  %v16758_v34 = vand.u32 4294901760, %v2865_v63 }
 0x1f1   : > { %v3167_v38 = vsub.f32 %v16711_v52, %v22022_v42  ;;  %v2419_v22 = vsel %vm2405_vm0, %v2381_v55, %v16475_v1  ;;  %v1331_v1 = vrot.slane %v16637_v26, 2  ;;  %v11440_v55 = vadd.f32 -1.0, %v13836_v12 }
 0x1f2   : > { %v1986_v28 = vpop.permute.xlu0 %1985  ;;  %v16746_v45 = vpop.permute.xlu1 %964  ;;  %v2457_v52 = vsel %vm2443_vm1, %v2419_v22, %v1684_v31  ;;  %22823 = vst [vmem:[#allocation80_spill] sm:$0xff] %v16758_v34  ;;  %v11441_v35 = vadd.f32 -1.0, %v13838_v41  ;;  %v22824_v31 = vrot.slane %v16047_v33, 6 }
 0x1f3   : > { %22821 = vst [vmem:[#allocation79_spill] sm:$0xff] %v16746_v45  ;;  %v3168_v42 = vand.u32 4294901760, %v3167_v38  ;;  %v2495_v2 = vsel %vm22061_vm3, %v2457_v52, %v1869_v53  ;;  %v1629_v53 = vrot.slane %v16637_v26, 3  ;;  %v22858_v45 = vrot.slane %v16641_v37, 2 }
 0x1f4   : > { %2184 = vrot.lane.b32.xlu0 %v2113_v4, %s14308_s14  ;;  %1401 = vrot.lane.b32.xlu1 %v16578_v62, %s14303_s9  ;;  %v2533_v38 = vsel %vm2519_vm10, %v2495_v2, %v1986_v28  ;;  %v22825_v62 = vrot.slane %v15925_v36, 6  ;;  %v16781_v28 = vsel %vm1281_vm4, %v1331_v1, %v22025_v51  ;;  %v22026_v2 = vrot.slane %v16641_v37, 3  ;;  %v16810_v51 = vld [vmem:[%s14365_s29 + $0xf8] sm:$0xff] }
 0x1f5   : > { %3169 = vmatmul.mubr.f32.gmra.mrb[22].mxu0 %v3168_v42  ;;  %v22826_v42 = vrot.slane %v16293_v8, 1  ;;  %v390_v4 = vmin.f32 %v16810_v51, 0.0 }
 0x1f6   : > { %v2171_v11 = vpop.permute.xlu0 %2170  ;;  %3178 = vmatprep.mubr.f32.mxu0 %v3177_v16  ;;  %v16763_v22 = vpop.permute.xlu1 %1202  ;;  %v16770_v30 = vsel %vm2255_vm5, %v22825_v62, %v22824_v31  ;;  %v22828_v16 = vrot.slane %v16669_v59, 1  ;;  %v552_v62 = vsel %vm347_vm12, %v16615_v13, %v11440_v55  ;;  %v16814_v59 = vld [vmem:[%s14365_s29 + $0x100] sm:$0xff]  ;;  %v22833_v13 = vrot.slane %v16533_v58, 2 }
 0x1f7   : > { %v16773_v52 = vsel %vm2557_vm11, %v2533_v38, %v2171_v11  ;;  %v1143_v12 = vsel %vm1096_vm2, %v22826_v42, %v1142_v46  ;;  %v16791_v46 = vsub.f32 %v2865_v63, %v16758_v34  ;;  %v553_v42 = vsel %vm348_vm13, %v16624_v9, %v11441_v35 }
 0x1f8   : > { %v22027_v41 = vrot.slane %v16773_v52, 1  ;;  %1214 = vrot.lane.b32.xlu0 %v1143_v12, %s14302_s8  ;;  %1518 = vrot.lane.b32.xlu1 %v16781_v28, %s14304_s10  ;;  %v1632_v63 = vsel %vm1583_vm6, %v1629_v53, %v22026_v2  ;;  %v22831_v55 = vrot.slane %v16770_v30, 1  ;;  %v22832_v35 = vrot.slane %v16682_v21, 1 }
 0x1f9   : > { %22827 = vst [vmem:[#allocation81_spill] sm:$0xff] %v16791_v46  ;;  %v16832_v34 = vsel %vm1017_vm14, %v552_v62, %v15779_v0  ;;  %v16843_v21 = vsel %vm1281_vm4, %v22833_v13, %v1331_v1  ;;  %v460_v0 = vmul.f32 1.442695, %v390_v4  ;;  %v2344_v13 = vsel %vm2329_vm7, %v15317_v32, %v16536_v50 }
 0x1fa   : > { %v2708_v38 = vsel %vm1096_vm2, %v22828_v16, %v22027_v41  ;;  %v1686_v11 = vpop.permute.xlu0 %1685  ;;  %v16800_v31 = vpop.permute.xlu1 %1387  ;;  %v391_v16 = vmin.f32 %v16814_v59, 0.0  ;;  %v2718_v2 = vsel %vm1096_vm2, %v22832_v35, %v22831_v55  ;;  %v1818_v55 = vrot.slane %v16832_v34, 4 }
 0x1fb   : > { %v16804_v12 = vand.u32 4294901760, %v2708_v38  ;;  %v2867_v1 = vsel %vm2329_vm7, %v2718_v2, 0  ;;  %v2382_v41 = vsel %vm2367_vm15, %v2344_v13, %v16568_v15  ;;  %v22835_v32 = vrot.slane %v16533_v58, 3 }
 0x1fc   : > { %1399 = vrot.lane.b32.xlu0 %v16463_v23, %s14303_s9  ;;  %1703 = vrot.lane.b32.xlu1 %v1632_v63, %s14305_s11  ;;  %v16836_v23 = vsel %vm1017_vm14, %v553_v42, %v15901_v24  ;;  %v462_v62 = vmul.f32 1.442695, %v391_v16  ;;  %v22834_v24 = vand.u32 4294901760, %v16791_v46  ;;  %v16863_v16 = vld [vmem:[%s14365_s29 + $0x138] sm:$0xff]  ;;  %v2420_v15 = vsel %vm2405_vm0, %v2382_v41, %v16597_v17 }
 0x1fd   : > { %22829 = vst [vmem:[#allocation82_spill] sm:$0xff] %v16804_v12  ;;  %v16822_v9 = vsub.f32 %v2708_v38, %v16804_v12  ;;  %v1630_v50 = vsel %vm1583_vm6, %v22835_v32, %v1629_v53  ;;  %v22838_v13 = vrot.slane %v16836_v23, 4  ;;  %v22045_v6 = vrot.slane %v16836_v23, 5 }
 0x1fe   : > { %v1871_v63 = vpop.permute.xlu0 %1870  ;;  %v16838_v38 = vpop.permute.xlu1 %1504  ;;  %v3191_v42 = vsub.f32 %v16791_v46, %v22834_v24  ;;  %v16869_v46 = vld [vmem:[%s14365_s29 + $0x130] sm:$0xff]  ;;  %v2458_v53 = vsel %vm2443_vm1, %v2420_v15, %v1686_v11  ;;  %13839 = vpow2.f32 %v462_v62  ;;  %v2116_v41 = vrot.slane %v16832_v34, 5 }
 0x1ff   : > { %22830 = vst [vmem:[#allocation83_spill] sm:$0xff] %v16822_v9  ;;  %v22034_v35 = vand.u32 4294901760, %v16822_v9  ;;  %v397_v2 = vmin.f32 %v16869_v46, 0.0  ;;  %v16889_v49 = vsel %vm1768_vm8, %v1818_v55, %v22838_v13  ;;  %v2496_v17 = vsel %vm22061_vm3, %v2458_v53, %v1871_v63  ;;  %v16912_v63 = vld [vmem:[%s14365_s29 + $0x140] sm:$0xff] }
 0x200   : > { %1516 = vrot.lane.b32.xlu0 %v16843_v21, %s14304_s10  ;;  %1888 = vrot.lane.b32.xlu1 %v16674_v19, %s14306_s12  ;;  %v398_v19 = vmin.f32 %v16863_v16, 0.0  ;;  %13841 = vpow2.f32 %v460_v0  ;;  %v22046_v15 = vrot.slane %v16641_v37, 1  ;;  %v399_v0 = vmin.f32 %v16912_v63, 0.0 }
 0x201   : > { %v3182_v4 = vsub.f32 %v16822_v9, %v22034_v35  ;;  %v22836_v35 = vrot.slane %v16169_v25, 6  ;;  %v22837_v9 = vrot.slane %v16047_v33, 6  ;;  %v474_v13 = vmul.f32 1.442695, %v397_v2 }
 0x202   : > { %v1988_v24 = vpop.permute.xlu0 %1987  ;;  %v16872_v12 = vpop.permute.xlu1 %966  ;;  %v22051_v53 = vrot.slane %v16293_v8, 6  ;;  %vm350_vm12 = vcmp.gt.f32.partialorder %v16814_v59, 0.0  ;;  %v22062_v61 = vrot.slane %v16836_v23, 3  ;;  %vm349_vm13 = vcmp.gt.f32.partialorder %v16810_v51, 0.0 }
 0x203   : > { %v16882_v56 = vsel %vm2255_vm5, %v22837_v9, %v22836_v35  ;;  %v3183_v44 = vand.u32 4294901760, %v3182_v4  ;;  %v3192_v9 = vand.u32 4294901760, %v3191_v42  ;;  %v16896_v35 = vand.u32 4294901760, %v2867_v1 }
 0x204   : > { %1701 = vrot.lane.b32.xlu0 %v1630_v50, %s14305_s11  ;;  %2005 = vrot.lane.b32.xlu1 %v16889_v49, %s14307_s13  ;;  %v476_v4 = vmul.f32 1.442695, %v398_v19  ;;  %v2534_v32 = vsel %vm2519_vm10, %v2496_v17, %v1988_v24  ;;  %v22048_v42 = vrot.slane %v16882_v56, 1  ;;  %v1146_v24 = vrot.slane %v16637_v26, 1 }
 0x205   : > { %22839 = vst [vmem:[#allocation84_spill] sm:$0xff] %v16896_v35  ;;  %3184 = vmatmul.mubr.f32.gmra.mrb[24].mxu0 %v3183_v44  ;;  %v2119_v44 = vsel %vm2070_vm9, %v2116_v41, %v22045_v6  ;;  %v16921_v2 = vsub.f32 %v2867_v1, %v16896_v35  ;;  %v22842_v1 = vrot.slane %v16770_v30, 1  ;;  %v478_v6 = vmul.f32 1.442695, %v399_v0 }
 0x206   : > { %v2173_v11 = vpop.permute.xlu0 %2172  ;;  %3193 = vmatprep.mubr.f32.mxu0 %v3192_v9  ;;  %v16901_v50 = vpop.permute.xlu1 %1204  ;;  %13843 = vpow2.f32 %v476_v4  ;;  %v22841_v9 = vrot.slane %v16773_v52, 1  ;;  %v22844_v52 = vrot.slane %v16641_v37, 4 }
 0x207   : > { %v16906_v62 = vsel %vm2557_vm11, %v2534_v32, %v2173_v11  ;;  %22840 = vst [vmem:[#allocation85_spill] sm:$0xff] %v16921_v2  ;;  %13845 = vpow2.f32 %v474_v13  ;;  %v22846_v13 = vrot.slane %v16169_v25, 6 }
 0x208   : > { %v22047_v19 = vrot.slane %v16906_v62, 1  ;;  %1886 = vrot.lane.b32.xlu0 %v16724_v20, %s14306_s12  ;;  %2190 = vrot.lane.b32.xlu1 %v2119_v44, %s14308_s14  ;;  %v1149_v20 = vsel %vm1096_vm2, %v1146_v24, %v22046_v15  ;;  %v2722_v44 = vsel %vm1096_vm2, %v22842_v1, %v22048_v42  ;;  %13847 = vpow2.f32 %v478_v6 }
 0x209   : > { %v16958_v1 = vsel %vm2255_vm5, %v22846_v13, %v22051_v53  ;;  %v2869_v0 = vsel %vm2329_vm7, %v2722_v44, 0  ;;  %v22848_v13 = vand.u32 4294901760, %v16921_v2 }
 0x20a   : > { %v2712_v17 = vsel %vm1096_vm2, %v22841_v9, %v22047_v19  ;;  %v1688_v32 = vpop.permute.xlu0 %1687  ;;  %v16929_v11 = vpop.permute.xlu1 %1389  ;;  %v16944_v9 = vsel %vm1768_vm8, %v22844_v52, %v1818_v55 }
 0x20b   : > { %v16939_v4 = vand.u32 4294901760, %v2712_v17  ;;  %v13840_v19 = vpop.eup %13839  ;;  %v3206_v44 = vsub.f32 %v16921_v2, %v22848_v13  ;;  %v22850_v2 = vrot.slane %v16533_v58, 1 }
 0x20c   : > { %2003 = vrot.lane.b32.xlu0 %v16944_v9, %s14307_s13  ;;  %1220 = vrot.lane.b32.xlu1 %v1149_v20, %s14302_s8  ;;  %v22847_v20 = vrot.slane %v16641_v37, 5  ;;  %v13842_v35 = vpop.eup %13841 }
 0x20d   : > { %22843 = vst [vmem:[#allocation86_spill] sm:$0xff] %v16939_v4  ;;  %v16951_v30 = vsub.f32 %v2712_v17, %v16939_v4 }
 0x20e   : > { %v1873_v55 = vpop.permute.xlu0 %1872  ;;  %v16960_v52 = vpop.permute.xlu1 %1506  ;;  %v2117_v42 = vsel %vm2070_vm9, %v22847_v20, %v2116_v41  ;;  %v2345_v41 = vsel %vm2329_vm7, %v15437_v18, %v16663_v39  ;;  %v1335_v20 = vrot.slane %v16832_v34, 2  ;;  %v1147_v18 = vsel %vm1096_vm2, %v22850_v2, %v1146_v24 }
 0x20f   : > { %22845 = vst [vmem:[#allocation87_spill] sm:$0xff] %v16951_v30  ;;  %v22056_v15 = vand.u32 4294901760, %v16951_v30  ;;  %v2383_v13 = vsel %vm2367_vm15, %v2345_v41, %v16697_v43  ;;  %v11442_v43 = vadd.f32 -1.0, %v13842_v35  ;;  %v22853_v35 = vrot.slane %v16958_v1, 1 }
 0x210   : > { %2188 = vrot.lane.b32.xlu0 %v2117_v42, %s14308_s14  ;;  %1405 = vrot.lane.b32.xlu1 %v16781_v28, %s14303_s9  ;;  %v16982_v42 = vand.u32 4294901760, %v2869_v0  ;;  %v11443_v28 = vadd.f32 -1.0, %v13840_v19  ;;  %v13844_v39 = vpop.eup %13843  ;;  %v2421_v4 = vsel %vm2405_vm0, %v2383_v13, %v16714_v3  ;;  %v3207_v3 = vand.u32 4294901760, %v3206_v44  ;;  %v17017_v13 = vld [vmem:[%s14365_s29 + $0x108] sm:$0xff] }
 0x211   : > { %v3197_v6 = vsub.f32 %v16951_v30, %v22056_v15  ;;  %v22851_v15 = vrot.slane %v16836_v23, 2  ;;  %v2459_v41 = vsel %vm2443_vm1, %v2421_v4, %v1688_v32  ;;  %v13846_v24 = vpop.eup %13845  ;;  %v22854_v32 = vrot.slane %v16882_v56, 1 }
 0x212   : > { %22849 = vst [vmem:[#allocation88_spill] sm:$0xff] %v16982_v42  ;;  %v1990_v17 = vpop.permute.xlu0 %1989  ;;  %v969_v53 = vpop.permute.xlu1 %968  ;;  %v2497_v2 = vsel %vm22061_vm3, %v2459_v41, %v1873_v55  ;;  %v555_v44 = vsel %vm350_vm12, %v16814_v59, %v11443_v28  ;;  %v392_v55 = vmin.f32 %v17017_v13, 0.0  ;;  %vm357_vm3 = vcmp.gt.f32.partialorder %v16863_v16, 0.0  ;;  %v17031_v28 = vld [vmem:[%s14365_s29 + $0x148] sm:$0xff] }
 0x213   : > { %v16995_v30 = vsel %vm1281_vm4, %v1335_v20, %v22851_v15  ;;  %v3198_v19 = vand.u32 4294901760, %v3197_v6  ;;  %v1633_v15 = vrot.slane %v16832_v34, 3  ;;  %v17006_v6 = vsub.f32 %v2869_v0, %v16982_v42 }
 0x214   : > { %1218 = vrot.lane.b32.xlu0 %v1147_v18, %s14302_s8  ;;  %1522 = vrot.lane.b32.xlu1 %v16995_v30, %s14304_s10  ;;  %v2726_v4 = vsel %vm1096_vm2, %v22854_v32, %v22853_v35  ;;  %v2535_v18 = vsel %vm2519_vm10, %v2497_v2, %v1990_v17  ;;  %v400_v35 = vmin.f32 %v17031_v28, 0.0  ;;  %v11449_v2 = vadd.f32 -1.0, %v13846_v24 }
 0x215   : > { %3199 = vmatmul.mubr.f32.gmra.mrb[26].mxu0 %v3198_v19  ;;  %22852 = vst [vmem:[#allocation89_spill] sm:$0xff] %v17006_v6  ;;  %v11450_v19 = vadd.f32 -1.0, %v13844_v39  ;;  %v1636_v59 = vsel %vm1583_vm6, %v1633_v15, %v22062_v61  ;;  %v17036_v39 = vld [vmem:[%s14365_s29 + $0x110] sm:$0xff]  ;;  %vm356_vm12 = vcmp.gt.f32.partialorder %v16869_v46, 0.0  ;;  %v17049_v17 = vsel %vm2329_vm7, %v2726_v4, 0 }
 0x216   : > { %v2175_v0 = vpop.permute.xlu0 %2174  ;;  %3208 = vmatprep.mubr.f32.mxu0 %v3207_v3  ;;  %v17021_v41 = vpop.permute.xlu1 %1206  ;;  %v393_v3 = vmin.f32 %v17036_v39, 0.0  ;;  %v17053_v24 = vsel %vm1017_vm14, %v555_v44, %v16145_v57  ;;  %v464_v32 = vmul.f32 1.442695, %v392_v55  ;;  %v17070_v57 = vsel %vm1281_vm4, %v22858_v45, %v1335_v20 }
 0x217   : > { %v17025_v56 = vsel %vm2557_vm11, %v2535_v18, %v2175_v0  ;;  %v13848_v18 = vpop.eup %13847  ;;  %v554_v0 = vsel %vm349_vm13, %v16810_v51, %v11442_v43  ;;  %v22856_v51 = vrot.slane %v16906_v62, 1  ;;  %v22065_v44 = vrot.slane %v17053_v24, 4 }
 0x218   : > { %1403 = vrot.lane.b32.xlu0 %v16843_v21, %s14303_s9  ;;  %1707 = vrot.lane.b32.xlu1 %v1636_v59, %s14305_s11  ;;  %v562_v21 = vsel %vm357_vm3, %v16863_v16, %v11450_v19  ;;  %v22855_v59 = vrot.slane %v17025_v56, 1  ;;  %v480_v55 = vmul.f32 1.442695, %v400_v35  ;;  %v17075_v16 = vsel %vm1017_vm14, %v554_v0, %v16023_v47 }
 0x219   : > { %v466_v62 = vmul.f32 1.442695, %v393_v3  ;;  %v561_v19 = vsel %vm356_vm12, %v16869_v46, %v11449_v2  ;;  %v17083_v45 = vsel %vm1017_vm14, %v562_v21, %v969_v53  ;;  %v1822_v35 = vrot.slane %v17075_v16, 4 }
 0x21a   : > { %v2716_v43 = vsel %vm1096_vm2, %v22856_v51, %v22855_v59  ;;  %v1690_v42 = vpop.permute.xlu0 %1689  ;;  %v17063_v61 = vpop.permute.xlu1 %1391  ;;  %v11451_v59 = vadd.f32 -1.0, %v13848_v18  ;;  %vm358_vm3 = vcmp.gt.f32.partialorder %v16912_v63, 0.0  ;;  %v22860_v46 = vrot.slane %v16641_v37, 3 }
 0x21b   : > { %v17065_v4 = vand.u32 4294901760, %v2716_v43  ;;  %v22861_v18 = vand.u32 4294901760, %v17006_v6  ;;  %v22862_v0 = vrot.slane %v16419_v5, 6  ;;  %v22863_v21 = vrot.slane %v16293_v8, 6 }
 0x21c   : > { %1520 = vrot.lane.b32.xlu0 %v17070_v57, %s14304_s10  ;;  %1892 = vrot.lane.b32.xlu1 %v16889_v49, %s14306_s12  ;;  %v1634_v2 = vsel %vm1583_vm6, %v22860_v46, %v1633_v15  ;;  %v17113_v15 = vsel %vm1768_vm8, %v1822_v35, %v22065_v44  ;;  %13849 = vpow2.f32 %v480_v55  ;;  %v2120_v55 = vrot.slane %v17075_v16, 5 }
 0x21d   : > { %22857 = vst [vmem:[#allocation90_spill] sm:$0xff] %v17065_v4  ;;  %v17086_v20 = vsub.f32 %v2716_v43, %v17065_v4  ;;  %v3221_v53 = vsub.f32 %v17006_v6, %v22861_v18  ;;  %v17104_v51 = vsel %vm2255_vm5, %v22863_v21, %v22862_v0  ;;  %v17108_v43 = vsel %vm1017_vm14, %v561_v19, %v16872_v12 }
 0x21e   : > { %v1875_v47 = vpop.permute.xlu0 %1874  ;;  %v17090_v3 = vpop.permute.xlu1 %1508  ;;  %13851 = vpow2.f32 %v464_v32  ;;  %v2321_v18 = vrot.slane %v17083_v45, 6  ;;  %v563_v0 = vsel %vm358_vm3, %v16912_v63, %v11451_v59  ;;  %v17122_v12 = vand.u32 4294901760, %v17049_v17 }
 0x21f   : > { %22859 = vst [vmem:[#allocation91_spill] sm:$0xff] %v17086_v20  ;;  %v22066_v46 = vand.u32 4294901760, %v17086_v20  ;;  %13853 = vpow2.f32 %v466_v62  ;;  %v2346_v19 = vsel %vm2329_vm7, %v15559_v40, %v16763_v22  ;;  %v22069_v21 = vrot.slane %v17108_v43, 6 }
 0x220   : > { %1705 = vrot.lane.b32.xlu0 %v1634_v2, %s14305_s11  ;;  %2009 = vrot.lane.b32.xlu1 %v17113_v15, %s14307_s13  ;;  %22864 = vst [vmem:[#allocation92_spill] sm:$0xff] %v17122_v12  ;;  %v2384_v2 = vsel %vm2367_vm15, %v2346_v19, %v16800_v31  ;;  %v3222_v44 = vand.u32 4294901760, %v3221_v53  ;;  %v22070_v62 = vrot.slane %v16836_v23, 1  ;;  %v22865_v22 = vrot.slane %v17053_v24, 5 }
 0x221   : > { %v3212_v32 = vsub.f32 %v17086_v20, %v22066_v46  ;;  %v2422_v49 = vsel %vm2405_vm0, %v2384_v2, %v16838_v38  ;;  %v17146_v31 = vsel %vm2255_vm5, %v22069_v21, %v2321_v18  ;;  %v1150_v38 = vrot.slane %v16832_v34, 1 }
 0x222   : > { %v1992_v63 = vpop.permute.xlu0 %1991  ;;  %v971_v59 = vpop.permute.xlu1 %970  ;;  %v2123_v46 = vsel %vm2070_vm9, %v2120_v55, %v22865_v22  ;;  %v2460_v53 = vsel %vm2443_vm1, %v2422_v49, %v1690_v42  ;;  %vm22866_vm13 = vcmask 654336   ;;  %v17178_v22 = vld [vmem:[%s14365_s29 + $0x150] sm:$0xff]  ;;  %vm359_vm12 = vcmp.gt.f32.partialorder %v17031_v28, 0.0 }
 0x223   : > { %v17138_v40 = vsel %vm1017_vm14, %v563_v0, %v971_v59  ;;  %v3213_v6 = vand.u32 4294901760, %v3212_v32  ;;  %v2498_v0 = vsel %vm22866_vm13, %v2460_v53, %v1875_v47  ;;  %v22081_v32 = vrot.slane %v17104_v51, 1 }
 0x224   : > { %v22071_v19 = vrot.slane %v17138_v40, 6  ;;  %1890 = vrot.lane.b32.xlu0 %v16944_v9, %s14306_s12  ;;  %2194 = vrot.lane.b32.xlu1 %v2123_v46, %s14308_s14  ;;  %v2536_v2 = vsel %vm2519_vm10, %v2498_v0, %v1992_v63  ;;  %v22867_v46 = vrot.slane %v16836_v23, 4  ;;  %v22076_v47 = vrot.slane %v17146_v31, 1 }
 0x225   : > { %3214 = vmatmul.mubr.f32.gmra.mrb[28].mxu0 %v3213_v6  ;;  %v1153_v6 = vsel %vm1096_vm2, %v1150_v38, %v22070_v62  ;;  %vm352_vm3 = vcmp.gt.f32.partialorder %v17036_v39, 0.0  ;;  %vm351_vm13 = vcmp.gt.f32.partialorder %v17017_v13, 0.0 }
 0x226   : > { %v17160_v42 = vsel %vm2255_vm5, %v2321_v18, %v22071_v19  ;;  %v2177_v49 = vpop.permute.xlu0 %2176  ;;  %3223 = vmatprep.mubr.f32.mxu0 %v3222_v44  ;;  %v17162_v9 = vpop.permute.xlu1 %1208  ;;  %v17167_v59 = vsel %vm1768_vm8, %v22867_v46, %v1822_v35  ;;  %v401_v44 = vmin.f32 %v17178_v22, 0.0  ;;  %v17187_v35 = vsub.f32 %v17049_v17, %v17122_v12 }
 0x227   : > { %v22077_v63 = vrot.slane %v17160_v42, 1  ;;  %v17175_v18 = vsel %vm2557_vm11, %v2536_v2, %v2177_v49  ;;  %v13850_v0 = vpop.eup %13849  ;;  %v22869_v46 = vrot.slane %v17025_v56, 1  ;;  %v22870_v17 = vrot.slane %v16958_v1, 1 }
 0x228   : > { %v22080_v53 = vrot.slane %v17175_v18, 1  ;;  %2007 = vrot.lane.b32.xlu0 %v17167_v59, %s14307_s13  ;;  %1224 = vrot.lane.b32.xlu1 %v1153_v6, %s14302_s8  ;;  %22868 = vst [vmem:[#allocation93_spill] sm:$0xff] %v17187_v35  ;;  %v13852_v49 = vpop.eup %13851  ;;  %v22082_v56 = vrot.slane %v17053_v24, 2  ;;  %v482_v4 = vmul.f32 1.442695, %v401_v44  ;;  %v2347_v1 = vsel %vm2329_vm7, %v15681_v48, %v16901_v50 }
 0x229   : > { %v17194_v2 = vsel %vm1096_vm2, %v22076_v47, %v22077_v63  ;;  %v2730_v19 = vsel %vm1096_vm2, %v22870_v17, %v22081_v32  ;;  %v13854_v20 = vpop.eup %13853  ;;  %v22872_v47 = vrot.slane %v16836_v23, 5  ;;  %v22877_v48 = vrot.slane %v16533_v58, 6 }
 0x22a   : > { %v2720_v21 = vsel %vm1096_vm2, %v22869_v46, %v22080_v53  ;;  %v1692_v6 = vpop.permute.xlu0 %1691  ;;  %v17201_v62 = vpop.permute.xlu1 %1393  ;;  %v11452_v46 = vadd.f32 -1.0, %v13850_v0  ;;  %v1339_v53 = vrot.slane %v17075_v16, 2  ;;  %13855 = vpow2.f32 %v482_v4 }
 0x22b   : > { %v17208_v12 = vand.u32 4294901760, %v2720_v21  ;;  %v2121_v63 = vsel %vm2070_vm9, %v22872_v47, %v2120_v55  ;;  %v2873_v55 = vsel %vm2329_vm7, %v2730_v19, 0  ;;  %v22875_v47 = vand.u32 4294901760, %v17187_v35 }
 0x22c   : > { %2192 = vrot.lane.b32.xlu0 %v2121_v63, %s14308_s14  ;;  %1409 = vrot.lane.b32.xlu1 %v16995_v30, %s14303_s9  ;;  %v11445_v63 = vadd.f32 -1.0, %v13854_v20  ;;  %v22874_v30 = vrot.slane %v16641_v37, 1  ;;  %v564_v20 = vsel %vm359_vm12, %v17031_v28, %v11452_v46  ;;  %v1637_v4 = vrot.slane %v17075_v16, 3 }
 0x22d   : > { %22871 = vst [vmem:[#allocation94_spill] sm:$0xff] %v17208_v12  ;;  %v17219_v17 = vsub.f32 %v2720_v21, %v17208_v12  ;;  %v17234_v21 = vsel %vm1281_vm4, %v1339_v53, %v22082_v56  ;;  %v11444_v56 = vadd.f32 -1.0, %v13852_v49  ;;  %v2385_v49 = vsel %vm2367_vm15, %v2347_v1, %v16929_v11 }
 0x22e   : > { %v1877_v44 = vpop.permute.xlu0 %1876  ;;  %v17226_v32 = vpop.permute.xlu1 %1510  ;;  %v1151_v0 = vsel %vm1096_vm2, %v22874_v30, %v1150_v38  ;;  %v3236_v38 = vsub.f32 %v17187_v35, %v22875_v47  ;;  %v17245_v30 = vand.u32 4294901760, %v2873_v55  ;;  %v557_v28 = vsel %vm352_vm3, %v17036_v39, %v11445_v63 }
 0x22f   : > { %22873 = vst [vmem:[#allocation95_spill] sm:$0xff] %v17219_v17  ;;  %v22085_v19 = vand.u32 4294901760, %v17219_v17  ;;  %v22878_v50 = vrot.slane %v16419_v5, 6  ;;  %v22879_v39 = vrot.slane %v17053_v24, 3  ;;  %vm22880_vm12 = vcmask 654336  }
 0x230   : > { %1222 = vrot.lane.b32.xlu0 %v1151_v0, %s14302_s8  ;;  %1526 = vrot.lane.b32.xlu1 %v17234_v21, %s14304_s10  ;;  %22876 = vst [vmem:[#allocation96_spill] sm:$0xff] %v17245_v30  ;;  %vm360_vm3 = vcmp.gt.f32.partialorder %v17178_v22, 0.0 }
 0x231   : > { %v3227_v0 = vsub.f32 %v17219_v17, %v22085_v19  ;;  %v17265_v35 = vsel %vm2255_vm5, %v22878_v50, %v22877_v48  ;;  %v2423_v19 = vsel %vm2405_vm0, %v2385_v49, %v16960_v52  ;;  %v1640_v63 = vsel %vm1583_vm6, %v1637_v4, %v22879_v39  ;;  %v17282_v49 = vld [vmem:[%s14365_s29 + $0x120] sm:$0xff] }
 0x232   : > { %v1994_v46 = vpop.permute.xlu0 %1993  ;;  %v973_v47 = vpop.permute.xlu1 %972  ;;  %v2461_v1 = vsel %vm2443_vm1, %v2423_v19, %v1692_v6  ;;  %v3237_v48 = vand.u32 4294901760, %v3236_v38  ;;  %v556_v52 = vsel %vm351_vm13, %v17017_v13, %v11444_v56  ;;  %v22093_v6 = vrot.slane %v17265_v35, 1  ;;  %vm22900_vm13 = vmmov %vm22880_vm12 }
 0x233   : > { %v17270_v17 = vsel %vm1017_vm14, %v564_v20, %v973_v47  ;;  %v3228_v11 = vand.u32 4294901760, %v3227_v0  ;;  %v395_v20 = vmin.f32 %v17282_v49, 0.0  ;;  %v2499_v47 = vsel %vm22880_vm12, %v2461_v1, %v1877_v44 }
 0x234   : > { %v22090_v12 = vrot.slane %v17270_v17, 6  ;;  %1407 = vrot.lane.b32.xlu0 %v17070_v57, %s14303_s9  ;;  %1711 = vrot.lane.b32.xlu1 %v1640_v63, %s14305_s11  ;;  %v17289_v19 = vsel %vm1017_vm14, %v557_v28, %v16388_v60  ;;  %v2537_v57 = vsel %vm2519_vm10, %v2499_v47, %v1994_v46  ;;  %v22881_v13 = vrot.slane %v17138_v40, 6 }
 0x235   : > { %3229 = vmatmul.mubr.f32.gmra.mrb[30].mxu0 %v3228_v11  ;;  %v17302_v0 = vsub.f32 %v2873_v55, %v17245_v30  ;;  %v22883_v28 = vrot.slane %v16836_v23, 2  ;;  %v22094_v39 = vrot.slane %v17289_v19, 4  ;;  %v17317_v11 = vsel %vm1017_vm14, %v556_v52, %v16269_v29  ;;  %v17320_v55 = vld [vmem:[%s14365_s29 + $0x118] sm:$0xff] }
 0x236   : > { %v17297_v56 = vsel %vm2255_vm5, %v22881_v13, %v22090_v12  ;;  %v2179_v38 = vpop.permute.xlu0 %2178  ;;  %3238 = vmatprep.mubr.f32.mxu0 %v3237_v48  ;;  %v17299_v44 = vpop.permute.xlu1 %1210  ;;  %v394_v1 = vmin.f32 %v17320_v55, 0.0  ;;  %v470_v47 = vmul.f32 1.442695, %v395_v20  ;;  %v22884_v29 = vrot.slane %v17104_v51, 1 }
 0x237   : > { %22882 = vst [vmem:[#allocation97_spill] sm:$0xff] %v17302_v0  ;;  %v22091_v50 = vrot.slane %v17297_v56, 1  ;;  %v17306_v60 = vsel %vm2557_vm11, %v2537_v57, %v2179_v38  ;;  %v17311_v46 = vsel %vm1281_vm4, %v22883_v28, %v1339_v53  ;;  %v13856_v53 = vpop.eup %13855  ;;  %v1826_v57 = vrot.slane %v17317_v11, 4 }
 0x238   : > { %v22092_v48 = vrot.slane %v17306_v60, 1  ;;  %1524 = vrot.lane.b32.xlu0 %v17311_v46, %s14304_s10  ;;  %1896 = vrot.lane.b32.xlu1 %v17113_v15, %s14306_s12  ;;  %v2734_v52 = vsel %vm1096_vm2, %v22884_v29, %v22093_v6  ;;  %v22885_v13 = vrot.slane %v17160_v42, 1  ;;  %v22887_v15 = vrot.slane %v17175_v18, 1 }
 0x239   : > { %v22097_v51 = vand.u32 4294901760, %v17302_v0  ;;  %v22889_v29 = vrot.slane %v16836_v23, 3  ;;  %v22890_v6 = vrot.slane %v16637_v26, 6  ;;  %13857 = vpow2.f32 %v470_v47 }
 0x23a   : > { %v17339_v38 = vsel %vm1096_vm2, %v22885_v13, %v22091_v50  ;;  %v2724_v20 = vsel %vm1096_vm2, %v22887_v15, %v22092_v48  ;;  %v1694_v28 = vpop.permute.xlu0 %1693  ;;  %v17346_v12 = vpop.permute.xlu1 %1395  ;;  %v17357_v13 = vsel %vm1768_vm8, %v1826_v57, %v22094_v39  ;;  %v468_v50 = vmul.f32 1.442695, %v394_v1 }
 0x23b   : > { %22886 = vst [vmem:[#allocation98_spill] sm:$0xff] %v17339_v38  ;;  %v17349_v63 = vand.u32 4294901760, %v2724_v20  ;;  %v1638_v42 = vsel %vm1583_vm6, %v22889_v29, %v1637_v4  ;;  %v11453_v15 = vadd.f32 -1.0, %v13856_v53  ;;  %v2875_v48 = vsel %vm2329_vm7, %v2734_v52, 0 }
 0x23c   : > { %1709 = vrot.lane.b32.xlu0 %v1638_v42, %s14305_s11  ;;  %2013 = vrot.lane.b32.xlu1 %v17357_v13, %s14307_s13  ;;  %v22891_v4 = vrot.slane %v16533_v58, 6  ;;  %v2124_v1 = vrot.slane %v17317_v11, 5  ;;  %v3251_v52 = vsub.f32 %v17302_v0, %v22097_v51  ;;  %v22893_v47 = vrot.slane %v17289_v19, 5 }
 0x23d   : > { %22888 = vst [vmem:[#allocation99_spill] sm:$0xff] %v17349_v63  ;;  %v17372_v39 = vsub.f32 %v2724_v20, %v17349_v63  ;;  %13859 = vpow2.f32 %v468_v50  ;;  %v565_v53 = vsel %vm360_vm3, %v17178_v22, %v11453_v15  ;;  %v1154_v51 = vrot.slane %v17075_v16, 1 }
 0x23e   : > { %v17369_v29 = vsel %vm2255_vm5, %v22891_v4, %v22890_v6  ;;  %v1879_v42 = vpop.permute.xlu0 %1878  ;;  %v17376_v18 = vpop.permute.xlu1 %1512  ;;  %v2127_v20 = vsel %vm2070_vm9, %v2124_v1, %v22893_v47  ;;  %v17393_v0 = vand.u32 4294901760, %v2875_v48  ;;  %v2348_v47 = vsel %vm2329_vm7, %v15803_v27, %v17021_v41 }
 0x23f   : > { %22892 = vst [vmem:[#allocation100_spill] sm:$0xff] %v17372_v39  ;;  %v22102_v4 = vand.u32 4294901760, %v17372_v39  ;;  %v22895_v30 = vrot.slane %v17053_v24, 4  ;;  %v22896_v27 = vrot.slane %v17053_v24, 1  ;;  %v3252_v38 = vand.u32 4294901760, %v3251_v52 }
 0x240   : > { %1894 = vrot.lane.b32.xlu0 %v17167_v59, %s14306_s12  ;;  %2198 = vrot.lane.b32.xlu1 %v2127_v20, %s14308_s14  ;;  %22894 = vst [vmem:[#allocation101_spill] sm:$0xff] %v17393_v0  ;;  %v2386_v20 = vsel %vm2367_vm15, %v2348_v47, %v17063_v61  ;;  %v22897_v61 = vand.u32 4294901760, %v14770_v10  ;;  %vm354_vm12 = vcmp.gt.f32.partialorder %v17282_v49, 0.0  ;;  %vm353_vm3 = vcmp.gt.f32.partialorder %v17320_v55, 0.0 }
 0x241   : > { %v3242_v6 = vsub.f32 %v17372_v39, %v22102_v4  ;;  %v17408_v63 = vsel %vm1768_vm8, %v22895_v30, %v1826_v57  ;;  %v1157_v41 = vsel %vm1096_vm2, %v1154_v51, %v22896_v27  ;;  %v2424_v4 = vsel %vm2405_vm0, %v2386_v20, %v17090_v3 }
 0x242   : > { %v1996_v22 = vpop.permute.xlu0 %1995  ;;  %v975_v15 = vpop.permute.xlu1 %974  ;;  %v3538_v47 = vsub.f32 %v14770_v10, %v22897_v61  ;;  %v2462_v39 = vsel %vm2443_vm1, %v2424_v4, %v1694_v28  ;;  %v17427_v57 = vsub.f32 %v2875_v48, %v17393_v0  ;;  %v22899_v3 = vand.u32 4294901760, %v14772_v54  ;;  %v17526_v10 = vld [vmem:[%s14365_s29 + $0x128] sm:$0xff] }
 0x243   : > { %v17416_v59 = vsel %vm1017_vm14, %v565_v53, %v975_v15  ;;  %v3243_v50 = vand.u32 4294901760, %v3242_v6  ;;  %v2500_v52 = vsel %vm22900_vm13, %v2462_v39, %v1879_v42  ;;  %v22901_v4 = vrot.slane %v17270_v17, 6 }
 0x244   : > { %v2327_v30 = vrot.slane %v17416_v59, 6  ;;  %2011 = vrot.lane.b32.xlu0 %v17408_v63, %s14307_s13  ;;  %1228 = vrot.lane.b32.xlu1 %v1157_v41, %s14302_s8  ;;  %22898 = vst [vmem:[#allocation102_spill] sm:$0xff] %v17427_v57  ;;  %v3545_v53 = vsub.f32 %v14772_v54, %v22899_v3  ;;  %v3539_v6 = vand.u32 4294901760, %v3538_v47  ;;  %v2538_v28 = vsel %vm2519_vm10, %v2500_v52, %v1996_v22  ;;  %v13858_v3 = vpop.eup %13857  ;;  %v22917_v54 = vld [vmem:[#allocation9_spill] sm:$0xff] }
 0x245   : > { %3244 = vmatmul.mubr.f32.gmra.mrb[32].mxu0 %v3243_v50  ;;  %v22902_v48 = vrot.slane %v17053_v24, 5  ;;  %v22107_v42 = vrot.slane %v17289_v19, 2  ;;  %v22903_v47 = vrot.slane %v17369_v29, 1  ;;  %v22905_v52 = vrot.slane %v16641_v37, 6 }
 0x246   : > { %v2328_v20 = vsel %vm2255_vm5, %v22901_v4, %v2327_v30  ;;  %v2801_v15 = vrot.slane %v2327_v30, 1  ;;  %v2181_v27 = vpop.permute.xlu0 %2180  ;;  %3253 = vmatprep.mubr.f32.mxu0 %v3252_v38  ;;  %v17437_v41 = vpop.permute.xlu1 %1212  ;;  %v3546_v50 = vand.u32 4294901760, %v3545_v53  ;;  %v22108_v38 = vand.u32 4294901760, %v17427_v57 }
 0x247   : > { %v2125_v61 = vsel %vm2070_vm9, %v22902_v48, %v2124_v1  ;;  %v2797_v0 = vrot.slane %v2328_v20, 1  ;;  %v17443_v39 = vsel %vm2557_vm11, %v2538_v28, %v2181_v27  ;;  %v22904_v1 = vrot.slane %v17265_v35, 1  ;;  %v13860_v35 = vpop.eup %13859 }
 0x248   : > { %v22109_v22 = vrot.slane %v17443_v39, 1  ;;  %2196 = vrot.lane.b32.xlu0 %v2125_v61, %s14308_s14  ;;  %1413 = vrot.lane.b32.xlu1 %v17234_v21, %s14303_s9  ;;  %v22906_v28 = vrot.slane %v16637_v26, 6  ;;  %v1343_v21 = vrot.slane %v17317_v11, 2  ;;  %v12753_v20 = vpack.c.bf16 %v3546_v50, %v3539_v6 }
 0x249   : > { %v2738_v30 = vsel %vm1096_vm2, %v22904_v1, %v22903_v47  ;;  %v17464_v4 = vsel %vm1096_vm2, %v2797_v0, %v2801_v15  ;;  %v22908_v27 = vrot.slane %v17297_v56, 1  ;;  %v11447_v61 = vadd.f32 -1.0, %v13858_v3 }
 0x24a   : > { %v17461_v53 = vsel %vm2255_vm5, %v22906_v28, %v22905_v52  ;;  %22907 = vst [vmem:[#allocation103_spill] sm:$0xff] %v17464_v4  ;;  %v22909_v47 = vrot.slane %v17306_v60, 1  ;;  %v1696_v52 = vpop.permute.xlu0 %1695  ;;  %v17477_v28 = vpop.permute.xlu1 %1397  ;;  %v22911_v6 = vrot.slane %v16836_v23, 1  ;;  %v22116_v3 = vrot.slane %v17289_v19, 3  ;;  %12754 = vmatpush1.bf16.msra.mxu0 %v12753_v20 }
 0x24b   : > { %v17470_v48 = vsel %vm1096_vm2, %v22908_v27, %v2797_v0  ;;  %v17487_v0 = vsel %vm1281_vm4, %v1343_v21, %v22107_v42  ;;  %v3266_v60 = vsub.f32 %v17427_v57, %v22108_v38  ;;  %v22119_v50 = vrot.slane %v17461_v53, 1 }
 0x24c   : > { %v2728_v1 = vsel %vm1096_vm2, %v22909_v47, %v22109_v22  ;;  %v1155_v56 = vsel %vm1096_vm2, %v22911_v6, %v1154_v51  ;;  %1530 = vrot.lane.b32.xlu1 %v17487_v0, %s14304_s10  ;;  %v2877_v51 = vsel %vm2329_vm7, %v2738_v30, 0  ;;  %v11446_v27 = vadd.f32 -1.0, %v13860_v35 }
 0x24d   : > { %v17479_v15 = vand.u32 4294901760, %v2728_v1  ;;  %1226 = vrot.lane.b32.xlu0 %v1155_v56, %s14302_s8  ;;  %v1641_v20 = vrot.slane %v17317_v11, 3  ;;  %v22913_v6 = vmov 0.0|0.0   ;;  %v559_v38 = vsel %vm354_vm12, %v17282_v49, %v11447_v61  ;;  %v22916_v61 = vld [vmem:[#allocation8_spill] sm:$0xff]  ;;  %vm22936_vm12 = vmmov %vm22900_vm13 }
 0x24e   : > { %12755 = vmatprep.subr.bf16.mxu0 %v22913_v6  ;;  %v1881_v56 = vpop.permute.xlu0 %1880  ;;  %v17505_v42 = vpop.permute.xlu1 %1514  ;;  %v3267_v22 = vand.u32 4294901760, %v3266_v60  ;;  %v22915_v57 = vrot.slane %v17369_v29, 1  ;;  %v558_v35 = vsel %vm353_vm3, %v17320_v55, %v11446_v27  ;;  %v396_v4 = vmin.f32 %v17526_v10, 0.0  ;;  %vm22937_vm3 = vmmov %vm22936_vm12 }
 0x24f   : > { %22910 = vst [vmem:[#allocation104_spill] sm:$0xff] %v17479_v15  ;;  %v17500_v47 = vsub.f32 %v2728_v1, %v17479_v15  ;;  %v1644_v30 = vsel %vm1583_vm6, %v1641_v20, %v22116_v3  ;;  %v17512_v1 = vand.u32 4294901760, %v2877_v51  ;;  %v22120_v15 = vand.u32 4294901760, %v22916_v61 }
 0x250   : > { %1715 = vrot.lane.b32.xlu1 %v1644_v30, %s14305_s11  ;;  %v2742_v49 = vsel %vm1096_vm2, %v22915_v57, %v22119_v50  ;;  %v22121_v3 = vand.u32 4294901760, %v22917_v54  ;;  %v17537_v57 = vsel %vm1017_vm14, %v559_v38, %v16645_v14  ;;  %v22919_v14 = vrot.slane %v17053_v24, 2 }
 0x251   : > { %22912 = vst [vmem:[#allocation105_spill] sm:$0xff] %v17500_v47  ;;  %22914 = vst [vmem:[#allocation106_spill] sm:$0xff] %v17512_v1  ;;  %1411 = vrot.lane.b32.xlu0 %v17311_v46, %s14303_s9  ;;  %v2349_v46 = vsel %vm2329_vm7, %v15925_v36, %v17162_v9  ;;  %v22918_v60 = vand.u32 4294901760, %v17500_v47  ;;  %v3552_v50 = vsub.f32 %v22916_v61, %v22120_v15 }
 0x252   : > { %v2387_v30 = vsel %vm2367_vm15, %v2349_v46, %v17201_v62  ;;  %v1998_v55 = vpop.permute.xlu0 %1997  ;;  %v17541_v27 = vpop.permute.xlu1 %1699  ;;  %v3559_v36 = vsub.f32 %v22917_v54, %v22121_v3  ;;  %v17554_v38 = vsel %vm1281_vm4, %v22919_v14, %v1343_v21  ;;  %v22122_v46 = vrot.slane %v17537_v57, 4 }
 0x253   : > { %v3257_v29 = vsub.f32 %v17500_v47, %v22918_v60  ;;  %v2425_v9 = vsel %vm2405_vm0, %v2387_v30, %v17226_v32  ;;  %v17559_v60 = vsel %vm1017_vm14, %v558_v35, %v16510_v7  ;;  %v3553_v32 = vand.u32 4294901760, %v3552_v50  ;;  %v22929_v47 = vld [vmem:[#allocation10_spill] sm:$0xff] }
 0x254   : > { %v2463_v15 = vsel %vm2443_vm1, %v2425_v9, %v1696_v52  ;;  %1900 = vrot.lane.b32.xlu1 %v17357_v13, %s14306_s12  ;;  %v3560_v30 = vand.u32 4294901760, %v3559_v36  ;;  %v22123_v21 = vrot.slane %v16832_v34, 6  ;;  %v1830_v14 = vrot.slane %v17559_v60, 4 }
 0x255   : > { %v3258_v62 = vand.u32 4294901760, %v3257_v29  ;;  %1528 = vrot.lane.b32.xlu0 %v17554_v38, %s14304_s10  ;;  %v2501_v29 = vsel %vm22900_vm13, %v2463_v15, %v1881_v56  ;;  %v17571_v9 = vsub.f32 %v2877_v51, %v17512_v1  ;;  %v2879_v3 = vsel %vm2329_vm7, %v2742_v49, 0 }
 0x256   : > { %v2539_v7 = vsel %vm2519_vm10, %v2501_v29, %v1998_v55  ;;  %v2183_v35 = vpop.permute.xlu0 %2182  ;;  %v1885_v52 = vpop.permute.xlu1 %1884  ;;  %v12756_v13 = vpack.c.bf16 %v3560_v30, %v3553_v32  ;;  %v22921_v36 = vrot.slane %v17053_v24, 3  ;;  %v17583_v56 = vsel %vm1768_vm8, %v1830_v14, %v22122_v46 }
 0x257   : > { %3259 = vmatmul.mubr.f32.gmra.mrb[34].mxu0 %v3258_v62  ;;  %22920 = vst [vmem:[#allocation8_spill] sm:$0xff] %v17571_v9  ;;  %v17575_v50 = vsel %vm2557_vm11, %v2539_v7, %v2183_v35  ;;  %v472_v55 = vmul.f32 1.442695, %v396_v4  ;;  %v2128_v49 = vrot.slane %v17559_v60, 5  ;;  %v22923_v4 = vrot.slane %v17443_v39, 1 }
 0x258   : > { %3268 = vmatprep.mubr.f32.mxu0 %v3267_v22  ;;  %v1642_v15 = vsel %vm1583_vm6, %v22921_v36, %v1641_v20  ;;  %v22125_v22 = vrot.slane %v17537_v57, 5  ;;  %v22124_v51 = vrot.slane %v17575_v50, 1  ;;  %2017 = vrot.lane.b32.xlu1 %v17583_v56, %s14307_s13  ;;  %v22922_v20 = vrot.slane %v16641_v37, 6 }
 0x259   : > { %1713 = vrot.lane.b32.xlu0 %v1642_v15, %s14305_s11  ;;  %12757 = vmatpush1.bf16.msra.mxu0 %v12756_v13  ;;  %v22128_v7 = vrot.slane %v17289_v19, 1  ;;  %v22131_v35 = vand.u32 4294901760, %v17571_v9  ;;  %v17605_v36 = vand.u32 4294901760, %v2879_v3  ;;  %13861 = vpow2.f32 %v472_v55 }
 0x25a   : > { %v17596_v62 = vsel %vm2255_vm5, %v22922_v20, %v22123_v21  ;;  %v2732_v32 = vsel %vm1096_vm2, %v22923_v4, %v22124_v51  ;;  %v1698_v30 = vpop.permute.xlu0 %1697  ;;  %v2002_v29 = vpop.permute.xlu1 %2001  ;;  %12758 = vmatprep.subr.bf16.mxu0 %v22913_v6  ;;  %v2131_v13 = vsel %vm2070_vm9, %v2128_v49, %v22125_v22  ;;  %v1158_v39 = vrot.slane %v17317_v11, 1 }
 0x25b   : > { %22924 = vst [vmem:[#allocation9_spill] sm:$0xff] %v17605_v36  ;;  %v17608_v15 = vand.u32 4294901760, %v2732_v32  ;;  %v3281_v55 = vsub.f32 %v17571_v9, %v22131_v35  ;;  %v22933_v35 = vld [vmem:[#allocation12_spill] sm:$0xff]  ;;  %vm355_vm13 = vcmp.gt.f32.partialorder %v17526_v10, 0.0 }
 0x25c   : > { %2202 = vrot.lane.b32.xlu1 %v2131_v13, %s14308_s14  ;;  %v1161_v51 = vsel %vm1096_vm2, %v1158_v39, %v22128_v7  ;;  %v2351_v13 = vsel %vm2329_vm7, %v16169_v25, %v17437_v41  ;;  %v22931_v41 = vrot.slane %v17596_v62, 1 }
 0x25d   : > { %22925 = vst [vmem:[#allocation107_spill] sm:$0xff] %v17608_v15  ;;  %1898 = vrot.lane.b32.xlu0 %v17408_v63, %s14306_s12  ;;  %v17619_v4 = vsub.f32 %v2732_v32, %v17608_v15  ;;  %v17628_v63 = vsub.f32 %v2879_v3, %v17605_v36  ;;  %v22928_v32 = vrot.slane %v17289_v19, 4  ;;  %v2389_v1 = vsel %vm2367_vm15, %v2351_v13, %v17477_v28 }
 0x25e   : > { %v1883_v46 = vpop.permute.xlu0 %1882  ;;  %v2187_v21 = vpop.permute.xlu1 %2186  ;;  %v22930_v3 = vrot.slane %v17289_v19, 5  ;;  %v2350_v28 = vsel %vm2329_vm7, %v16047_v33, %v17299_v44  ;;  %v2427_v13 = vsel %vm2405_vm0, %v2389_v1, %v17505_v42  ;;  %v22935_v44 = vand.u32 4294901760, %v22933_v35 }
 0x25f   : > { %22926 = vst [vmem:[#allocation108_spill] sm:$0xff] %v17619_v4  ;;  %22927 = vst [vmem:[#allocation109_spill] sm:$0xff] %v17628_v63  ;;  %v17636_v22 = vsel %vm1768_vm8, %v22928_v32, %v1830_v14  ;;  %v22132_v20 = vand.u32 4294901760, %v17619_v4  ;;  %v22932_v14 = vrot.slane %v17461_v53, 1  ;;  %v2388_v53 = vsel %vm2367_vm15, %v2350_v28, %v17346_v12 }
 0x260   : > { %1232 = vrot.lane.b32.xlu1 %v1161_v51, %s14302_s8  ;;  %v2129_v25 = vsel %vm2070_vm9, %v22930_v3, %v2128_v49  ;;  %v22934_v49 = vand.u32 4294901760, %v22929_v47  ;;  %v3573_v42 = vsub.f32 %v22933_v35, %v22935_v44  ;;  %v2426_v1 = vsel %vm2405_vm0, %v2388_v53, %v17376_v18 }
 0x261   : > { %2015 = vrot.lane.b32.xlu0 %v17636_v22, %s14307_s13  ;;  %v2746_v32 = vsel %vm1096_vm2, %v22932_v14, %v22931_v41  ;;  %v3272_v51 = vsub.f32 %v17619_v4, %v22132_v20  ;;  %v2465_v41 = vsel %vm2443_vm1, %v2427_v13, %v17541_v27  ;;  %v2464_v12 = vsel %vm2443_vm1, %v2426_v1, %v1698_v30 }
 0x262   : > { %v3566_v3 = vsub.f32 %v22929_v47, %v22934_v49  ;;  %v2000_v14 = vpop.permute.xlu0 %1999  ;;  %v17669_v7 = vpop.permute.xlu1 %1216  ;;  %v2503_v49 = vsel %vm22936_vm12, %v2465_v41, %v1885_v52  ;;  %v3282_v28 = vand.u32 4294901760, %v3281_v55  ;;  %v3574_v13 = vand.u32 4294901760, %v3573_v42  ;;  %vm22963_vm12 = vmmov %vm22937_vm3 }
 0x263   : > { %v3273_v20 = vand.u32 4294901760, %v3272_v51  ;;  %v2541_v27 = vsel %vm2519_vm10, %v2503_v49, %v2002_v29  ;;  %v2502_v44 = vsel %vm22937_vm3, %v2464_v12, %v1883_v46  ;;  %v1347_v18 = vrot.slane %v17559_v60, 2  ;;  %v13862_v30 = vpop.eup %13861 }
 0x264   : > { %v3567_v9 = vand.u32 4294901760, %v3566_v3  ;;  %1417 = vrot.lane.b32.xlu1 %v17487_v0, %s14303_s9  ;;  %v17685_v33 = vsel %vm2557_vm11, %v2541_v27, %v2187_v21  ;;  %v2881_v52 = vsel %vm2329_vm7, %v2746_v32, 0  ;;  %v2540_v29 = vsel %vm2519_vm10, %v2502_v44, %v2000_v14 }
 0x265   : > { %2200 = vrot.lane.b32.xlu0 %v2129_v25, %s14308_s14  ;;  %3274 = vmatmul.mubr.f32.gmra.mrb[36].mxu0 %v3273_v20  ;;  %v22938_v46 = vrot.slane %v17053_v24, 1  ;;  %v22939_v20 = vrot.slane %v17537_v57, 2  ;;  %v22136_v32 = vrot.slane %v17537_v57, 3  ;;  %v22137_v53 = vrot.slane %v17685_v33, 1 }
 0x266   : > { %v2185_v51 = vpop.permute.xlu0 %2184  ;;  %3283 = vmatprep.mubr.f32.mxu0 %v3282_v28  ;;  %v17690_v25 = vpop.permute.xlu1 %1401  ;;  %v12759_v0 = vpack.c.bf16 %v3574_v13, %v3567_v9  ;;  %v22135_v9 = vand.u32 4294901760, %v17628_v63  ;;  %v17707_v14 = vand.u32 4294901760, %v2881_v52  ;;  %v1645_v42 = vrot.slane %v17559_v60, 3 }
 0x267   : > { %v2578_v55 = vsel %vm2557_vm11, %v2540_v29, %v2185_v51  ;;  %v1159_v21 = vsel %vm1096_vm2, %v22938_v46, %v1158_v39  ;;  %v17699_v3 = vsel %vm1281_vm4, %v1347_v18, %v22939_v20  ;;  %v11448_v39 = vadd.f32 -1.0, %v13862_v30 }
 0x268   : > { %v2735_v41 = vrot.slane %v2578_v55, 1  ;;  %1534 = vrot.lane.b32.xlu1 %v17699_v3, %s14304_s10  ;;  %22940 = vst [vmem:[#allocation10_spill] sm:$0xff] %v17707_v14  ;;  %12760 = vmatpush1.bf16.msra.mxu0 %v12759_v0  ;;  %v22941_v1 = vrot.slane %v17575_v50, 1  ;;  %v1648_v50 = vsel %vm1583_vm6, %v1645_v42, %v22136_v32  ;;  %v3296_v30 = vsub.f32 %v17628_v63, %v22135_v9 }
 0x269   : > { %1230 = vrot.lane.b32.xlu0 %v1159_v21, %s14302_s8  ;;  %12761 = vmatprep.subr.bf16.mxu0 %v22913_v6  ;;  %v17736_v29 = vsub.f32 %v2881_v52, %v17707_v14  ;;  %v2303_v51 = vrot.slane %v16836_v23, 6  ;;  %v560_v0 = vsel %vm355_vm13, %v17526_v10, %v11448_v39  ;;  %v22947_v20 = vrot.slane %v17289_v19, 2  ;;  %v22948_v39 = vld [vmem:[#allocation79_spill] sm:$0xff]  ;;  %vm22990_vm13 = vmmov %vm22937_vm3 }
 0x26a   : > { %v2736_v49 = vsel %vm1096_vm2, %v22941_v1, %v2735_v41  ;;  %v2740_v12 = vsel %vm1096_vm2, %v2735_v41, %v22137_v53  ;;  %v17717_v27 = vpop.permute.xlu0 %1214  ;;  %v17719_v28 = vpop.permute.xlu1 %1518  ;;  %v22959_v15 = vrot.slane %v17108_v43, 5 }
 0x26b   : > { %v17722_v13 = vand.u32 4294901760, %v2736_v49  ;;  %v17724_v44 = vand.u32 4294901760, %v2740_v12  ;;  %22944 = vst [vmem:[#allocation111_spill] sm:$0xff] %v17736_v29  ;;  %v17753_v41 = vsel %vm1281_vm4, %v22947_v20, %v1347_v18  ;;  %v22949_v18 = vld [vmem:[#allocation13_spill] sm:$0xff]  ;;  %v22950_v20 = vld [vmem:[#allocation14_spill] sm:$0xff] }
 0x26c   : > { %1719 = vrot.lane.b32.xlu1 %v1648_v50, %s14305_s11  ;;  %v22953_v9 = vand.u32 4294901760, %v22949_v18  ;;  %v22954_v14 = vand.u32 4294901760, %v22950_v20 }
 0x26d   : > { %22942 = vst [vmem:[#allocation12_spill] sm:$0xff] %v17722_v13  ;;  %22943 = vst [vmem:[#allocation110_spill] sm:$0xff] %v17724_v44  ;;  %1415 = vrot.lane.b32.xlu0 %v17554_v38, %s14303_s9  ;;  %v17741_v55 = vsub.f32 %v2736_v49, %v17722_v13  ;;  %v17744_v46 = vsub.f32 %v2740_v12, %v17724_v44  ;;  %v17760_v49 = vsel %vm1017_vm14, %v560_v0, %v22948_v39 }
 0x26e   : > { %v17746_v38 = vpop.permute.xlu0 %1399  ;;  %v17748_v21 = vpop.permute.xlu1 %1703  ;;  %v1834_v32 = vrot.slane %v17760_v49, 4  ;;  %v3297_v0 = vand.u32 4294901760, %v3296_v30  ;;  %v22951_v39 = vrot.slane %v16832_v34, 6  ;;  %v22952_v12 = vrot.slane %v17289_v19, 3 }
 0x26f   : > { %22945 = vst [vmem:[#allocation112_spill] sm:$0xff] %v17741_v55  ;;  %22946 = vst [vmem:[#allocation113_spill] sm:$0xff] %v17744_v46  ;;  %v22144_v1 = vand.u32 4294901760, %v17741_v55  ;;  %v3580_v4 = vsub.f32 %v22949_v18, %v22953_v9  ;;  %v3587_v30 = vsub.f32 %v22950_v20, %v22954_v14  ;;  %v22956_v44 = vand.u32 4294901760, %v17744_v46 }
 0x270   : > { %1904 = vrot.lane.b32.xlu1 %v17583_v56, %s14306_s12  ;;  %v2304_v10 = vsel %vm2255_vm5, %v22951_v39, %v2303_v51  ;;  %v1646_v50 = vsel %vm1583_vm6, %v22952_v12, %v1645_v42  ;;  %v22957_v9 = vand.u32 4294901760, %v17736_v29 }
 0x271   : > { %1532 = vrot.lane.b32.xlu0 %v17753_v41, %s14304_s10  ;;  %v3287_v53 = vsub.f32 %v17741_v55, %v22144_v1  ;;  %v22955_v1 = vrot.slane %v17108_v43, 4  ;;  %v3302_v42 = vsub.f32 %v17744_v46, %v22956_v44  ;;  %v2749_v12 = vrot.slane %v2304_v10, 1 }
 0x272   : > { %v1517_v56 = vpop.permute.xlu0 %1516  ;;  %v1889_v63 = vpop.permute.xlu1 %1888  ;;  %v3311_v14 = vsub.f32 %v17736_v29, %v22957_v9  ;;  %v3581_v36 = vand.u32 4294901760, %v3580_v4  ;;  %v22958_v44 = vrot.slane %v17075_v16, 6  ;;  %v22162_v4 = vrot.slane %v17537_v57, 1 }
 0x273   : > { %v17789_v39 = vsel %vm1768_vm8, %v1834_v32, %v22955_v1  ;;  %v3288_v52 = vand.u32 4294901760, %v3287_v53  ;;  %v3588_v1 = vand.u32 4294901760, %v3587_v30  ;;  %v2132_v53 = vrot.slane %v17760_v49, 5 }
 0x274   : > { %2021 = vrot.lane.b32.xlu1 %v17789_v39, %s14307_s13  ;;  %v3303_v9 = vand.u32 4294901760, %v3302_v42  ;;  %v22960_v10 = vrot.slane %v17596_v62, 1 }
 0x275   : > { %1717 = vrot.lane.b32.xlu0 %v1646_v50, %s14305_s11  ;;  %3289 = vmatmul.mubr.f32.gmra.mrb[38].mxu0 %v3288_v52  ;;  %v17805_v50 = vsel %vm2255_vm5, %v2303_v51, %v22958_v44  ;;  %v12762_v46 = vpack.c.bf16 %v3588_v1, %v3581_v36  ;;  %v2135_v20 = vsel %vm2070_vm9, %v2132_v53, %v22959_v15  ;;  %v3312_v52 = vand.u32 4294901760, %v3311_v14 }
 0x276   : > { %v1702_v55 = vpop.permute.xlu0 %1701  ;;  %3298 = vmatprep.mubr.f32.mxu0 %v3297_v0  ;;  %v2006_v13 = vpop.permute.xlu1 %2005  ;;  %v2750_v0 = vsel %vm1096_vm2, %v22960_v10, %v2749_v12  ;;  %v1162_v36 = vrot.slane %v17559_v60, 1  ;;  %v22163_v51 = vrot.slane %v17805_v50, 1 }
 0x277   : > { %12763 = vmatpush1.bf16.msra.mxu0 %v12762_v46  ;;  %v2883_v14 = vsel %vm2329_vm7, %v2750_v0, 0 }
 0x278   : > { %2206 = vrot.lane.b32.xlu1 %v2135_v20, %s14308_s14  ;;  %v22961_v20 = vrot.slane %v17537_v57, 4  ;;  %v1165_v62 = vsel %vm1096_vm2, %v1162_v36, %v22162_v4  ;;  %12764 = vmatprep.subr.bf16.mxu0 %v22913_v6 }
 0x279   : > { %1902 = vrot.lane.b32.xlu0 %v17636_v22, %s14306_s12  ;;  %3304 = vmatmul.mubr.f32.gmra.mrb[40].mxu0 %v3303_v9  ;;  %v2353_v22 = vsel %vm2329_vm7, %v16419_v5, %v17669_v7  ;;  %v2352_v5 = vsel %vm2329_vm7, %v16293_v8, %v17717_v27 }
 0x27a   : > { %v1887_v30 = vpop.permute.xlu0 %1886  ;;  %3313 = vmatprep.mubr.f32.mxu0 %v3312_v52  ;;  %v2191_v15 = vpop.permute.xlu1 %2190  ;;  %v17825_v42 = vsel %vm1768_vm8, %v22961_v20, %v1834_v32  ;;  %v2391_v46 = vsel %vm2367_vm15, %v2353_v22, %v17690_v25  ;;  %v2754_v32 = vsel %vm1096_vm2, %v2749_v12, %v22163_v51  ;;  %v2390_v1 = vsel %vm2367_vm15, %v2352_v5, %v17746_v38  ;;  %v22965_v22 = vld [vmem:[#allocation16_spill] sm:$0xff] }
 0x27b   : > { %v2429_v7 = vsel %vm2405_vm0, %v2391_v46, %v17719_v28  ;;  %v17851_v52 = vand.u32 4294901760, %v2883_v14  ;;  %v2428_v8 = vsel %vm2405_vm0, %v2390_v1, %v1517_v56  ;;  %v22964_v28 = vrot.slane %v17537_v57, 5 }
 0x27c   : > { %1236 = vrot.lane.b32.xlu1 %v1165_v62, %s14302_s8  ;;  %v2467_v25 = vsel %vm2443_vm1, %v2429_v7, %v17748_v21  ;;  %v17859_v12 = vrot.slane %v17108_v43, 2  ;;  %v2466_v38 = vsel %vm2443_vm1, %v2428_v8, %v1702_v55  ;;  %v1351_v56 = vrot.slane %v17760_v49, 2  ;;  %v22966_v62 = vld [vmem:[#allocation17_spill] sm:$0xff] }
 0x27d   : > { %2019 = vrot.lane.b32.xlu0 %v17825_v42, %s14307_s13  ;;  %22962 = vst [vmem:[#allocation79_spill] sm:$0xff] %v17851_v52  ;;  %v2505_v27 = vsel %vm22963_vm12, %v2467_v25, %v1889_v63  ;;  %v2133_v10 = vsel %vm2070_vm9, %v22964_v28, %v2132_v53  ;;  %v2885_v63 = vsel %vm2329_vm7, %v2754_v32, 0  ;;  %v2504_v0 = vsel %vm22937_vm3, %v2466_v38, %v1887_v30  ;;  %vm22992_vm12 = vmmov %vm22937_vm3 }
 0x27e   : > { %v2004_v44 = vpop.permute.xlu0 %2003  ;;  %v17849_v9 = vpop.permute.xlu1 %1220  ;;  %v2543_v21 = vsel %vm2519_vm10, %v2505_v27, %v2006_v13  ;;  %v22159_v20 = vand.u32 4294901760, %v22965_v22  ;;  %v22158_v55 = vand.u32 4294901760, %v22966_v62  ;;  %v22160_v32 = vrot.slane %v17108_v43, 3 }
 0x27f   : > { %v17870_v53 = vsel %vm2557_vm11, %v2543_v21, %v2191_v15  ;;  %v2542_v13 = vsel %vm2519_vm10, %v2504_v0, %v2004_v44  ;;  %v17884_v15 = vsel %vm1281_vm4, %v1351_v56, %v17859_v12  ;;  %v17899_v27 = vand.u32 4294901760, %v2885_v63 }
 0x280   : > { %1421 = vrot.lane.b32.xlu1 %v17699_v3, %s14303_s9  ;;  %v22967_v3 = vrot.slane %v17289_v19, 1  ;;  %v3594_v1 = vsub.f32 %v22965_v22, %v22159_v20  ;;  %v3601_v25 = vsub.f32 %v22966_v62, %v22158_v55  ;;  %v22161_v44 = vrot.slane %v17870_v53, 1 }
 0x281   : > { %2204 = vrot.lane.b32.xlu0 %v2133_v10, %s14308_s14  ;;  %22969 = vst [vmem:[#allocation16_spill] sm:$0xff] %v17899_v27  ;;  %v1649_v28 = vrot.slane %v17760_v49, 3  ;;  %v22970_v21 = vrot.slane %v17685_v33, 1  ;;  %v2307_v55 = vrot.slane %v17053_v24, 6  ;;  %v22977_v51 = vrot.slane %v17537_v57, 3 }
 0x282   : > { %v2189_v46 = vpop.permute.xlu0 %2188  ;;  %v17875_v5 = vpop.permute.xlu1 %1405  ;;  %v1163_v7 = vsel %vm1096_vm2, %v22967_v3, %v1162_v36  ;;  %v17897_v36 = vsub.f32 %v2883_v14, %v17851_v52  ;;  %v3595_v10 = vand.u32 4294901760, %v3594_v1  ;;  %v3602_v38 = vand.u32 4294901760, %v3601_v25 }
 0x283   : > { %v2580_v30 = vsel %vm2557_vm11, %v2542_v13, %v2189_v46  ;;  %v17924_v1 = vsub.f32 %v2885_v63, %v17899_v27  ;;  %v17943_v63 = vrot.slane %v17138_v40, 4 }
 0x284   : > { %v2743_v8 = vrot.slane %v2580_v30, 1  ;;  %1538 = vrot.lane.b32.xlu1 %v17884_v15, %s14304_s10  ;;  %22968 = vst [vmem:[#allocation13_spill] sm:$0xff] %v17897_v36  ;;  %v1652_v30 = vsel %vm1583_vm6, %v1649_v28, %v22160_v32  ;;  %v22164_v33 = vand.u32 4294901760, %v17897_v36  ;;  %v12765_v25 = vpack.c.bf16 %v3602_v38, %v3595_v10 }
 0x285   : > { %1234 = vrot.lane.b32.xlu0 %v1163_v7, %s14302_s8  ;;  %22973 = vst [vmem:[#allocation115_spill] sm:$0xff] %v17924_v1  ;;  %v22978_v38 = vrot.slane %v17075_v16, 6 }
 0x286   : > { %v2744_v0 = vsel %vm1096_vm2, %v22970_v21, %v2743_v8  ;;  %v2748_v13 = vsel %vm1096_vm2, %v2743_v8, %v22161_v44  ;;  %v17908_v46 = vpop.permute.xlu0 %1218  ;;  %v17910_v3 = vpop.permute.xlu1 %1522  ;;  %12766 = vmatpush1.bf16.msra.mxu0 %v12765_v25 }
 0x287   : > { %v17912_v14 = vand.u32 4294901760, %v2744_v0  ;;  %v17914_v7 = vand.u32 4294901760, %v2748_v13  ;;  %12767 = vmatprep.subr.bf16.mxu0 %v22913_v6 }
 0x288   : > { %1723 = vrot.lane.b32.xlu1 %v1652_v30, %s14305_s11 }
 0x289   : > { %22971 = vst [vmem:[#allocation17_spill] sm:$0xff] %v17912_v14  ;;  %22972 = vst [vmem:[#allocation114_spill] sm:$0xff] %v17914_v7  ;;  %1419 = vrot.lane.b32.xlu0 %v17753_v41, %s14303_s9  ;;  %v17927_v8 = vsub.f32 %v2744_v0, %v17912_v14  ;;  %v17930_v21 = vsub.f32 %v2748_v13, %v17914_v7  ;;  %v22976_v41 = vrot.slane %v17537_v57, 2  ;;  %v1838_v13 = vrot.slane %v17083_v45, 4  ;;  %v22985_v7 = vld [vmem:[#allocation20_spill] sm:$0xff] }
 0x28a   : > { %v17933_v20 = vpop.permute.xlu0 %1403  ;;  %v17935_v32 = vpop.permute.xlu1 %1707 }
 0x28b   : > { %22974 = vst [vmem:[#allocation116_spill] sm:$0xff] %v17927_v8  ;;  %22975 = vst [vmem:[#allocation117_spill] sm:$0xff] %v17930_v21  ;;  %v17940_v30 = vsel %vm1281_vm4, %v22976_v41, %v1351_v56  ;;  %v22169_v10 = vand.u32 4294901760, %v17927_v8  ;;  %v3326_v56 = vsub.f32 %v17897_v36, %v22164_v33  ;;  %v2308_v33 = vsel %vm2255_vm5, %v22978_v38, %v2307_v55 }
 0x28c   : > { %1908 = vrot.lane.b32.xlu1 %v17789_v39, %s14306_s12  ;;  %v1650_v39 = vsel %vm1583_vm6, %v22977_v51, %v1649_v28  ;;  %v17969_v0 = vsel %vm1768_vm8, %v1838_v13, %v17943_v63  ;;  %v22980_v28 = vand.u32 4294901760, %v17924_v1 }
 0x28d   : > { %1536 = vrot.lane.b32.xlu0 %v17940_v30, %s14304_s10  ;;  %v3317_v25 = vsub.f32 %v17927_v8, %v22169_v10  ;;  %v22979_v10 = vand.u32 4294901760, %v17930_v21  ;;  %v3327_v51 = vand.u32 4294901760, %v3326_v56  ;;  %v2136_v8 = vrot.slane %v17083_v45, 5 }
 0x28e   : > { %v1521_v44 = vpop.permute.xlu0 %1520  ;;  %v1893_v4 = vpop.permute.xlu1 %1892  ;;  %v3341_v38 = vsub.f32 %v17924_v1, %v22980_v28  ;;  %v22982_v56 = vrot.slane %v17317_v11, 6  ;;  %v22185_v1 = vand.u32 4294901760, %v22985_v7 }
 0x28f   : > { %v3318_v36 = vand.u32 4294901760, %v3317_v25  ;;  %v3332_v41 = vsub.f32 %v17930_v21, %v22979_v10  ;;  %v2757_v25 = vrot.slane %v2308_v33, 1  ;;  %v22981_v10 = vrot.slane %v17138_v40, 5 }
 0x290   : > { %2025 = vrot.lane.b32.xlu1 %v17969_v0, %s14307_s13  ;;  %v17989_v52 = vsel %vm2255_vm5, %v2307_v55, %v22982_v56  ;;  %v1166_v33 = vrot.slane %v17760_v49, 1  ;;  %v22986_v56 = vrot.slane %v17108_v43, 1 }
 0x291   : > { %1721 = vrot.lane.b32.xlu0 %v1650_v39, %s14305_s11  ;;  %3319 = vmatmul.mubr.f32.gmra.mrb[42].mxu0 %v3318_v36  ;;  %v2139_v39 = vsel %vm2070_vm9, %v2136_v8, %v22981_v10  ;;  %v3333_v21 = vand.u32 4294901760, %v3332_v41  ;;  %v3342_v36 = vand.u32 4294901760, %v3341_v38  ;;  %v22984_v10 = vld [vmem:[#allocation19_spill] sm:$0xff] }
 0x292   : > { %v1706_v27 = vpop.permute.xlu0 %1705  ;;  %3328 = vmatprep.mubr.f32.mxu0 %v3327_v51  ;;  %v2010_v29 = vpop.permute.xlu1 %2009  ;;  %v22983_v51 = vrot.slane %v17805_v50, 1  ;;  %v22184_v41 = vand.u32 4294901760, %v22984_v10  ;;  %v22987_v50 = vrot.slane %v17108_v43, 4 }
 0x294   : > { %2210 = vrot.lane.b32.xlu1 %v2139_v39, %s14308_s14  ;;  %v2758_v28 = vsel %vm1096_vm2, %v22983_v51, %v2757_v25  ;;  %v18010_v39 = vsel %vm1768_vm8, %v22987_v50, %v1838_v13  ;;  %v3615_v51 = vsub.f32 %v22985_v7, %v22185_v1 }
 0x295   : > { %1906 = vrot.lane.b32.xlu0 %v17825_v42, %s14306_s12  ;;  %3334 = vmatmul.mubr.f32.gmra.mrb[44].mxu0 %v3333_v21  ;;  %v1169_v42 = vsel %vm1096_vm2, %v1166_v33, %v22986_v56  ;;  %v2355_v21 = vsel %vm2329_vm7, %v16637_v26, %v17849_v9  ;;  %v2887_v26 = vsel %vm2329_vm7, %v2758_v28, 0  ;;  %v2354_v9 = vsel %vm2329_vm7, %v16533_v58, %v17908_v46 }
 0x296   : > { %v1891_v14 = vpop.permute.xlu0 %1890  ;;  %3343 = vmatprep.mubr.f32.mxu0 %v3342_v36  ;;  %v2195_v55 = vpop.permute.xlu1 %2194  ;;  %v3608_v36 = vsub.f32 %v22984_v10, %v22184_v41  ;;  %v2393_v56 = vsel %vm2367_vm15, %v2355_v21, %v17875_v5  ;;  %v3616_v41 = vand.u32 4294901760, %v3615_v51  ;;  %v2392_v1 = vsel %vm2367_vm15, %v2354_v9, %v17933_v20 }
 0x297   : > { %v2431_v13 = vsel %vm2405_vm0, %v2393_v56, %v17910_v3  ;;  %v22988_v28 = vrot.slane %v17108_v43, 5  ;;  %v22989_v58 = vrot.slane %v17989_v52, 1  ;;  %v2430_v3 = vsel %vm2405_vm0, %v2392_v1, %v1521_v44 }
 0x298   : > { %1240 = vrot.lane.b32.xlu1 %v1169_v42, %s14302_s8  ;;  %v3609_v50 = vand.u32 4294901760, %v3608_v36  ;;  %v2469_v5 = vsel %vm2443_vm1, %v2431_v13, %v17935_v32  ;;  %v22189_v20 = vrot.slane %v17138_v40, 2  ;;  %v2468_v32 = vsel %vm2443_vm1, %v2430_v3, %v1706_v27 }
 0x299   : > { %2023 = vrot.lane.b32.xlu0 %v18010_v39, %s14307_s13  ;;  %v2137_v42 = vsel %vm2070_vm9, %v22988_v28, %v2136_v8  ;;  %v2762_v46 = vsel %vm1096_vm2, %v2757_v25, %v22989_v58  ;;  %v2507_v36 = vsel %vm22990_vm13, %v2469_v5, %v1893_v4  ;;  %v18049_v8 = vand.u32 4294901760, %v2887_v26  ;;  %vm23048_vm13 = vmmov %vm22937_vm3 }
 0x29a   : > { %v2008_v21 = vpop.permute.xlu0 %2007  ;;  %v18033_v38 = vpop.permute.xlu1 %1224  ;;  %v12768_v51 = vpack.c.bf16 %v3616_v41, %v3609_v50  ;;  %v2545_v56 = vsel %vm2519_vm10, %v2507_v36, %v2010_v29  ;;  %v2506_v25 = vsel %vm22992_vm12, %v2468_v32, %v1891_v14  ;;  %v1468_v4 = vrot.slane %v17083_v45, 2  ;;  %vm23057_vm12 = vmmov %vm22937_vm3 }
 0x29b   : > { %22991 = vst [vmem:[#allocation19_spill] sm:$0xff] %v18049_v8  ;;  %v18053_v44 = vsel %vm2557_vm11, %v2545_v56, %v2195_v55  ;;  %v2889_v1 = vsel %vm2329_vm7, %v2762_v46, 0  ;;  %v2544_v27 = vsel %vm2519_vm10, %v2506_v25, %v2008_v21  ;;  %v22993_v9 = vrot.slane %v17537_v57, 1  ;;  %v22997_v46 = vld [vmem:[#allocation22_spill] sm:$0xff] }
 0x29c   : > { %1425 = vrot.lane.b32.xlu1 %v17884_v15, %s14303_s9  ;;  %12769 = vmatpush1.bf16.msra.mxu0 %v12768_v51  ;;  %v1471_v55 = vsel %vm1281_vm4, %v1468_v4, %v22189_v20  ;;  %v22187_v13 = vrot.slane %v17138_v40, 3  ;;  %v22190_v50 = vrot.slane %v18053_v44, 1  ;;  %v18073_v21 = vsub.f32 %v2887_v26, %v18049_v8 }
 0x29d   : > { %2208 = vrot.lane.b32.xlu0 %v2137_v42, %s14308_s14  ;;  %12770 = vmatprep.subr.bf16.mxu0 %v22913_v6  ;;  %v1167_v14 = vsel %vm1096_vm2, %v22993_v9, %v1166_v33  ;;  %v18075_v28 = vand.u32 4294901760, %v2889_v1  ;;  %v1653_v33 = vrot.slane %v17083_v45, 3  ;;  %v22996_v42 = vld [vmem:[#allocation21_spill] sm:$0xff]  ;;  %v22188_v3 = vand.u32 4294901760, %v22997_v46 }
 0x29e   : > { %v2193_v29 = vpop.permute.xlu0 %2192  ;;  %v18058_v41 = vpop.permute.xlu1 %1409  ;;  %22994 = vst [vmem:[#allocation20_spill] sm:$0xff] %v18073_v21  ;;  %v22186_v58 = vand.u32 4294901760, %v22996_v42  ;;  %v22998_v36 = vrot.slane %v17870_v53, 1  ;;  %v22193_v53 = vand.u32 4294901760, %v18073_v21  ;;  %v1955_v20 = vrot.slane %v17270_v17, 4 }
 0x29f   : > { %v2582_v15 = vsel %vm2557_vm11, %v2544_v27, %v2193_v29  ;;  %22995 = vst [vmem:[#allocation118_spill] sm:$0xff] %v18075_v28  ;;  %v1656_v45 = vsel %vm1583_vm6, %v1653_v33, %v22187_v13  ;;  %v18102_v29 = vsub.f32 %v2889_v1, %v18075_v28  ;;  %v3629_v9 = vsub.f32 %v22997_v46, %v22188_v3 }
 0x2a0   : > { %v2751_v5 = vrot.slane %v2582_v15, 1  ;;  %1542 = vrot.lane.b32.xlu1 %v1471_v55, %s14304_s10  ;;  %v3622_v15 = vsub.f32 %v22996_v42, %v22186_v58  ;;  %v2311_v55 = vrot.slane %v17289_v19, 6  ;;  %v1469_v13 = vsel %vm1281_vm4, %v17859_v12, %v1468_v4  ;;  %vm23013_vm4 = vmmov %vm22937_vm3 }
 0x2a1   : > { %1238 = vrot.lane.b32.xlu0 %v1167_v14, %s14302_s8  ;;  %23001 = vst [vmem:[#allocation119_spill] sm:$0xff] %v18102_v29  ;;  %v23004_v58 = vrot.slane %v17108_v43, 3  ;;  %v23005_v28 = vrot.slane %v17317_v11, 6 }
 0x2a2   : > { %v2752_v51 = vsel %vm1096_vm2, %v22998_v36, %v2751_v5  ;;  %v2756_v32 = vsel %vm1096_vm2, %v2751_v5, %v22190_v50  ;;  %v18086_v56 = vpop.permute.xlu0 %1222  ;;  %v18088_v26 = vpop.permute.xlu1 %1526  ;;  %v3623_v36 = vand.u32 4294901760, %v3622_v15 }
 0x2a3   : > { %v18090_v25 = vand.u32 4294901760, %v2752_v51  ;;  %v18092_v27 = vand.u32 4294901760, %v2756_v32 }
 0x2a4   : > { %1727 = vrot.lane.b32.xlu1 %v1656_v45, %s14305_s11  ;;  %v3630_v45 = vand.u32 4294901760, %v3629_v9 }
 0x2a5   : > { %22999 = vst [vmem:[#allocation21_spill] sm:$0xff] %v18090_v25  ;;  %23000 = vst [vmem:[#allocation22_spill] sm:$0xff] %v18092_v27  ;;  %1423 = vrot.lane.b32.xlu0 %v17940_v30, %s14303_s9  ;;  %v18111_v14 = vsub.f32 %v2752_v51, %v18090_v25  ;;  %v18114_v30 = vsub.f32 %v2756_v32, %v18092_v27  ;;  %v3356_v32 = vsub.f32 %v18073_v21, %v22193_v53 }
 0x2a6   : > { %v18117_v5 = vpop.permute.xlu0 %1407  ;;  %v18119_v1 = vpop.permute.xlu1 %1711  ;;  %v12771_v9 = vpack.c.bf16 %v3630_v45, %v3623_v36  ;;  %v2312_v53 = vsel %vm2255_vm5, %v23005_v28, %v2311_v55  ;;  %v2142_v36 = vrot.slane %v17416_v59, 5  ;;  %v23006_v45 = vrot.slane %v17416_v59, 4 }
 0x2a7   : > { %23002 = vst [vmem:[#allocation120_spill] sm:$0xff] %v18111_v14  ;;  %23003 = vst [vmem:[#allocation121_spill] sm:$0xff] %v18114_v30  ;;  %v22194_v3 = vand.u32 4294901760, %v18111_v14  ;;  %v23007_v50 = vand.u32 4294901760, %v18114_v30  ;;  %v23008_v28 = vand.u32 4294901760, %v18102_v29  ;;  %v23009_v27 = vrot.slane %v17559_v60, 6 }
 0x2a8   : > { %1912 = vrot.lane.b32.xlu1 %v17969_v0, %s14306_s12  ;;  %v1654_v0 = vsel %vm1583_vm6, %v23004_v58, %v1653_v33  ;;  %12772 = vmatpush1.bf16.msra.mxu0 %v12771_v9  ;;  %v1958_v15 = vsel %vm1768_vm8, %v1955_v20, %v23006_v45  ;;  %v3357_v33 = vand.u32 4294901760, %v3356_v32  ;;  %v2140_v9 = vrot.slane %v17270_v17, 5  ;;  %vm23016_vm6 = vmmov %vm22937_vm3 }
 0x2a9   : > { %1540 = vrot.lane.b32.xlu0 %v1469_v13, %s14304_s10  ;;  %v3347_v4 = vsub.f32 %v18111_v14, %v22194_v3  ;;  %v3362_v21 = vsub.f32 %v18114_v30, %v23007_v50  ;;  %12773 = vmatprep.subr.bf16.mxu0 %v22913_v6  ;;  %v3371_v58 = vsub.f32 %v18102_v29, %v23008_v28  ;;  %v2765_v45 = vrot.slane %v2312_v53, 1  ;;  %v23011_v53 = vld [vmem:[#allocation24_spill] sm:$0xff] }
 0x2aa   : > { %v1525_v51 = vpop.permute.xlu0 %1524  ;;  %v1897_v13 = vpop.permute.xlu1 %1896  ;;  %v2143_v50 = vsel %vm2070_vm9, %v2140_v9, %v2142_v36  ;;  %v23010_v17 = vrot.slane %v17989_v52, 1 }
 0x2ab   : > { %v3348_v3 = vand.u32 4294901760, %v3347_v4  ;;  %v3363_v30 = vand.u32 4294901760, %v3362_v21  ;;  %v3372_v32 = vand.u32 4294901760, %v3371_v58 }
 0x2ac   : > { %2029 = vrot.lane.b32.xlu1 %v1958_v15, %s14307_s13  ;;  %v22207_v15 = vand.u32 4294901760, %v23011_v53 }
 0x2ad   : > { %1725 = vrot.lane.b32.xlu0 %v1654_v0, %s14305_s11  ;;  %3349 = vmatmul.mubr.f32.gmra.mrb[46].mxu0 %v3348_v3  ;;  %v18162_v0 = vsel %vm2255_vm5, %v2311_v55, %v23009_v27  ;;  %v2766_v3 = vsel %vm1096_vm2, %v23010_v17, %v2765_v45 }
 0x2ae   : > { %v1710_v4 = vpop.permute.xlu0 %1709  ;;  %3358 = vmatprep.mubr.f32.mxu0 %v3357_v33  ;;  %v2014_v14 = vpop.permute.xlu1 %2013  ;;  %v23012_v33 = vld [vmem:[#allocation25_spill] sm:$0xff]  ;;  %v22209_v27 = vrot.slane %v18162_v0, 1  ;;  %v3636_v52 = vsub.f32 %v23011_v53, %v22207_v15 }
 0x2af   : > { %v22206_v21 = vand.u32 4294901760, %v23012_v33 }
 0x2b0   : > { %2214 = vrot.lane.b32.xlu1 %v2143_v50, %s14308_s14  ;;  %v3637_v50 = vand.u32 4294901760, %v3636_v52 }
 0x2b1   : > { %1910 = vrot.lane.b32.xlu0 %v18010_v39, %s14306_s12  ;;  %3364 = vmatmul.mubr.f32.gmra.mrb[48].mxu0 %v3363_v30  ;;  %v2357_v39 = vsel %vm2329_vm7, %v16832_v34, %v18033_v38  ;;  %v1956_v30 = vsel %vm1768_vm8, %v17943_v63, %v1955_v20  ;;  %v3643_v55 = vsub.f32 %v23012_v33, %v22206_v21  ;;  %v2891_v34 = vsel %vm2329_vm7, %v2766_v3, 0 }
 0x2b2   : > { %v1895_v28 = vpop.permute.xlu0 %1894  ;;  %3373 = vmatprep.mubr.f32.mxu0 %v3372_v32  ;;  %v2199_v29 = vpop.permute.xlu1 %2198  ;;  %v2395_v58 = vsel %vm2367_vm15, %v2357_v39, %v18058_v41  ;;  %v2356_v38 = vsel %vm2329_vm7, %v16641_v37, %v18086_v56 }
 0x2b3   : > { %v2433_v20 = vsel %vm2405_vm0, %v2395_v58, %v18088_v26  ;;  %v3644_v32 = vand.u32 4294901760, %v3643_v55  ;;  %v2394_v17 = vsel %vm2367_vm15, %v2356_v38, %v18117_v5  ;;  %v23014_v26 = vrot.slane %v17138_v40, 5 }
 0x2b4   : > { %1914 = vrot.lane.b32.xlu1 %v17943_v63, %s14306_s12  ;;  %v2471_v41 = vsel %vm2443_vm1, %v2433_v20, %v18119_v1  ;;  %v2770_v63 = vsel %vm1096_vm2, %v2765_v45, %v22209_v27  ;;  %v2432_v37 = vsel %vm2405_vm0, %v2394_v17, %v1525_v51  ;;  %v18213_v55 = vand.u32 4294901760, %v2891_v34 }
 0x2b5   : > { %2027 = vrot.lane.b32.xlu0 %v1956_v30, %s14307_s13  ;;  %v2509_v56 = vsel %vm23013_vm4, %v2471_v41, %v1897_v13  ;;  %v2141_v3 = vsel %vm2070_vm9, %v23014_v26, %v2140_v9  ;;  %v12774_v52 = vpack.c.bf16 %v3644_v32, %v3637_v50  ;;  %v2470_v5 = vsel %vm2443_vm1, %v2432_v37, %v1710_v4  ;;  %vm23034_vm9 = vmmov %vm22937_vm3 }
 0x2b6   : > { %v2012_v39 = vpop.permute.xlu0 %2011  ;;  %v18199_v30 = vpop.permute.xlu1 %1228  ;;  %v2547_v1 = vsel %vm2519_vm10, %v2509_v56, %v2014_v14  ;;  %23015 = vst [vmem:[#allocation24_spill] sm:$0xff] %v18213_v55  ;;  %v2508_v45 = vsel %vm23016_vm6, %v2470_v5, %v1895_v28  ;;  %v2893_v13 = vsel %vm2329_vm7, %v2770_v63, 0  ;;  %v23017_v28 = vrot.slane %v17108_v43, 1  ;;  %vm23059_vm4 = vmmov %vm22937_vm3 }
 0x2b7   : > { %v18217_v51 = vsel %vm2557_vm11, %v2547_v1, %v2199_v29  ;;  %12775 = vmatpush1.bf16.msra.mxu0 %v12774_v52  ;;  %v2546_v9 = vsel %vm2519_vm10, %v2508_v45, %v2012_v39  ;;  %v18230_v29 = vsub.f32 %v2891_v34, %v18213_v55  ;;  %v18232_v20 = vand.u32 4294901760, %v2893_v13  ;;  %vm23069_vm6 = vmmov %vm22937_vm3 }
 0x2b8   : > { %2216 = vrot.lane.b32.xlu1 %v2142_v36, %s14308_s14  ;;  %12776 = vmatprep.subr.bf16.mxu0 %v22913_v6  ;;  %v22208_v36 = vrot.slane %v18217_v51, 1  ;;  %v23020_v50 = vrot.slane %v18053_v44, 1  ;;  %v2315_v5 = vrot.slane %v17537_v57, 6  ;;  %v23028_v27 = vrot.slane %v17559_v60, 6 }
 0x2b9   : > { %2212 = vrot.lane.b32.xlu0 %v2141_v3, %s14308_s14  ;;  %23018 = vst [vmem:[#allocation25_spill] sm:$0xff] %v18230_v29  ;;  %23019 = vst [vmem:[#allocation122_spill] sm:$0xff] %v18232_v20  ;;  %v22205_v34 = vand.u32 4294901760, %v18230_v29  ;;  %v18248_v56 = vsub.f32 %v2893_v13, %v18232_v20 }
 0x2ba   : > { %v2197_v58 = vpop.permute.xlu0 %2196  ;;  %v18221_v4 = vpop.permute.xlu1 %1413 }
 0x2bb   : > { %v2584_v14 = vsel %vm2557_vm11, %v2546_v9, %v2197_v58  ;;  %v3386_v13 = vsub.f32 %v18230_v29, %v22205_v34  ;;  %v23026_v58 = vld [vmem:[#allocation26_spill] sm:$0xff]  ;;  %v23029_v9 = vrot.slane %v17138_v40, 3  ;;  %v23030_v29 = vand.u32 4294901760, %v18248_v56 }
 0x2bc   : > { %v2759_v38 = vrot.slane %v2584_v14, 1  ;;  %v22211_v14 = vand.u32 4294901760, %v23026_v58 }
 0x2bd   : > { %1242 = vrot.lane.b32.xlu0 %v23017_v28, %s14302_s8 }
 0x2be   : > { %v2760_v32 = vsel %vm1096_vm2, %v23020_v50, %v2759_v38  ;;  %v2764_v17 = vsel %vm1096_vm2, %v2759_v38, %v22208_v36  ;;  %v1531_v39 = vpop.permute.xlu1 %1530  ;;  %v23027_v38 = vld [vmem:[#allocation27_spill] sm:$0xff] }
 0x2bf   : > { %v1227_v41 = vpop.permute.xlu0 %1226  ;;  %v18240_v63 = vand.u32 4294901760, %v2760_v32  ;;  %v18242_v37 = vand.u32 4294901760, %v2764_v17  ;;  %v22214_v28 = vand.u32 4294901760, %v23027_v38 }
 0x2c1   : > { %23021 = vst [vmem:[#allocation123_spill] sm:$0xff] %v18240_v63  ;;  %23022 = vst [vmem:[#allocation124_spill] sm:$0xff] %v18242_v37  ;;  %1427 = vrot.lane.b32.xlu0 %v17859_v12, %s14303_s9  ;;  %v18251_v44 = vsub.f32 %v2760_v32, %v18240_v63  ;;  %v18254_v26 = vsub.f32 %v2764_v17, %v18242_v37  ;;  %v23025_v12 = vrot.slane %v17138_v40, 2  ;;  %v23032_v40 = vrot.slane %v17416_v59, 4 }
 0x2c2   : > { %v1716_v52 = vpop.permute.xlu1 %1715  ;;  %v3657_v34 = vsub.f32 %v23027_v38, %v22214_v28  ;;  %v3401_v28 = vsub.f32 %v18248_v56, %v23030_v29 }
 0x2c3   : > { %23023 = vst [vmem:[#allocation125_spill] sm:$0xff] %v18251_v44  ;;  %23024 = vst [vmem:[#allocation126_spill] sm:$0xff] %v18254_v26  ;;  %v1412_v3 = vpop.permute.xlu0 %1411  ;;  %v22210_v1 = vand.u32 4294901760, %v18251_v44  ;;  %v22219_v45 = vand.u32 4294901760, %v18254_v26 }
 0x2c4   : > { %v3658_v21 = vand.u32 4294901760, %v3657_v34 }
 0x2c5   : > { %1544 = vrot.lane.b32.xlu0 %v23025_v12, %s14304_s10  ;;  %v3377_v50 = vsub.f32 %v18251_v44, %v22210_v1  ;;  %v3650_v12 = vsub.f32 %v23026_v58, %v22211_v14  ;;  %v3392_v36 = vsub.f32 %v18254_v26, %v22219_v45  ;;  %v2316_v1 = vsel %vm2255_vm5, %v23028_v27, %v2315_v5 }
 0x2c6   : > { %v1901_v17 = vpop.permute.xlu1 %1900  ;;  %v3387_v14 = vand.u32 4294901760, %v3386_v13  ;;  %v2773_v45 = vrot.slane %v2316_v1, 1  ;;  %v23031_v27 = vrot.slane %v17760_v49, 6  ;;  %v3402_v13 = vand.u32 4294901760, %v3401_v28 }
 0x2c7   : > { %v1529_v32 = vpop.permute.xlu0 %1528  ;;  %v3378_v15 = vand.u32 4294901760, %v3377_v50  ;;  %v3651_v44 = vand.u32 4294901760, %v3650_v12  ;;  %v3393_v37 = vand.u32 4294901760, %v3392_v36 }
 0x2c8   : > { %v18293_v55 = vsel %vm2255_vm5, %v2315_v5, %v23031_v27 }
 0x2c9   : > { %1729 = vrot.lane.b32.xlu0 %v23029_v9, %s14305_s11  ;;  %3379 = vmatmul.mubr.f32.gmra.mrb[50].mxu0 %v3378_v15  ;;  %v12777_v26 = vpack.c.bf16 %v3658_v21, %v3651_v44  ;;  %v23033_v21 = vrot.slane %v18162_v0, 1  ;;  %v22230_v34 = vrot.slane %v18293_v55, 1  ;;  %v2359_v44 = vsel %vm2329_vm7, %v17075_v16, %v18199_v30 }
 0x2ca   : > { %3388 = vmatprep.mubr.f32.mxu0 %v3387_v14  ;;  %v2018_v20 = vpop.permute.xlu1 %2017  ;;  %v2397_v59 = vsel %vm2367_vm15, %v2359_v44, %v18221_v4 }
 0x2cb   : > { %v1714_v50 = vpop.permute.xlu0 %1713  ;;  %12778 = vmatpush1.bf16.msra.mxu0 %v12777_v26  ;;  %v2774_v36 = vsel %vm1096_vm2, %v23033_v21, %v2773_v45  ;;  %v2435_v26 = vsel %vm2405_vm0, %v2397_v59, %v1531_v39  ;;  %v2778_v16 = vsel %vm1096_vm2, %v2773_v45, %v22230_v34 }
 0x2cc   : > { %12779 = vmatprep.subr.bf16.mxu0 %v22913_v6  ;;  %v2895_v5 = vsel %vm2329_vm7, %v2774_v36, 0  ;;  %v2473_v1 = vsel %vm2443_vm1, %v2435_v26, %v1716_v52  ;;  %v2897_v28 = vsel %vm2329_vm7, %v2778_v16, 0 }
 0x2cd   : > { %2031 = vrot.lane.b32.xlu0 %v23032_v40, %s14307_s13  ;;  %3394 = vmatmul.mubr.f32.gmra.mrb[52].mxu0 %v3393_v37  ;;  %v2358_v37 = vsel %vm2329_vm7, %v16836_v23, %v1227_v41  ;;  %v2511_v4 = vsel %vm23034_vm9, %v2473_v1, %v1901_v17  ;;  %v18321_v39 = vand.u32 4294901760, %v2895_v5  ;;  %v18334_v40 = vand.u32 4294901760, %v2897_v28  ;;  %vm23071_vm9 = vmmov %vm22937_vm3 }
 0x2ce   : > { %3403 = vmatprep.mubr.f32.mxu0 %v3402_v13  ;;  %v2203_v29 = vpop.permute.xlu1 %2202  ;;  %v2396_v0 = vsel %vm2367_vm15, %v2358_v37, %v1412_v3  ;;  %v2549_v41 = vsel %vm2519_vm10, %v2511_v4, %v2018_v20  ;;  %v23037_v13 = vrot.slane %v18217_v51, 1 }
 0x2cf   : > { %v1899_v15 = vpop.permute.xlu0 %1898  ;;  %v2434_v30 = vsel %vm2405_vm0, %v2396_v0, %v1529_v32  ;;  %23035 = vst [vmem:[#allocation26_spill] sm:$0xff] %v18321_v39  ;;  %v18325_v52 = vsel %vm2557_vm11, %v2549_v41, %v2203_v29  ;;  %v18332_v20 = vsub.f32 %v2895_v5, %v18321_v39  ;;  %23036 = vst [vmem:[#allocation27_spill] sm:$0xff] %v18334_v40 }
 0x2d0   : > { %v2472_v23 = vsel %vm2443_vm1, %v2434_v30, %v1714_v50  ;;  %v22228_v17 = vrot.slane %v18325_v52, 1  ;;  %v18348_v26 = vsub.f32 %v2897_v28, %v18334_v40 }
 0x2d1   : > { %v2510_v3 = vsel %vm22937_vm3, %v2472_v23, %v1899_v15  ;;  %v22226_v37 = vand.u32 4294901760, %v18332_v20 }
 0x2d2   : > { %v1233_v14 = vpop.permute.xlu1 %1232  ;;  %23040 = vst [vmem:[#allocation129_spill] sm:$0xff] %v18348_v26  ;;  %v22234_v4 = vand.u32 4294901760, %v18348_v26 }
 0x2d3   : > { %v2016_v9 = vpop.permute.xlu0 %2015  ;;  %v3416_v30 = vsub.f32 %v18332_v20, %v22226_v37 }
 0x2d4   : > { %v2548_v12 = vsel %vm2519_vm10, %v2510_v3, %v2016_v9 }
 0x2d6   : > { %v1418_v27 = vpop.permute.xlu1 %1417 }
 0x2d7   : > { %v2201_v45 = vpop.permute.xlu0 %2200 }
 0x2d8   : > { %v2586_v32 = vsel %vm2557_vm11, %v2548_v12, %v2201_v45  ;;  %v23042_v45 = vrot.slane %v17108_v43, 6 }
 0x2d9   : > { %v2767_v50 = vrot.slane %v2586_v32, 1  ;;  %v23043_v32 = vrot.slane %v17760_v49, 6 }
 0x2da   : > { %v1535_v36 = vpop.permute.xlu1 %1534 }
 0x2db   : > { %v2768_v15 = vsel %vm1096_vm2, %v23037_v13, %v2767_v50  ;;  %v2772_v29 = vsel %vm1096_vm2, %v2767_v50, %v22228_v17  ;;  %v1231_v21 = vpop.permute.xlu0 %1230  ;;  %v2320_v50 = vsel %vm2255_vm5, %v23043_v32, %v23042_v45  ;;  %v3417_v13 = vand.u32 4294901760, %v3416_v30  ;;  %vm23046_vm5 = vmmov %vm22937_vm3 }
 0x2dc   : > { %v18342_v44 = vand.u32 4294901760, %v2768_v15  ;;  %v18344_v59 = vand.u32 4294901760, %v2772_v29  ;;  %v2361_v30 = vsel %vm2329_vm7, %v17317_v11, %v1233_v14 }
 0x2dd   : > { %v2399_v32 = vsel %vm2367_vm15, %v2361_v30, %v1418_v27 }
 0x2de   : > { %23038 = vst [vmem:[#allocation127_spill] sm:$0xff] %v18342_v44  ;;  %23039 = vst [vmem:[#allocation128_spill] sm:$0xff] %v18344_v59  ;;  %v18351_v5 = vsub.f32 %v2768_v15, %v18342_v44  ;;  %v18354_v51 = vsub.f32 %v2772_v29, %v18344_v59  ;;  %v1720_v1 = vpop.permute.xlu1 %1719  ;;  %v3431_v15 = vsub.f32 %v18348_v26, %v22234_v4 }
 0x2df   : > { %v1416_v0 = vpop.permute.xlu0 %1415 }
 0x2e0   : > { %23041 = vst [vmem:[#allocation130_spill] sm:$0xff] %v18354_v51  ;;  %v22227_v9 = vand.u32 4294901760, %v18351_v5  ;;  %v22229_v16 = vand.u32 4294901760, %v18354_v51  ;;  %v3432_v17 = vand.u32 4294901760, %v3431_v15 }
 0x2e2   : > { %v3407_v23 = vsub.f32 %v18351_v5, %v22227_v9  ;;  %v1905_v3 = vpop.permute.xlu1 %1904  ;;  %v3422_v12 = vsub.f32 %v18354_v51, %v22229_v16  ;;  %v23044_v51 = vrot.slane %v18293_v55, 1 }
 0x2e3   : > { %v1533_v41 = vpop.permute.xlu0 %1532 }
 0x2e4   : > { %v3408_v28 = vand.u32 4294901760, %v3407_v23  ;;  %v2781_v23 = vrot.slane %v2320_v50, 1  ;;  %v3423_v9 = vand.u32 4294901760, %v3422_v12  ;;  %v2437_v50 = vsel %vm2405_vm0, %v2399_v32, %v1535_v36 }
 0x2e6   : > { %3409 = vmatmul.mubr.f32.gmra.mrb[54].mxu0 %v3408_v28  ;;  %v2022_v37 = vpop.permute.xlu1 %2021  ;;  %v2782_v45 = vsel %vm1096_vm2, %v23044_v51, %v2781_v23  ;;  %v2360_v28 = vsel %vm2329_vm7, %v17053_v24, %v1231_v21  ;;  %v23045_v51 = vrot.slane %v17146_v31, 1 }
 0x2e7   : > { %v1718_v29 = vpop.permute.xlu0 %1717  ;;  %3418 = vmatprep.mubr.f32.mxu0 %v3417_v13  ;;  %v2899_v12 = vsel %vm2329_vm7, %v2782_v45, 0 }
 0x2e8   : > { %v2786_v15 = vsel %vm1096_vm2, %v2781_v23, %v23045_v51  ;;  %v18395_v21 = vand.u32 4294901760, %v2899_v12 }
 0x2ea   : > { %3424 = vmatmul.mubr.f32.gmra.mrb[56].mxu0 %v3423_v9  ;;  %v2207_v34 = vpop.permute.xlu1 %2206  ;;  %v2398_v9 = vsel %vm2367_vm15, %v2360_v28, %v1416_v0  ;;  %23047 = vst [vmem:[#allocation131_spill] sm:$0xff] %v18395_v21 }
 0x2eb   : > { %v1903_v16 = vpop.permute.xlu0 %1902  ;;  %3433 = vmatprep.mubr.f32.mxu0 %v3432_v17  ;;  %v2475_v17 = vsel %vm2443_vm1, %v2437_v50, %v1720_v1  ;;  %v2436_v11 = vsel %vm2405_vm0, %v2398_v9, %v1533_v41  ;;  %v2901_v1 = vsel %vm2329_vm7, %v2786_v15, 0 }
 0x2ec   : > { %v2513_v14 = vsel %vm23046_vm5, %v2475_v17, %v1905_v3  ;;  %v2474_v24 = vsel %vm2443_vm1, %v2436_v11, %v1718_v29  ;;  %v18408_v30 = vand.u32 4294901760, %v2901_v1 }
 0x2ed   : > { %v2551_v27 = vsel %vm2519_vm10, %v2513_v14, %v2022_v37  ;;  %v2512_v36 = vsel %vm23048_vm13, %v2474_v24, %v1903_v16  ;;  %v18406_v37 = vsub.f32 %v2899_v12, %v18395_v21  ;;  %v23051_v16 = vrot.slane %v18325_v52, 1 }
 0x2ee   : > { %v1237_v55 = vpop.permute.xlu1 %1236  ;;  %v18399_v0 = vsel %vm2557_vm11, %v2551_v27, %v2207_v34  ;;  %23050 = vst [vmem:[#allocation133_spill] sm:$0xff] %v18408_v30  ;;  %v18422_v12 = vsub.f32 %v2901_v1, %v18408_v30 }
 0x2ef   : > { %v2020_v13 = vpop.permute.xlu0 %2019  ;;  %v22235_v3 = vrot.slane %v18399_v0, 1  ;;  %23049 = vst [vmem:[#allocation132_spill] sm:$0xff] %v18406_v37 }
 0x2f0   : > { %v2550_v31 = vsel %vm2519_vm10, %v2512_v36, %v2020_v13  ;;  %v22233_v13 = vand.u32 4294901760, %v18406_v37  ;;  %23054 = vst [vmem:[#allocation136_spill] sm:$0xff] %v18422_v12  ;;  %v22240_v36 = vand.u32 4294901760, %v18422_v12 }
 0x2f2   : > { %v1422_v45 = vpop.permute.xlu1 %1421  ;;  %v3446_v27 = vsub.f32 %v18406_v37, %v22233_v13 }
 0x2f3   : > { %v2205_v23 = vpop.permute.xlu0 %2204 }
 0x2f4   : > { %v2588_v41 = vsel %vm2557_vm11, %v2550_v31, %v2205_v23 }
 0x2f5   : > { %v2775_v29 = vrot.slane %v2588_v41, 1 }
 0x2f6   : > { %v1539_v50 = vpop.permute.xlu1 %1538 }
 0x2f7   : > { %v2776_v34 = vsel %vm1096_vm2, %v23051_v16, %v2775_v29  ;;  %v2780_v32 = vsel %vm1096_vm2, %v2775_v29, %v22235_v3  ;;  %v1235_v28 = vpop.permute.xlu0 %1234  ;;  %v3447_v16 = vand.u32 4294901760, %v3446_v27 }
 0x2f8   : > { %v18416_v9 = vand.u32 4294901760, %v2776_v34  ;;  %v18418_v17 = vand.u32 4294901760, %v2780_v32  ;;  %v2362_v27 = vsel %vm2329_vm7, %v17289_v19, %v1235_v28 }
 0x2fa   : > { %23052 = vst [vmem:[#allocation134_spill] sm:$0xff] %v18416_v9  ;;  %23053 = vst [vmem:[#allocation135_spill] sm:$0xff] %v18418_v17  ;;  %v18425_v51 = vsub.f32 %v2776_v34, %v18416_v9  ;;  %v18428_v52 = vsub.f32 %v2780_v32, %v18418_v17  ;;  %v1724_v11 = vpop.permute.xlu1 %1723  ;;  %v3461_v34 = vsub.f32 %v18422_v12, %v22240_v36 }
 0x2fb   : > { %v1420_v15 = vpop.permute.xlu0 %1419 }
 0x2fc   : > { %23055 = vst [vmem:[#allocation137_spill] sm:$0xff] %v18425_v51  ;;  %23056 = vst [vmem:[#allocation138_spill] sm:$0xff] %v18428_v52  ;;  %v22236_v14 = vand.u32 4294901760, %v18425_v51  ;;  %v22239_v24 = vand.u32 4294901760, %v18428_v52  ;;  %v3462_v3 = vand.u32 4294901760, %v3461_v34 }
 0x2fe   : > { %v3437_v1 = vsub.f32 %v18425_v51, %v22236_v14  ;;  %v1909_v23 = vpop.permute.xlu1 %1908  ;;  %v3452_v29 = vsub.f32 %v18428_v52, %v22239_v24 }
 0x2ff   : > { %v1537_v31 = vpop.permute.xlu0 %1536 }
 0x300   : > { %v3438_v41 = vand.u32 4294901760, %v3437_v1  ;;  %v3453_v4 = vand.u32 4294901760, %v3452_v29  ;;  %v2363_v1 = vsel %vm2329_vm7, %v17559_v60, %v1237_v55  ;;  %v2400_v29 = vsel %vm2367_vm15, %v2362_v27, %v1420_v15 }
 0x301   : > { %v2401_v24 = vsel %vm2367_vm15, %v2363_v1, %v1422_v45  ;;  %v2438_v34 = vsel %vm2405_vm0, %v2400_v29, %v1537_v31 }
 0x302   : > { %3439 = vmatmul.mubr.f32.gmra.mrb[58].mxu0 %v3438_v41  ;;  %v2026_v13 = vpop.permute.xlu1 %2025  ;;  %v2439_v36 = vsel %vm2405_vm0, %v2401_v24, %v1539_v50  ;;  %v2903_v41 = vsel %vm2329_vm7, %v17194_v2, 0  ;;  %v23060_v50 = vld [vmem:[#allocation98_spill] sm:$0xff] }
 0x303   : > { %v1722_v32 = vpop.permute.xlu0 %1721  ;;  %3448 = vmatprep.mubr.f32.mxu0 %v3447_v16  ;;  %v18459_v19 = vand.u32 4294901760, %v2903_v41  ;;  %v2905_v15 = vsel %vm2329_vm7, %v23060_v50, 0 }
 0x304   : > { %v2476_v55 = vsel %vm2443_vm1, %v2438_v34, %v1722_v32  ;;  %v18473_v1 = vand.u32 4294901760, %v2905_v15 }
 0x305   : > { %23058 = vst [vmem:[#allocation139_spill] sm:$0xff] %v18459_v19 }
 0x306   : > { %3454 = vmatmul.mubr.f32.gmra.mrb[60].mxu0 %v3453_v4  ;;  %v2211_v37 = vpop.permute.xlu1 %2210  ;;  %v2477_v4 = vsel %vm2443_vm1, %v2439_v36, %v1724_v11  ;;  %23062 = vst [vmem:[#allocation140_spill] sm:$0xff] %v18473_v1 }
 0x307   : > { %v1907_v14 = vpop.permute.xlu0 %1906  ;;  %3463 = vmatprep.mubr.f32.mxu0 %v3462_v3  ;;  %v2515_v60 = vsel %vm23057_vm12, %v2477_v4, %v1909_v23 }
 0x308   : > { %v2553_v45 = vsel %vm2519_vm10, %v2515_v60, %v2026_v13  ;;  %v2514_v28 = vsel %vm23059_vm4, %v2476_v55, %v1907_v14  ;;  %v18471_v13 = vsub.f32 %v2903_v41, %v18459_v19  ;;  %v18485_v55 = vsub.f32 %v2905_v15, %v18473_v1 }
 0x309   : > { %v18463_v2 = vsel %vm2557_vm11, %v2553_v45, %v2211_v37  ;;  %v23063_v37 = vrot.slane %v18399_v0, 1 }
 0x30a   : > { %v1241_v3 = vpop.permute.xlu1 %1240  ;;  %v2787_v23 = vrot.slane %v18463_v2, 1  ;;  %23061 = vst [vmem:[#allocation98_spill] sm:$0xff] %v18471_v13  ;;  %v22243_v60 = vand.u32 4294901760, %v18471_v13  ;;  %23066 = vst [vmem:[#allocation143_spill] sm:$0xff] %v18485_v55 }
 0x30b   : > { %v2024_v16 = vpop.permute.xlu0 %2023 }
 0x30c   : > { %v2552_v11 = vsel %vm2519_vm10, %v2514_v28, %v2024_v16 }
 0x30e   : > { %v1426_v36 = vpop.permute.xlu1 %1425 }
 0x30f   : > { %v2209_v24 = vpop.permute.xlu0 %2208 }
 0x310   : > { %v2590_v31 = vsel %vm2557_vm11, %v2552_v11, %v2209_v24  ;;  %v3476_v11 = vsub.f32 %v18471_v13, %v22243_v60  ;;  %v22256_v24 = vand.u32 4294901760, %v18485_v55 }
 0x311   : > { %v2783_v32 = vrot.slane %v2590_v31, 1 }
 0x312   : > { %v1543_v4 = vpop.permute.xlu1 %1542  ;;  %v3491_v12 = vsub.f32 %v18485_v55, %v22256_v24 }
 0x313   : > { %v2784_v14 = vsel %vm1096_vm2, %v23063_v37, %v2783_v32  ;;  %v2788_v27 = vsel %vm1096_vm2, %v2783_v32, %v2787_v23  ;;  %v1239_v29 = vpop.permute.xlu0 %1238 }
 0x314   : > { %v18479_v16 = vand.u32 4294901760, %v2784_v14  ;;  %v18481_v34 = vand.u32 4294901760, %v2788_v27  ;;  %v3492_v51 = vand.u32 4294901760, %v3491_v12 }
 0x316   : > { %23064 = vst [vmem:[#allocation141_spill] sm:$0xff] %v18479_v16  ;;  %23065 = vst [vmem:[#allocation142_spill] sm:$0xff] %v18481_v34  ;;  %v18488_v41 = vsub.f32 %v2784_v14, %v18479_v16  ;;  %v18491_v0 = vsub.f32 %v2788_v27, %v18481_v34  ;;  %v1728_v28 = vpop.permute.xlu1 %1727  ;;  %v3477_v27 = vand.u32 4294901760, %v3476_v11  ;;  %v2364_v11 = vsel %vm2329_vm7, %v17537_v57, %v1239_v29 }
 0x317   : > { %v1424_v45 = vpop.permute.xlu0 %1423 }
 0x318   : > { %23067 = vst [vmem:[#allocation144_spill] sm:$0xff] %v18488_v41  ;;  %23068 = vst [vmem:[#allocation145_spill] sm:$0xff] %v18491_v0  ;;  %v22250_v2 = vand.u32 4294901760, %v18488_v41  ;;  %v22253_v50 = vand.u32 4294901760, %v18491_v0 }
 0x31a   : > { %v3467_v15 = vsub.f32 %v18488_v41, %v22250_v2  ;;  %v1913_v32 = vpop.permute.xlu1 %1912  ;;  %v3482_v14 = vsub.f32 %v18491_v0, %v22253_v50 }
 0x31b   : > { %v1541_v31 = vpop.permute.xlu0 %1540 }
 0x31c   : > { %v3468_v37 = vand.u32 4294901760, %v3467_v15  ;;  %v3483_v13 = vand.u32 4294901760, %v3482_v14  ;;  %v2365_v15 = vsel %vm2329_vm7, %v17760_v49, %v1241_v3  ;;  %v2402_v14 = vsel %vm2367_vm15, %v2364_v11, %v1424_v45 }
 0x31d   : > { %v2403_v41 = vsel %vm2367_vm15, %v2365_v15, %v1426_v36 }
 0x31e   : > { %3469 = vmatmul.mubr.f32.gmra.mrb[62].mxu0 %v3468_v37  ;;  %v2030_v52 = vpop.permute.xlu1 %2029  ;;  %v2441_v50 = vsel %vm2405_vm0, %v2403_v41, %v1543_v4  ;;  %v2907_v37 = vsel %vm2329_vm7, %v17470_v48, 0  ;;  %v23072_v4 = vld [vmem:[#allocation103_spill] sm:$0xff] }
 0x31f   : > { %v1726_v60 = vpop.permute.xlu0 %1725  ;;  %3478 = vmatprep.mubr.f32.mxu0 %v3477_v27  ;;  %v2479_v12 = vsel %vm2443_vm1, %v2441_v50, %v1728_v28  ;;  %v18522_v57 = vand.u32 4294901760, %v2907_v37  ;;  %v2909_v41 = vsel %vm2329_vm7, %v23072_v4, 0 }
 0x320   : > { %v2517_v49 = vsel %vm23069_vm6, %v2479_v12, %v1913_v32 }
 0x321   : > { %v2555_v36 = vsel %vm2519_vm10, %v2517_v49, %v2030_v52  ;;  %23070 = vst [vmem:[#allocation146_spill] sm:$0xff] %v18522_v57  ;;  %v18533_v52 = vand.u32 4294901760, %v2909_v41 }
 0x322   : > { %3484 = vmatmul.mubr.f32.gmra.mrb[64].mxu0 %v3483_v13  ;;  %v2215_v13 = vpop.permute.xlu1 %2214 }
 0x323   : > { %v1911_v2 = vpop.permute.xlu0 %1910  ;;  %3493 = vmatprep.mubr.f32.mxu0 %v3492_v51  ;;  %v2440_v51 = vsel %vm2405_vm0, %v2402_v14, %v1541_v31  ;;  %v2593_v48 = vsel %vm2557_vm11, %v2555_v36, %v2215_v13  ;;  %23074 = vst [vmem:[#allocation147_spill] sm:$0xff] %v18533_v52 }
 0x324   : > { %v2478_v3 = vsel %vm2443_vm1, %v2440_v51, %v1726_v60  ;;  %v2795_v31 = vrot.slane %v2593_v48, 1  ;;  %v18531_v60 = vsub.f32 %v2907_v37, %v18522_v57 }
 0x325   : > { %v2516_v29 = vsel %vm23071_vm9, %v2478_v3, %v1911_v2 }
 0x326   : > { %23073 = vst [vmem:[#allocation103_spill] sm:$0xff] %v18531_v60  ;;  %v22254_v13 = vand.u32 4294901760, %v18531_v60 }
 0x327   : > { %v2028_v27 = vpop.permute.xlu0 %2027 }
 0x328   : > { %v2554_v45 = vsel %vm2519_vm10, %v2516_v29, %v2028_v27  ;;  %v18543_v27 = vsub.f32 %v2909_v41, %v18533_v52  ;;  %v3506_v36 = vsub.f32 %v18531_v60, %v22254_v13 }
 0x32a   : > { %23077 = vst [vmem:[#allocation150_spill] sm:$0xff] %v18543_v27  ;;  %v22260_v29 = vand.u32 4294901760, %v18543_v27 }
 0x32b   : > { %v2213_v28 = vpop.permute.xlu0 %2212 }
 0x32c   : > { %v2592_v50 = vsel %vm2557_vm11, %v2554_v45, %v2213_v28 }
 0x32d   : > { %v2791_v32 = vrot.slane %v2592_v50, 1  ;;  %v3507_v50 = vand.u32 4294901760, %v3506_v36 }
 0x32f   : > { %v2792_v15 = vsel %vm1096_vm2, %v2787_v23, %v2791_v32  ;;  %v2796_v2 = vsel %vm1096_vm2, %v2791_v32, %v2795_v31  ;;  %v1243_v11 = vpop.permute.xlu0 %1242  ;;  %v3521_v32 = vsub.f32 %v18543_v27, %v22260_v29 }
 0x330   : > { %v18537_v14 = vand.u32 4294901760, %v2792_v15  ;;  %v18539_v12 = vand.u32 4294901760, %v2796_v2  ;;  %v2366_v28 = vsel %vm2329_vm7, %v17108_v43, %v1243_v11  ;;  %vm23079_vm7 = vmmov %vm22937_vm3 }
 0x332   : > { %23075 = vst [vmem:[#allocation148_spill] sm:$0xff] %v18537_v14  ;;  %23076 = vst [vmem:[#allocation149_spill] sm:$0xff] %v18539_v12  ;;  %v18546_v51 = vsub.f32 %v2792_v15, %v18537_v14  ;;  %v18549_v37 = vsub.f32 %v2796_v2, %v18539_v12  ;;  %v1915_v15 = vpop.permute.xlu1 %1914 }
 0x333   : > { %v1428_v49 = vpop.permute.xlu0 %1427 }
 0x334   : > { %23078 = vst [vmem:[#allocation151_spill] sm:$0xff] %v18549_v37  ;;  %v22255_v23 = vand.u32 4294901760, %v18546_v51  ;;  %v22257_v3 = vand.u32 4294901760, %v18549_v37  ;;  %v2404_v2 = vsel %vm2367_vm15, %v2366_v28, %v1428_v49 }
 0x336   : > { %v3497_v48 = vsub.f32 %v18546_v51, %v22255_v23  ;;  %v3512_v45 = vsub.f32 %v18549_v37, %v22257_v3  ;;  %v3522_v3 = vand.u32 4294901760, %v3521_v32  ;;  %v2217_v11 = vpop.permute.xlu1 %2216  ;;  %v12783_v32 = vpack.c.bf16 %v22917_v54, %v22916_v61 }
 0x337   : > { %v1545_v4 = vpop.permute.xlu0 %1544 }
 0x338   : > { %v3498_v41 = vand.u32 4294901760, %v3497_v48  ;;  %v2442_v13 = vsel %vm2405_vm0, %v2404_v2, %v1545_v4  ;;  %v3513_v24 = vand.u32 4294901760, %v3512_v45  ;;  %v23084_v45 = vld [vmem:[#allocation6_spill] sm:$0xff]  ;;  %v23088_v2 = vld [vmem:[#allocation35_spill] sm:$0xff] }
 0x33a   : > { %3499 = vmatmul.mubr.f32.gmra.mrb[66].mxu0 %v3498_v41 }
 0x33b   : > { %v1730_v23 = vpop.permute.xlu0 %1729  ;;  %3508 = vmatprep.mubr.f32.mxu0 %v3507_v50  ;;  %v23085_v50 = vld [vmem:[#allocation33_spill] sm:$0xff] }
 0x33c   : > { %v2480_v48 = vsel %vm2443_vm1, %v2442_v13, %v1730_v23 }
 0x33d   : > { %v2518_v43 = vsel %vm23079_vm7, %v2480_v48, %v1915_v15  ;;  %v23087_v15 = vld [vmem:[#allocation37_spill] sm:$0xff]  ;;  %v12786_v48 = vpack.c.bf16 %v22933_v35, %v22929_v47 }
 0x33e   : > { %3514 = vmatmul.mubr.f32.gmra.mrb[68].mxu0 %v3513_v24 }
 0x33f   : > { %v2032_v37 = vpop.permute.xlu0 %2031  ;;  %3523 = vmatprep.mubr.f32.mxu0 %v3522_v3  ;;  %v23082_v3 = vld [vmem:[#allocation2_spill] sm:$0xff] }
 0x340   : > { %v2556_v36 = vsel %vm2519_vm10, %v2518_v43, %v2032_v37  ;;  %v23083_v37 = vld [vmem:[#allocation5_spill] sm:$0xff] }
 0x341   : > { %v2594_v29 = vsel %vm2557_vm11, %v2556_v36, %v2217_v11  ;;  %v23089_v43 = vld [vmem:[#allocation41_spill] sm:$0xff]  ;;  %v23090_v11 = vld [vmem:[#allocation39_spill] sm:$0xff]  ;;  %v23091_v36 = vld [vmem:[#allocation14_spill] sm:$0xff] }
 0x342   : > { %v2799_v49 = vrot.slane %v2594_v29, 1  ;;  %v12780_v29 = vpack.c.bf16 %v23084_v45, %v23083_v37 }
 0x344   : > { %v2800_v41 = vsel %vm1096_vm2, %v2795_v31, %v2799_v49  ;;  %v23086_v31 = vld [vmem:[#allocation31_spill] sm:$0xff]  ;;  %v12789_v49 = vpack.c.bf16 %v23091_v36, %v22949_v18 }
 0x345   : > { %v18575_v4 = vand.u32 4294901760, %v2800_v41 }
 0x347   : > { %23080 = vst [vmem:[#allocation152_spill] sm:$0xff] %v18575_v4  ;;  %v18578_v28 = vsub.f32 %v2800_v41, %v18575_v4  ;;  %v23092_v41 = vld [vmem:[#allocation45_spill] sm:$0xff] }
 0x349   : > { %23081 = vst [vmem:[#allocation153_spill] sm:$0xff] %v18578_v28  ;;  %v22261_v13 = vand.u32 4294901760, %v18578_v28 }
 0x34b   : > { %v3527_v24 = vsub.f32 %v18578_v28, %v22261_v13  ;;  %v23096_v13 = vld [vmem:[#allocation53_spill] sm:$0xff] }
 0x34d   : > { %v3528_v23 = vand.u32 4294901760, %v3527_v24  ;;  %v23093_v24 = vld [vmem:[#allocation43_spill] sm:$0xff] }
 0x34f   : > { %3529 = vmatmul.mubr.f32.gmra.mrb[70].mxu0 %v3528_v23  ;;  %v12792_v23 = vpack.c.bf16 %v22966_v62, %v22965_v22 }
 0x350   : > { %3689 = vmatprep.mubr.f32.mxu0 %v23082_v3  ;;  %v23180_v3 = vld [vmem:[#allocation97_spill] sm:$0xff] }
 0x353   : > { %3691 = vmatmul.mubr.f32.vlgmr.msra.gmra.mrb[0].mxu0 %v23085_v50  ;;  %v23179_v50 = vld [vmem:[#allocation100_spill] sm:$0xff] }
 0x354   : > { %12781 = vmatpush1.bf16.msra.mxu0 %v12780_v29  ;;  %3696 = vmatprep.mubr.f32.mxu0 %v23086_v31  ;;  %v23094_v29 = vld [vmem:[#allocation49_spill] sm:$0xff]  ;;  %v23177_v31 = vld [vmem:[#allocation95_spill] sm:$0xff] }
 0x355   : > { %12782 = vmatprep.subr.bf16.mxu0 %v22913_v6 }
 0x357   : > { %3698 = vmatmul.mubr.f32.gmra.mrb[2].mxu0 %v23087_v15  ;;  %v23176_v15 = vld [vmem:[#allocation89_spill] sm:$0xff] }
 0x358   : > { %3703 = vmatprep.mubr.f32.mxu0 %v23088_v2  ;;  %12784 = vmatpush1.bf16.msra.mxu0 %v12783_v32  ;;  %v23095_v32 = vld [vmem:[#allocation47_spill] sm:$0xff]  ;;  %v23114_v2 = vld [vmem:[#allocation90_spill] sm:$0xff] }
 0x359   : > { %12785 = vmatprep.subr.bf16.mxu0 %v22913_v6 }
 0x35b   : > { %3705 = vmatmul.mubr.f32.gmra.mrb[4].mxu0 %v23089_v43  ;;  %v23110_v43 = vld [vmem:[#allocation82_spill] sm:$0xff] }
 0x35c   : > { %3710 = vmatprep.mubr.f32.mxu0 %v23090_v11  ;;  %12787 = vmatpush1.bf16.msra.mxu0 %v12786_v48  ;;  %v12795_v48 = vpack.c.bf16 %v22985_v7, %v22984_v10  ;;  %v23109_v11 = vld [vmem:[#allocation75_spill] sm:$0xff] }
 0x35d   : > { %12788 = vmatprep.subr.bf16.mxu0 %v22913_v6 }
 0x35f   : > { %3712 = vmatmul.mubr.f32.gmra.mrb[6].mxu0 %v23092_v41  ;;  %v23097_v41 = vld [vmem:[#allocation51_spill] sm:$0xff] }
 0x360   : > { %3717 = vmatprep.mubr.f32.mxu0 %v23093_v24  ;;  %12790 = vmatpush1.bf16.msra.mxu0 %v12789_v49  ;;  %v12798_v49 = vpack.c.bf16 %v22997_v46, %v22996_v42  ;;  %v23098_v24 = vld [vmem:[#allocation57_spill] sm:$0xff] }
 0x361   : > { %12791 = vmatprep.subr.bf16.mxu0 %v22913_v6 }
 0x363   : > { %3719 = vmatmul.mubr.f32.gmra.mrb[8].mxu0 %v23094_v29  ;;  %v23099_v29 = vld [vmem:[#allocation55_spill] sm:$0xff] }
 0x364   : > { %3724 = vmatprep.mubr.f32.mxu0 %v23095_v32  ;;  %12793 = vmatpush1.bf16.msra.mxu0 %v12792_v23  ;;  %v12801_v23 = vpack.c.bf16 %v23012_v33, %v23011_v53  ;;  %v23100_v32 = vld [vmem:[#allocation61_spill] sm:$0xff] }
 0x365   : > { %12794 = vmatprep.subr.bf16.mxu0 %v22913_v6 }
 0x367   : > { %3726 = vmatmul.mubr.f32.gmra.mrb[10].mxu0 %v23096_v13  ;;  %v23101_v13 = vld [vmem:[#allocation59_spill] sm:$0xff] }
 0x368   : > { %3731 = vmatprep.mubr.f32.mxu0 %v23097_v41  ;;  %12796 = vmatpush1.bf16.msra.mxu0 %v12795_v48  ;;  %v12804_v48 = vpack.c.bf16 %v23027_v38, %v23026_v58  ;;  %v23102_v41 = vld [vmem:[#allocation65_spill] sm:$0xff] }
 0x369   : > { %12797 = vmatprep.subr.bf16.mxu0 %v22913_v6 }
 0x36b   : > { %3733 = vmatmul.mubr.f32.gmra.mrb[12].mxu0 %v23098_v24  ;;  %v23103_v24 = vld [vmem:[#allocation63_spill] sm:$0xff] }
 0x36c   : > { %3738 = vmatprep.mubr.f32.mxu0 %v23099_v29  ;;  %12799 = vmatpush1.bf16.msra.mxu0 %v12798_v49  ;;  %v23104_v49 = vld [vmem:[#allocation69_spill] sm:$0xff]  ;;  %v23105_v29 = vld [vmem:[#allocation67_spill] sm:$0xff] }
 0x36d   : > { %12800 = vmatprep.subr.bf16.mxu0 %v22913_v6 }
 0x36f   : > { %3740 = vmatmul.mubr.f32.gmra.mrb[14].mxu0 %v23100_v32  ;;  %v23106_v32 = vld [vmem:[#allocation73_spill] sm:$0xff] }
 0x370   : > { %3745 = vmatprep.mubr.f32.mxu0 %v23101_v13  ;;  %12802 = vmatpush1.bf16.msra.mxu0 %v12801_v23  ;;  %v23107_v13 = vld [vmem:[#allocation71_spill] sm:$0xff]  ;;  %v23108_v23 = vld [vmem:[#allocation77_spill] sm:$0xff] }
 0x371   : > { %12803 = vmatprep.subr.bf16.mxu0 %v22913_v6 }
 0x373   : > { %3747 = vmatmul.mubr.f32.gmra.mrb[16].mxu0 %v23102_v41  ;;  %v23111_v41 = vld [vmem:[#allocation80_spill] sm:$0xff] }
 0x374   : > { %3752 = vmatprep.mubr.f32.mxu0 %v23103_v24  ;;  %12805 = vmatpush1.bf16.msra.mxu0 %v12804_v48  ;;  %v23112_v24 = vld [vmem:[#allocation86_spill] sm:$0xff]  ;;  %v23113_v48 = vld [vmem:[#allocation84_spill] sm:$0xff] }
 0x375   : > { %12806 = vmatprep.subr.bf16.mxu0 %v22913_v6 }
 0x377   : > { %3754 = vmatmul.mubr.f32.gmra.mrb[18].mxu0 %v23104_v49  ;;  %v23115_v49 = vld [vmem:[#allocation88_spill] sm:$0xff] }
 0x378   : > { %3759 = vmatprep.mubr.f32.mxu0 %v23105_v29  ;;  %v23116_v29 = vld [vmem:[#allocation94_spill] sm:$0xff] }
 0x37b   : > { %3761 = vmatmul.mubr.f32.gmra.mrb[20].mxu0 %v23106_v32  ;;  %v23117_v32 = vld [vmem:[#allocation92_spill] sm:$0xff] }
 0x37c   : > { %3766 = vmatprep.mubr.f32.mxu0 %v23107_v13  ;;  %v23118_v13 = vld [vmem:[#allocation99_spill] sm:$0xff] }
 0x37f   : > { %3768 = vmatmul.mubr.f32.gmra.mrb[22].mxu0 %v23108_v23  ;;  %v23119_v23 = vld [vmem:[#allocation96_spill] sm:$0xff] }
 0x380   : > { %3773 = vmatprep.mubr.f32.mxu0 %v23109_v11  ;;  %v23120_v11 = vld [vmem:[#allocation104_spill] sm:$0xff] }
 0x383   : > { %3775 = vmatmul.mubr.f32.gmra.mrb[24].mxu0 %v23110_v43  ;;  %v23121_v43 = vld [vmem:[#allocation101_spill] sm:$0xff] }
 0x384   : > { %3780 = vmatprep.mubr.f32.mxu0 %v23111_v41  ;;  %v23122_v41 = vld [vmem:[#allocation107_spill] sm:$0xff] }
 0x387   : > { %3782 = vmatmul.mubr.f32.gmra.mrb[26].mxu0 %v23112_v24  ;;  %v23123_v24 = vld [vmem:[#allocation106_spill] sm:$0xff] }
 0x388   : > { %3787 = vmatprep.mubr.f32.mxu0 %v23113_v48  ;;  %v23124_v48 = vld [vmem:[#allocation12_spill] sm:$0xff] }
 0x38b   : > { %3789 = vmatmul.mubr.f32.gmra.mrb[28].mxu0 %v23114_v2  ;;  %v23125_v2 = vld [vmem:[#allocation9_spill] sm:$0xff] }
 0x38c   : > { %3794 = vmatprep.mubr.f32.mxu0 %v23115_v49  ;;  %v23126_v49 = vld [vmem:[#allocation110_spill] sm:$0xff] }
 0x38f   : > { %3796 = vmatmul.mubr.f32.gmra.mrb[30].mxu0 %v23116_v29  ;;  %v23127_v29 = vld [vmem:[#allocation10_spill] sm:$0xff] }
 0x390   : > { %3801 = vmatprep.mubr.f32.mxu0 %v23117_v32  ;;  %v23128_v32 = vld [vmem:[#allocation17_spill] sm:$0xff] }
 0x393   : > { %3803 = vmatmul.mubr.f32.gmra.mrb[32].mxu0 %v23118_v13  ;;  %v23129_v13 = vld [vmem:[#allocation79_spill] sm:$0xff] }
 0x394   : > { %3808 = vmatprep.mubr.f32.mxu0 %v23119_v23  ;;  %v23130_v23 = vld [vmem:[#allocation114_spill] sm:$0xff] }
 0x397   : > { %3810 = vmatmul.mubr.f32.gmra.mrb[34].mxu0 %v23120_v11  ;;  %v23131_v11 = vld [vmem:[#allocation16_spill] sm:$0xff] }
 0x398   : > { %3815 = vmatprep.mubr.f32.mxu0 %v23121_v43  ;;  %v23167_v43 = vld [vmem:[#allocation74_spill] sm:$0xff] }
 0x39b   : > { %3817 = vmatmul.mubr.f32.gmra.mrb[36].mxu0 %v23122_v41  ;;  %v23166_v41 = vld [vmem:[#allocation68_spill] sm:$0xff] }
 0x39c   : > { %3822 = vmatprep.mubr.f32.mxu0 %v23123_v24  ;;  %v23132_v24 = vld [vmem:[#allocation22_spill] sm:$0xff] }
 0x39f   : > { %3824 = vmatmul.mubr.f32.gmra.mrb[38].mxu0 %v23124_v48  ;;  %v23133_v48 = vld [vmem:[#allocation118_spill] sm:$0xff] }
 0x3a0   : > { %3829 = vmatprep.mubr.f32.mxu0 %v23125_v2  ;;  %v23165_v2 = vld [vmem:[#allocation70_spill] sm:$0xff] }
 0x3a3   : > { %3831 = vmatmul.mubr.f32.gmra.mrb[40].mxu0 %v23126_v49  ;;  %v23134_v49 = vld [vmem:[#allocation24_spill] sm:$0xff] }
 0x3a4   : > { %3836 = vmatprep.mubr.f32.mxu0 %v23127_v29  ;;  %v23135_v29 = vld [vmem:[#allocation124_spill] sm:$0xff] }
 0x3a7   : > { %3838 = vmatmul.mubr.f32.gmra.mrb[42].mxu0 %v23128_v32  ;;  %v23136_v32 = vld [vmem:[#allocation122_spill] sm:$0xff] }
 0x3a8   : > { %3843 = vmatprep.mubr.f32.mxu0 %v23129_v13  ;;  %v23164_v13 = vld [vmem:[#allocation30_spill] sm:$0xff] }
 0x3ab   : > { %3845 = vmatmul.mubr.f32.gmra.mrb[44].mxu0 %v23130_v23  ;;  %v23163_v23 = vld [vmem:[#allocation64_spill] sm:$0xff] }
 0x3ac   : > { %3850 = vmatprep.mubr.f32.mxu0 %v23131_v11  ;;  %v23162_v11 = vld [vmem:[#allocation66_spill] sm:$0xff] }
 0x3af   : > { %3852 = vmatmul.mubr.f32.gmra.mrb[46].mxu0 %v18090_v25  ;;  %v23161_v25 = vld [vmem:[#allocation29_spill] sm:$0xff] }
 0x3b0   : > { %3857 = vmatprep.mubr.f32.mxu0 %v18049_v8  ;;  %v23160_v8 = vld [vmem:[#allocation60_spill] sm:$0xff] }
 0x3b3   : > { %3859 = vmatmul.mubr.f32.gmra.mrb[48].mxu0 %v23132_v24  ;;  %v23159_v24 = vld [vmem:[#allocation62_spill] sm:$0xff] }
 0x3b4   : > { %3864 = vmatprep.mubr.f32.mxu0 %v23133_v48  ;;  %v23158_v48 = vld [vmem:[#allocation28_spill] sm:$0xff] }
 0x3b7   : > { %3866 = vmatmul.mubr.f32.gmra.mrb[50].mxu0 %v18240_v63  ;;  %v23157_v63 = vld [vmem:[#allocation56_spill] sm:$0xff] }
 0x3b8   : > { %3871 = vmatprep.mubr.f32.mxu0 %v23134_v49  ;;  %v23156_v49 = vld [vmem:[#allocation58_spill] sm:$0xff] }
 0x3bb   : > { %3873 = vmatmul.mubr.f32.gmra.mrb[52].mxu0 %v23135_v29  ;;  %v23155_v29 = vld [vmem:[#allocation23_spill] sm:$0xff] }
 0x3bc   : > { %3878 = vmatprep.mubr.f32.mxu0 %v23136_v32  ;;  %v23154_v32 = vld [vmem:[#allocation52_spill] sm:$0xff] }
 0x3bf   : > { %3880 = vmatmul.mubr.f32.gmra.mrb[54].mxu0 %v18342_v44  ;;  %v23153_v44 = vld [vmem:[#allocation54_spill] sm:$0xff] }
 0x3c0   : > { %3885 = vmatprep.mubr.f32.mxu0 %v18321_v39  ;;  %v23152_v39 = vld [vmem:[#allocation18_spill] sm:$0xff] }
 0x3c3   : > { %3887 = vmatmul.mubr.f32.gmra.mrb[56].mxu0 %v18344_v59  ;;  %v23151_v59 = vld [vmem:[#allocation48_spill] sm:$0xff] }
 0x3c4   : > { %3892 = vmatprep.mubr.f32.mxu0 %v18334_v40  ;;  %v23150_v40 = vld [vmem:[#allocation50_spill] sm:$0xff] }
 0x3c7   : > { %3894 = vmatmul.mubr.f32.gmra.mrb[58].mxu0 %v18416_v9  ;;  %v23149_v9 = vld [vmem:[#allocation15_spill] sm:$0xff] }
 0x3c8   : > { %3899 = vmatprep.mubr.f32.mxu0 %v18395_v21  ;;  %v23148_v21 = vld [vmem:[#allocation44_spill] sm:$0xff] }
 0x3cb   : > { %3901 = vmatmul.mubr.f32.gmra.mrb[60].mxu0 %v18418_v17  ;;  %v23137_v17 = vld [vmem:[#allocation3_spill] sm:$0xff] }
 0x3cc   : > { %3906 = vmatprep.mubr.f32.mxu0 %v18408_v30  ;;  %v23138_v30 = vld [vmem:[#allocation34_spill] sm:$0xff] }
 0x3cf   : > { %3908 = vmatmul.mubr.f32.gmra.mrb[62].mxu0 %v18479_v16  ;;  %v23139_v16 = vld [vmem:[#allocation4_spill] sm:$0xff] }
 0x3d0   : > { %3913 = vmatprep.mubr.f32.mxu0 %v18459_v19  ;;  %v23140_v19 = vld [vmem:[#allocation32_spill] sm:$0xff] }
 0x3d3   : > { %3915 = vmatmul.mubr.f32.gmra.mrb[64].mxu0 %v18481_v34  ;;  %v23147_v34 = vld [vmem:[#allocation46_spill] sm:$0xff] }
 0x3d4   : > { %3920 = vmatprep.mubr.f32.mxu0 %v18473_v1  ;;  %v23141_v1 = vld [vmem:[#allocation38_spill] sm:$0xff] }
 0x3d7   : > { %3922 = vmatmul.mubr.f32.gmra.mrb[66].mxu0 %v18537_v14  ;;  %v23142_v14 = vld [vmem:[#allocation36_spill] sm:$0xff] }
 0x3d8   : > { %3927 = vmatprep.mubr.f32.mxu0 %v18522_v57  ;;  %v23143_v57 = vld [vmem:[#allocation7_spill] sm:$0xff] }
 0x3db   : > { %3929 = vmatmul.mubr.f32.gmra.mrb[68].mxu0 %v18539_v12  ;;  %v23146_v12 = vld [vmem:[#allocation11_spill] sm:$0xff] }
 0x3dc   : > { %3934 = vmatprep.mubr.f32.mxu0 %v18533_v52  ;;  %v23144_v52 = vld [vmem:[#allocation42_spill] sm:$0xff] }
 0x3df   : > { %3936 = vmatmul.mubr.f32.gmra.mrb[70].mxu0 %v18575_v4  ;;  %v23145_v4 = vld [vmem:[#allocation40_spill] sm:$0xff] }
 0x3e0   : > { %4043 = vmatprep.mubr.f32.mxu0 %v23137_v17 }
 0x3e3   : > { %4046 = vmatmul.mubr.f32.vlgmr.msra.gmra.mrb[0].mxu0 %v23138_v30 }
 0x3e4   : > { %12808 = vmatpush1.bf16.msra.mxu0 %v23139_v16  ;;  %4052 = vmatprep.mubr.f32.mxu0 %v23140_v19  ;;  %v23178_v16 = vld [vmem:[#allocation93_spill] sm:$0xff] }
 0x3e5   : > { %12809 = vmatprep.subr.bf16.mxu0 %v22913_v6 }
 0x3e7   : > { %4055 = vmatmul.mubr.f32.gmra.mrb[2].mxu0 %v23141_v1 }
 0x3e8   : > { %4061 = vmatprep.mubr.f32.mxu0 %v23142_v14  ;;  %12811 = vmatpush1.bf16.msra.mxu0 %v23143_v57  ;;  %v23175_v57 = vld [vmem:[#allocation91_spill] sm:$0xff] }
 0x3e9   : > { %12812 = vmatprep.subr.bf16.mxu0 %v22913_v6 }
 0x3eb   : > { %4064 = vmatmul.mubr.f32.gmra.mrb[4].mxu0 %v23144_v52 }
 0x3ec   : > { %4070 = vmatprep.mubr.f32.mxu0 %v23145_v4  ;;  %12814 = vmatpush1.bf16.msra.mxu0 %v23146_v12  ;;  %v23173_v12 = vld [vmem:[#allocation87_spill] sm:$0xff] }
 0x3ed   : > { %12815 = vmatprep.subr.bf16.mxu0 %v22913_v6 }
 0x3ef   : > { %4073 = vmatmul.mubr.f32.gmra.mrb[6].mxu0 %v23147_v34 }
 0x3f0   : > { %4079 = vmatprep.mubr.f32.mxu0 %v23148_v21  ;;  %12817 = vmatpush1.bf16.msra.mxu0 %v23149_v9  ;;  %v23172_v9 = vld [vmem:[#allocation81_spill] sm:$0xff] }
 0x3f1   : > { %12818 = vmatprep.subr.bf16.mxu0 %v22913_v6 }
 0x3f3   : > { %4082 = vmatmul.mubr.f32.gmra.mrb[8].mxu0 %v23150_v40 }
 0x3f4   : > { %4088 = vmatprep.mubr.f32.mxu0 %v23151_v59  ;;  %12820 = vmatpush1.bf16.msra.mxu0 %v23152_v39  ;;  %v23171_v39 = vld [vmem:[#allocation83_spill] sm:$0xff] }
 0x3f5   : > { %12821 = vmatprep.subr.bf16.mxu0 %v22913_v6 }
 0x3f7   : > { %4091 = vmatmul.mubr.f32.gmra.mrb[10].mxu0 %v23153_v44 }
 0x3f8   : > { %4097 = vmatprep.mubr.f32.mxu0 %v23154_v32  ;;  %12823 = vmatpush1.bf16.msra.mxu0 %v23155_v29  ;;  %v23169_v29 = vld [vmem:[#allocation78_spill] sm:$0xff] }
 0x3f9   : > { %12824 = vmatprep.subr.bf16.mxu0 %v22913_v6 }
 0x3fb   : > { %4100 = vmatmul.mubr.f32.gmra.mrb[12].mxu0 %v23156_v49 }
 0x3fc   : > { %4106 = vmatprep.mubr.f32.mxu0 %v23157_v63  ;;  %12826 = vmatpush1.bf16.msra.mxu0 %v23158_v48  ;;  %v23168_v48 = vld [vmem:[#allocation72_spill] sm:$0xff] }
 0x3fd   : > { %12827 = vmatprep.subr.bf16.mxu0 %v22913_v6 }
 0x3ff   : > { %4109 = vmatmul.mubr.f32.gmra.mrb[14].mxu0 %v23159_v24 }
 0x400   : > { %4115 = vmatprep.mubr.f32.mxu0 %v23160_v8  ;;  %12829 = vmatpush1.bf16.msra.mxu0 %v23161_v25  ;;  %v23170_v25 = vld [vmem:[#allocation76_spill] sm:$0xff] }
 0x401   : > { %12830 = vmatprep.subr.bf16.mxu0 %v22913_v6 }
 0x403   : > { %4118 = vmatmul.mubr.f32.gmra.mrb[16].mxu0 %v23162_v11 }
 0x404   : > { %4124 = vmatprep.mubr.f32.mxu0 %v23163_v23  ;;  %12832 = vmatpush1.bf16.msra.mxu0 %v23164_v13  ;;  %v23174_v13 = vld [vmem:[#allocation85_spill] sm:$0xff] }
 0x405   : > { %12833 = vmatprep.subr.bf16.mxu0 %v22913_v6 }
 0x407   : > { %4127 = vmatmul.mubr.f32.gmra.mrb[18].mxu0 %v23165_v2 }
 0x408   : > { %4133 = vmatprep.mubr.f32.mxu0 %v23166_v41 }
 0x40b   : > { %4136 = vmatmul.mubr.f32.gmra.mrb[20].mxu0 %v23167_v43 }
 0x40c   : > { %4142 = vmatprep.mubr.f32.mxu0 %v23168_v48 }
 0x40f   : > { %4145 = vmatmul.mubr.f32.gmra.mrb[22].mxu0 %v23169_v29 }
 0x410   : > { %4151 = vmatprep.mubr.f32.mxu0 %v23170_v25  ;;  %v23181_v25 = vld [vmem:[#allocation105_spill] sm:$0xff] }
 0x413   : > { %4154 = vmatmul.mubr.f32.gmra.mrb[24].mxu0 %v23171_v39  ;;  %v23182_v39 = vld [vmem:[#allocation102_spill] sm:$0xff] }
 0x414   : > { %4160 = vmatprep.mubr.f32.mxu0 %v23172_v9  ;;  %v23183_v9 = vld [vmem:[#allocation108_spill] sm:$0xff] }
 0x417   : > { %4163 = vmatmul.mubr.f32.gmra.mrb[26].mxu0 %v23173_v12  ;;  %v23184_v12 = vld [vmem:[#allocation8_spill] sm:$0xff] }
 0x418   : > { %4169 = vmatprep.mubr.f32.mxu0 %v23174_v13  ;;  %v23185_v13 = vld [vmem:[#allocation112_spill] sm:$0xff] }
 0x41b   : > { %4172 = vmatmul.mubr.f32.gmra.mrb[28].mxu0 %v23175_v57  ;;  %v23186_v57 = vld [vmem:[#allocation109_spill] sm:$0xff] }
 0x41c   : > { %4178 = vmatprep.mubr.f32.mxu0 %v23176_v15  ;;  %v23187_v15 = vld [vmem:[#allocation113_spill] sm:$0xff] }
 0x41f   : > { %4181 = vmatmul.mubr.f32.gmra.mrb[30].mxu0 %v23177_v31  ;;  %v23188_v31 = vld [vmem:[#allocation111_spill] sm:$0xff] }
 0x420   : > { %4187 = vmatprep.mubr.f32.mxu0 %v23178_v16  ;;  %v23189_v16 = vld [vmem:[#allocation116_spill] sm:$0xff] }
 0x423   : > { %4190 = vmatmul.mubr.f32.gmra.mrb[32].mxu0 %v23179_v50  ;;  %v23190_v50 = vld [vmem:[#allocation13_spill] sm:$0xff] }
 0x424   : > { %4196 = vmatprep.mubr.f32.mxu0 %v23180_v3  ;;  %v23191_v3 = vld [vmem:[#allocation117_spill] sm:$0xff] }
 0x427   : > { %4199 = vmatmul.mubr.f32.gmra.mrb[34].mxu0 %v23181_v25  ;;  %v23192_v25 = vld [vmem:[#allocation115_spill] sm:$0xff] }
 0x428   : > { %4205 = vmatprep.mubr.f32.mxu0 %v23182_v39  ;;  %v23193_v39 = vld [vmem:[#allocation120_spill] sm:$0xff] }
 0x42b   : > { %4208 = vmatmul.mubr.f32.gmra.mrb[36].mxu0 %v23183_v9  ;;  %v23194_v9 = vld [vmem:[#allocation20_spill] sm:$0xff] }
 0x42c   : > { %4214 = vmatprep.mubr.f32.mxu0 %v23184_v12  ;;  %v23195_v12 = vld [vmem:[#allocation121_spill] sm:$0xff] }
 0x42f   : > { %4217 = vmatmul.mubr.f32.gmra.mrb[38].mxu0 %v23185_v13  ;;  %v23196_v13 = vld [vmem:[#allocation119_spill] sm:$0xff] }
 0x430   : > { %4223 = vmatprep.mubr.f32.mxu0 %v23186_v57  ;;  %v23197_v57 = vld [vmem:[#allocation125_spill] sm:$0xff] }
 0x433   : > { %4226 = vmatmul.mubr.f32.gmra.mrb[40].mxu0 %v23187_v15  ;;  %v23198_v15 = vld [vmem:[#allocation25_spill] sm:$0xff] }
 0x434   : > { %4232 = vmatprep.mubr.f32.mxu0 %v23188_v31  ;;  %v23199_v31 = vld [vmem:[#allocation126_spill] sm:$0xff] }
 0x437   : > { %4235 = vmatmul.mubr.f32.gmra.mrb[42].mxu0 %v23189_v16 }
 0x438   : > { %4241 = vmatprep.mubr.f32.mxu0 %v23190_v50 }
 0x43b   : > { %4244 = vmatmul.mubr.f32.gmra.mrb[44].mxu0 %v23191_v3 }
 0x43c   : > { %4250 = vmatprep.mubr.f32.mxu0 %v23192_v25  ;;  %v23200_v25 = vld [vmem:[#allocation130_spill] sm:$0xff] }
 0x43f   : > { %4253 = vmatmul.mubr.f32.gmra.mrb[46].mxu0 %v23193_v39 }
 0x440   : > { %4259 = vmatprep.mubr.f32.mxu0 %v23194_v9  ;;  %v23201_v9 = vld [vmem:[#allocation137_spill] sm:$0xff] }
 0x443   : > { %4262 = vmatmul.mubr.f32.gmra.mrb[48].mxu0 %v23195_v12  ;;  %v23202_v12 = vld [vmem:[#allocation132_spill] sm:$0xff] }
 0x444   : > { %4268 = vmatprep.mubr.f32.mxu0 %v23196_v13  ;;  %v23203_v13 = vld [vmem:[#allocation138_spill] sm:$0xff] }
 0x447   : > { %4271 = vmatmul.mubr.f32.gmra.mrb[50].mxu0 %v23197_v57  ;;  %v23204_v57 = vld [vmem:[#allocation136_spill] sm:$0xff] }
 0x448   : > { %4277 = vmatprep.mubr.f32.mxu0 %v23198_v15  ;;  %v23205_v15 = vld [vmem:[#allocation144_spill] sm:$0xff] }
 0x44b   : > { %4280 = vmatmul.mubr.f32.gmra.mrb[52].mxu0 %v23199_v31  ;;  %v23206_v31 = vld [vmem:[#allocation98_spill] sm:$0xff] }
 0x44c   : > { %4286 = vmatprep.mubr.f32.mxu0 %v18248_v56 }
 0x44f   : > { %4289 = vmatmul.mubr.f32.gmra.mrb[54].mxu0 %v18351_v5 }
 0x450   : > { %4295 = vmatprep.mubr.f32.mxu0 %v18332_v20 }
 0x453   : > { %4298 = vmatmul.mubr.f32.gmra.mrb[56].mxu0 %v23200_v25 }
 0x454   : > { %4304 = vmatprep.mubr.f32.mxu0 %v18348_v26  ;;  %v23207_v26 = vld [vmem:[#allocation151_spill] sm:$0xff] }
 0x457   : > { %4307 = vmatmul.mubr.f32.gmra.mrb[58].mxu0 %v23201_v9 }
 0x458   : > { %4313 = vmatprep.mubr.f32.mxu0 %v23202_v12 }
 0x45b   : > { %4316 = vmatmul.mubr.f32.gmra.mrb[60].mxu0 %v23203_v13 }
 0x45c   : > { %4322 = vmatprep.mubr.f32.mxu0 %v23204_v57  ;;  %v23208_v57 = vand.u32 4294901760, %v23137_v17  ;;  %v23215_v17 = vand.u32 4294901760, %v23141_v1  ;;  %v23222_v1 = vand.u32 4294901760, %v23091_v36  ;;  %v23246_v36 = vand.u32 4294901760, %v23166_v41  ;;  %v23256_v41 = vld [vmem:[#allocation87_spill] sm:$0xff] }
 0x45f   : > { %4325 = vmatmul.mubr.f32.gmra.mrb[62].mxu0 %v23205_v15  ;;  %v23209_v15 = vand.u32 4294901760, %v23083_v37  ;;  %v23238_v37 = vand.u32 4294901760, %v23012_v33  ;;  %v23244_v33 = vand.u32 4294901760, %v23163_v23 }
 0x460   : > { %4331 = vmatprep.mubr.f32.mxu0 %v23206_v31  ;;  %v23210_v31 = vand.u32 4294901760, %v23084_v45 }
 0x463   : > { %4334 = vmatmul.mubr.f32.gmra.mrb[64].mxu0 %v18491_v0  ;;  %v12834_v0 = vpack.c.bf16 %v23210_v31, %v23209_v15  ;;  %v23241_v31 = vand.u32 4294901760, %v23026_v58  ;;  %v23247_v58 = vand.u32 4294901760, %v23167_v43  ;;  %v23258_v43 = vld [vmem:[#allocation85_spill] sm:$0xff] }
 0x464   : > { %4340 = vmatprep.mubr.f32.mxu0 %v18485_v55  ;;  %v23211_v55 = vand.u32 4294901760, %v23138_v30  ;;  %v23217_v30 = vand.u32 4294901760, %v22929_v47  ;;  %v23223_v47 = vand.u32 4294901760, %v23147_v34  ;;  %v23229_v34 = vand.u32 4294901760, %v22984_v10 }
 0x465   : > { %v23235_v10 = vand.u32 4294901760, %v23156_v49  ;;  %v23252_v49 = vld [vmem:[#allocation83_spill] sm:$0xff] }
 0x466   : > { %v23253_v23 = vand.u32 4294901760, %v23252_v49  ;;  %v23307_v49 = vand.u32 4294901760, %v18351_v5  ;;  %v23315_v5 = vld [vmem:[#allocation136_spill] sm:$0xff] }
 0x467   : > { %4343 = vmatmul.mubr.f32.gmra.mrb[66].mxu0 %v18546_v51 }
 0x468   : > { %4349 = vmatprep.mubr.f32.mxu0 %v18531_v60  ;;  %v23212_v60 = vand.u32 4294901760, %v23140_v19 }
 0x46b   : > { %4352 = vmatmul.mubr.f32.gmra.mrb[68].mxu0 %v23207_v26  ;;  %v23213_v26 = vand.u32 4294901760, %v22916_v61  ;;  %v23219_v61 = vand.u32 4294901760, %v23144_v52  ;;  %v23226_v52 = vand.u32 4294901760, %v22966_v62  ;;  %v23232_v62 = vand.u32 4294901760, %v23154_v32 }
 0x46c   : > { %4358 = vmatprep.mubr.f32.mxu0 %v18543_v27  ;;  %v23214_v27 = vand.u32 4294901760, %v22917_v54  ;;  %v23220_v54 = vand.u32 4294901760, %v23145_v4 }
 0x46f   : > { %4361 = vmatmul.mubr.f32.gmra.mrb[70].mxu0 %v18578_v28  ;;  %v12837_v28 = vpack.c.bf16 %v23214_v27, %v23213_v26  ;;  %v23221_v26 = vand.u32 4294901760, %v22949_v18  ;;  %v23227_v18 = vand.u32 4294901760, %v23150_v40  ;;  %v23228_v27 = vand.u32 4294901760, %v23151_v59 }
 0x470   : > { %4451 = vmatprep.mubr.f32.mxu0 %v23208_v57  ;;  %v23216_v57 = vand.u32 4294901760, %v23142_v14  ;;  %v23233_v40 = vand.u32 4294901760, %v22996_v42  ;;  %v23234_v59 = vand.u32 4294901760, %v22997_v46  ;;  %v23239_v42 = vand.u32 4294901760, %v23159_v24  ;;  %v23250_v24 = vld [vmem:[#allocation76_spill] sm:$0xff] }
 0x471   : > { %v23240_v46 = vand.u32 4294901760, %v23160_v8  ;;  %v23245_v8 = vand.u32 4294901760, %v23165_v2  ;;  %v23251_v32 = vand.u32 4294901760, %v23250_v24  ;;  %v23254_v2 = vld [vmem:[#allocation81_spill] sm:$0xff]  ;;  %v23304_v24 = vld [vmem:[#allocation126_spill] sm:$0xff] }
 0x473   : > { %4455 = vmatmul.mubr.f32.vlgmr.msra.gmra.mrb[0].mxu0 %v23211_v55  ;;  %v23218_v55 = vand.u32 4294901760, %v22933_v35  ;;  %v23224_v35 = vand.u32 4294901760, %v23148_v21  ;;  %v23230_v21 = vand.u32 4294901760, %v22985_v7  ;;  %v23236_v7 = vand.u32 4294901760, %v23157_v63 }
 0x474   : > { %12835 = vmatpush1.bf16.msra.mxu0 %v12834_v0  ;;  %4462 = vmatprep.mubr.f32.mxu0 %v23212_v60  ;;  %v12843_v0 = vpack.c.bf16 %v23222_v1, %v23221_v26  ;;  %v23225_v60 = vand.u32 4294901760, %v22965_v22  ;;  %v23231_v22 = vand.u32 4294901760, %v23153_v44  ;;  %v23237_v44 = vand.u32 4294901760, %v23011_v53  ;;  %v23266_v26 = vld [vmem:[#allocation93_spill] sm:$0xff] }
 0x475   : > { %12836 = vmatprep.subr.bf16.mxu0 %v22913_v6  ;;  %v12840_v19 = vpack.c.bf16 %v23218_v55, %v23217_v30  ;;  %v12849_v4 = vpack.c.bf16 %v23230_v21, %v23229_v34  ;;  %v23242_v63 = vand.u32 4294901760, %v23027_v38  ;;  %v23243_v53 = vand.u32 4294901760, %v23162_v11  ;;  %v23276_v34 = vld [vmem:[#allocation108_spill] sm:$0xff] }
 0x476   : > { %v12846_v14 = vpack.c.bf16 %v23226_v52, %v23225_v60  ;;  %v12855_v45 = vpack.c.bf16 %v23238_v37, %v23237_v44  ;;  %v23248_v38 = vand.u32 4294901760, %v23168_v48  ;;  %v23249_v11 = vand.u32 4294901760, %v23169_v29  ;;  %v23260_v48 = vld [vmem:[#allocation91_spill] sm:$0xff]  ;;  %v23262_v29 = vld [vmem:[#allocation89_spill] sm:$0xff] }
 0x477   : > { %4466 = vmatmul.mubr.f32.gmra.mrb[2].mxu0 %v23215_v17  ;;  %v12858_v15 = vpack.c.bf16 %v23242_v63, %v23241_v31  ;;  %v23255_v17 = vand.u32 4294901760, %v23254_v2  ;;  %v23259_v30 = vand.u32 4294901760, %v23258_v43  ;;  %v23261_v55 = vand.u32 4294901760, %v23260_v48  ;;  %v23272_v52 = vld [vmem:[#allocation105_spill] sm:$0xff]  ;;  %v23286_v44 = vld [vmem:[#allocation111_spill] sm:$0xff] }
 0x478   : > { %4473 = vmatprep.mubr.f32.mxu0 %v23216_v57  ;;  %12838 = vmatpush1.bf16.msra.mxu0 %v12837_v28  ;;  %v12852_v28 = vpack.c.bf16 %v23234_v59, %v23233_v40  ;;  %v23257_v57 = vand.u32 4294901760, %v23256_v41  ;;  %v23267_v1 = vand.u32 4294901760, %v23266_v26  ;;  %v23277_v21 = vand.u32 4294901760, %v23276_v34  ;;  %v23282_v59 = vld [vmem:[#allocation109_spill] sm:$0xff]  ;;  %v23291_v31 = vld [vmem:[#allocation115_spill] sm:$0xff] }
 0x479   : > { %12839 = vmatprep.subr.bf16.mxu0 %v22913_v6  ;;  %v23287_v37 = vand.u32 4294901760, %v23286_v44  ;;  %v23292_v63 = vand.u32 4294901760, %v23291_v31  ;;  %v23309_v2 = vand.u32 4294901760, %v23200_v25  ;;  %v23313_v43 = vand.u32 4294901760, %v23202_v12  ;;  %v23319_v25 = vld [vmem:[#allocation98_spill] sm:$0xff]  ;;  %v23328_v26 = vld [vmem:[#allocation151_spill] sm:$0xff] }
 0x47a   : > { %v23325_v12 = vand.u32 4294901760, %v18546_v51  ;;  %v23337_v51 = vld [vmem:[#allocation31_spill] sm:$0xff]  ;;  %v23349_v44 = vld [vmem:[#allocation18_spill] sm:$0xff] }
 0x47b   : > { %4477 = vmatmul.mubr.f32.gmra.mrb[4].mxu0 %v23219_v61  ;;  %v23264_v61 = vld [vmem:[#allocation95_spill] sm:$0xff] }
 0x47c   : > { %4484 = vmatprep.mubr.f32.mxu0 %v23220_v54  ;;  %12841 = vmatpush1.bf16.msra.mxu0 %v12840_v19  ;;  %v23263_v19 = vand.u32 4294901760, %v23262_v29  ;;  %v23265_v54 = vand.u32 4294901760, %v23264_v61  ;;  %v23321_v29 = vld [vmem:[#allocation145_spill] sm:$0xff]  ;;  %v23339_v34 = vld [vmem:[#allocation35_spill] sm:$0xff] }
 0x47d   : > { %12842 = vmatprep.subr.bf16.mxu0 %v22913_v6  ;;  %v23354_v31 = vld [vmem:[#allocation55_spill] sm:$0xff] }
 0x47f   : > { %4488 = vmatmul.mubr.f32.gmra.mrb[6].mxu0 %v23223_v47 }
 0x480   : > { %4495 = vmatprep.mubr.f32.mxu0 %v23224_v35  ;;  %12844 = vmatpush1.bf16.msra.mxu0 %v12843_v0  ;;  %v23268_v0 = vld [vmem:[#allocation100_spill] sm:$0xff]  ;;  %v23270_v35 = vld [vmem:[#allocation97_spill] sm:$0xff] }
 0x481   : > { %12845 = vmatprep.subr.bf16.mxu0 %v22913_v6  ;;  %v23269_v47 = vand.u32 4294901760, %v23268_v0  ;;  %v23271_v60 = vand.u32 4294901760, %v23270_v35  ;;  %v23330_v0 = vld [vmem:[#allocation150_spill] sm:$0xff]  ;;  %v23332_v35 = vld [vmem:[#allocation153_spill] sm:$0xff] }
 0x483   : > { %4499 = vmatmul.mubr.f32.gmra.mrb[8].mxu0 %v23227_v18  ;;  %v23274_v18 = vld [vmem:[#allocation102_spill] sm:$0xff] }
 0x484   : > { %4506 = vmatprep.mubr.f32.mxu0 %v23228_v27  ;;  %12847 = vmatpush1.bf16.msra.mxu0 %v12846_v14  ;;  %v23273_v14 = vand.u32 4294901760, %v23272_v52  ;;  %v23275_v27 = vand.u32 4294901760, %v23274_v18  ;;  %v23334_v52 = vld [vmem:[#allocation2_spill] sm:$0xff]  ;;  %v23336_v18 = vld [vmem:[#allocation4_spill] sm:$0xff] }
 0x485   : > { %12848 = vmatprep.subr.bf16.mxu0 %v22913_v6 }
 0x487   : > { %4510 = vmatmul.mubr.f32.gmra.mrb[10].mxu0 %v23231_v22 }
 0x488   : > { %4517 = vmatprep.mubr.f32.mxu0 %v23232_v62  ;;  %12850 = vmatpush1.bf16.msra.mxu0 %v12849_v4  ;;  %v23278_v4 = vld [vmem:[#allocation8_spill] sm:$0xff] }
 0x489   : > { %12851 = vmatprep.subr.bf16.mxu0 %v22913_v6  ;;  %v23279_v22 = vand.u32 4294901760, %v23278_v4  ;;  %v23280_v62 = vld [vmem:[#allocation112_spill] sm:$0xff]  ;;  %v23341_v4 = vld [vmem:[#allocation41_spill] sm:$0xff] }
 0x48a   : > { %v23281_v40 = vand.u32 4294901760, %v23280_v62  ;;  %v23343_v62 = vld [vmem:[#allocation11_spill] sm:$0xff] }
 0x48b   : > { %4521 = vmatmul.mubr.f32.gmra.mrb[12].mxu0 %v23235_v10  ;;  %v23284_v10 = vld [vmem:[#allocation113_spill] sm:$0xff] }
 0x48c   : > { %4528 = vmatprep.mubr.f32.mxu0 %v23236_v7  ;;  %12853 = vmatpush1.bf16.msra.mxu0 %v12852_v28  ;;  %v23283_v28 = vand.u32 4294901760, %v23282_v59  ;;  %v23285_v7 = vand.u32 4294901760, %v23284_v10  ;;  %v23345_v59 = vld [vmem:[#allocation43_spill] sm:$0xff]  ;;  %v23347_v10 = vld [vmem:[#allocation49_spill] sm:$0xff] }
 0x48d   : > { %12854 = vmatprep.subr.bf16.mxu0 %v22913_v6 }
 0x48f   : > { %4532 = vmatmul.mubr.f32.gmra.mrb[14].mxu0 %v23239_v42  ;;  %v23289_v42 = vand.u32 4294901760, %v23190_v50  ;;  %v23300_v50 = vld [vmem:[#allocation125_spill] sm:$0xff] }
 0x490   : > { %4539 = vmatprep.mubr.f32.mxu0 %v23240_v46  ;;  %12856 = vmatpush1.bf16.msra.mxu0 %v12855_v45  ;;  %v23288_v45 = vand.u32 4294901760, %v23189_v16  ;;  %v23290_v46 = vand.u32 4294901760, %v23191_v3  ;;  %v23298_v16 = vld [vmem:[#allocation119_spill] sm:$0xff]  ;;  %v23302_v3 = vld [vmem:[#allocation25_spill] sm:$0xff] }
 0x491   : > { %12857 = vmatprep.subr.bf16.mxu0 %v22913_v6 }
 0x493   : > { %4543 = vmatmul.mubr.f32.gmra.mrb[16].mxu0 %v23243_v53  ;;  %v23294_v53 = vld [vmem:[#allocation20_spill] sm:$0xff] }
 0x494   : > { %4550 = vmatprep.mubr.f32.mxu0 %v23244_v33  ;;  %12859 = vmatpush1.bf16.msra.mxu0 %v12858_v15  ;;  %v23293_v15 = vand.u32 4294901760, %v23193_v39  ;;  %v23295_v33 = vand.u32 4294901760, %v23294_v53  ;;  %v23306_v39 = vand.u32 4294901760, %v18248_v56  ;;  %v23314_v56 = vand.u32 4294901760, %v23203_v13  ;;  %v23326_v13 = vld [vmem:[#allocation103_spill] sm:$0xff] }
 0x495   : > { %12860 = vmatprep.subr.bf16.mxu0 %v22913_v6  ;;  %v23357_v53 = vld [vmem:[#allocation59_spill] sm:$0xff] }
 0x497   : > { %4554 = vmatmul.mubr.f32.gmra.mrb[18].mxu0 %v23245_v8  ;;  %v23296_v8 = vld [vmem:[#allocation121_spill] sm:$0xff] }
 0x498   : > { %4561 = vmatprep.mubr.f32.mxu0 %v23246_v36  ;;  %v23297_v36 = vand.u32 4294901760, %v23296_v8  ;;  %v23359_v8 = vld [vmem:[#allocation65_spill] sm:$0xff] }
 0x49b   : > { %4565 = vmatmul.mubr.f32.gmra.mrb[20].mxu0 %v23247_v58  ;;  %v23299_v58 = vand.u32 4294901760, %v23298_v16  ;;  %v23361_v16 = vld [vmem:[#allocation30_spill] sm:$0xff] }
 0x49c   : > { %4572 = vmatprep.mubr.f32.mxu0 %v23248_v38  ;;  %v23301_v38 = vand.u32 4294901760, %v23300_v50  ;;  %v23363_v50 = vld [vmem:[#allocation67_spill] sm:$0xff] }
 0x49f   : > { %4576 = vmatmul.mubr.f32.gmra.mrb[22].mxu0 %v23249_v11  ;;  %v23303_v11 = vand.u32 4294901760, %v23302_v3  ;;  %v23365_v3 = vld [vmem:[#allocation71_spill] sm:$0xff] }
 0x4a0   : > { %4583 = vmatprep.mubr.f32.mxu0 %v23251_v32  ;;  %v23305_v32 = vand.u32 4294901760, %v23304_v24  ;;  %v23367_v24 = vld [vmem:[#allocation75_spill] sm:$0xff] }
 0x4a3   : > { %4587 = vmatmul.mubr.f32.gmra.mrb[24].mxu0 %v23253_v23  ;;  %v23308_v23 = vand.u32 4294901760, %v18332_v20  ;;  %v23317_v20 = vld [vmem:[#allocation144_spill] sm:$0xff] }
 0x4a4   : > { %4594 = vmatprep.mubr.f32.mxu0 %v23255_v17  ;;  %v23310_v17 = vld [vmem:[#allocation129_spill] sm:$0xff]  ;;  %v23318_v48 = vand.u32 4294901760, %v23317_v20  ;;  %v23381_v20 = vld [vmem:[#allocation106_spill] sm:$0xff] }
 0x4a5   : > { %v23311_v41 = vand.u32 4294901760, %v23310_v17  ;;  %v23374_v17 = vld [vmem:[#allocation94_spill] sm:$0xff] }
 0x4a7   : > { %4598 = vmatmul.mubr.f32.gmra.mrb[26].mxu0 %v23257_v57  ;;  %v23312_v57 = vand.u32 4294901760, %v23201_v9  ;;  %v23323_v9 = vld [vmem:[#allocation143_spill] sm:$0xff] }
 0x4a8   : > { %4605 = vmatprep.mubr.f32.mxu0 %v23259_v30  ;;  %v23316_v30 = vand.u32 4294901760, %v23315_v5  ;;  %v23324_v61 = vand.u32 4294901760, %v23323_v9  ;;  %v23379_v5 = vld [vmem:[#allocation101_spill] sm:$0xff]  ;;  %v23387_v9 = vld [vmem:[#allocation79_spill] sm:$0xff] }
 0x4ab   : > { %4609 = vmatmul.mubr.f32.gmra.mrb[28].mxu0 %v23261_v55  ;;  %v23320_v55 = vand.u32 4294901760, %v23319_v25  ;;  %v23383_v25 = vld [vmem:[#allocation9_spill] sm:$0xff] }
 0x4ac   : > { %4616 = vmatprep.mubr.f32.mxu0 %v23263_v19  ;;  %v23322_v19 = vand.u32 4294901760, %v23321_v29  ;;  %v23385_v29 = vld [vmem:[#allocation10_spill] sm:$0xff] }
 0x4af   : > { %4620 = vmatmul.mubr.f32.gmra.mrb[30].mxu0 %v23265_v54  ;;  %v23327_v54 = vand.u32 4294901760, %v23326_v13  ;;  %v23390_v13 = vld [vmem:[#allocation21_spill] sm:$0xff] }
 0x4b0   : > { %4627 = vmatprep.mubr.f32.mxu0 %v23267_v1  ;;  %v23329_v1 = vand.u32 4294901760, %v23328_v26  ;;  %v23392_v26 = vld [vmem:[#allocation22_spill] sm:$0xff] }
 0x4b3   : > { %4631 = vmatmul.mubr.f32.gmra.mrb[32].mxu0 %v23269_v47  ;;  %v23331_v47 = vand.u32 4294901760, %v23330_v0  ;;  %v23394_v0 = vld [vmem:[#allocation123_spill] sm:$0xff] }
 0x4b4   : > { %4638 = vmatprep.mubr.f32.mxu0 %v23271_v60  ;;  %v23333_v60 = vand.u32 4294901760, %v23332_v35  ;;  %v23396_v35 = vld [vmem:[#allocation124_spill] sm:$0xff] }
 0x4b7   : > { %4642 = vmatmul.mubr.f32.gmra.mrb[34].mxu0 %v23273_v14  ;;  %v23335_v14 = vld [vmem:[#allocation33_spill] sm:$0xff] }
 0x4b8   : > { %4649 = vmatprep.mubr.f32.mxu0 %v23275_v27  ;;  %v23338_v27 = vld [vmem:[#allocation37_spill] sm:$0xff] }
 0x4bb   : > { %4653 = vmatmul.mubr.f32.gmra.mrb[36].mxu0 %v23277_v21  ;;  %v23340_v21 = vld [vmem:[#allocation7_spill] sm:$0xff] }
 0x4bc   : > { %4660 = vmatprep.mubr.f32.mxu0 %v23279_v22  ;;  %v23342_v22 = vld [vmem:[#allocation39_spill] sm:$0xff] }
 0x4bf   : > { %4664 = vmatmul.mubr.f32.gmra.mrb[38].mxu0 %v23281_v40  ;;  %v23344_v40 = vld [vmem:[#allocation45_spill] sm:$0xff] }
 0x4c0   : > { %4671 = vmatprep.mubr.f32.mxu0 %v23283_v28  ;;  %v23346_v28 = vld [vmem:[#allocation15_spill] sm:$0xff] }
 0x4c3   : > { %4675 = vmatmul.mubr.f32.gmra.mrb[40].mxu0 %v23285_v7  ;;  %v23348_v7 = vld [vmem:[#allocation47_spill] sm:$0xff] }
 0x4c4   : > { %4682 = vmatprep.mubr.f32.mxu0 %v23287_v37  ;;  %v23350_v37 = vld [vmem:[#allocation53_spill] sm:$0xff] }
 0x4c7   : > { %4686 = vmatmul.mubr.f32.gmra.mrb[42].mxu0 %v23288_v45  ;;  %v23351_v45 = vld [vmem:[#allocation51_spill] sm:$0xff] }
 0x4c8   : > { %4693 = vmatprep.mubr.f32.mxu0 %v23289_v42  ;;  %v23352_v42 = vld [vmem:[#allocation23_spill] sm:$0xff] }
 0x4cb   : > { %4697 = vmatmul.mubr.f32.gmra.mrb[44].mxu0 %v23290_v46  ;;  %v23353_v46 = vld [vmem:[#allocation57_spill] sm:$0xff] }
 0x4cc   : > { %4704 = vmatprep.mubr.f32.mxu0 %v23292_v63  ;;  %v23355_v63 = vld [vmem:[#allocation28_spill] sm:$0xff] }
 0x4cf   : > { %4708 = vmatmul.mubr.f32.gmra.mrb[46].mxu0 %v23293_v15  ;;  %v23356_v15 = vld [vmem:[#allocation61_spill] sm:$0xff] }
 0x4d0   : > { %4715 = vmatprep.mubr.f32.mxu0 %v23295_v33  ;;  %v23358_v33 = vld [vmem:[#allocation29_spill] sm:$0xff] }
 0x4d3   : > { %4719 = vmatmul.mubr.f32.gmra.mrb[48].mxu0 %v23297_v36  ;;  %v23360_v36 = vld [vmem:[#allocation63_spill] sm:$0xff] }
 0x4d4   : > { %4726 = vmatprep.mubr.f32.mxu0 %v23299_v58  ;;  %v23362_v58 = vld [vmem:[#allocation69_spill] sm:$0xff] }
 0x4d7   : > { %4730 = vmatmul.mubr.f32.gmra.mrb[50].mxu0 %v23301_v38  ;;  %v23364_v38 = vld [vmem:[#allocation73_spill] sm:$0xff] }
 0x4d8   : > { %4737 = vmatprep.mubr.f32.mxu0 %v23303_v11  ;;  %v23366_v11 = vld [vmem:[#allocation77_spill] sm:$0xff] }
 0x4db   : > { %4741 = vmatmul.mubr.f32.gmra.mrb[52].mxu0 %v23305_v32  ;;  %v23368_v32 = vld [vmem:[#allocation82_spill] sm:$0xff] }
 0x4dc   : > { %4748 = vmatprep.mubr.f32.mxu0 %v23306_v39  ;;  %v23370_v39 = vld [vmem:[#allocation86_spill] sm:$0xff] }
 0x4df   : > { %4752 = vmatmul.mubr.f32.gmra.mrb[54].mxu0 %v23307_v49  ;;  %v23371_v49 = vld [vmem:[#allocation84_spill] sm:$0xff] }
 0x4e0   : > { %4759 = vmatprep.mubr.f32.mxu0 %v23308_v23  ;;  %v23372_v23 = vld [vmem:[#allocation90_spill] sm:$0xff] }
 0x4e3   : > { %4763 = vmatmul.mubr.f32.gmra.mrb[56].mxu0 %v23309_v2  ;;  %v23373_v2 = vld [vmem:[#allocation88_spill] sm:$0xff] }
 0x4e4   : > { %4770 = vmatprep.mubr.f32.mxu0 %v23311_v41  ;;  %v23375_v41 = vld [vmem:[#allocation92_spill] sm:$0xff] }
 0x4e7   : > { %4774 = vmatmul.mubr.f32.gmra.mrb[58].mxu0 %v23312_v57  ;;  %v23376_v57 = vld [vmem:[#allocation99_spill] sm:$0xff] }
 0x4e8   : > { %4781 = vmatprep.mubr.f32.mxu0 %v23313_v43  ;;  %v23377_v43 = vld [vmem:[#allocation96_spill] sm:$0xff] }
 0x4eb   : > { %4785 = vmatmul.mubr.f32.gmra.mrb[60].mxu0 %v23314_v56  ;;  %v23378_v56 = vld [vmem:[#allocation104_spill] sm:$0xff] }
 0x4ec   : > { %4792 = vmatprep.mubr.f32.mxu0 %v23316_v30  ;;  %v23380_v30 = vld [vmem:[#allocation107_spill] sm:$0xff] }
 0x4ef   : > { %4796 = vmatmul.mubr.f32.gmra.mrb[62].mxu0 %v23318_v48  ;;  %v23382_v48 = vld [vmem:[#allocation12_spill] sm:$0xff] }
 0x4f0   : > { %4803 = vmatprep.mubr.f32.mxu0 %v23320_v55  ;;  %v23384_v55 = vld [vmem:[#allocation110_spill] sm:$0xff] }
 0x4f3   : > { %4807 = vmatmul.mubr.f32.gmra.mrb[64].mxu0 %v23322_v19  ;;  %v23386_v19 = vld [vmem:[#allocation17_spill] sm:$0xff] }
 0x4f4   : > { %4814 = vmatprep.mubr.f32.mxu0 %v23324_v61  ;;  %v23388_v61 = vld [vmem:[#allocation114_spill] sm:$0xff] }
 0x4f7   : > { %4818 = vmatmul.mubr.f32.gmra.mrb[66].mxu0 %v23325_v12  ;;  %v23389_v12 = vld [vmem:[#allocation16_spill] sm:$0xff] }
 0x4f8   : > { %4825 = vmatprep.mubr.f32.mxu0 %v23327_v54  ;;  %v23391_v54 = vld [vmem:[#allocation19_spill] sm:$0xff] }
 0x4fb   : > { %4829 = vmatmul.mubr.f32.gmra.mrb[68].mxu0 %v23329_v1  ;;  %v23393_v1 = vld [vmem:[#allocation118_spill] sm:$0xff] }
 0x4fc   : > { %4836 = vmatprep.mubr.f32.mxu0 %v23331_v47  ;;  %v23395_v47 = vld [vmem:[#allocation24_spill] sm:$0xff] }
 0x4ff   : > { %4840 = vmatmul.mubr.f32.gmra.mrb[70].mxu0 %v23333_v60  ;;  %v23397_v60 = vld [vmem:[#allocation122_spill] sm:$0xff] }
 0x500   : > { %4964 = vmatprep.mubr.f32.mxu0 %v23334_v52 }
 0x503   : > { %4966 = vmatmul.mubr.f32.vlgmr.msra.gmra.mrb[0].mxu0 %v23335_v14 }
 0x504   : > { %12862 = vmatpush1.bf16.msra.mxu0 %v23336_v18  ;;  %4971 = vmatprep.mubr.f32.mxu0 %v23337_v51  ;;  %v23398_v18 = vld [vmem:[#allocation127_spill] sm:$0xff] }
 0x505   : > { %12863 = vmatprep.subr.bf16.mxu0 %v22913_v6 }
 0x507   : > { %4973 = vmatmul.mubr.f32.gmra.mrb[2].mxu0 %v23338_v27 }
 0x508   : > { %4978 = vmatprep.mubr.f32.mxu0 %v23339_v34  ;;  %12865 = vmatpush1.bf16.msra.mxu0 %v23340_v21  ;;  %v23399_v21 = vld [vmem:[#allocation26_spill] sm:$0xff] }
 0x509   : > { %12866 = vmatprep.subr.bf16.mxu0 %v22913_v6 }
 0x50b   : > { %4980 = vmatmul.mubr.f32.gmra.mrb[4].mxu0 %v23341_v4 }
 0x50c   : > { %4985 = vmatprep.mubr.f32.mxu0 %v23342_v22  ;;  %12868 = vmatpush1.bf16.msra.mxu0 %v23343_v62  ;;  %v23400_v62 = vld [vmem:[#allocation128_spill] sm:$0xff] }
 0x50d   : > { %12869 = vmatprep.subr.bf16.mxu0 %v22913_v6 }
 0x50f   : > { %4987 = vmatmul.mubr.f32.gmra.mrb[6].mxu0 %v23344_v40 }
 0x510   : > { %4992 = vmatprep.mubr.f32.mxu0 %v23345_v59  ;;  %12871 = vmatpush1.bf16.msra.mxu0 %v23346_v28  ;;  %v23401_v28 = vld [vmem:[#allocation27_spill] sm:$0xff] }
 0x511   : > { %12872 = vmatprep.subr.bf16.mxu0 %v22913_v6 }
 0x513   : > { %4994 = vmatmul.mubr.f32.gmra.mrb[8].mxu0 %v23347_v10 }
 0x514   : > { %4999 = vmatprep.mubr.f32.mxu0 %v23348_v7  ;;  %12874 = vmatpush1.bf16.msra.mxu0 %v23349_v44  ;;  %v23402_v44 = vld [vmem:[#allocation134_spill] sm:$0xff] }
 0x515   : > { %12875 = vmatprep.subr.bf16.mxu0 %v22913_v6 }
 0x517   : > { %5001 = vmatmul.mubr.f32.gmra.mrb[10].mxu0 %v23350_v37 }
 0x518   : > { %5006 = vmatprep.mubr.f32.mxu0 %v23351_v45  ;;  %12877 = vmatpush1.bf16.msra.mxu0 %v23352_v42  ;;  %v23403_v42 = vld [vmem:[#allocation131_spill] sm:$0xff] }
 0x519   : > { %12878 = vmatprep.subr.bf16.mxu0 %v22913_v6 }
 0x51b   : > { %5008 = vmatmul.mubr.f32.gmra.mrb[12].mxu0 %v23353_v46 }
 0x51c   : > { %5013 = vmatprep.mubr.f32.mxu0 %v23354_v31  ;;  %12880 = vmatpush1.bf16.msra.mxu0 %v23355_v63  ;;  %v23404_v63 = vld [vmem:[#allocation135_spill] sm:$0xff] }
 0x51d   : > { %12881 = vmatprep.subr.bf16.mxu0 %v22913_v6 }
 0x51f   : > { %5015 = vmatmul.mubr.f32.gmra.mrb[14].mxu0 %v23356_v15 }
 0x520   : > { %5020 = vmatprep.mubr.f32.mxu0 %v23357_v53  ;;  %12883 = vmatpush1.bf16.msra.mxu0 %v23358_v33  ;;  %v23405_v33 = vld [vmem:[#allocation133_spill] sm:$0xff] }
 0x521   : > { %12884 = vmatprep.subr.bf16.mxu0 %v22913_v6  ;;  %v23369_v6 = vld [vmem:[#allocation80_spill] sm:$0xff] }
 0x523   : > { %5022 = vmatmul.mubr.f32.gmra.mrb[16].mxu0 %v23359_v8 }
 0x524   : > { %5027 = vmatprep.mubr.f32.mxu0 %v23360_v36  ;;  %12886 = vmatpush1.bf16.msra.mxu0 %v23361_v16  ;;  %v23406_v16 = vld [vmem:[#allocation141_spill] sm:$0xff] }
 0x527   : > { %5029 = vmatmul.mubr.f32.gmra.mrb[18].mxu0 %v23362_v58 }
 0x528   : > { %5034 = vmatprep.mubr.f32.mxu0 %v23363_v50 }
 0x52b   : > { %5036 = vmatmul.mubr.f32.gmra.mrb[20].mxu0 %v23364_v38 }
 0x52c   : > { %5041 = vmatprep.mubr.f32.mxu0 %v23365_v3 }
 0x52f   : > { %5043 = vmatmul.mubr.f32.gmra.mrb[22].mxu0 %v23366_v11 }
 0x530   : > { %5048 = vmatprep.mubr.f32.mxu0 %v23367_v24 }
 0x533   : > { %5050 = vmatmul.mubr.f32.gmra.mrb[24].mxu0 %v23368_v32 }
 0x534   : > { %5055 = vmatprep.mubr.f32.mxu0 %v23369_v6 }
 0x537   : > { %5057 = vmatmul.mubr.f32.gmra.mrb[26].mxu0 %v23370_v39 }
 0x538   : > { %5062 = vmatprep.mubr.f32.mxu0 %v23371_v49 }
 0x53b   : > { %5064 = vmatmul.mubr.f32.gmra.mrb[28].mxu0 %v23372_v23 }
 0x53c   : > { %5069 = vmatprep.mubr.f32.mxu0 %v23373_v2 }
 0x53f   : > { %5071 = vmatmul.mubr.f32.gmra.mrb[30].mxu0 %v23374_v17 }
 0x540   : > { %5076 = vmatprep.mubr.f32.mxu0 %v23375_v41 }
 0x543   : > { %5078 = vmatmul.mubr.f32.gmra.mrb[32].mxu0 %v23376_v57 }
 0x544   : > { %5083 = vmatprep.mubr.f32.mxu0 %v23377_v43 }
 0x547   : > { %5085 = vmatmul.mubr.f32.gmra.mrb[34].mxu0 %v23378_v56 }
 0x548   : > { %5090 = vmatprep.mubr.f32.mxu0 %v23379_v5 }
 0x54b   : > { %5092 = vmatmul.mubr.f32.gmra.mrb[36].mxu0 %v23380_v30 }
 0x54c   : > { %5097 = vmatprep.mubr.f32.mxu0 %v23381_v20 }
 0x54f   : > { %5099 = vmatmul.mubr.f32.gmra.mrb[38].mxu0 %v23382_v48 }
 0x550   : > { %5104 = vmatprep.mubr.f32.mxu0 %v23383_v25 }
 0x553   : > { %5106 = vmatmul.mubr.f32.gmra.mrb[40].mxu0 %v23384_v55 }
 0x554   : > { %5111 = vmatprep.mubr.f32.mxu0 %v23385_v29 }
 0x557   : > { %5113 = vmatmul.mubr.f32.gmra.mrb[42].mxu0 %v23386_v19 }
 0x558   : > { %5118 = vmatprep.mubr.f32.mxu0 %v23387_v9 }
 0x55b   : > { %5120 = vmatmul.mubr.f32.gmra.mrb[44].mxu0 %v23388_v61 }
 0x55c   : > { %5125 = vmatprep.mubr.f32.mxu0 %v23389_v12 }
 0x55f   : > { %5127 = vmatmul.mubr.f32.gmra.mrb[46].mxu0 %v23390_v13 }
 0x560   : > { %5132 = vmatprep.mubr.f32.mxu0 %v23391_v54 }
 0x563   : > { %5134 = vmatmul.mubr.f32.gmra.mrb[48].mxu0 %v23392_v26 }
 0x564   : > { %5139 = vmatprep.mubr.f32.mxu0 %v23393_v1 }
 0x567   : > { %5141 = vmatmul.mubr.f32.gmra.mrb[50].mxu0 %v23394_v0 }
 0x568   : > { %5146 = vmatprep.mubr.f32.mxu0 %v23395_v47 }
 0x56b   : > { %5148 = vmatmul.mubr.f32.gmra.mrb[52].mxu0 %v23396_v35  ;;  %v23407_v35 = vld [vmem:[#allocation139_spill] sm:$0xff] }
 0x56c   : > { %5153 = vmatprep.mubr.f32.mxu0 %v23397_v60  ;;  %v23408_v60 = vld [vmem:[#allocation142_spill] sm:$0xff] }
 0x56f   : > { %5155 = vmatmul.mubr.f32.gmra.mrb[54].mxu0 %v23398_v18  ;;  %v23409_v18 = vld [vmem:[#allocation140_spill] sm:$0xff] }
 0x570   : > { %5160 = vmatprep.mubr.f32.mxu0 %v23399_v21  ;;  %v23410_v21 = vld [vmem:[#allocation148_spill] sm:$0xff] }
 0x573   : > { %5162 = vmatmul.mubr.f32.gmra.mrb[56].mxu0 %v23400_v62  ;;  %v23411_v62 = vld [vmem:[#allocation146_spill] sm:$0xff] }
 0x574   : > { %5167 = vmatprep.mubr.f32.mxu0 %v23401_v28  ;;  %v23412_v28 = vld [vmem:[#allocation149_spill] sm:$0xff] }
 0x577   : > { %5169 = vmatmul.mubr.f32.gmra.mrb[58].mxu0 %v23402_v44  ;;  %v23413_v44 = vld [vmem:[#allocation147_spill] sm:$0xff] }
 0x578   : > { %5174 = vmatprep.mubr.f32.mxu0 %v23403_v42  ;;  %v23414_v42 = vld [vmem:[#allocation152_spill] sm:$0xff] }
 0x57b   : > { %5176 = vmatmul.mubr.f32.gmra.mrb[60].mxu0 %v23404_v63 }
 0x57c   : > { %5181 = vmatprep.mubr.f32.mxu0 %v23405_v33 }
 0x57f   : > { %5183 = vmatmul.mubr.f32.gmra.mrb[62].mxu0 %v23406_v16 }
 0x580   : > { %5188 = vmatprep.mubr.f32.mxu0 %v23407_v35 }
 0x583   : > { %5190 = vmatmul.mubr.f32.gmra.mrb[64].mxu0 %v23408_v60 }
 0x584   : > { %5195 = vmatprep.mubr.f32.mxu0 %v23409_v18 }
 0x587   : > { %5197 = vmatmul.mubr.f32.gmra.mrb[66].mxu0 %v23410_v21 }
 0x588   : > { %5202 = vmatprep.mubr.f32.mxu0 %v23411_v62 }
 0x58b   : > { %5204 = vmatmul.mubr.f32.gmra.mrb[68].mxu0 %v23412_v28 }
 0x58c   : > { %5209 = vmatprep.mubr.f32.mxu0 %v23413_v44 }
 0x58f   : > { %5211 = vmatmul.mubr.f32.gmra.mrb[70].mxu0 %v23414_v42 }
 0x590   : > { %5299 = vmatprep.mubr.f32.mxu0 %v23334_v52  ;;  %v23415_v52 = vld [vmem:[#allocation124_spill] sm:$0xff] }
 0x593   : > { %5301 = vmatmul.mubr.f32.vlgmr.msra.gmra.mrb[0].mxu0 %v23335_v14  ;;  %v23416_v14 = vld [vmem:[#allocation122_spill] sm:$0xff] }
 0x594   : > { %5306 = vmatprep.mubr.f32.mxu0 %v23337_v51  ;;  %v23417_v51 = vld [vmem:[#allocation127_spill] sm:$0xff] }
 0x597   : > { %5308 = vmatmul.mubr.f32.gmra.mrb[2].mxu0 %v23338_v27  ;;  %v23418_v27 = vld [vmem:[#allocation26_spill] sm:$0xff] }
 0x598   : > { %5313 = vmatprep.mubr.f32.mxu0 %v23339_v34  ;;  %v23419_v34 = vld [vmem:[#allocation128_spill] sm:$0xff] }
 0x59b   : > { %5315 = vmatmul.mubr.f32.gmra.mrb[4].mxu0 %v23341_v4  ;;  %v23420_v4 = vld [vmem:[#allocation27_spill] sm:$0xff] }
 0x59c   : > { %5320 = vmatprep.mubr.f32.mxu0 %v23342_v22  ;;  %v23421_v22 = vld [vmem:[#allocation134_spill] sm:$0xff] }
 0x59f   : > { %5322 = vmatmul.mubr.f32.gmra.mrb[6].mxu0 %v23344_v40  ;;  %v23422_v40 = vld [vmem:[#allocation131_spill] sm:$0xff] }
 0x5a0   : > { %5327 = vmatprep.mubr.f32.mxu0 %v23345_v59  ;;  %v19126_v59 = vld [vmem:[%s21819_s3 + $0x8] sm:$0xff] }
 0x5a3   : > { %5329 = vmatmul.mubr.f32.gmra.mrb[8].mxu0 %v23347_v10  ;;  %v19129_v10 = vand.u32 4294901760, %v19126_v59 }
 0x5a4   : > { %5334 = vmatprep.mubr.f32.mxu0 %v23348_v7  ;;  %v19136_v7 = vld [vmem:[%s21818_s2] ss:$0 sm:$0xff] }
 0x5a5   : > { %12053 = vmatprep.subr.mxu1 %v19129_v10 }
 0x5a6   : > { %12054 = vmatpush3.msra.mxu1 %v19129_v10 }
 0x5a7   : > { %5336 = vmatmul.mubr.f32.gmra.mrb[10].mxu0 %v23350_v37 }
 0x5a8   : > { %5341 = vmatprep.mubr.f32.mxu0 %v23351_v45 }
 0x5ab   : > { %5343 = vmatmul.mubr.f32.gmra.mrb[12].mxu0 %v23353_v46 }
 0x5ac   : > { %5348 = vmatprep.mubr.f32.mxu0 %v23354_v31 }
 0x5af   : > { %5350 = vmatmul.mubr.f32.gmra.mrb[14].mxu0 %v23356_v15 }
 0x5b0   : > { %5355 = vmatprep.mubr.f32.mxu0 %v23357_v53 }
 0x5b3   : > { %5357 = vmatmul.mubr.f32.gmra.mrb[16].mxu0 %v23359_v8 }
 0x5b4   : > { %5362 = vmatprep.mubr.f32.mxu0 %v23360_v36 }
 0x5b7   : > { %5364 = vmatmul.mubr.f32.gmra.mrb[18].mxu0 %v23362_v58 }
 0x5b8   : > { %5369 = vmatprep.mubr.f32.mxu0 %v23363_v50 }
 0x5bb   : > { %5371 = vmatmul.mubr.f32.gmra.mrb[20].mxu0 %v23364_v38 }
 0x5bc   : > { %5376 = vmatprep.mubr.f32.mxu0 %v23365_v3 }
 0x5bf   : > { %5378 = vmatmul.mubr.f32.gmra.mrb[22].mxu0 %v23366_v11 }
 0x5c0   : > { %5383 = vmatprep.mubr.f32.mxu0 %v23367_v24 }
 0x5c3   : > { %5385 = vmatmul.mubr.f32.gmra.mrb[24].mxu0 %v23368_v32 }
 0x5c4   : > { %5390 = vmatprep.mubr.f32.mxu0 %v23369_v6 }
 0x5c7   : > { %5392 = vmatmul.mubr.f32.gmra.mrb[26].mxu0 %v23370_v39 }
 0x5c8   : > { %5397 = vmatprep.mubr.f32.mxu0 %v23371_v49 }
 0x5cb   : > { %5399 = vmatmul.mubr.f32.gmra.mrb[28].mxu0 %v23372_v23 }
 0x5cc   : > { %5404 = vmatprep.mubr.f32.mxu0 %v23373_v2 }
 0x5cf   : > { %5406 = vmatmul.mubr.f32.gmra.mrb[30].mxu0 %v23374_v17 }
 0x5d0   : > { %5411 = vmatprep.mubr.f32.mxu0 %v23375_v41 }
 0x5d3   : > { %5413 = vmatmul.mubr.f32.gmra.mrb[32].mxu0 %v23376_v57 }
 0x5d4   : > { %5418 = vmatprep.mubr.f32.mxu0 %v23377_v43 }
 0x5d7   : > { %5420 = vmatmul.mubr.f32.gmra.mrb[34].mxu0 %v23378_v56 }
 0x5d8   : > { %5425 = vmatprep.mubr.f32.mxu0 %v23379_v5 }
 0x5db   : > { %5427 = vmatmul.mubr.f32.gmra.mrb[36].mxu0 %v23380_v30 }
 0x5dc   : > { %5432 = vmatprep.mubr.f32.mxu0 %v23381_v20 }
 0x5df   : > { %5434 = vmatmul.mubr.f32.gmra.mrb[38].mxu0 %v23382_v48 }
 0x5e0   : > { %5439 = vmatprep.mubr.f32.mxu0 %v23383_v25 }
 0x5e3   : > { %5441 = vmatmul.mubr.f32.gmra.mrb[40].mxu0 %v23384_v55 }
 0x5e4   : > { %5446 = vmatprep.mubr.f32.mxu0 %v23385_v29 }
 0x5e7   : > { %5448 = vmatmul.mubr.f32.gmra.mrb[42].mxu0 %v23386_v19 }
 0x5e8   : > { %5453 = vmatprep.mubr.f32.mxu0 %v23387_v9 }
 0x5eb   : > { %5455 = vmatmul.mubr.f32.gmra.mrb[44].mxu0 %v23388_v61 }
 0x5ec   : > { %5460 = vmatprep.mubr.f32.mxu0 %v23389_v12 }
 0x5ef   : > { %5462 = vmatmul.mubr.f32.gmra.mrb[46].mxu0 %v23390_v13 }
 0x5f0   : > { %5467 = vmatprep.mubr.f32.mxu0 %v23391_v54 }
 0x5f3   : > { %5469 = vmatmul.mubr.f32.gmra.mrb[48].mxu0 %v23392_v26 }
 0x5f4   : > { %5474 = vmatprep.mubr.f32.mxu0 %v23393_v1 }
 0x5f7   : > { %5476 = vmatmul.mubr.f32.gmra.mrb[50].mxu0 %v23394_v0 }
 0x5f8   : > { %5481 = vmatprep.mubr.f32.mxu0 %v23395_v47 }
 0x5fb   : > { %5483 = vmatmul.mubr.f32.gmra.mrb[52].mxu0 %v23415_v52 }
 0x5fc   : > { %5488 = vmatprep.mubr.f32.mxu0 %v23416_v14 }
 0x5ff   : > { %5490 = vmatmul.mubr.f32.gmra.mrb[54].mxu0 %v23417_v51 }
 0x600   : > { %5495 = vmatprep.mubr.f32.mxu0 %v23418_v27 }
 0x603   : > { %5497 = vmatmul.mubr.f32.gmra.mrb[56].mxu0 %v23419_v34 }
 0x604   : > { %5502 = vmatprep.mubr.f32.mxu0 %v23420_v4 }
 0x607   : > { %5504 = vmatmul.mubr.f32.gmra.mrb[58].mxu0 %v23421_v22 }
 0x608   : > { %5509 = vmatprep.mubr.f32.mxu0 %v23422_v40 }
 0x60b   : > { %5511 = vmatmul.mubr.f32.gmra.mrb[60].mxu0 %v23404_v63 }
 0x60c   : > { %5516 = vmatprep.mubr.f32.mxu0 %v23405_v33 }
 0x60f   : > { %5518 = vmatmul.mubr.f32.gmra.mrb[62].mxu0 %v23406_v16 }
 0x610   : > { %5523 = vmatprep.mubr.f32.mxu0 %v23407_v35 }
 0x613   : > { %5525 = vmatmul.mubr.f32.gmra.mrb[64].mxu0 %v23408_v60 }
 0x614   : > { %5530 = vmatprep.mubr.f32.mxu0 %v23409_v18 }
 0x617   : > { %5532 = vmatmul.mubr.f32.gmra.mrb[66].mxu0 %v23410_v21 }
 0x618   : > { %5537 = vmatprep.mubr.f32.mxu0 %v23411_v62 }
 0x61b   : > { %5539 = vmatmul.mubr.f32.gmra.mrb[68].mxu0 %v23412_v28 }
 0x61c   : > { %5544 = vmatprep.mubr.f32.mxu0 %v23413_v44 }
 0x61f   : > { %5546 = vmatmul.mubr.f32.gmra.mrb[70].mxu0 %v23414_v42 }
 0x666   : > { %v5302_v37 = vpop.f32.mrb[0].mxu0 }
 0x667   : > { %v19139_v45 = vadd.f32 %v19136_v7, %v5302_v37  ;;  %v5304_v46 = vpop.f32.mrb[1].mxu0 }
 0x669   : > { %23423 = vst [vmem:[#allocation5_spill] sm:$0xff] %v19139_v45  ;;  %v5769_v31 = vsub.f32 0.0, %v19139_v45 }
 0x66a   : > { %v5309_v15 = vpop.f32.mrb[2].mxu0 }
 0x66b   : > { %v5841_v53 = vmin.f32 %v5769_v31, 0.0  ;;  %v5311_v8 = vpop.f32.mrb[3].mxu0  ;;  %v19143_v58 = vadd.f32 %v19136_v7, %v5309_v15  ;;  %vm5805_vm2 = vcmp.gt.f32.partialorder %v5769_v31, 0.0 }
 0x66d   : > { %v5877_v36 = vmul.f32 1.442695, %v5841_v53  ;;  %23424 = vst [vmem:[#allocation6_spill] sm:$0xff] %v19143_v58  ;;  %v5770_v11 = vsub.f32 0.0, %v19143_v58 }
 0x66e   : > { %v5316_v50 = vpop.f32.mrb[4].mxu0 }
 0x66f   : > { %13863 = vpow2.f32 %v5877_v36  ;;  %v19146_v38 = vadd.f32 %v19136_v7, %v5316_v50  ;;  %v5318_v3 = vpop.f32.mrb[5].mxu0  ;;  %v5842_v39 = vmin.f32 %v5770_v11, 0.0  ;;  %vm5806_vm15 = vcmp.gt.f32.partialorder %v5770_v11, 0.0 }
 0x671   : > { %23425 = vst [vmem:[#allocation14_spill] sm:$0xff] %v19146_v38  ;;  %v5771_v32 = vsub.f32 0.0, %v19146_v38  ;;  %v5879_v41 = vmul.f32 1.442695, %v5842_v39 }
 0x672   : > { %v5323_v24 = vpop.f32.mrb[6].mxu0 }
 0x673   : > { %v5325_v6 = vpop.f32.mrb[7].mxu0  ;;  %v5843_v23 = vmin.f32 %v5771_v32, 0.0  ;;  %v19151_v57 = vadd.f32 %v19136_v7, %v5323_v24  ;;  %13865 = vpow2.f32 %v5879_v41  ;;  %vm5807_vm0 = vcmp.gt.f32.partialorder %v5771_v32, 0.0 }
 0x675   : > { %23426 = vst [vmem:[#allocation3_spill] sm:$0xff] %v19151_v57  ;;  %v5881_v5 = vmul.f32 1.442695, %v5843_v23  ;;  %v19154_v48 = vsub.f32 0.0, %v19151_v57 }
 0x676   : > { %v5330_v49 = vpop.f32.mrb[8].mxu0 }
 0x677   : > { %v5332_v2 = vpop.f32.mrb[9].mxu0  ;;  %v19157_v25 = vadd.f32 %v19136_v7, %v5330_v49  ;;  %13867 = vpow2.f32 %v5881_v5  ;;  %v5844_v9 = vmin.f32 %v19154_v48, 0.0  ;;  %vm5808_vm1 = vcmp.gt.f32.partialorder %v19154_v48, 0.0 }
 0x679   : > { %v13864_v17 = vpop.eup %13863  ;;  %23427 = vst [vmem:[#allocation34_spill] sm:$0xff] %v19157_v25  ;;  %v19162_v61 = vsub.f32 0.0, %v19157_v25  ;;  %v5883_v1 = vmul.f32 1.442695, %v5844_v9 }
 0x67a   : > { %v5337_v43 = vpop.f32.mrb[10].mxu0  ;;  %v11532_v56 = vadd.f32 -1.0, %v13864_v17 }
 0x67b   : > { %v5339_v30 = vpop.f32.mrb[11].mxu0  ;;  %v5845_v0 = vmin.f32 %v19162_v61, 0.0  ;;  %v19171_v35 = vadd.f32 %v19136_v7, %v5337_v43  ;;  %13869 = vpow2.f32 %v5883_v1  ;;  %vm5809_vm10 = vcmp.gt.f32.partialorder %v19162_v61, 0.0 }
 0x67c   : > { %v5985_v20 = vsel %vm5805_vm2, %v5769_v31, %v11532_v56 }
 0x67d   : > { %v6022_v19 = vsel %vm1017_vm14, %v5985_v20, 0  ;;  %23428 = vst [vmem:[#allocation32_spill] sm:$0xff] %v19171_v35  ;;  %v13866_v18 = vpop.eup %13865  ;;  %v5885_v28 = vmul.f32 1.442695, %v5845_v0  ;;  %v19178_v63 = vsub.f32 0.0, %v19171_v35 }
 0x67e   : > { %v5344_v55 = vpop.f32.mrb[12].mxu0  ;;  %v19164_v13 = vand.u32 4294901760, %v6022_v19  ;;  %v11533_v52 = vadd.f32 -1.0, %v13866_v18 }
 0x67f   : > { %v5346_v29 = vpop.f32.mrb[13].mxu0  ;;  %v19181_v33 = vadd.f32 %v19136_v7, %v5344_v55  ;;  %13871 = vpow2.f32 %v5885_v28  ;;  %v5846_v34 = vmin.f32 %v19178_v63, 0.0  ;;  %vm5810_vm11 = vcmp.gt.f32.partialorder %v19178_v63, 0.0 }
 0x680   : > { %v19167_v26 = vsub.f32 %v6022_v19, %v19164_v13  ;;  %v5986_v22 = vsel %vm5806_vm15, %v5770_v11, %v11533_v52 }
 0x681   : > { %v13868_v62 = vpop.eup %13867  ;;  %23429 = vst [vmem:[#allocation38_spill] sm:$0xff] %v19181_v33  ;;  %v19185_v4 = vsub.f32 0.0, %v19181_v33  ;;  %v6025_v46 = vsel %vm1017_vm14, %v5986_v22, 0  ;;  %v5887_v8 = vmul.f32 1.442695, %v5846_v34 }
 0x682   : > { %v5351_v12 = vpop.f32.mrb[14].mxu0  ;;  %v22316_v21 = vand.u32 4294901760, %v19167_v26  ;;  %v11534_v14 = vadd.f32 -1.0, %v13868_v62  ;;  %v19191_v15 = vand.u32 4294901760, %v6025_v46 }
 0x683   : > { %v5353_v54 = vpop.f32.mrb[15].mxu0  ;;  %v19189_v31 = vadd.f32 %v19136_v7, %v5351_v12  ;;  %v5847_v36 = vmin.f32 %v19185_v4, 0.0  ;;  %13873 = vpow2.f32 %v5887_v8  ;;  %vm5811_vm3 = vcmp.gt.f32.partialorder %v19185_v4, 0.0 }
 0x684   : > { %v6198_v44 = vsub.f32 %v19167_v26, %v22316_v21  ;;  %v5987_v37 = vsel %vm5807_vm0, %v5771_v32, %v11534_v14  ;;  %v19198_v11 = vsub.f32 %v6025_v46, %v19191_v15 }
 0x685   : > { %23430 = vst [vmem:[#allocation36_spill] sm:$0xff] %v19189_v31  ;;  %v6028_v50 = vsel %vm1017_vm14, %v5987_v37, 0  ;;  %v13870_v24 = vpop.eup %13869  ;;  %v19203_v6 = vsub.f32 0.0, %v19189_v31  ;;  %v5889_v17 = vmul.f32 1.442695, %v5847_v36 }
 0x686   : > { %v5358_v47 = vpop.f32.mrb[16].mxu0  ;;  %v6199_v51 = vand.u32 4294901760, %v6198_v44  ;;  %v19200_v32 = vand.u32 4294901760, %v6028_v50  ;;  %v22314_v49 = vand.u32 4294901760, %v19198_v11  ;;  %v11535_v41 = vadd.f32 -1.0, %v13870_v24 }
 0x687   : > { %v5360_v60 = vpop.f32.mrb[17].mxu0  ;;  %v19206_v39 = vadd.f32 %v19136_v7, %v5358_v47  ;;  %v5848_v20 = vmin.f32 %v19203_v6, 0.0  ;;  %13875 = vpow2.f32 %v5889_v17  ;;  %vm5812_vm5 = vcmp.gt.f32.partialorder %v19203_v6, 0.0 }
 0x688   : > { %12055 = vmatprep.mubr.f32.mxu1 %v6199_v51  ;;  %v19210_v23 = vsub.f32 %v6028_v50, %v19200_v32  ;;  %v6208_v5 = vsub.f32 %v19198_v11, %v22314_v49  ;;  %v5988_v12 = vsel %vm5808_vm1, %v19154_v48, %v11535_v41 }
 0x689   : > { %23431 = vst [vmem:[#allocation42_spill] sm:$0xff] %v19206_v39  ;;  %v13872_v56 = vpop.eup %13871  ;;  %v19221_v55 = vsub.f32 0.0, %v19206_v39  ;;  %v6031_v47 = vsel %vm1017_vm14, %v5988_v12, 0  ;;  %v5891_v18 = vmul.f32 1.442695, %v5848_v20 }
 0x68a   : > { %v5365_v42 = vpop.f32.mrb[18].mxu0  ;;  %v22313_v30 = vand.u32 4294901760, %v19210_v23  ;;  %v6209_v29 = vand.u32 4294901760, %v6208_v5  ;;  %v11536_v54 = vadd.f32 -1.0, %v13872_v56  ;;  %v19235_v28 = vand.u32 4294901760, %v6031_v47 }
 0x68b   : > { %v5367_v16 = vpop.f32.mrb[19].mxu0  ;;  %v19231_v60 = vadd.f32 %v19136_v7, %v5365_v42  ;;  %v5849_v62 = vmin.f32 %v19221_v55, 0.0  ;;  %13877 = vpow2.f32 %v5891_v18  ;;  %vm5813_vm13 = vcmp.gt.f32.partialorder %v19221_v55, 0.0 }
 0x68c   : > { %v6218_v19 = vsub.f32 %v19210_v23, %v22313_v30  ;;  %12056 = vmatmul.mubr.f32.vlgmr.msra.gmra.mrb[0].mxu1 %v6209_v29  ;;  %v5989_v48 = vsel %vm5809_vm10, %v19162_v61, %v11536_v54  ;;  %v19241_v52 = vsub.f32 %v6031_v47, %v19235_v28 }
 0x68d   : > { %23432 = vst [vmem:[#allocation40_spill] sm:$0xff] %v19231_v60  ;;  %v13874_v14 = vpop.eup %13873  ;;  %v19244_v42 = vsub.f32 0.0, %v19231_v60  ;;  %v5893_v34 = vmul.f32 1.442695, %v5849_v62 }
 0x68e   : > { %v5372_v27 = vpop.f32.mrb[20].mxu0  ;;  %v6219_v0 = vand.u32 4294901760, %v6218_v19  ;;  %v22312_v22 = vand.u32 4294901760, %v19241_v52  ;;  %v11537_v36 = vadd.f32 -1.0, %v13874_v14 }
 0x68f   : > { %v5374_v40 = vpop.f32.mrb[21].mxu0  ;;  %v19247_v51 = vadd.f32 %v19136_v7, %v5372_v27  ;;  %v5850_v27 = vmin.f32 %v19244_v42, 0.0  ;;  %13879 = vpow2.f32 %v5893_v34  ;;  %vm5814_vm12 = vcmp.gt.f32.partialorder %v19244_v42, 0.0 }
 0x690   : > { %12058 = vmatprep.mubr.f32.mxu1 %v6219_v0  ;;  %v6034_v40 = vsel %vm1017_vm14, %v5989_v48, 0  ;;  %v6228_v8 = vsub.f32 %v19241_v52, %v22312_v22  ;;  %v5990_v41 = vsel %vm5810_vm11, %v19178_v63, %v11537_v36 }
 0x691   : > { %23433 = vst [vmem:[#allocation46_spill] sm:$0xff] %v19247_v51  ;;  %v19253_v61 = vand.u32 4294901760, %v6034_v40  ;;  %v13876_v50 = vpop.eup %13875  ;;  %v6037_v5 = vsel %vm1017_vm14, %v5990_v41, 0  ;;  %v5895_v54 = vmul.f32 1.442695, %v5850_v27 }
 0x692   : > { %v19193_v53 = vpop.f32.mrb[22].mxu0  ;;  %v6229_v17 = vand.u32 4294901760, %v6228_v8  ;;  %v19275_v19 = vand.u32 4294901760, %v6037_v5  ;;  %v11538_v12 = vadd.f32 -1.0, %v13876_v50 }
 0x693   : > { %v5381_v3 = vpop.f32.mrb[23].mxu0  ;;  %v19264_v24 = vsub.f32 %v6034_v40, %v19253_v61  ;;  %v19273_v29 = vadd.f32 %v19136_v7, %v19193_v53  ;;  %13881 = vpow2.f32 %v5895_v54 }
 0x694   : > { %v19261_v3 = vsub.f32 0.0, %v19247_v51  ;;  %12059 = vmatmul.mubr.f32.gmra.mrb[2].mxu1 %v6229_v17  ;;  %v19283_v0 = vsub.f32 %v6037_v5, %v19275_v19  ;;  %v5991_v47 = vsel %vm5811_vm3, %v19185_v4, %v11538_v12 }
 0x695   : > { %v22310_v56 = vand.u32 4294901760, %v19264_v24  ;;  %23434 = vst [vmem:[#allocation44_spill] sm:$0xff] %v19273_v29  ;;  %v6040_v62 = vsel %vm1017_vm14, %v5991_v47, 0  ;;  %v19290_v14 = vsub.f32 0.0, %v19273_v29 }
 0x696   : > { %v19212_v2 = vpop.f32.mrb[24].mxu0  ;;  %v5851_v63 = vmin.f32 %v19261_v3, 0.0  ;;  %23435 = vst [vmem:[#allocation50_spill] sm:$0xff] %v19283_v0  ;;  %v22309_v40 = vand.u32 4294901760, %v19283_v0  ;;  %v19297_v4 = vand.u32 4294901760, %v6040_v62  ;;  %vm5815_vm4 = vcmp.gt.f32.partialorder %v19261_v3, 0.0 }
 0x697   : > { %v5388_v43 = vpop.f32.mrb[25].mxu0  ;;  %v19294_v34 = vadd.f32 %v19136_v7, %v19212_v2  ;;  %v5852_v41 = vmin.f32 %v19290_v14, 0.0  ;;  %vm5816_vm6 = vcmp.gt.f32.partialorder %v19290_v14, 0.0 }
 0x698   : > { %v6248_v8 = vsub.f32 %v19283_v0, %v22309_v40  ;;  %v19305_v50 = vsub.f32 %v6040_v62, %v19297_v4 }
 0x699   : > { %23436 = vst [vmem:[#allocation48_spill] sm:$0xff] %v19294_v34  ;;  %v19309_v5 = vsub.f32 0.0, %v19294_v34 }
 0x69a   : > { %v19226_v9 = vpop.f32.mrb[26].mxu0  ;;  %23437 = vst [vmem:[#allocation54_spill] sm:$0xff] %v19305_v50  ;;  %v22308_v12 = vand.u32 4294901760, %v19305_v50 }
 0x69b   : > { %v5395_v1 = vpop.f32.mrb[27].mxu0  ;;  %vm5817_vm9 = vcmp.gt.f32.partialorder %v19309_v5, 0.0 }
 0x69c   : > { %v6238_v1 = vsub.f32 %v19264_v24, %v22310_v56  ;;  %v6258_v47 = vsub.f32 %v19305_v50, %v22308_v12 }
 0x69e   : > { %v19237_v44 = vpop.f32.mrb[28].mxu0  ;;  %v6239_v18 = vand.u32 4294901760, %v6238_v1  ;;  %v19318_v1 = vadd.f32 %v19136_v7, %v19226_v9 }
 0x69f   : > { %v5402_v16 = vpop.f32.mrb[29].mxu0 }
 0x6a0   : > { %v13878_v16 = vpop.eup %13877  ;;  %12061 = vmatprep.mubr.f32.mxu1 %v6239_v18  ;;  %23438 = vst [vmem:[#allocation52_spill] sm:$0xff] %v19318_v1 }
 0x6a1   : > { %v11539_v27 = vadd.f32 -1.0, %v13878_v16  ;;  %v13880_v2 = vpop.eup %13879  ;;  %v5899_v16 = vmul.f32 1.442695, %v5852_v41 }
 0x6a2   : > { %v19251_v37 = vpop.f32.mrb[30].mxu0  ;;  %v11540_v62 = vadd.f32 -1.0, %v13880_v2  ;;  %v19339_v2 = vadd.f32 %v19136_v7, %v19237_v44 }
 0x6a3   : > { %v5409_v46 = vpop.f32.mrb[31].mxu0  ;;  %v5992_v54 = vsel %vm5812_vm5, %v19203_v6, %v11539_v27  ;;  %v6259_v6 = vand.u32 4294901760, %v6258_v47 }
 0x6a4   : > { %v5897_v46 = vmul.f32 1.442695, %v5851_v63  ;;  %v6043_v18 = vsel %vm1017_vm14, %v5992_v54, 0  ;;  %v5993_v9 = vsel %vm5813_vm13, %v19221_v55, %v11540_v62  ;;  %v19335_v54 = vsub.f32 0.0, %v19318_v1  ;;  %23440 = vst [vmem:[#allocation56_spill] sm:$0xff] %v19339_v2 }
 0x6a5   : > { %v6046_v41 = vsel %vm1017_vm14, %v5993_v9, 0 }
 0x6a6   : > { %v19267_v43 = vpop.f32.mrb[32].mxu0  ;;  %13883 = vpow2.f32 %v5897_v46  ;;  %v5853_v46 = vmin.f32 %v19309_v5, 0.0  ;;  %v19343_v12 = vand.u32 4294901760, %v6046_v41  ;;  %v5854_v9 = vmin.f32 %v19335_v54, 0.0 }
 0x6a7   : > { %v5416_v20 = vpop.f32.mrb[33].mxu0  ;;  %13885 = vpow2.f32 %v5899_v16  ;;  %v19355_v16 = vsub.f32 0.0, %v19339_v2  ;;  %vm5818_vm7 = vcmp.gt.f32.partialorder %v19335_v54, 0.0 }
 0x6a8   : > { %v6249_v20 = vand.u32 4294901760, %v6248_v8  ;;  %v19325_v8 = vand.u32 4294901760, %v6043_v18  ;;  %v5901_v47 = vmul.f32 1.442695, %v5853_v46  ;;  %v19349_v62 = vsub.f32 %v6046_v41, %v19343_v12 }
 0x6a9   : > { %vm5819_vm2 = vcmp.gt.f32.partialorder %v19355_v16, 0.0 }
 0x6aa   : > { %v19286_v53 = vpop.f32.mrb[34].mxu0  ;;  %12062 = vmatmul.mubr.f32.gmra.mrb[4].mxu1 %v6249_v20  ;;  %v19329_v27 = vsub.f32 %v6043_v18, %v19325_v8  ;;  %v13882_v20 = vpop.eup %13881  ;;  %23441 = vst [vmem:[#allocation62_spill] sm:$0xff] %v19349_v62  ;;  %13887 = vpow2.f32 %v5901_v47  ;;  %v22315_v56 = vand.u32 4294901760, %v19349_v62  ;;  %v5903_v47 = vmul.f32 1.442695, %v5854_v9 }
 0x6ab   : > { %v5423_v48 = vpop.f32.mrb[35].mxu0  ;;  %12064 = vmatprep.mubr.f32.mxu1 %v6259_v6  ;;  %v11541_v40 = vadd.f32 -1.0, %v13882_v20  ;;  %v19362_v20 = vadd.f32 %v19136_v7, %v19251_v37 }
 0x6ac   : > { %23439 = vst [vmem:[#allocation58_spill] sm:$0xff] %v19329_v27  ;;  %v22311_v18 = vand.u32 4294901760, %v19329_v27  ;;  %v6278_v41 = vsub.f32 %v19349_v62, %v22315_v56  ;;  %13889 = vpow2.f32 %v5903_v47 }
 0x6ad   : > { %23442 = vst [vmem:[#allocation60_spill] sm:$0xff] %v19362_v20 }
 0x6ae   : > { %v19302_v36 = vpop.f32.mrb[36].mxu0  ;;  %v6268_v55 = vsub.f32 %v19329_v27, %v22311_v18  ;;  %v5994_v18 = vsel %vm5814_vm12, %v19244_v42, %v11541_v40  ;;  %v6279_v37 = vand.u32 4294901760, %v6278_v41 }
 0x6af   : > { %v5430_v17 = vpop.f32.mrb[37].mxu0  ;;  %v6049_v22 = vsel %vm1017_vm14, %v5994_v18, 0  ;;  %v19379_v18 = vsub.f32 0.0, %v19362_v20 }
 0x6b0   : > { %v13884_v6 = vpop.eup %13883  ;;  %v19371_v49 = vand.u32 4294901760, %v6049_v22 }
 0x6b1   : > { %v13886_v56 = vpop.eup %13885  ;;  %vm5820_vm15 = vcmp.gt.f32.partialorder %v19379_v18, 0.0 }
 0x6b2   : > { %v19314_v63 = vpop.f32.mrb[38].mxu0  ;;  %v19375_v40 = vsub.f32 %v6049_v22, %v19371_v49 }
 0x6b3   : > { %v5437_v48 = vpop.f32.mrb[39].mxu0 }
 0x6b4   : > { %23443 = vst [vmem:[#allocation66_spill] sm:$0xff] %v19375_v40  ;;  %v22323_v22 = vand.u32 4294901760, %v19375_v40 }
 0x6b6   : > { %v19332_v17 = vpop.f32.mrb[40].mxu0 }
 0x6b7   : > { %v5444_v48 = vpop.f32.mrb[41].mxu0 }
 0x6b8   : > { %v6269_v48 = vand.u32 4294901760, %v6268_v55  ;;  %v5855_v55 = vmin.f32 %v19355_v16, 0.0 }
 0x6ba   : > { %v19351_v44 = vpop.f32.mrb[42].mxu0  ;;  %12065 = vmatmul.mubr.f32.gmra.mrb[6].mxu1 %v6269_v48  ;;  %v5905_v41 = vmul.f32 1.442695, %v5855_v55 }
 0x6bb   : > { %v5451_v46 = vpop.f32.mrb[43].mxu0  ;;  %12067 = vmatprep.mubr.f32.mxu1 %v6279_v37  ;;  %v13888_v37 = vpop.eup %13887 }
 0x6bc   : > { %v11542_v46 = vadd.f32 -1.0, %v13884_v6  ;;  %v19383_v6 = vadd.f32 %v19136_v7, %v19267_v43  ;;  %v11543_v43 = vadd.f32 -1.0, %v13886_v56  ;;  %13891 = vpow2.f32 %v5905_v41 }
 0x6bd   : > { %v19408_v56 = vadd.f32 %v19136_v7, %v19286_v53  ;;  %v11544_v34 = vadd.f32 -1.0, %v13888_v37 }
 0x6be   : > { %v19368_v30 = vpop.f32.mrb[44].mxu0  ;;  %v5995_v48 = vsel %vm5815_vm4, %v19261_v3, %v11542_v46  ;;  %23444 = vst [vmem:[#allocation64_spill] sm:$0xff] %v19383_v6  ;;  %v6288_v46 = vsub.f32 %v19375_v40, %v22323_v22  ;;  %v19399_v2 = vsub.f32 0.0, %v19383_v6  ;;  %v5996_v22 = vsel %vm5816_vm6, %v19290_v14, %v11543_v43 }
 0x6bf   : > { %v5458_v42 = vpop.f32.mrb[45].mxu0  ;;  %v6052_v9 = vsel %vm1017_vm14, %v5995_v48, 0  ;;  %v5856_v48 = vmin.f32 %v19379_v18, 0.0  ;;  %23446 = vst [vmem:[#allocation68_spill] sm:$0xff] %v19408_v56  ;;  %v6055_v6 = vsel %vm1017_vm14, %v5996_v22, 0  ;;  %v19425_v22 = vsub.f32 0.0, %v19408_v56 }
 0x6c0   : > { %v19389_v21 = vand.u32 4294901760, %v6052_v9  ;;  %v6289_v55 = vand.u32 4294901760, %v6288_v46  ;;  %v5857_v41 = vmin.f32 %v19399_v2, 0.0  ;;  %v19415_v46 = vand.u32 4294901760, %v6055_v6 }
 0x6c1   : > { %v5907_v29 = vmul.f32 1.442695, %v5856_v48  ;;  %vm5821_vm0 = vcmp.gt.f32.partialorder %v19399_v2, 0.0  ;;  %vm5822_vm1 = vcmp.gt.f32.partialorder %v19425_v22, 0.0 }
 0x6c2   : > { %v19386_v42 = vpop.f32.mrb[46].mxu0  ;;  %v19395_v20 = vsub.f32 %v6052_v9, %v19389_v21  ;;  %12068 = vmatmul.mubr.f32.gmra.mrb[8].mxu1 %v6289_v55  ;;  %v19421_v43 = vsub.f32 %v6055_v6, %v19415_v46  ;;  %v5997_v55 = vsel %vm5817_vm9, %v19309_v5, %v11544_v34  ;;  %v5909_v48 = vmul.f32 1.442695, %v5857_v41 }
 0x6c3   : > { %v5465_v3 = vpop.f32.mrb[47].mxu0  ;;  %v6058_v37 = vsel %vm1017_vm14, %v5997_v55, 0  ;;  %13893 = vpow2.f32 %v5907_v29  ;;  %v5858_v55 = vmin.f32 %v19425_v22, 0.0  ;;  %v19442_v29 = vadd.f32 %v19136_v7, %v19302_v36 }
 0x6c4   : > { %23445 = vst [vmem:[#allocation70_spill] sm:$0xff] %v19395_v20  ;;  %v22330_v3 = vand.u32 4294901760, %v19395_v20  ;;  %23447 = vst [vmem:[#allocation74_spill] sm:$0xff] %v19421_v43  ;;  %v22337_v51 = vand.u32 4294901760, %v19421_v43  ;;  %v19429_v60 = vand.u32 4294901760, %v6058_v37  ;;  %13895 = vpow2.f32 %v5909_v48 }
 0x6c5   : > { %23449 = vst [vmem:[#allocation78_spill] sm:$0xff] %v19442_v29  ;;  %v5911_v31 = vmul.f32 1.442695, %v5858_v55  ;;  %v19454_v33 = vsub.f32 0.0, %v19442_v29 }
 0x6c6   : > { %v19401_v47 = vpop.f32.mrb[48].mxu0  ;;  %v6298_v9 = vsub.f32 %v19395_v20, %v22330_v3  ;;  %v13890_v3 = vpop.eup %13889  ;;  %v6308_v34 = vsub.f32 %v19421_v43, %v22337_v51  ;;  %v19437_v5 = vsub.f32 %v6058_v37, %v19429_v60 }
 0x6c7   : > { %v5472_v1 = vpop.f32.mrb[49].mxu0  ;;  %v11545_v6 = vadd.f32 -1.0, %v13890_v3  ;;  %13897 = vpow2.f32 %v5911_v31  ;;  %vm5823_vm10 = vcmp.gt.f32.partialorder %v19454_v33, 0.0 }
 0x6c8   : > { %v6299_v14 = vand.u32 4294901760, %v6298_v9  ;;  %23448 = vst [vmem:[#allocation72_spill] sm:$0xff] %v19437_v5  ;;  %v6309_v41 = vand.u32 4294901760, %v6308_v34 }
 0x6c9   : > { %v5998_v51 = vsel %vm5818_vm7, %v19335_v54, %v11545_v6  ;;  %v19461_v54 = vadd.f32 %v19136_v7, %v19314_v63  ;;  %v5859_v63 = vmin.f32 %v19454_v33, 0.0 }
 0x6ca   : > { %v19417_v1 = vpop.f32.mrb[50].mxu0  ;;  %12070 = vmatprep.mubr.f32.mxu1 %v6299_v14  ;;  %v13892_v14 = vpop.eup %13891  ;;  %v6061_v39 = vsel %vm1017_vm14, %v5998_v51, 0 }
 0x6cb   : > { %v5479_v53 = vpop.f32.mrb[51].mxu0  ;;  %12071 = vmatmul.mubr.f32.gmra.mrb[10].mxu1 %v6309_v41  ;;  %v11546_v36 = vadd.f32 -1.0, %v13892_v14  ;;  %v19456_v48 = vand.u32 4294901760, %v6061_v39  ;;  %23450 = vst [vmem:[#allocation116_spill] sm:$0xff] %v19461_v54  ;;  %v5913_v35 = vmul.f32 1.442695, %v5859_v63 }
 0x6cd   : > { %v19466_v41 = vsub.f32 %v6061_v39, %v19456_v48  ;;  %v5999_v51 = vsel %vm5819_vm2, %v19355_v16, %v11546_v36  ;;  %v13894_v55 = vpop.eup %13893  ;;  %v19479_v39 = vsub.f32 0.0, %v19461_v54  ;;  %13899 = vpow2.f32 %v5913_v35 }
 0x6ce   : > { %v19431_v9 = vpop.f32.mrb[52].mxu0 }
 0x6cf   : > { %v5486_v53 = vpop.f32.mrb[53].mxu0  ;;  %23451 = vst [vmem:[#allocation13_spill] sm:$0xff] %v19466_v41  ;;  %v5860_v57 = vmin.f32 %v19479_v39, 0.0  ;;  %vm5824_vm11 = vcmp.gt.f32.partialorder %v19479_v39, 0.0 }
 0x6d0   : > { %v22344_v53 = vand.u32 4294901760, %v19437_v5 }
 0x6d2   : > { %v19446_v56 = vpop.f32.mrb[54].mxu0  ;;  %v6318_v3 = vsub.f32 %v19437_v5, %v22344_v53  ;;  %v6064_v53 = vsel %vm1017_vm14, %v5999_v51, 0  ;;  %v13896_v51 = vpop.eup %13895 }
 0x6d3   : > { %v5493_v37 = vpop.f32.mrb[55].mxu0  ;;  %v19476_v29 = vand.u32 4294901760, %v6064_v53 }
 0x6d4   : > { %v6319_v34 = vand.u32 4294901760, %v6318_v3  ;;  %v19471_v37 = vadd.f32 %v19136_v7, %v19332_v17  ;;  %v22357_v3 = vand.u32 4294901760, %v19466_v41 }
 0x6d5   : > { %v19487_v36 = vsub.f32 %v6064_v53, %v19476_v29  ;;  %v19500_v53 = vadd.f32 %v19136_v7, %v19351_v44 }
 0x6d6   : > { %v19463_v6 = vpop.f32.mrb[56].mxu0  ;;  %23452 = vst [vmem:[#allocation117_spill] sm:$0xff] %v19471_v37  ;;  %12073 = vmatprep.mubr.f32.mxu1 %v6319_v34  ;;  %v6328_v17 = vsub.f32 %v19466_v41, %v22357_v3  ;;  %v11547_v34 = vadd.f32 -1.0, %v13894_v55 }
 0x6d7   : > { %v5500_v14 = vpop.f32.mrb[57].mxu0  ;;  %23453 = vst [vmem:[#allocation120_spill] sm:$0xff] %v19487_v36  ;;  %v22364_v25 = vand.u32 4294901760, %v19487_v36  ;;  %23454 = vst [vmem:[#allocation130_spill] sm:$0xff] %v19500_v53 }
 0x6d8   : > { %v19490_v14 = vsub.f32 0.0, %v19471_v37  ;;  %v6329_v54 = vand.u32 4294901760, %v6328_v17  ;;  %v6000_v38 = vsel %vm5820_vm15, %v19379_v18, %v11547_v34  ;;  %v11548_v17 = vadd.f32 -1.0, %v13896_v51 }
 0x6d9   : > { %v6338_v55 = vsub.f32 %v19487_v36, %v22364_v25  ;;  %v6067_v63 = vsel %vm1017_vm14, %v6000_v38, 0  ;;  %v5915_v34 = vmul.f32 1.442695, %v5860_v57  ;;  %v13898_v25 = vpop.eup %13897  ;;  %v19517_v38 = vsub.f32 0.0, %v19500_v53 }
 0x6da   : > { %v19481_v16 = vpop.f32.mrb[58].mxu0  ;;  %12074 = vmatmul.mubr.f32.gmra.mrb[12].mxu1 %v6329_v54  ;;  %v5861_v37 = vmin.f32 %v19490_v14, 0.0  ;;  %v19507_v58 = vand.u32 4294901760, %v6067_v63  ;;  %v6001_v54 = vsel %vm5821_vm0, %v19399_v2, %v11548_v17  ;;  %vm5825_vm3 = vcmp.gt.f32.partialorder %v19490_v14, 0.0 }
 0x6db   : > { %v5507_v31 = vpop.f32.mrb[59].mxu0  ;;  %v6339_v18 = vand.u32 4294901760, %v6338_v55  ;;  %v6070_v51 = vsel %vm1017_vm14, %v6001_v54, 0  ;;  %13901 = vpow2.f32 %v5915_v34  ;;  %v19539_v34 = vadd.f32 %v19136_v7, %v19386_v42  ;;  %v13900_v42 = vpop.eup %13899 }
 0x6dc   : > { %v19511_v44 = vsub.f32 %v6067_v63, %v19507_v58  ;;  %v5917_v36 = vmul.f32 1.442695, %v5861_v37  ;;  %v19521_v55 = vand.u32 4294901760, %v6070_v51  ;;  %v11549_v63 = vadd.f32 -1.0, %v13898_v25 }
 0x6dd   : > { %12076 = vmatprep.mubr.f32.mxu1 %v6339_v18  ;;  %v5862_v18 = vmin.f32 %v19517_v38, 0.0  ;;  %v19535_v37 = vadd.f32 %v19136_v7, %v19368_v30  ;;  %23458 = vst [vmem:[#allocation76_spill] sm:$0xff] %v19539_v34  ;;  %v19549_v30 = vsub.f32 %v19126_v59, %v19129_v10  ;;  %vm5826_vm5 = vcmp.gt.f32.partialorder %v19517_v38, 0.0 }
 0x6de   : > { %v19496_v3 = vpop.f32.mrb[60].mxu0  ;;  %23455 = vst [vmem:[#allocation137_spill] sm:$0xff] %v19511_v44  ;;  %v22367_v35 = vand.u32 4294901760, %v19511_v44  ;;  %v19527_v2 = vsub.f32 %v6070_v51, %v19521_v55  ;;  %13903 = vpow2.f32 %v5917_v36  ;;  %v6002_v25 = vsel %vm5822_vm1, %v19425_v22, %v11549_v63 }
 0x6df   : > { %v5514_v31 = vpop.f32.mrb[61].mxu0  ;;  %23457 = vst [vmem:[#allocation138_spill] sm:$0xff] %v19535_v37  ;;  %v6073_v53 = vsel %vm1017_vm14, %v6002_v25, 0  ;;  %v19559_v63 = vsub.f32 0.0, %v19539_v34  ;;  %v19565_v59 = vand.u32 4294901760, %v19549_v30 }
 0x6e0   : > { %v6348_v57 = vsub.f32 %v19511_v44, %v22367_v35  ;;  %23456 = vst [vmem:[#allocation132_spill] sm:$0xff] %v19527_v2  ;;  %v22372_v51 = vand.u32 4294901760, %v19527_v2  ;;  %v19556_v44 = vand.u32 4294901760, %v6073_v53 }
 0x6e1   : > { %v5864_v41 = vmin.f32 %v19559_v63, 0.0  ;;  %vm5828_vm12 = vcmp.gt.f32.partialorder %v19559_v63, 0.0 }
 0x6e2   : > { %v19514_v45 = vpop.f32.mrb[62].mxu0  ;;  %v6358_v35 = vsub.f32 %v19527_v2, %v22372_v51  ;;  %v19562_v25 = vsub.f32 %v6073_v53, %v19556_v44  ;;  %v11550_v51 = vadd.f32 -1.0, %v13900_v42  ;;  %v6559_v53 = vsub.f32 %v19549_v30, %v19565_v59 }
 0x6e3   : > { %v5521_v31 = vpop.f32.mrb[63].mxu0 }
 0x6e4   : > { %v6349_v31 = vand.u32 4294901760, %v6348_v57  ;;  %v19554_v57 = vsub.f32 0.0, %v19535_v37  ;;  %23459 = vst [vmem:[#allocation83_spill] sm:$0xff] %v19562_v25  ;;  %v6003_v5 = vsel %vm5823_vm10, %v19454_v33, %v11550_v51  ;;  %v6560_v42 = vand.u32 4294901760, %v6559_v53 }
 0x6e5   : > { %v13902_v2 = vpop.eup %13901  ;;  %v5923_v51 = vmul.f32 1.442695, %v5864_v41 }
 0x6e6   : > { %v19529_v17 = vpop.f32.mrb[64].mxu0  ;;  %12077 = vmatmul.mubr.f32.gmra.mrb[14].mxu1 %v6349_v31  ;;  %v6359_v31 = vand.u32 4294901760, %v6358_v35  ;;  %v22393_v35 = vand.u32 4294901760, %v19562_v25  ;;  %12109 = vmatprep.subr.mxu1 %v6560_v42  ;;  %v11551_v27 = vadd.f32 -1.0, %v13902_v2  ;;  %vm5827_vm13 = vcmp.gt.f32.partialorder %v19554_v57, 0.0 }
 0x6e7   : > { %v5528_v54 = vpop.f32.mrb[65].mxu0  ;;  %12110 = vmatpush3.msra.mxu1 %v6560_v42 }
 0x6e8   : > { %v5919_v54 = vmul.f32 1.442695, %v5862_v18  ;;  %v19570_v18 = vadd.f32 %v19136_v7, %v19401_v47  ;;  %12079 = vmatprep.mubr.f32.mxu1 %v6359_v31  ;;  %v6368_v47 = vsub.f32 %v19562_v25, %v22393_v35  ;;  %v13904_v31 = vpop.eup %13903  ;;  %12165 = vmatprep.subr.mxu1 %v19549_v30 }
 0x6e9   : > { %v11552_v35 = vadd.f32 -1.0, %v13904_v31 }
 0x6ea   : > { %v19551_v36 = vpop.f32.mrb[66].mxu0  ;;  %23460 = vst [vmem:[#allocation81_spill] sm:$0xff] %v19570_v18  ;;  %13905 = vpow2.f32 %v5919_v54  ;;  %v6076_v54 = vsel %vm1017_vm14, %v6003_v5, 0  ;;  %v19585_v43 = vsub.f32 0.0, %v19570_v18  ;;  %v6369_v62 = vand.u32 4294901760, %v6368_v47 }
 0x6eb   : > { %v5535_v22 = vpop.f32.mrb[67].mxu0  ;;  %v19587_v20 = vand.u32 4294901760, %v6076_v54  ;;  %v6004_v5 = vsel %vm5824_vm11, %v19479_v39, %v11551_v27 }
 0x6ec   : > { %v5863_v22 = vmin.f32 %v19554_v57, 0.0  ;;  %12080 = vmatmul.mubr.f32.gmra.mrb[16].mxu1 %v6369_v62  ;;  %v5865_v18 = vmin.f32 %v19585_v43, 0.0  ;;  %v6079_v41 = vsel %vm1017_vm14, %v6004_v5, 0  ;;  %v6005_v62 = vsel %vm5825_vm3, %v19490_v14, %v11552_v35 }
 0x6ed   : > { %v19593_v53 = vsub.f32 %v6076_v54, %v19587_v20  ;;  %v19605_v47 = vand.u32 4294901760, %v6079_v41  ;;  %v6082_v42 = vsel %vm1017_vm14, %v6005_v62, 0  ;;  %vm5829_vm4 = vcmp.gt.f32.partialorder %v19585_v43, 0.0 }
 0x6ee   : > { %v19572_v37 = vpop.f32.mrb[68].mxu0  ;;  %v5925_v54 = vmul.f32 1.442695, %v5865_v18  ;;  %v19623_v5 = vand.u32 4294901760, %v6082_v42 }
 0x6ef   : > { %v5542_v34 = vpop.f32.mrb[69].mxu0  ;;  %23461 = vst [vmem:[#allocation87_spill] sm:$0xff] %v19593_v53  ;;  %v22397_v2 = vand.u32 4294901760, %v19593_v53 }
 0x6f0   : > { %v5921_v34 = vmul.f32 1.442695, %v5863_v22  ;;  %v19600_v22 = vadd.f32 %v19136_v7, %v19417_v1  ;;  %v19612_v1 = vsub.f32 %v6079_v41, %v19605_v47  ;;  %23465 = vst [vmem:[#allocation95_spill] sm:$0xff] %v19623_v5  ;;  %v19630_v35 = vsub.f32 %v6082_v42, %v19623_v5 }
 0x6f1   : > { %v6378_v27 = vsub.f32 %v19593_v53, %v22397_v2 }
 0x6f2   : > { %v19589_v40 = vpop.f32.mrb[70].mxu0  ;;  %23462 = vst [vmem:[#allocation85_spill] sm:$0xff] %v19600_v22  ;;  %13907 = vpow2.f32 %v5921_v34  ;;  %23463 = vst [vmem:[#allocation91_spill] sm:$0xff] %v19612_v1  ;;  %v19616_v31 = vsub.f32 0.0, %v19600_v22  ;;  %v19620_v34 = vadd.f32 %v19136_v7, %v19431_v9 }
 0x6f3   : > { %v5549_v33 = vpop.f32.mrb[71].mxu0  ;;  %13909 = vpow2.f32 %v5923_v51  ;;  %v22396_v51 = vand.u32 4294901760, %v19612_v1  ;;  %23466 = vst [vmem:[#allocation93_spill] sm:$0xff] %v19630_v35 }
 0x6f4   : > { %v13906_v39 = vpop.eup %13905  ;;  %23464 = vst [vmem:[#allocation89_spill] sm:$0xff] %v19620_v34  ;;  %v6379_v33 = vand.u32 4294901760, %v6378_v27  ;;  %13911 = vpow2.f32 %v5925_v54  ;;  %v5866_v9 = vmin.f32 %v19616_v31, 0.0  ;;  %v19634_v41 = vsub.f32 0.0, %v19620_v34 }
 0x6f5   : > { %v11553_v14 = vadd.f32 -1.0, %v13906_v39  ;;  %v6388_v18 = vsub.f32 %v19612_v1, %v22396_v51  ;;  %v19638_v27 = vadd.f32 %v19136_v7, %v19446_v56  ;;  %v22402_v39 = vand.u32 4294901760, %v19630_v35 }
 0x6f6   : > { %12082 = vmatprep.mubr.f32.mxu1 %v6379_v33  ;;  %v5927_v22 = vmul.f32 1.442695, %v5866_v9  ;;  %v5867_v56 = vmin.f32 %v19634_v41, 0.0  ;;  %v19722_v1 = vadd.f32 %v19136_v7, %v19551_v36  ;;  %vm5830_vm6 = vcmp.gt.f32.partialorder %v19616_v31, 0.0 }
 0x6f7   : > { %23467 = vst [vmem:[#allocation100_spill] sm:$0xff] %v19638_v27  ;;  %v6389_v62 = vand.u32 4294901760, %v6388_v18  ;;  %v6006_v33 = vsel %vm5826_vm5, %v19517_v38, %v11553_v14  ;;  %v6398_v42 = vsub.f32 %v19630_v35, %v22402_v39  ;;  %v19650_v18 = vsub.f32 0.0, %v19638_v27 }
 0x6f8   : > { %v6085_v51 = vsel %vm1017_vm14, %v6006_v33, 0  ;;  %v19654_v38 = vadd.f32 %v19136_v7, %v19463_v6  ;;  %v19661_v33 = vadd.f32 %v19136_v7, %v19481_v16  ;;  %v19667_v27 = vadd.f32 %v19136_v7, %v19496_v3  ;;  %23479 = vst [vmem:[#allocation121_spill] sm:$0xff] %v19722_v1 }
 0x6f9   : > { %12083 = vmatmul.mubr.f32.gmra.mrb[18].mxu1 %v6389_v62  ;;  %v19646_v54 = vand.u32 4294901760, %v6085_v51  ;;  %v6399_v14 = vand.u32 4294901760, %v6398_v42  ;;  %13913 = vpow2.f32 %v5927_v22  ;;  %v5929_v42 = vmul.f32 1.442695, %v5867_v56 }
 0x6fa   : > { %23469 = vst [vmem:[#allocation105_spill] sm:$0xff] %v19654_v38  ;;  %23471 = vst [vmem:[#allocation108_spill] sm:$0xff] %v19661_v33  ;;  %v19673_v16 = vsub.f32 0.0, %v19654_v38  ;;  %v19690_v38 = vadd.f32 %v19136_v7, %v19514_v45  ;;  %vm5831_vm9 = vcmp.gt.f32.partialorder %v19634_v41, 0.0  ;;  %vm5832_vm7 = vcmp.gt.f32.partialorder %v19650_v18, 0.0 }
 0x6fb   : > { %23468 = vst [vmem:[#allocation97_spill] sm:$0xff] %v19646_v54  ;;  %v19657_v62 = vsub.f32 %v6085_v51, %v19646_v54  ;;  %12085 = vmatprep.mubr.f32.mxu1 %v6399_v14  ;;  %23472 = vst [vmem:[#allocation8_spill] sm:$0xff] %v19667_v27  ;;  %v5868_v51 = vmin.f32 %v19650_v18, 0.0  ;;  %13915 = vpow2.f32 %v5929_v42 }
 0x6fc   : > { %v13908_v2 = vpop.eup %13907  ;;  %23474 = vst [vmem:[#allocation109_spill] sm:$0xff] %v19690_v38  ;;  %vm5833_vm2 = vcmp.gt.f32.partialorder %v19673_v16, 0.0 }
 0x6fd   : > { %v13910_v34 = vpop.eup %13909  ;;  %23470 = vst [vmem:[#allocation102_spill] sm:$0xff] %v19657_v62  ;;  %v11554_v39 = vadd.f32 -1.0, %v13908_v2  ;;  %v22409_v9 = vand.u32 4294901760, %v19657_v62 }
 0x6fe   : > { %v11555_v6 = vadd.f32 -1.0, %v13910_v34  ;;  %v13912_v3 = vpop.eup %13911  ;;  %v19680_v34 = vsub.f32 0.0, %v19661_v33  ;;  %v5869_v33 = vmin.f32 %v19673_v16, 0.0 }
 0x6ff   : > { %v6007_v35 = vsel %vm5827_vm13, %v19554_v57, %v11554_v39  ;;  %v6408_v2 = vsub.f32 %v19657_v62, %v22409_v9  ;;  %v19686_v39 = vsub.f32 0.0, %v19667_v27  ;;  %v5931_v9 = vmul.f32 1.442695, %v5868_v51 }
 0x700   : > { %v6088_v14 = vsel %vm1017_vm14, %v6007_v35, 0  ;;  %v6008_v56 = vsel %vm5828_vm12, %v19559_v63, %v11555_v6  ;;  %v19699_v63 = vadd.f32 %v19136_v7, %v19529_v17  ;;  %v11556_v6 = vadd.f32 -1.0, %v13912_v3 }
 0x701   : > { %v19682_v22 = vand.u32 4294901760, %v6088_v14  ;;  %v6409_v57 = vand.u32 4294901760, %v6408_v2  ;;  %v6091_v62 = vsel %vm1017_vm14, %v6008_v56, 0  ;;  %v5870_v2 = vmin.f32 %v19680_v34, 0.0 }
 0x702   : > { %23476 = vst [vmem:[#allocation111_spill] sm:$0xff] %v19699_v63  ;;  %v19703_v27 = vand.u32 4294901760, %v6091_v62  ;;  %v5871_v42 = vmin.f32 %v19686_v39, 0.0  ;;  %v19708_v51 = vsub.f32 0.0, %v19690_v38  ;;  %v19717_v3 = vsub.f32 0.0, %v19699_v63 }
 0x703   : > { %23473 = vst [vmem:[#allocation112_spill] sm:$0xff] %v19682_v22  ;;  %v19693_v35 = vsub.f32 %v6088_v14, %v19682_v22  ;;  %12086 = vmatmul.mubr.f32.gmra.mrb[20].mxu1 %v6409_v57  ;;  %v6009_v56 = vsel %vm5829_vm4, %v19585_v43, %v11556_v6  ;;  %13917 = vpow2.f32 %v5931_v9  ;;  %v5933_v57 = vmul.f32 1.442695, %v5869_v33  ;;  %v13914_v38 = vpop.eup %13913 }
 0x704   : > { %23477 = vst [vmem:[#allocation115_spill] sm:$0xff] %v19703_v27  ;;  %v19714_v17 = vsub.f32 %v6091_v62, %v19703_v27  ;;  %v5935_v53 = vmul.f32 1.442695, %v5870_v2  ;;  %v5937_v62 = vmul.f32 1.442695, %v5871_v42  ;;  %v5873_v33 = vmin.f32 %v19717_v3, 0.0 }
 0x705   : > { %23475 = vst [vmem:[#allocation113_spill] sm:$0xff] %v19693_v35  ;;  %v22426_v45 = vand.u32 4294901760, %v19693_v35  ;;  %13919 = vpow2.f32 %v5933_v57  ;;  %v19734_v7 = vsub.f32 0.0, %v19722_v1  ;;  %v11557_v36 = vadd.f32 -1.0, %v13914_v38  ;;  %v13916_v6 = vpop.eup %13915 }
 0x706   : > { %23478 = vst [vmem:[#allocation20_spill] sm:$0xff] %v19714_v17  ;;  %v22429_v50 = vand.u32 4294901760, %v19714_v17  ;;  %13921 = vpow2.f32 %v5935_v53  ;;  %v14255_v53 = vld [vmem:[%s21818_s2] ss:$0 sm:$0xff]  ;;  %vm5834_vm15 = vcmp.gt.f32.partialorder %v19680_v34, 0.0  ;;  %vm5835_vm0 = vcmp.gt.f32.partialorder %v19686_v39, 0.0 }
 0x707   : > { %v6418_v14 = vsub.f32 %v19693_v35, %v22426_v45  ;;  %v6094_v45 = vsel %vm1017_vm14, %v6009_v56, 0  ;;  %v5872_v35 = vmin.f32 %v19708_v51, 0.0  ;;  %13923 = vpow2.f32 %v5937_v62 }
 0x708   : > { %v6428_v43 = vsub.f32 %v19714_v17, %v22429_v50  ;;  %v19731_v9 = vand.u32 4294901760, %v6094_v45  ;;  %v5941_v56 = vmul.f32 1.442695, %v5873_v33  ;;  %v5874_v50 = vmin.f32 %v19734_v7, 0.0 }
 0x709   : > { %v6419_v25 = vand.u32 4294901760, %v6418_v14  ;;  %v5939_v42 = vmul.f32 1.442695, %v5872_v35  ;;  %v6010_v14 = vsel %vm5830_vm6, %v19616_v31, %v11557_v36  ;;  %v11558_v35 = vadd.f32 -1.0, %v13916_v6 }
 0x70a   : > { %23480 = vst [vmem:[#allocation119_spill] sm:$0xff] %v19731_v9  ;;  %v6429_v2 = vand.u32 4294901760, %v6428_v43  ;;  %v6097_v38 = vsel %vm1017_vm14, %v6010_v14, 0  ;;  %v19760_v33 = vadd.f32 %v14255_v53, %v19589_v40  ;;  %vm5836_vm1 = vcmp.gt.f32.partialorder %v19708_v51, 0.0 }
 0x70b   : > { %12088 = vmatprep.mubr.f32.mxu1 %v6419_v25  ;;  %v19738_v25 = vsub.f32 %v6094_v45, %v19731_v9  ;;  %v19744_v1 = vand.u32 4294901760, %v6097_v38  ;;  %v19750_v45 = vadd.f32 %v14255_v53, %v19572_v37  ;;  %13925 = vpow2.f32 %v5939_v42 }
 0x70c   : > { %12089 = vmatmul.mubr.f32.gmra.mrb[22].mxu1 %v6429_v2  ;;  %23485 = vst [vmem:[#allocation136_spill] sm:$0xff] %v19760_v33  ;;  %13927 = vpow2.f32 %v5941_v56  ;;  %v5943_v2 = vmul.f32 1.442695, %v5874_v50  ;;  %v6011_v14 = vsel %vm5831_vm9, %v19634_v41, %v11558_v35  ;;  %v19773_v56 = vsub.f32 0.0, %v19760_v33 }
 0x70d   : > { %23481 = vst [vmem:[#allocation125_spill] sm:$0xff] %v19738_v25  ;;  %v22432_v57 = vand.u32 4294901760, %v19738_v25  ;;  %23482 = vst [vmem:[#allocation25_spill] sm:$0xff] %v19744_v1  ;;  %v13918_v62 = vpop.eup %13917  ;;  %v19757_v43 = vsub.f32 %v6097_v38, %v19744_v1  ;;  %v19763_v37 = vsub.f32 0.0, %v19750_v45  ;;  %v6100_v40 = vsel %vm1017_vm14, %v6011_v14, 0 }
 0x70e   : > { %23483 = vst [vmem:[#allocation126_spill] sm:$0xff] %v19750_v45  ;;  %v11559_v50 = vadd.f32 -1.0, %v13918_v62  ;;  %13929 = vpow2.f32 %v5943_v2  ;;  %v19775_v45 = vand.u32 4294901760, %v6100_v40  ;;  %v5876_v14 = vmin.f32 %v19773_v56, 0.0 }
 0x70f   : > { %v6438_v31 = vsub.f32 %v19738_v25, %v22432_v57  ;;  %23484 = vst [vmem:[#allocation129_spill] sm:$0xff] %v19757_v43  ;;  %v22435_v6 = vand.u32 4294901760, %v19757_v43  ;;  %v5875_v57 = vmin.f32 %v19763_v37, 0.0  ;;  %v13920_v42 = vpop.eup %13919  ;;  %vm5837_vm10 = vcmp.gt.f32.partialorder %v19717_v3, 0.0 }
 0x710   : > { %v13922_v53 = vpop.eup %13921  ;;  %23486 = vst [vmem:[#allocation144_spill] sm:$0xff] %v19775_v45  ;;  %v6012_v62 = vsel %vm5832_vm7, %v19650_v18, %v11559_v50  ;;  %v5947_v33 = vmul.f32 1.442695, %v5876_v14  ;;  %vm5838_vm11 = vcmp.gt.f32.partialorder %v19734_v7, 0.0  ;;  %vm5839_vm3 = vcmp.gt.f32.partialorder %v19763_v37, 0.0 }
 0x711   : > { %v6439_v36 = vand.u32 4294901760, %v6438_v31  ;;  %v6448_v38 = vsub.f32 %v19757_v43, %v22435_v6  ;;  %v5945_v31 = vmul.f32 1.442695, %v5875_v57  ;;  %v13924_v41 = vpop.eup %13923  ;;  %v11560_v57 = vadd.f32 -1.0, %v13920_v42 }
 0x712   : > { %v11561_v2 = vadd.f32 -1.0, %v13922_v53  ;;  %v11562_v63 = vadd.f32 -1.0, %v13924_v41  ;;  %vm5840_vm5 = vcmp.gt.f32.partialorder %v19773_v56, 0.0 }
 0x713   : > { %12091 = vmatprep.mubr.f32.mxu1 %v6439_v36  ;;  %v6449_v35 = vand.u32 4294901760, %v6448_v38  ;;  %v19781_v36 = vsub.f32 %v6100_v40, %v19775_v45  ;;  %13931 = vpow2.f32 %v5945_v31  ;;  %v6103_v38 = vsel %vm1017_vm14, %v6012_v62, 0 }
 0x714   : > { %v19787_v25 = vand.u32 4294901760, %v6103_v38  ;;  %v6013_v40 = vsel %vm5833_vm2, %v19673_v16, %v11560_v57  ;;  %v6014_v17 = vsel %vm5834_vm15, %v19680_v34, %v11561_v2  ;;  %13933 = vpow2.f32 %v5947_v33 }
 0x715   : > { %12092 = vmatmul.mubr.f32.gmra.mrb[24].mxu1 %v6449_v35  ;;  %v22449_v6 = vand.u32 4294901760, %v19781_v36  ;;  %v13926_v43 = vpop.eup %13925  ;;  %v6106_v42 = vsel %vm1017_vm14, %v6013_v40, 0  ;;  %v6109_v16 = vsel %vm1017_vm14, %v6014_v17, 0  ;;  %v6015_v41 = vsel %vm5835_vm0, %v19686_v39, %v11562_v63 }
 0x716   : > { %23487 = vst [vmem:[#allocation98_spill] sm:$0xff] %v19787_v25  ;;  %v13928_v0 = vpop.eup %13927  ;;  %v19798_v50 = vsub.f32 %v6103_v38, %v19787_v25  ;;  %v19800_v53 = vand.u32 4294901760, %v6106_v42  ;;  %v19803_v31 = vand.u32 4294901760, %v6109_v16  ;;  %v11563_v35 = vadd.f32 -1.0, %v13926_v43 }
 0x717   : > { %v6458_v18 = vsub.f32 %v19781_v36, %v22449_v6  ;;  %v6112_v62 = vsel %vm1017_vm14, %v6015_v41, 0  ;;  %v11564_v57 = vadd.f32 -1.0, %v13928_v0 }
 0x718   : > { %23488 = vst [vmem:[#allocation145_spill] sm:$0xff] %v19800_v53  ;;  %23489 = vst [vmem:[#allocation143_spill] sm:$0xff] %v19803_v31  ;;  %v22448_v14 = vand.u32 4294901760, %v19798_v50  ;;  %v19808_v33 = vsub.f32 %v6106_v42, %v19800_v53  ;;  %v13930_v2 = vpop.eup %13929  ;;  %v19812_v38 = vsub.f32 %v6109_v16, %v19803_v31  ;;  %v19814_v17 = vand.u32 4294901760, %v6112_v62 }
 0x719   : > { %v6459_v34 = vand.u32 4294901760, %v6458_v18  ;;  %v6016_v39 = vsel %vm5836_vm1, %v19708_v51, %v11563_v35  ;;  %v6017_v41 = vsel %vm5837_vm10, %v19717_v3, %v11564_v57  ;;  %v11565_v35 = vadd.f32 -1.0, %v13930_v2 }
 0x71a   : > { %23490 = vst [vmem:[#allocation103_spill] sm:$0xff] %v19812_v38  ;;  %23491 = vst [vmem:[#allocation151_spill] sm:$0xff] %v19814_v17  ;;  %v6468_v63 = vsub.f32 %v19798_v50, %v22448_v14  ;;  %v22450_v43 = vand.u32 4294901760, %v19808_v33  ;;  %v6115_v40 = vsel %vm1017_vm14, %v6016_v39, 0  ;;  %v22451_v0 = vand.u32 4294901760, %v19812_v38 }
 0x71b   : > { %12094 = vmatprep.mubr.f32.mxu1 %v6459_v34  ;;  %v19827_v18 = vsub.f32 %v6112_v62, %v19814_v17  ;;  %v19829_v42 = vand.u32 4294901760, %v6115_v40  ;;  %v6118_v57 = vsel %vm1017_vm14, %v6017_v41, 0 }
 0x71c   : > { %v6469_v34 = vand.u32 4294901760, %v6468_v63  ;;  %v6478_v51 = vsub.f32 %v19808_v33, %v22450_v43  ;;  %v6488_v39 = vsub.f32 %v19812_v38, %v22451_v0  ;;  %v19849_v0 = vand.u32 4294901760, %v6118_v57 }
 0x71d   : > { %23492 = vst [vmem:[#allocation150_spill] sm:$0xff] %v19829_v42  ;;  %v13932_v16 = vpop.eup %13931  ;;  %v22454_v14 = vand.u32 4294901760, %v19827_v18  ;;  %v19841_v6 = vsub.f32 %v6115_v40, %v19829_v42 }
 0x71e   : > { %12095 = vmatmul.mubr.f32.gmra.mrb[26].mxu1 %v6469_v34  ;;  %v6479_v62 = vand.u32 4294901760, %v6478_v51  ;;  %v13934_v63 = vpop.eup %13933  ;;  %v6489_v43 = vand.u32 4294901760, %v6488_v39  ;;  %23493 = vst [vmem:[#allocation153_spill] sm:$0xff] %v19849_v0  ;;  %v6018_v34 = vsel %vm5838_vm11, %v19734_v7, %v11565_v35  ;;  %v11566_v51 = vadd.f32 -1.0, %v13932_v16 }
 0x71f   : > { %v6498_v3 = vsub.f32 %v19827_v18, %v22454_v14  ;;  %v22459_v2 = vand.u32 4294901760, %v19841_v6  ;;  %v6121_v38 = vsel %vm1017_vm14, %v6018_v34, 0  ;;  %v11567_v39 = vadd.f32 -1.0, %v13934_v63 }
 0x720   : > { %12097 = vmatprep.mubr.f32.mxu1 %v6479_v62  ;;  %v19858_v41 = vsub.f32 %v6118_v57, %v19849_v0  ;;  %v19860_v62 = vand.u32 4294901760, %v6121_v38  ;;  %v6019_v7 = vsel %vm5839_vm3, %v19763_v37, %v11566_v51 }
 0x721   : > { %v6499_v40 = vand.u32 4294901760, %v6498_v3  ;;  %v6508_v14 = vsub.f32 %v19841_v6, %v22459_v2  ;;  %v6124_v16 = vsel %vm1017_vm14, %v6019_v7, 0  ;;  %v6020_v35 = vsel %vm5840_vm5, %v19773_v56, %v11567_v39  ;;  %v23508_v2 = vld [vmem:[#allocation132_spill] sm:$0xff] }
 0x722   : > { %12098 = vmatmul.mubr.f32.gmra.mrb[28].mxu1 %v6489_v43  ;;  %23494 = vst [vmem:[#allocation2_spill] sm:$0xff] %v19860_v62  ;;  %v22455_v43 = vand.u32 4294901760, %v19858_v41  ;;  %v19869_v3 = vsub.f32 %v6121_v38, %v19860_v62  ;;  %v19871_v34 = vand.u32 4294901760, %v6124_v16  ;;  %v6127_v57 = vsel %vm1017_vm14, %v6020_v35, 0 }
 0x723   : > { %12100 = vmatprep.mubr.f32.mxu1 %v6499_v40  ;;  %v6509_v63 = vand.u32 4294901760, %v6508_v14  ;;  %v19881_v56 = vand.u32 4294901760, %v6127_v57 }
 0x724   : > { %23495 = vst [vmem:[#allocation33_spill] sm:$0xff] %v19871_v34  ;;  %v6518_v37 = vsub.f32 %v19858_v41, %v22455_v43  ;;  %v22456_v51 = vand.u32 4294901760, %v19869_v3  ;;  %v19879_v40 = vsub.f32 %v6124_v16, %v19871_v34 }
 0x725   : > { %23496 = vst [vmem:[#allocation4_spill] sm:$0xff] %v19881_v56  ;;  %v19888_v7 = vsub.f32 %v6127_v57, %v19881_v56  ;;  %v23499_v57 = vld [vmem:[#allocation58_spill] sm:$0xff] }
 0x726   : > { %12101 = vmatmul.mubr.f32.gmra.mrb[30].mxu1 %v6509_v63  ;;  %v6519_v14 = vand.u32 4294901760, %v6518_v37  ;;  %v6528_v38 = vsub.f32 %v19869_v3, %v22456_v51  ;;  %v22458_v39 = vand.u32 4294901760, %v19879_v40 }
 0x727   : > { %v22457_v16 = vand.u32 4294901760, %v19888_v7 }
 0x728   : > { %12103 = vmatprep.mubr.f32.mxu1 %v6519_v14  ;;  %v6529_v35 = vand.u32 4294901760, %v6528_v38  ;;  %v6538_v63 = vsub.f32 %v19879_v40, %v22458_v39  ;;  %v23501_v14 = vld [vmem:[#allocation66_spill] sm:$0xff]  ;;  %v23507_v39 = vld [vmem:[#allocation137_spill] sm:$0xff] }
 0x729   : > { %v6548_v37 = vsub.f32 %v19888_v7, %v22457_v16  ;;  %v23502_v38 = vld [vmem:[#allocation70_spill] sm:$0xff]  ;;  %v23506_v16 = vld [vmem:[#allocation120_spill] sm:$0xff] }
 0x72a   : > { %12104 = vmatmul.mubr.f32.gmra.mrb[32].mxu1 %v6529_v35  ;;  %v6539_v43 = vand.u32 4294901760, %v6538_v63  ;;  %v23503_v35 = vld [vmem:[#allocation74_spill] sm:$0xff]  ;;  %v23504_v63 = vld [vmem:[#allocation72_spill] sm:$0xff] }
 0x72b   : > { %v6549_v51 = vand.u32 4294901760, %v6548_v37  ;;  %v23505_v37 = vld [vmem:[#allocation13_spill] sm:$0xff] }
 0x72c   : > { %12106 = vmatprep.mubr.f32.mxu1 %v6539_v43  ;;  %v23498_v43 = vld [vmem:[#allocation54_spill] sm:$0xff] }
 0x72e   : > { %12107 = vmatmul.mubr.f32.gmra.mrb[34].mxu1 %v6549_v51  ;;  %v23500_v51 = vld [vmem:[#allocation62_spill] sm:$0xff] }
 0x72f   : > { %12111 = vmatprep.mubr.f32.mxu1 %v19164_v13 }
 0x732   : > { %12112 = vmatmul.mubr.f32.vlgmr.msra.gmra.mrb[0].mxu1 %v19191_v15 }
 0x733   : > { %12166 = vmatpush3.msra.mxu1 %v19549_v30  ;;  %12114 = vmatprep.mubr.f32.mxu1 %v19200_v32  ;;  %v23497_v30 = vld [vmem:[#allocation50_spill] sm:$0xff] }
 0x734   : > { %12221 = vmatprep.subr.mxu1 %v19129_v10 }
 0x736   : > { %12115 = vmatmul.mubr.f32.gmra.mrb[2].mxu1 %v19235_v28 }
 0x737   : > { %12117 = vmatprep.mubr.f32.mxu1 %v19253_v61 }
 0x73a   : > { %12118 = vmatmul.mubr.f32.gmra.mrb[4].mxu1 %v19275_v19 }
 0x73b   : > { %12120 = vmatprep.mubr.f32.mxu1 %v19297_v4 }
 0x73e   : > { %12121 = vmatmul.mubr.f32.gmra.mrb[6].mxu1 %v19325_v8 }
 0x73f   : > { %12123 = vmatprep.mubr.f32.mxu1 %v19343_v12 }
 0x742   : > { %12124 = vmatmul.mubr.f32.gmra.mrb[8].mxu1 %v19371_v49 }
 0x743   : > { %12126 = vmatprep.mubr.f32.mxu1 %v19389_v21 }
 0x746   : > { %12127 = vmatmul.mubr.f32.gmra.mrb[10].mxu1 %v19415_v46 }
 0x747   : > { %12129 = vmatprep.mubr.f32.mxu1 %v19429_v60 }
 0x74a   : > { %12130 = vmatmul.mubr.f32.gmra.mrb[12].mxu1 %v19456_v48 }
 0x74b   : > { %12132 = vmatprep.mubr.f32.mxu1 %v19476_v29 }
 0x74e   : > { %12133 = vmatmul.mubr.f32.gmra.mrb[14].mxu1 %v19507_v58 }
 0x74f   : > { %12135 = vmatprep.mubr.f32.mxu1 %v19521_v55 }
 0x752   : > { %12136 = vmatmul.mubr.f32.gmra.mrb[16].mxu1 %v19556_v44 }
 0x753   : > { %12138 = vmatprep.mubr.f32.mxu1 %v19587_v20 }
 0x756   : > { %12139 = vmatmul.mubr.f32.gmra.mrb[18].mxu1 %v19605_v47 }
 0x757   : > { %12141 = vmatprep.mubr.f32.mxu1 %v19623_v5  ;;  %v23524_v5 = vand.u32 4294901760, %v23497_v30 }
 0x75a   : > { %12142 = vmatmul.mubr.f32.gmra.mrb[20].mxu1 %v19646_v54  ;;  %v23523_v54 = vand.u32 4294901760, %v19264_v24 }
 0x75b   : > { %12144 = vmatprep.mubr.f32.mxu1 %v19682_v22  ;;  %v23522_v22 = vand.u32 4294901760, %v19241_v52 }
 0x75e   : > { %12145 = vmatmul.mubr.f32.gmra.mrb[22].mxu1 %v19703_v27  ;;  %v23521_v27 = vand.u32 4294901760, %v19210_v23 }
 0x75f   : > { %12147 = vmatprep.mubr.f32.mxu1 %v19731_v9  ;;  %v23520_v9 = vand.u32 4294901760, %v19198_v11 }
 0x762   : > { %12148 = vmatmul.mubr.f32.gmra.mrb[24].mxu1 %v19744_v1  ;;  %v23519_v1 = vand.u32 4294901760, %v19167_v26 }
 0x763   : > { %12150 = vmatprep.mubr.f32.mxu1 %v19775_v45  ;;  %v23518_v45 = vld [vmem:[#allocation103_spill] sm:$0xff] }
 0x766   : > { %12151 = vmatmul.mubr.f32.gmra.mrb[26].mxu1 %v19787_v25  ;;  %v23517_v25 = vld [vmem:[#allocation129_spill] sm:$0xff] }
 0x767   : > { %12153 = vmatprep.mubr.f32.mxu1 %v19800_v53  ;;  %v23516_v53 = vld [vmem:[#allocation125_spill] sm:$0xff] }
 0x76a   : > { %12154 = vmatmul.mubr.f32.gmra.mrb[28].mxu1 %v19803_v31  ;;  %v23515_v31 = vld [vmem:[#allocation20_spill] sm:$0xff] }
 0x76b   : > { %12156 = vmatprep.mubr.f32.mxu1 %v19814_v17  ;;  %v23514_v17 = vld [vmem:[#allocation113_spill] sm:$0xff] }
 0x76e   : > { %12157 = vmatmul.mubr.f32.gmra.mrb[30].mxu1 %v19829_v42  ;;  %v23513_v42 = vld [vmem:[#allocation102_spill] sm:$0xff] }
 0x76f   : > { %12159 = vmatprep.mubr.f32.mxu1 %v19849_v0  ;;  %v23512_v0 = vld [vmem:[#allocation93_spill] sm:$0xff] }
 0x772   : > { %12160 = vmatmul.mubr.f32.gmra.mrb[32].mxu1 %v19860_v62  ;;  %v23511_v62 = vld [vmem:[#allocation91_spill] sm:$0xff] }
 0x773   : > { %12162 = vmatprep.mubr.f32.mxu1 %v19871_v34  ;;  %v23510_v34 = vld [vmem:[#allocation87_spill] sm:$0xff] }
 0x776   : > { %12163 = vmatmul.mubr.f32.gmra.mrb[34].mxu1 %v19881_v56  ;;  %v23509_v56 = vld [vmem:[#allocation83_spill] sm:$0xff] }
 0x777   : > { %12167 = vmatprep.mubr.f32.mxu1 %v19167_v26  ;;  %v23525_v26 = vand.u32 4294901760, %v23498_v43 }
 0x77a   : > { %12168 = vmatmul.mubr.f32.vlgmr.msra.gmra.mrb[0].mxu1 %v19198_v11  ;;  %v23526_v11 = vand.u32 4294901760, %v23499_v57 }
 0x77b   : > { %12222 = vmatpush3.msra.mxu1 %v19129_v10  ;;  %12170 = vmatprep.mubr.f32.mxu1 %v19210_v23  ;;  %v23527_v23 = vand.u32 4294901760, %v23500_v51 }
 0x77c   : > { %12277 = vmatprep.subr.mxu1 %v19565_v59 }
 0x77e   : > { %12171 = vmatmul.mubr.f32.gmra.mrb[2].mxu1 %v19241_v52  ;;  %v23529_v52 = vand.u32 4294901760, %v23502_v38 }
 0x77f   : > { %12173 = vmatprep.mubr.f32.mxu1 %v19264_v24  ;;  %v23530_v24 = vand.u32 4294901760, %v23503_v35 }
 0x782   : > { %12174 = vmatmul.mubr.f32.gmra.mrb[4].mxu1 %v23497_v30  ;;  %v23537_v30 = vand.u32 4294901760, %v23510_v34 }
 0x783   : > { %12176 = vmatprep.mubr.f32.mxu1 %v23498_v43  ;;  %v23538_v43 = vand.u32 4294901760, %v23511_v62 }
 0x786   : > { %12177 = vmatmul.mubr.f32.gmra.mrb[6].mxu1 %v23499_v57  ;;  %v23539_v57 = vand.u32 4294901760, %v23512_v0 }
 0x787   : > { %12179 = vmatprep.mubr.f32.mxu1 %v23500_v51  ;;  %v23562_v51 = vld [vmem:[#allocation144_spill] sm:$0xff] }
 0x78a   : > { %12180 = vmatmul.mubr.f32.gmra.mrb[8].mxu1 %v23501_v14 }
 0x78b   : > { %12182 = vmatprep.mubr.f32.mxu1 %v23502_v38  ;;  %v23564_v38 = vld [vmem:[#allocation145_spill] sm:$0xff] }
 0x78e   : > { %12183 = vmatmul.mubr.f32.gmra.mrb[10].mxu1 %v23503_v35  ;;  %v23565_v35 = vld [vmem:[#allocation143_spill] sm:$0xff] }
 0x78f   : > { %12185 = vmatprep.mubr.f32.mxu1 %v23504_v63 }
 0x792   : > { %12186 = vmatmul.mubr.f32.gmra.mrb[12].mxu1 %v23505_v37 }
 0x793   : > { %12188 = vmatprep.mubr.f32.mxu1 %v23506_v16 }
 0x796   : > { %12189 = vmatmul.mubr.f32.gmra.mrb[14].mxu1 %v23507_v39 }
 0x797   : > { %12191 = vmatprep.mubr.f32.mxu1 %v23508_v2 }
 0x79a   : > { %12192 = vmatmul.mubr.f32.gmra.mrb[16].mxu1 %v23509_v56 }
 0x79b   : > { %12194 = vmatprep.mubr.f32.mxu1 %v23510_v34  ;;  %v23544_v34 = vand.u32 4294901760, %v23517_v25 }
 0x79e   : > { %12195 = vmatmul.mubr.f32.gmra.mrb[18].mxu1 %v23511_v62  ;;  %v23545_v62 = vand.u32 4294901760, %v19781_v36 }
 0x79f   : > { %12197 = vmatprep.mubr.f32.mxu1 %v23512_v0  ;;  %v23546_v0 = vand.u32 4294901760, %v19798_v50 }
 0x7a2   : > { %12198 = vmatmul.mubr.f32.gmra.mrb[20].mxu1 %v23513_v42 }
 0x7a3   : > { %12200 = vmatprep.mubr.f32.mxu1 %v23514_v17 }
 0x7a6   : > { %12201 = vmatmul.mubr.f32.gmra.mrb[22].mxu1 %v23515_v31 }
 0x7a7   : > { %12203 = vmatprep.mubr.f32.mxu1 %v23516_v53 }
 0x7aa   : > { %12204 = vmatmul.mubr.f32.gmra.mrb[24].mxu1 %v23517_v25  ;;  %v23551_v25 = vand.u32 4294901760, %v19858_v41 }
 0x7ab   : > { %12206 = vmatprep.mubr.f32.mxu1 %v19781_v36  ;;  %v23552_v36 = vand.u32 4294901760, %v19869_v3 }
 0x7ae   : > { %12207 = vmatmul.mubr.f32.gmra.mrb[26].mxu1 %v19798_v50  ;;  %v23553_v50 = vand.u32 4294901760, %v19879_v40 }
 0x7af   : > { %12209 = vmatprep.mubr.f32.mxu1 %v19808_v33 }
 0x7b2   : > { %12210 = vmatmul.mubr.f32.gmra.mrb[28].mxu1 %v23518_v45 }
 0x7b3   : > { %12212 = vmatprep.mubr.f32.mxu1 %v19827_v18 }
 0x7b6   : > { %12213 = vmatmul.mubr.f32.gmra.mrb[30].mxu1 %v19841_v6 }
 0x7b7   : > { %12215 = vmatprep.mubr.f32.mxu1 %v19858_v41  ;;  %v23558_v41 = vld [vmem:[#allocation112_spill] sm:$0xff] }
 0x7ba   : > { %12216 = vmatmul.mubr.f32.gmra.mrb[32].mxu1 %v19869_v3  ;;  %v23559_v3 = vld [vmem:[#allocation115_spill] sm:$0xff] }
 0x7bb   : > { %12218 = vmatprep.mubr.f32.mxu1 %v19879_v40  ;;  %v23560_v40 = vld [vmem:[#allocation119_spill] sm:$0xff] }
 0x7be   : > { %12219 = vmatmul.mubr.f32.gmra.mrb[34].mxu1 %v19888_v7 }
 0x7bf   : > { %12223 = vmatprep.mubr.f32.mxu1 %v23519_v1  ;;  %v23531_v1 = vand.u32 4294901760, %v23504_v63  ;;  %v23566_v63 = vld [vmem:[#allocation151_spill] sm:$0xff] }
 0x7c2   : > { %12224 = vmatmul.mubr.f32.vlgmr.msra.gmra.mrb[0].mxu1 %v23520_v9  ;;  %v23536_v9 = vand.u32 4294901760, %v23509_v56  ;;  %v23543_v56 = vand.u32 4294901760, %v23516_v53  ;;  %v23550_v53 = vand.u32 4294901760, %v19841_v6 }
 0x7c3   : > { %12278 = vmatpush3.msra.mxu1 %v19565_v59  ;;  %12226 = vmatprep.mubr.f32.mxu1 %v23521_v27  ;;  %v23528_v59 = vand.u32 4294901760, %v23501_v14  ;;  %v23533_v27 = vand.u32 4294901760, %v23506_v16  ;;  %v23540_v16 = vand.u32 4294901760, %v23513_v42  ;;  %v23547_v42 = vand.u32 4294901760, %v19808_v33  ;;  %v23563_v14 = vld [vmem:[#allocation98_spill] sm:$0xff] }
 0x7c4   : > { %12333 = vmatprep.subr.mxu1 %v19129_v10  ;;  %v23554_v33 = vand.u32 4294901760, %v19888_v7  ;;  %v23561_v7 = vld [vmem:[#allocation25_spill] sm:$0xff] }
 0x7c6   : > { %12227 = vmatmul.mubr.f32.gmra.mrb[2].mxu1 %v23522_v22  ;;  %v23535_v22 = vand.u32 4294901760, %v23508_v2  ;;  %v23542_v2 = vand.u32 4294901760, %v23515_v31  ;;  %v23549_v31 = vand.u32 4294901760, %v19827_v18  ;;  %v23557_v18 = vld [vmem:[#allocation97_spill] sm:$0xff] }
 0x7c7   : > { %12229 = vmatprep.mubr.f32.mxu1 %v23523_v54  ;;  %v23534_v54 = vand.u32 4294901760, %v23507_v39  ;;  %v23541_v39 = vand.u32 4294901760, %v23514_v17  ;;  %v23548_v17 = vand.u32 4294901760, %v23518_v45  ;;  %v5551_v45 = vld [vmem:[%s21819_s3] sm:$0xff] }
 0x7c8   : > { %v20051_v6 = vand.u32 4294901760, %v5551_v45 }
 0x7ca   : > { %12230 = vmatmul.mubr.f32.gmra.mrb[4].mxu1 %v23524_v5  ;;  %v23532_v5 = vand.u32 4294901760, %v23505_v37  ;;  %23555 = vst [vmem:[#allocation31_spill] sm:$0xff] %v20051_v6  ;;  %v20086_v37 = vsub.f32 %v5551_v45, %v20051_v6  ;;  %v23583_v45 = vld [vmem:[#allocation46_spill] sm:$0xff] }
 0x7cb   : > { %12232 = vmatprep.mubr.f32.mxu1 %v23525_v26  ;;  %v23567_v26 = vld [vmem:[#allocation150_spill] sm:$0xff]  ;;  %vm5563_vm10 = vcmp.gt.f32.partialorder %v23583_v45, 0.0 }
 0x7ce   : > { %12233 = vmatmul.mubr.f32.gmra.mrb[6].mxu1 %v23526_v11  ;;  %v23568_v11 = vld [vmem:[#allocation153_spill] sm:$0xff] }
 0x7cf   : > { %12235 = vmatprep.mubr.f32.mxu1 %v23527_v23  ;;  %v20091_v23 = vand.u32 4294901760, %v20086_v37 }
 0x7d1   : > { %23569 = vst [vmem:[#allocation37_spill] sm:$0xff] %v20091_v23 }
 0x7d2   : > { %12236 = vmatmul.mubr.f32.gmra.mrb[8].mxu1 %v23528_v59  ;;  %v23570_v59 = vld [vmem:[#allocation2_spill] sm:$0xff] }
 0x7d3   : > { %12238 = vmatprep.mubr.f32.mxu1 %v23529_v52  ;;  %v23571_v52 = vld [vmem:[#allocation33_spill] sm:$0xff] }
 0x7d6   : > { %12239 = vmatmul.mubr.f32.gmra.mrb[10].mxu1 %v23530_v24  ;;  %v8618_v24 = vsub.f32 %v20086_v37, %v20091_v23 }
 0x7d7   : > { %12241 = vmatprep.mubr.f32.mxu1 %v23531_v1  ;;  %v23572_v1 = vld [vmem:[#allocation4_spill] sm:$0xff] }
 0x7da   : > { %12242 = vmatmul.mubr.f32.gmra.mrb[12].mxu1 %v23532_v5  ;;  %v20099_v5 = vand.u32 4294901760, %v8618_v24 }
 0x7db   : > { %12244 = vmatprep.mubr.f32.mxu1 %v23533_v27  ;;  %v23573_v27 = vld [vmem:[#allocation5_spill] sm:$0xff] }
 0x7dc   : > { %vm5553_vm13 = vcmp.gt.f32.partialorder %v23573_v27, 0.0 }
 0x7de   : > { %12245 = vmatmul.mubr.f32.gmra.mrb[14].mxu1 %v23534_v54  ;;  %v5589_v54 = vmin.f32 %v23573_v27, 0.0 }
 0x7df   : > { %12247 = vmatprep.mubr.f32.mxu1 %v23535_v22  ;;  %v23574_v22 = vld [vmem:[#allocation6_spill] sm:$0xff] }
 0x7e0   : > { %vm5554_vm12 = vcmp.gt.f32.partialorder %v23574_v22, 0.0 }
 0x7e2   : > { %12248 = vmatmul.mubr.f32.gmra.mrb[16].mxu1 %v23536_v9  ;;  %v5590_v9 = vmin.f32 %v23574_v22, 0.0 }
 0x7e3   : > { %12250 = vmatprep.mubr.f32.mxu1 %v23537_v30  ;;  %v5625_v30 = vmul.f32 1.442695, %v5589_v54 }
 0x7e5   : > { %13935 = vpow2.f32 %v5625_v30 }
 0x7e6   : > { %12251 = vmatmul.mubr.f32.gmra.mrb[18].mxu1 %v23538_v43  ;;  %v5627_v43 = vmul.f32 1.442695, %v5590_v9  ;;  %v23584_v9 = vld [vmem:[#allocation44_spill] sm:$0xff] }
 0x7e7   : > { %12253 = vmatprep.mubr.f32.mxu1 %v23539_v57  ;;  %v5600_v30 = vmin.f32 %v23584_v9, 0.0  ;;  %vm5564_vm11 = vcmp.gt.f32.partialorder %v23584_v9, 0.0 }
 0x7e8   : > { %13937 = vpow2.f32 %v5627_v43 }
 0x7ea   : > { %12254 = vmatmul.mubr.f32.gmra.mrb[20].mxu1 %v23540_v16  ;;  %v23576_v16 = vld [vmem:[#allocation3_spill] sm:$0xff] }
 0x7eb   : > { %12256 = vmatprep.mubr.f32.mxu1 %v23541_v39  ;;  %v5592_v39 = vmin.f32 %v23576_v16, 0.0  ;;  %vm5556_vm6 = vcmp.gt.f32.partialorder %v23576_v16, 0.0 }
 0x7ee   : > { %12257 = vmatmul.mubr.f32.gmra.mrb[22].mxu1 %v23542_v2 }
 0x7ef   : > { %12259 = vmatprep.mubr.f32.mxu1 %v23543_v56  ;;  %v23578_v56 = vld [vmem:[#allocation32_spill] sm:$0xff] }
 0x7f0   : > { %vm5558_vm7 = vcmp.gt.f32.partialorder %v23578_v56, 0.0 }
 0x7f2   : > { %12260 = vmatmul.mubr.f32.gmra.mrb[24].mxu1 %v23544_v34  ;;  %v23579_v34 = vld [vmem:[#allocation38_spill] sm:$0xff] }
 0x7f3   : > { %12262 = vmatprep.mubr.f32.mxu1 %v23545_v62  ;;  %v5595_v62 = vmin.f32 %v23579_v34, 0.0  ;;  %vm5559_vm2 = vcmp.gt.f32.partialorder %v23579_v34, 0.0 }
 0x7f6   : > { %12263 = vmatmul.mubr.f32.gmra.mrb[26].mxu1 %v23546_v0  ;;  %v23580_v0 = vld [vmem:[#allocation36_spill] sm:$0xff] }
 0x7f7   : > { %12265 = vmatprep.mubr.f32.mxu1 %v23547_v42  ;;  %vm5560_vm15 = vcmp.gt.f32.partialorder %v23580_v0, 0.0 }
 0x7fa   : > { %12266 = vmatmul.mubr.f32.gmra.mrb[28].mxu1 %v23548_v17  ;;  %v23581_v17 = vld [vmem:[#allocation42_spill] sm:$0xff] }
 0x7fb   : > { %12268 = vmatprep.mubr.f32.mxu1 %v23549_v31  ;;  %v5597_v31 = vmin.f32 %v23581_v17, 0.0  ;;  %vm5561_vm0 = vcmp.gt.f32.partialorder %v23581_v17, 0.0 }
 0x7fe   : > { %12269 = vmatmul.mubr.f32.gmra.mrb[30].mxu1 %v23550_v53  ;;  %v13936_v53 = vpop.eup %13935 }
 0x7ff   : > { %12271 = vmatprep.mubr.f32.mxu1 %v23551_v25  ;;  %v23582_v25 = vld [vmem:[#allocation40_spill] sm:$0xff]  ;;  %v11496_v24 = vadd.f32 -1.0, %v13936_v53 }
 0x800   : > { %v23589_v53 = vld [vmem:[#allocation64_spill] sm:$0xff]  ;;  %vm5562_vm1 = vcmp.gt.f32.partialorder %v23582_v25, 0.0 }
 0x802   : > { %12272 = vmatmul.mubr.f32.gmra.mrb[32].mxu1 %v23552_v36  ;;  %v5598_v36 = vmin.f32 %v23582_v25, 0.0 }
 0x803   : > { %12274 = vmatprep.mubr.f32.mxu1 %v23553_v50 }
 0x806   : > { %12275 = vmatmul.mubr.f32.gmra.mrb[34].mxu1 %v23554_v33  ;;  %v5599_v33 = vmin.f32 %v23583_v45, 0.0 }
 0x807   : > { %12279 = vmatprep.mubr.f32.mxu1 %v19164_v13 }
 0x808   : > { %v5645_v43 = vmul.f32 1.442695, %v5599_v33 }
 0x80a   : > { %12280 = vmatmul.mubr.f32.vlgmr.msra.gmra.mrb[0].mxu1 %v19191_v15 }
 0x80b   : > { %12334 = vmatpush3.msra.mxu1 %v19129_v10  ;;  %12282 = vmatprep.mubr.f32.mxu1 %v19200_v32  ;;  %v23556_v10 = vld [vmem:[#allocation95_spill] sm:$0xff] }
 0x80c   : > { %12389 = vmatprep.subr.mxu1 %v20051_v6 }
 0x80e   : > { %12283 = vmatmul.mubr.f32.gmra.mrb[2].mxu1 %v19235_v28 }
 0x80f   : > { %12285 = vmatprep.mubr.f32.mxu1 %v19253_v61 }
 0x812   : > { %12286 = vmatmul.mubr.f32.gmra.mrb[4].mxu1 %v19275_v19 }
 0x813   : > { %12288 = vmatprep.mubr.f32.mxu1 %v19297_v4 }
 0x816   : > { %12289 = vmatmul.mubr.f32.gmra.mrb[6].mxu1 %v19325_v8 }
 0x817   : > { %12291 = vmatprep.mubr.f32.mxu1 %v19343_v12 }
 0x81a   : > { %12292 = vmatmul.mubr.f32.gmra.mrb[8].mxu1 %v19371_v49 }
 0x81b   : > { %12294 = vmatprep.mubr.f32.mxu1 %v19389_v21 }
 0x81e   : > { %12295 = vmatmul.mubr.f32.gmra.mrb[10].mxu1 %v19415_v46 }
 0x81f   : > { %12297 = vmatprep.mubr.f32.mxu1 %v19429_v60 }
 0x822   : > { %12298 = vmatmul.mubr.f32.gmra.mrb[12].mxu1 %v19456_v48 }
 0x823   : > { %12300 = vmatprep.mubr.f32.mxu1 %v19476_v29 }
 0x826   : > { %12301 = vmatmul.mubr.f32.gmra.mrb[14].mxu1 %v19507_v58 }
 0x827   : > { %12303 = vmatprep.mubr.f32.mxu1 %v19521_v55 }
 0x82a   : > { %12304 = vmatmul.mubr.f32.gmra.mrb[16].mxu1 %v19556_v44 }
 0x82b   : > { %12306 = vmatprep.mubr.f32.mxu1 %v19587_v20 }
 0x82e   : > { %12307 = vmatmul.mubr.f32.gmra.mrb[18].mxu1 %v19605_v47 }
 0x82f   : > { %12309 = vmatprep.mubr.f32.mxu1 %v23556_v10 }
 0x832   : > { %12310 = vmatmul.mubr.f32.gmra.mrb[20].mxu1 %v23557_v18 }
 0x833   : > { %12312 = vmatprep.mubr.f32.mxu1 %v23558_v41 }
 0x836   : > { %12313 = vmatmul.mubr.f32.gmra.mrb[22].mxu1 %v23559_v3 }
 0x837   : > { %12315 = vmatprep.mubr.f32.mxu1 %v23560_v40 }
 0x83a   : > { %12316 = vmatmul.mubr.f32.gmra.mrb[24].mxu1 %v23561_v7 }
 0x83b   : > { %12318 = vmatprep.mubr.f32.mxu1 %v23562_v51 }
 0x83e   : > { %12319 = vmatmul.mubr.f32.gmra.mrb[26].mxu1 %v23563_v14 }
 0x83f   : > { %12321 = vmatprep.mubr.f32.mxu1 %v23564_v38 }
 0x842   : > { %12322 = vmatmul.mubr.f32.gmra.mrb[28].mxu1 %v23565_v35 }
 0x843   : > { %12324 = vmatprep.mubr.f32.mxu1 %v23566_v63 }
 0x846   : > { %12325 = vmatmul.mubr.f32.gmra.mrb[30].mxu1 %v23567_v26 }
 0x847   : > { %12327 = vmatprep.mubr.f32.mxu1 %v23568_v11 }
 0x84a   : > { %12328 = vmatmul.mubr.f32.gmra.mrb[32].mxu1 %v23570_v59 }
 0x84b   : > { %12330 = vmatprep.mubr.f32.mxu1 %v23571_v52 }
 0x84e   : > { %12331 = vmatmul.mubr.f32.gmra.mrb[34].mxu1 %v23572_v1 }
 0x84f   : > { %12335 = vmatprep.mubr.f32.mxu1 %v19164_v13  ;;  %v23575_v13 = vld [vmem:[#allocation14_spill] sm:$0xff] }
 0x850   : > { %v5591_v57 = vmin.f32 %v23575_v13, 0.0  ;;  %vm5555_vm4 = vcmp.gt.f32.partialorder %v23575_v13, 0.0 }
 0x852   : > { %12336 = vmatmul.mubr.f32.vlgmr.msra.gmra.mrb[0].mxu1 %v19191_v15  ;;  %v5629_v15 = vmul.f32 1.442695, %v5591_v57 }
 0x853   : > { %12390 = vmatpush3.msra.mxu1 %v20051_v6  ;;  %12338 = vmatprep.mubr.f32.mxu1 %v19200_v32  ;;  %v23577_v32 = vld [vmem:[#allocation34_spill] sm:$0xff] }
 0x854   : > { %12445 = vmatprep.subr.mxu1 %v20099_v5  ;;  %v5593_v2 = vmin.f32 %v23577_v32, 0.0  ;;  %13939 = vpow2.f32 %v5629_v15  ;;  %v5733_v15 = vsel %vm5553_vm13, %v23573_v27, %v11496_v24  ;;  %vm5557_vm9 = vcmp.gt.f32.partialorder %v23577_v32, 0.0 }
 0x855   : > { %v20137_v27 = vsel %vm1017_vm14, %v5733_v15, 0 }
 0x856   : > { %12339 = vmatmul.mubr.f32.gmra.mrb[2].mxu1 %v19235_v28  ;;  %v5594_v28 = vmin.f32 %v23578_v56, 0.0  ;;  %v5633_v42 = vmul.f32 1.442695, %v5593_v2  ;;  %v5647_v2 = vmul.f32 1.442695, %v5600_v30 }
 0x857   : > { %12341 = vmatprep.mubr.f32.mxu1 %v19253_v61  ;;  %v5631_v61 = vmul.f32 1.442695, %v5592_v39 }
 0x859   : > { %13941 = vpow2.f32 %v5631_v61 }
 0x85a   : > { %12342 = vmatmul.mubr.f32.gmra.mrb[4].mxu1 %v19275_v19  ;;  %v5596_v19 = vmin.f32 %v23580_v0, 0.0  ;;  %13943 = vpow2.f32 %v5633_v42 }
 0x85b   : > { %12344 = vmatprep.mubr.f32.mxu1 %v19297_v4  ;;  %v5635_v4 = vmul.f32 1.442695, %v5594_v28  ;;  %v23586_v28 = vld [vmem:[#allocation52_spill] sm:$0xff] }
 0x85c   : > { %v5639_v50 = vmul.f32 1.442695, %v5596_v19  ;;  %v5602_v61 = vmin.f32 %v23586_v28, 0.0  ;;  %v23587_v19 = vld [vmem:[#allocation56_spill] sm:$0xff]  ;;  %vm5566_vm5 = vcmp.gt.f32.partialorder %v23586_v28, 0.0 }
 0x85d   : > { %13945 = vpow2.f32 %v5635_v4  ;;  %v5603_v42 = vmin.f32 %v23587_v19, 0.0  ;;  %v23588_v4 = vld [vmem:[#allocation60_spill] sm:$0xff]  ;;  %vm5567_vm13 = vcmp.gt.f32.partialorder %v23587_v19, 0.0 }
 0x85e   : > { %12345 = vmatmul.mubr.f32.gmra.mrb[6].mxu1 %v19325_v8  ;;  %v5637_v8 = vmul.f32 1.442695, %v5595_v62 }
 0x85f   : > { %12347 = vmatprep.mubr.f32.mxu1 %v19343_v12  ;;  %v13938_v12 = vpop.eup %13937 }
 0x860   : > { %v11497_v54 = vadd.f32 -1.0, %v13938_v12  ;;  %13947 = vpow2.f32 %v5637_v8  ;;  %v13940_v57 = vpop.eup %13939  ;;  %v5605_v8 = vmin.f32 %v23589_v53, 0.0  ;;  %v5651_v12 = vmul.f32 1.442695, %v5602_v61 }
 0x861   : > { %13949 = vpow2.f32 %v5639_v50  ;;  %v11498_v62 = vadd.f32 -1.0, %v13940_v57  ;;  %v23590_v50 = vld [vmem:[#allocation68_spill] sm:$0xff]  ;;  %v23591_v57 = vld [vmem:[#allocation78_spill] sm:$0xff] }
 0x862   : > { %12348 = vmatmul.mubr.f32.gmra.mrb[8].mxu1 %v19371_v49  ;;  %v5641_v49 = vmul.f32 1.442695, %v5597_v31  ;;  %v5604_v31 = vmin.f32 %v23588_v4, 0.0  ;;  %v5606_v33 = vmin.f32 %v23590_v50, 0.0  ;;  %v5607_v15 = vmin.f32 %v23591_v57, 0.0 }
 0x863   : > { %12350 = vmatprep.mubr.f32.mxu1 %v19389_v21  ;;  %v5643_v21 = vmul.f32 1.442695, %v5598_v36 }
 0x864   : > { %13951 = vpow2.f32 %v5641_v49  ;;  %v20149_v49 = vand.u32 4294901760, %v20137_v27 }
 0x865   : > { %13953 = vpow2.f32 %v5643_v21  ;;  %v5653_v21 = vmul.f32 1.442695, %v5603_v42  ;;  %v5659_v42 = vmul.f32 1.442695, %v5606_v33 }
 0x866   : > { %12351 = vmatmul.mubr.f32.gmra.mrb[10].mxu1 %v19415_v46  ;;  %v23585_v46 = vld [vmem:[#allocation48_spill] sm:$0xff]  ;;  %13955 = vpow2.f32 %v5645_v43 }
 0x867   : > { %12353 = vmatprep.mubr.f32.mxu1 %v19429_v60  ;;  %v5601_v39 = vmin.f32 %v23585_v46, 0.0  ;;  %v5734_v60 = vsel %vm5554_vm12, %v23574_v22, %v11497_v54  ;;  %13957 = vpow2.f32 %v5647_v2  ;;  %v23592_v2 = vld [vmem:[#allocation116_spill] sm:$0xff]  ;;  %vm5565_vm3 = vcmp.gt.f32.partialorder %v23585_v46, 0.0 }
 0x868   : > { %v5608_v61 = vmin.f32 %v23592_v2, 0.0  ;;  %vm5568_vm12 = vcmp.gt.f32.partialorder %v23588_v4, 0.0 }
 0x869   : > { %v5649_v22 = vmul.f32 1.442695, %v5601_v39 }
 0x86a   : > { %12354 = vmatmul.mubr.f32.gmra.mrb[12].mxu1 %v19456_v48  ;;  %v13942_v48 = vpop.eup %13941  ;;  %v5663_v33 = vmul.f32 1.442695, %v5608_v61 }
 0x86b   : > { %12356 = vmatprep.mubr.f32.mxu1 %v19476_v29  ;;  %v8084_v29 = vsel %vm1017_vm14, %v5734_v60, 0  ;;  %v13944_v36 = vpop.eup %13943  ;;  %v11499_v54 = vadd.f32 -1.0, %v13942_v48  ;;  %13959 = vpow2.f32 %v5649_v22  ;;  %v5657_v60 = vmul.f32 1.442695, %v5605_v8 }
 0x86c   : > { %v13946_v24 = vpop.eup %13945  ;;  %v20152_v43 = vand.u32 4294901760, %v8084_v29  ;;  %13961 = vpow2.f32 %v5651_v12 }
 0x86d   : > { %v13948_v30 = vpop.eup %13947  ;;  %13963 = vpow2.f32 %v5653_v21 }
 0x86e   : > { %12357 = vmatmul.mubr.f32.gmra.mrb[14].mxu1 %v19507_v58  ;;  %v5735_v58 = vsel %vm5555_vm4, %v23575_v13, %v11498_v62  ;;  %v13950_v39 = vpop.eup %13949  ;;  %v11500_v62 = vadd.f32 -1.0, %v13944_v36  ;;  %v11502_v23 = vadd.f32 -1.0, %v13948_v30  ;;  %v20167_v8 = vsub.f32 %v8084_v29, %v20152_v43 }
 0x86f   : > { %12359 = vmatprep.mubr.f32.mxu1 %v19521_v55  ;;  %v5655_v55 = vmul.f32 1.442695, %v5604_v31  ;;  %v20161_v13 = vsel %vm1017_vm14, %v5735_v58, 0  ;;  %v13952_v48 = vpop.eup %13951  ;;  %v11501_v31 = vadd.f32 -1.0, %v13946_v24  ;;  %v11503_v6 = vadd.f32 -1.0, %v13950_v39  ;;  %v23594_v58 = vld [vmem:[#allocation117_spill] sm:$0xff] }
 0x870   : > { %v13954_v22 = vpop.eup %13953  ;;  %23593 = vst [vmem:[#allocation35_spill] sm:$0xff] %v20167_v8  ;;  %v20171_v12 = vand.u32 4294901760, %v20161_v13  ;;  %v5737_v29 = vsel %vm5557_vm9, %v23577_v32, %v11500_v62  ;;  %v11504_v21 = vadd.f32 -1.0, %v13952_v48  ;;  %v23595_v39 = vld [vmem:[#allocation130_spill] sm:$0xff]  ;;  %vm5569_vm4 = vcmp.gt.f32.partialorder %v23589_v53, 0.0 }
 0x871   : > { %13965 = vpow2.f32 %v5655_v55  ;;  %v13956_v36 = vpop.eup %13955  ;;  %v5740_v55 = vsel %vm5560_vm15, %v23580_v0, %v11503_v6  ;;  %v5610_v32 = vmin.f32 %v23595_v39, 0.0  ;;  %vm5571_vm9 = vcmp.gt.f32.partialorder %v23591_v57, 0.0 }
 0x872   : > { %12360 = vmatmul.mubr.f32.gmra.mrb[16].mxu1 %v19556_v44  ;;  %v5736_v44 = vsel %vm5556_vm6, %v23576_v16, %v11499_v54  ;;  %13967 = vpow2.f32 %v5657_v60  ;;  %v5609_v16 = vmin.f32 %v23594_v58, 0.0  ;;  %v5739_v54 = vsel %vm5559_vm2, %v23579_v34, %v11502_v23  ;;  %v13958_v30 = vpop.eup %13957 }
 0x873   : > { %12362 = vmatprep.mubr.f32.mxu1 %v19587_v20  ;;  %v5661_v20 = vmul.f32 1.442695, %v5607_v15  ;;  %v20176_v24 = vsel %vm1017_vm14, %v5736_v44, 0  ;;  %13969 = vpow2.f32 %v5659_v42  ;;  %v11506_v15 = vadd.f32 -1.0, %v13956_v36 }
 0x874   : > { %v20192_v60 = vsel %vm1017_vm14, %v5737_v29, 0  ;;  %v20200_v6 = vsel %vm1017_vm14, %v5739_v54, 0  ;;  %v20205_v34 = vsel %vm1017_vm14, %v5740_v55, 0  ;;  %v5741_v0 = vsel %vm5561_vm0, %v23581_v17, %v11504_v21 }
 0x875   : > { %13971 = vpow2.f32 %v5661_v20  ;;  %v11507_v62 = vadd.f32 -1.0, %v13958_v30  ;;  %v20210_v42 = vand.u32 4294901760, %v20176_v24  ;;  %v5743_v48 = vsel %vm5563_vm10, %v23583_v45, %v11506_v15  ;;  %v23600_v15 = vld [vmem:[#allocation76_spill] sm:$0xff] }
 0x876   : > { %12363 = vmatmul.mubr.f32.gmra.mrb[18].mxu1 %v19605_v47  ;;  %v5738_v47 = vsel %vm5558_vm7, %v23578_v56, %v11501_v31  ;;  %13973 = vpow2.f32 %v5663_v33  ;;  %v5665_v56 = vmul.f32 1.442695, %v5609_v16  ;;  %v5667_v44 = vmul.f32 1.442695, %v5610_v32  ;;  %v23596_v31 = vld [vmem:[#allocation138_spill] sm:$0xff] }
 0x877   : > { %12365 = vmatprep.mubr.f32.mxu1 %v23556_v10  ;;  %v11505_v10 = vadd.f32 -1.0, %v13954_v22  ;;  %v20197_v23 = vsel %vm1017_vm14, %v5738_v47, 0  ;;  %v5611_v22 = vmin.f32 %v23596_v31, 0.0  ;;  %v20216_v36 = vand.u32 4294901760, %v20192_v60 }
 0x878   : > { %v20219_v17 = vand.u32 4294901760, %v20197_v23  ;;  %13975 = vpow2.f32 %v5665_v56  ;;  %v20226_v45 = vand.u32 4294901760, %v20205_v34  ;;  %v20229_v16 = vsel %vm1017_vm14, %v5741_v0, 0 }
 0x879   : > { %v5742_v61 = vsel %vm5562_vm1, %v23582_v25, %v11505_v10  ;;  %23597 = vst [vmem:[#allocation7_spill] sm:$0xff] %v20216_v36  ;;  %v20222_v25 = vand.u32 4294901760, %v20200_v6  ;;  %v20236_v47 = vsel %vm1017_vm14, %v5743_v48, 0  ;;  %v5744_v54 = vsel %vm5564_vm11, %v23584_v9, %v11507_v62 }
 0x87a   : > { %12366 = vmatmul.mubr.f32.gmra.mrb[20].mxu1 %v23557_v18  ;;  %v13960_v18 = vpop.eup %13959  ;;  %23598 = vst [vmem:[#allocation41_spill] sm:$0xff] %v20219_v17  ;;  %13977 = vpow2.f32 %v5667_v44  ;;  %v5669_v55 = vmul.f32 1.442695, %v5611_v22  ;;  %v5612_v32 = vmin.f32 %v23600_v15, 0.0  ;;  %v20242_v56 = vand.u32 4294901760, %v20229_v16 }
 0x87b   : > { %12368 = vmatprep.mubr.f32.mxu1 %v23558_v41  ;;  %v13962_v41 = vpop.eup %13961  ;;  %23599 = vst [vmem:[#allocation39_spill] sm:$0xff] %v20222_v25  ;;  %v11508_v21 = vadd.f32 -1.0, %v13960_v18  ;;  %v20250_v18 = vand.u32 4294901760, %v20236_v47  ;;  %v20253_v62 = vsel %vm1017_vm14, %v5744_v54, 0  ;;  %vm5570_vm6 = vcmp.gt.f32.partialorder %v23590_v50, 0.0 }
 0x87c   : > { %v13964_v20 = vpop.eup %13963  ;;  %13979 = vpow2.f32 %v5669_v55  ;;  %vm5572_vm7 = vcmp.gt.f32.partialorder %v23592_v2, 0.0  ;;  %vm5573_vm2 = vcmp.gt.f32.partialorder %v23594_v58, 0.0  ;;  %vm5574_vm15 = vcmp.gt.f32.partialorder %v23595_v39, 0.0 }
 0x87d   : > { %v13966_v33 = vpop.eup %13965  ;;  %v11510_v30 = vadd.f32 -1.0, %v13964_v20  ;;  %v5745_v48 = vsel %vm5565_vm3, %v23585_v46, %v11508_v21  ;;  %v5671_v20 = vmul.f32 1.442695, %v5612_v32  ;;  %vm5575_vm0 = vcmp.gt.f32.partialorder %v23596_v31, 0.0 }
 0x87e   : > { %12369 = vmatmul.mubr.f32.gmra.mrb[22].mxu1 %v23559_v3  ;;  %v20232_v3 = vsel %vm1017_vm14, %v5742_v61, 0  ;;  %v13968_v29 = vpop.eup %13967  ;;  %v11511_v61 = vadd.f32 -1.0, %v13966_v33  ;;  %v20263_v33 = vand.u32 4294901760, %v20253_v62  ;;  %v20269_v54 = vsel %vm1017_vm14, %v5745_v48, 0 }
 0x87f   : > { %12371 = vmatprep.mubr.f32.mxu1 %v23560_v40  ;;  %v11509_v40 = vadd.f32 -1.0, %v13962_v41  ;;  %v13970_v10 = vpop.eup %13969  ;;  %v20245_v0 = vand.u32 4294901760, %v20232_v3  ;;  %v5747_v22 = vsel %vm5567_vm13, %v23587_v19, %v11510_v30  ;;  %13981 = vpow2.f32 %v5671_v20 }
 0x880   : > { %v13972_v9 = vpop.eup %13971  ;;  %v11513_v44 = vadd.f32 -1.0, %v13970_v10  ;;  %23601 = vst [vmem:[#allocation11_spill] sm:$0xff] %v20263_v33  ;;  %v20291_v55 = vand.u32 4294901760, %v20269_v54  ;;  %vm5576_vm1 = vcmp.gt.f32.partialorder %v23600_v15, 0.0 }
 0x881   : > { %v13974_v41 = vpop.eup %13973  ;;  %v11514_v46 = vadd.f32 -1.0, %v13972_v9 }
 0x882   : > { %12372 = vmatmul.mubr.f32.gmra.mrb[24].mxu1 %v23561_v7  ;;  %v11512_v7 = vadd.f32 -1.0, %v13968_v29  ;;  %v5748_v29 = vsel %vm5568_vm12, %v23588_v4, %v11511_v61  ;;  %v11515_v19 = vadd.f32 -1.0, %v13974_v41  ;;  %v13976_v21 = vpop.eup %13975  ;;  %v5750_v4 = vsel %vm5570_vm6, %v23590_v50, %v11513_v44  ;;  %23604 = vst [vmem:[#allocation43_spill] sm:$0xff] %v20291_v55 }
 0x883   : > { %12374 = vmatprep.mubr.f32.mxu1 %v23562_v51  ;;  %v5746_v51 = vsel %vm5566_vm5, %v23586_v28, %v11509_v40  ;;  %v20277_v40 = vsel %vm1017_vm14, %v5747_v22, 0  ;;  %v20285_v10 = vsel %vm1017_vm14, %v5748_v29, 0  ;;  %v5751_v50 = vsel %vm5571_vm9, %v23591_v57, %v11514_v46 }
 0x884   : > { %v5749_v28 = vsel %vm5569_vm4, %v23589_v53, %v11512_v7  ;;  %v23603_v53 = vld [vmem:[#allocation81_spill] sm:$0xff]  ;;  %v20303_v9 = vsel %vm1017_vm14, %v5750_v4, 0  ;;  %v11516_v7 = vadd.f32 -1.0, %v13976_v21  ;;  %v20307_v41 = vand.u32 4294901760, %v20277_v40 }
 0x885   : > { %v5613_v30 = vmin.f32 %v23603_v53, 0.0  ;;  %v20294_v32 = vsel %vm1017_vm14, %v5749_v28, 0  ;;  %v20310_v48 = vand.u32 4294901760, %v20285_v10  ;;  %v20326_v22 = vand.u32 4294901760, %v20303_v9 }
 0x886   : > { %12375 = vmatmul.mubr.f32.gmra.mrb[26].mxu1 %v23563_v14  ;;  %v20274_v14 = vsel %vm1017_vm14, %v5746_v51, 0  ;;  %23605 = vst [vmem:[#allocation15_spill] sm:$0xff] %v20307_v41  ;;  %v20318_v44 = vand.u32 4294901760, %v20294_v32  ;;  %v20321_v51 = vsel %vm1017_vm14, %v5751_v50, 0  ;;  %v22499_v21 = vand.u32 4294901760, %v20167_v8 }
 0x887   : > { %12377 = vmatprep.mubr.f32.mxu1 %v23564_v38  ;;  %v20282_v38 = vsub.f32 %v20137_v27, %v20149_v49  ;;  %v13978_v27 = vpop.eup %13977  ;;  %v20300_v61 = vand.u32 4294901760, %v20274_v14  ;;  %v20341_v4 = vand.u32 4294901760, %v20321_v51  ;;  %vm5577_vm10 = vcmp.gt.f32.partialorder %v23603_v53, 0.0 }
 0x888   : > { %v11517_v29 = vadd.f32 -1.0, %v13978_v27  ;;  %v13980_v28 = vpop.eup %13979 }
 0x889   : > { %23602 = vst [vmem:[#allocation45_spill] sm:$0xff] %v20282_v38  ;;  %v22496_v57 = vand.u32 4294901760, %v20282_v38 }
 0x88a   : > { %12378 = vmatmul.mubr.f32.gmra.mrb[28].mxu1 %v23565_v35  ;;  %v5752_v35 = vsel %vm5572_vm7, %v23592_v2, %v11515_v19  ;;  %v5673_v2 = vmul.f32 1.442695, %v5613_v30  ;;  %v5753_v19 = vsel %vm5573_vm2, %v23594_v58, %v11516_v7  ;;  %v20349_v58 = vsub.f32 %v20192_v60, %v20216_v36  ;;  %v13982_v60 = vpop.eup %13981 }
 0x88b   : > { %12380 = vmatprep.mubr.f32.mxu1 %v23566_v63  ;;  %v20315_v63 = vsub.f32 %v20161_v13, %v20171_v12  ;;  %v20329_v20 = vsel %vm1017_vm14, %v5752_v35, 0  ;;  %v23607_v13 = vld [vmem:[#allocation85_spill] sm:$0xff]  ;;  %v8257_v30 = vsub.f32 %v20282_v38, %v22496_v57  ;;  %v20358_v35 = vsel %vm1017_vm14, %v5753_v19, 0 }
 0x88c   : > { %v5614_v46 = vmin.f32 %v23607_v13, 0.0  ;;  %23609 = vst [vmem:[#allocation18_spill] sm:$0xff] %v20349_v58  ;;  %v20352_v50 = vand.u32 4294901760, %v20329_v20  ;;  %13983 = vpow2.f32 %v5673_v2  ;;  %v5754_v7 = vsel %vm5574_vm15, %v23595_v39, %v11517_v29 }
 0x88d   : > { %23606 = vst [vmem:[#allocation49_spill] sm:$0xff] %v20315_v63  ;;  %v11518_v57 = vadd.f32 -1.0, %v13980_v28  ;;  %v8267_v2 = vsub.f32 %v20167_v8, %v22499_v21  ;;  %v8258_v19 = vand.u32 4294901760, %v8257_v30  ;;  %v23612_v39 = vand.u32 4294901760, %v20315_v63 }
 0x88e   : > { %12381 = vmatmul.mubr.f32.gmra.mrb[30].mxu1 %v23567_v26  ;;  %v20338_v26 = vsub.f32 %v20176_v24, %v20210_v42  ;;  %v23610_v24 = vld [vmem:[#allocation89_spill] sm:$0xff]  ;;  %v20380_v28 = vand.u32 4294901760, %v20358_v35  ;;  %v20383_v21 = vsel %vm1017_vm14, %v5754_v7, 0  ;;  %v23619_v36 = vand.u32 4294901760, %v20349_v58 }
 0x88f   : > { %12383 = vmatprep.mubr.f32.mxu1 %v23568_v11  ;;  %v5615_v27 = vmin.f32 %v23610_v24, 0.0  ;;  %v5675_v11 = vmul.f32 1.442695, %v5614_v46  ;;  %v8277_v29 = vsub.f32 %v20315_v63, %v23612_v39  ;;  %v20377_v46 = vsub.f32 %v20200_v6, %v20222_v25 }
 0x890   : > { %23608 = vst [vmem:[#allocation47_spill] sm:$0xff] %v20338_v26  ;;  %23614 = vst [vmem:[#allocation23_spill] sm:$0xff] %v20380_v28  ;;  %v5755_v30 = vsel %vm5575_vm0, %v23596_v31, %v11518_v57  ;;  %v11519_v39 = vadd.f32 -1.0, %v13982_v60  ;;  %v8268_v63 = vand.u32 4294901760, %v8267_v2  ;;  %v23617_v25 = vand.u32 4294901760, %v20338_v26  ;;  %v23621_v60 = vld [vmem:[#allocation108_spill] sm:$0xff] }
 0x891   : > { %23613 = vst [vmem:[#allocation51_spill] sm:$0xff] %v20377_v46  ;;  %v5677_v38 = vmul.f32 1.442695, %v5615_v27  ;;  %13985 = vpow2.f32 %v5675_v11  ;;  %v8297_v31 = vsub.f32 %v20349_v58, %v23619_v36  ;;  %v20405_v11 = vsub.f32 %v20229_v16, %v20242_v56  ;;  %v23633_v58 = vld [vmem:[#allocation121_spill] sm:$0xff] }
 0x892   : > { %12384 = vmatmul.mubr.f32.gmra.mrb[32].mxu1 %v23570_v59  ;;  %v20369_v59 = vsub.f32 %v20197_v23, %v20219_v17  ;;  %v23615_v23 = vld [vmem:[#allocation100_spill] sm:$0xff]  ;;  %v8287_v7 = vsub.f32 %v20338_v26, %v23617_v25  ;;  %v20397_v17 = vsub.f32 %v20205_v34, %v20226_v45  ;;  %v5618_v2 = vmin.f32 %v23621_v60, 0.0 }
 0x893   : > { %12386 = vmatprep.mubr.f32.mxu1 %v23571_v52  ;;  %v5616_v8 = vmin.f32 %v23615_v23, 0.0  ;;  %v23616_v52 = vld [vmem:[#allocation105_spill] sm:$0xff]  ;;  %23620 = vst [vmem:[#allocation55_spill] sm:$0xff] %v20405_v11  ;;  %13987 = vpow2.f32 %v5677_v38  ;;  %v20410_v34 = vand.u32 4294901760, %v20383_v21  ;;  %v5756_v36 = vsel %vm5576_vm1, %v23600_v15, %v11519_v39 }
 0x894   : > { %23611 = vst [vmem:[#allocation53_spill] sm:$0xff] %v20369_v59  ;;  %v5617_v6 = vmin.f32 %v23616_v52, 0.0  ;;  %v22510_v27 = vand.u32 4294901760, %v20369_v59  ;;  %23618 = vst [vmem:[#allocation57_spill] sm:$0xff] %v20397_v17  ;;  %v8288_v38 = vand.u32 4294901760, %v8287_v7  ;;  %v8298_v57 = vand.u32 4294901760, %v8297_v31 }
 0x895   : > { %v5679_v25 = vmul.f32 1.442695, %v5616_v8  ;;  %23622 = vst [vmem:[#allocation28_spill] sm:$0xff] %v20410_v34  ;;  %v23624_v15 = vand.u32 4294901760, %v20377_v46  ;;  %v20441_v31 = vsel %vm1017_vm14, %v5756_v36, 0  ;;  %v23630_v36 = vand.u32 4294901760, %v20405_v11 }
 0x896   : > { %12387 = vmatmul.mubr.f32.gmra.mrb[34].mxu1 %v23572_v1  ;;  %v8278_v1 = vand.u32 4294901760, %v8277_v29  ;;  %v5681_v29 = vmul.f32 1.442695, %v5617_v6  ;;  %v13984_v16 = vpop.eup %13983  ;;  %v8307_v8 = vsub.f32 %v20369_v59, %v22510_v27  ;;  %v20434_v6 = vsub.f32 %v20236_v47, %v20250_v18 }
 0x897   : > { %12391 = vmatprep.mubr.f32.mxu1 %v8258_v19  ;;  %v20413_v19 = vsel %vm1017_vm14, %v5755_v30, 0  ;;  %v20425_v30 = vsub.f32 %v20232_v3, %v20245_v0  ;;  %13989 = vpow2.f32 %v5679_v25  ;;  %v23627_v3 = vld [vmem:[#allocation8_spill] sm:$0xff]  ;;  %v23629_v47 = vand.u32 4294901760, %v20397_v17 }
 0x898   : > { %23625 = vst [vmem:[#allocation59_spill] sm:$0xff] %v20434_v6  ;;  %v20437_v7 = vand.u32 4294901760, %v20413_v19  ;;  %v5619_v27 = vmin.f32 %v23627_v3, 0.0  ;;  %13991 = vpow2.f32 %v5681_v29  ;;  %v8308_v39 = vand.u32 4294901760, %v8307_v8 }
 0x899   : > { %23623 = vst [vmem:[#allocation61_spill] sm:$0xff] %v20425_v30  ;;  %v8327_v59 = vsub.f32 %v20397_v17, %v23629_v47  ;;  %v20450_v25 = vsub.f32 %v20253_v62, %v20263_v33  ;;  %v8337_v29 = vsub.f32 %v20405_v11, %v23630_v36  ;;  %vm5578_vm11 = vcmp.gt.f32.partialorder %v23607_v13, 0.0  ;;  %v23631_v62 = vld [vmem:[#allocation111_spill] sm:$0xff] }
 0x89a   : > { %12392 = vmatmul.mubr.f32.vlgmr.msra.gmra.mrb[0].mxu1 %v8268_v63  ;;  %23626 = vst [vmem:[#allocation29_spill] sm:$0xff] %v20437_v7  ;;  %v11520_v63 = vadd.f32 -1.0, %v13984_v16  ;;  %vm5579_vm3 = vcmp.gt.f32.partialorder %v23610_v24, 0.0  ;;  %v5685_v8 = vmul.f32 1.442695, %v5619_v27  ;;  %v5621_v47 = vmin.f32 %v23631_v62, 0.0 }
 0x89b   : > { %12446 = vmatpush3.msra.mxu1 %v20099_v5  ;;  %12394 = vmatprep.mubr.f32.mxu1 %v8278_v1  ;;  %v8317_v5 = vsub.f32 %v20377_v46, %v23624_v15  ;;  %v5683_v1 = vmul.f32 1.442695, %v5618_v2  ;;  %v23628_v15 = vld [vmem:[#allocation109_spill] sm:$0xff]  ;;  %v13986_v2 = vpop.eup %13985  ;;  %v8328_v17 = vand.u32 4294901760, %v8327_v59  ;;  %v23634_v26 = vand.u32 4294901760, %v20425_v30 }
 0x89c   : > { %12501 = vmatprep.subr.mxu1 %v20086_v37  ;;  %v5620_v46 = vmin.f32 %v23628_v15, 0.0  ;;  %v5757_v36 = vsel %vm5577_vm10, %v23603_v53, %v11520_v63  ;;  %v23635_v33 = vand.u32 4294901760, %v20434_v6  ;;  %v20484_v59 = vsub.f32 %v20277_v40, %v20307_v41 }
 0x89d   : > { %13993 = vpow2.f32 %v5683_v1  ;;  %v13988_v11 = vpop.eup %13987  ;;  %v8347_v27 = vsub.f32 %v20425_v30, %v23634_v26  ;;  %v20487_v63 = vsel %vm1017_vm14, %v5757_v36, 0  ;;  %vm5580_vm5 = vcmp.gt.f32.partialorder %v23615_v23, 0.0 }
 0x89e   : > { %12395 = vmatmul.mubr.f32.gmra.mrb[2].mxu1 %v8288_v38  ;;  %v8318_v38 = vand.u32 4294901760, %v8317_v5  ;;  %v20464_v5 = vand.u32 4294901760, %v20441_v31  ;;  %v5687_v16 = vmul.f32 1.442695, %v5620_v46  ;;  %v8357_v53 = vsub.f32 %v20434_v6, %v23635_v33 }
 0x89f   : > { %12397 = vmatprep.mubr.f32.mxu1 %v8298_v57  ;;  %v20458_v57 = vsub.f32 %v20269_v54, %v20291_v55  ;;  %v5622_v54 = vmin.f32 %v23633_v58, 0.0  ;;  %v8338_v55 = vand.u32 4294901760, %v8337_v29  ;;  %13995 = vpow2.f32 %v5685_v8 }
 0x8a0   : > { %23632 = vst [vmem:[#allocation65_spill] sm:$0xff] %v20464_v5  ;;  %v5689_v26 = vmul.f32 1.442695, %v5621_v47  ;;  %v11521_v29 = vadd.f32 -1.0, %v13986_v2  ;;  %v11522_v1 = vadd.f32 -1.0, %v13988_v11  ;;  %13997 = vpow2.f32 %v5687_v16 }
 0x8a1   : > { %v5691_v33 = vmul.f32 1.442695, %v5622_v54  ;;  %v13990_v46 = vpop.eup %13989  ;;  %v8348_v6 = vand.u32 4294901760, %v8347_v27  ;;  %v23637_v40 = vand.u32 4294901760, %v20450_v25  ;;  %v20497_v8 = vsub.f32 %v20285_v10, %v20310_v48  ;;  %v23641_v27 = vld [vmem:[#allocation136_spill] sm:$0xff] }
 0x8a2   : > { %12398 = vmatmul.mubr.f32.gmra.mrb[4].mxu1 %v8308_v39  ;;  %v20476_v39 = vsub.f32 %v20274_v14, %v20300_v61  ;;  %v23636_v14 = vld [vmem:[#allocation126_spill] sm:$0xff]  ;;  %v13992_v47 = vpop.eup %13991  ;;  %v8358_v41 = vand.u32 4294901760, %v8357_v53  ;;  %v20505_v2 = vsub.f32 %v20294_v32, %v20318_v44  ;;  %v20508_v16 = vand.u32 4294901760, %v20487_v63 }
 0x8a3   : > { %12400 = vmatprep.mubr.f32.mxu1 %v8318_v38  ;;  %v5623_v38 = vmin.f32 %v23636_v14, 0.0  ;;  %v8367_v30 = vsub.f32 %v20450_v25, %v23637_v40  ;;  %13999 = vpow2.f32 %v5689_v26  ;;  %v5624_v10 = vmin.f32 %v23641_v27, 0.0 }
 0x8a4   : > { %v22533_v36 = vand.u32 4294901760, %v20476_v39  ;;  %23639 = vst [vmem:[#allocation63_spill] sm:$0xff] %v20505_v2  ;;  %23640 = vst [vmem:[#allocation30_spill] sm:$0xff] %v20508_v16  ;;  %v5758_v53 = vsel %vm5578_vm11, %v23607_v13, %v11521_v29  ;;  %v5759_v40 = vsel %vm5579_vm3, %v23610_v24, %v11522_v1  ;;  %14001 = vpow2.f32 %v5691_v33 }
 0x8a5   : > { %v5693_v54 = vmul.f32 1.442695, %v5623_v38  ;;  %v22535_v38 = vand.u32 4294901760, %v20497_v8  ;;  %v23642_v29 = vand.u32 4294901760, %v20484_v59  ;;  %v22534_v1 = vand.u32 4294901760, %v20505_v2 }
 0x8a6   : > { %12401 = vmatmul.mubr.f32.gmra.mrb[6].mxu1 %v8328_v17  ;;  %v23638_v17 = vand.u32 4294901760, %v20458_v57  ;;  %v8387_v26 = vsub.f32 %v20476_v39, %v22533_v36  ;;  %vm5581_vm13 = vcmp.gt.f32.partialorder %v23616_v52, 0.0  ;;  %vm5582_vm12 = vcmp.gt.f32.partialorder %v23621_v60, 0.0 }
 0x8a7   : > { %12403 = vmatprep.mubr.f32.mxu1 %v8338_v55  ;;  %v13994_v32 = vpop.eup %13993  ;;  %v8368_v55 = vand.u32 4294901760, %v8367_v30  ;;  %v8397_v24 = vsub.f32 %v20484_v59, %v23642_v29  ;;  %v20534_v30 = vsel %vm1017_vm14, %v5758_v53, 0  ;;  %14003 = vpow2.f32 %v5693_v54 }
 0x8a8   : > { %v8377_v11 = vsub.f32 %v20458_v57, %v23638_v17  ;;  %v11523_v17 = vadd.f32 -1.0, %v13990_v46  ;;  %v5695_v46 = vmul.f32 1.442695, %v5624_v10  ;;  %v11525_v29 = vadd.f32 -1.0, %v13994_v32 }
 0x8a9   : > { %v8388_v36 = vand.u32 4294901760, %v8387_v26  ;;  %v8407_v53 = vsub.f32 %v20497_v8, %v22535_v38  ;;  %v20560_v32 = vand.u32 4294901760, %v20534_v30  ;;  %vm5583_vm4 = vcmp.gt.f32.partialorder %v23627_v3, 0.0 }
 0x8aa   : > { %12404 = vmatmul.mubr.f32.gmra.mrb[8].mxu1 %v8348_v6  ;;  %v20523_v6 = vsub.f32 %v20303_v9, %v20326_v22  ;;  %v8378_v13 = vand.u32 4294901760, %v8377_v11  ;;  %v20538_v9 = vsel %vm1017_vm14, %v5759_v40, 0  ;;  %v5760_v33 = vsel %vm5580_vm5, %v23615_v23, %v11523_v17 }
 0x8ab   : > { %12406 = vmatprep.mubr.f32.mxu1 %v8358_v41  ;;  %v20531_v41 = vsub.f32 %v20321_v51, %v20341_v4  ;;  %v11524_v11 = vadd.f32 -1.0, %v13992_v47  ;;  %v13996_v51 = vpop.eup %13995  ;;  %v8398_v40 = vand.u32 4294901760, %v8397_v24  ;;  %v8417_v23 = vsub.f32 %v20505_v2, %v22534_v1  ;;  %23646 = vst [vmem:[#allocation71_spill] sm:$0xff] %v20560_v32 }
 0x8ac   : > { %v22538_v54 = vand.u32 4294901760, %v20523_v6  ;;  %v13998_v10 = vpop.eup %13997  ;;  %v20557_v17 = vsub.f32 %v20358_v35, %v20380_v28  ;;  %v20563_v26 = vand.u32 4294901760, %v20538_v9  ;;  %14005 = vpow2.f32 %v5695_v46 }
 0x8ad   : > { %23643 = vst [vmem:[#allocation69_spill] sm:$0xff] %v20531_v41  ;;  %v5762_v35 = vsel %vm5582_vm12, %v23621_v60, %v11525_v29  ;;  %v11526_v24 = vadd.f32 -1.0, %v13996_v51  ;;  %v14000_v1 = vpop.eup %13999  ;;  %v8408_v38 = vand.u32 4294901760, %v8407_v53  ;;  %v8418_v2 = vand.u32 4294901760, %v8417_v23 }
 0x8ae   : > { %12407 = vmatmul.mubr.f32.gmra.mrb[10].mxu1 %v8368_v55  ;;  %v20549_v55 = vsub.f32 %v20329_v20, %v20352_v50  ;;  %23645 = vst [vmem:[#allocation73_spill] sm:$0xff] %v20557_v17  ;;  %23647 = vst [vmem:[#allocation77_spill] sm:$0xff] %v20563_v26  ;;  %v20567_v20 = vsel %vm1017_vm14, %v5760_v33, 0  ;;  %v8427_v47 = vsub.f32 %v20523_v6, %v22538_v54  ;;  %v14002_v33 = vpop.eup %14001  ;;  %vm5584_vm6 = vcmp.gt.f32.partialorder %v23628_v15, 0.0 }
 0x8af   : > { %12409 = vmatprep.mubr.f32.mxu1 %v8378_v13  ;;  %v5761_v13 = vsel %vm5581_vm13, %v23616_v52, %v11524_v11  ;;  %v23648_v52 = vand.u32 4294901760, %v20531_v41  ;;  %v20587_v29 = vsub.f32 %v20413_v19, %v20437_v7  ;;  %v20590_v51 = vand.u32 4294901760, %v20567_v20 }
 0x8b0   : > { %23644 = vst [vmem:[#allocation67_spill] sm:$0xff] %v20549_v55  ;;  %v22541_v46 = vand.u32 4294901760, %v20549_v55  ;;  %v8165_v53 = vsel %vm1017_vm14, %v5761_v13, 0  ;;  %v11527_v23 = vadd.f32 -1.0, %v13998_v10  ;;  %v8428_v19 = vand.u32 4294901760, %v8427_v47 }
 0x8b1   : > { %v8437_v60 = vsub.f32 %v20531_v41, %v23648_v52  ;;  %23649 = vst [vmem:[#allocation75_spill] sm:$0xff] %v20590_v51  ;;  %v11528_v52 = vadd.f32 -1.0, %v14000_v1  ;;  %v14004_v54 = vpop.eup %14003  ;;  %v20603_v41 = vsub.f32 %v20441_v31, %v20464_v5  ;;  %v20613_v10 = vand.u32 4294901760, %v8165_v53 }
 0x8b2   : > { %12410 = vmatmul.mubr.f32.gmra.mrb[12].mxu1 %v8388_v36  ;;  %v20579_v36 = vsub.f32 %v20383_v21, %v20410_v34  ;;  %v8168_v21 = vsel %vm1017_vm14, %v5762_v35, 0  ;;  %v8447_v11 = vsub.f32 %v20549_v55, %v22541_v46  ;;  %v23650_v35 = vand.u32 4294901760, %v20557_v17 }
 0x8b3   : > { %12412 = vmatprep.mubr.f32.mxu1 %v8398_v40  ;;  %v5763_v40 = vsel %vm5583_vm4, %v23627_v3, %v11526_v24  ;;  %23651 = vst [vmem:[#allocation82_spill] sm:$0xff] %v20613_v10  ;;  %v20615_v47 = vand.u32 4294901760, %v8168_v21  ;;  %vm5585_vm9 = vcmp.gt.f32.partialorder %v23631_v62, 0.0  ;;  %v5764_v31 = vsel %vm5584_vm6, %v23628_v15, %v11527_v23 }
 0x8b4   : > { %v22546_v13 = vand.u32 4294901760, %v20579_v36  ;;  %v8457_v3 = vsub.f32 %v20557_v17, %v23650_v35  ;;  %v8171_v24 = vsel %vm1017_vm14, %v5763_v40, 0  ;;  %v11529_v35 = vadd.f32 -1.0, %v14002_v33 }
 0x8b5   : > { %23652 = vst [vmem:[#allocation80_spill] sm:$0xff] %v20615_v47  ;;  %v11530_v46 = vadd.f32 -1.0, %v14004_v54  ;;  %v8448_v1 = vand.u32 4294901760, %v8447_v11  ;;  %v22550_v40 = vand.u32 4294901760, %v20603_v41  ;;  %v23653_v15 = vand.u32 4294901760, %v20587_v29 }
 0x8b6   : > { %12413 = vmatmul.mubr.f32.gmra.mrb[14].mxu1 %v8408_v38  ;;  %v8438_v38 = vand.u32 4294901760, %v8437_v60  ;;  %v5765_v60 = vsel %vm5585_vm9, %v23631_v62, %v11528_v52  ;;  %v8467_v17 = vsub.f32 %v20579_v36, %v22546_v13  ;;  %v8458_v55 = vand.u32 4294901760, %v8457_v3 }
 0x8b7   : > { %12415 = vmatprep.mubr.f32.mxu1 %v8418_v2  ;;  %v20611_v2 = vsub.f32 %v20487_v63, %v20508_v16  ;;  %v14006_v63 = vpop.eup %14005  ;;  %v8477_v62 = vsub.f32 %v20587_v29, %v23653_v15  ;;  %v20637_v33 = vsub.f32 %v20538_v9, %v20563_v26  ;;  %v20639_v11 = vand.u32 4294901760, %v8171_v24 }
 0x8b8   : > { %v8174_v23 = vsel %vm1017_vm14, %v5764_v31, 0  ;;  %vm5586_vm7 = vcmp.gt.f32.partialorder %v23633_v58, 0.0  ;;  %vm5587_vm2 = vcmp.gt.f32.partialorder %v23636_v14, 0.0  ;;  %v11531_v3 = vadd.f32 -1.0, %v14006_v63 }
 0x8b9   : > { %v22547_v54 = vand.u32 4294901760, %v20611_v2  ;;  %23654 = vst [vmem:[#allocation86_spill] sm:$0xff] %v20639_v11  ;;  %v5766_v52 = vsel %vm5586_vm7, %v23633_v58, %v11529_v35  ;;  %v8468_v15 = vand.u32 4294901760, %v8467_v17  ;;  %v8487_v9 = vsub.f32 %v20603_v41, %v22550_v40 }
 0x8ba   : > { %12416 = vmatmul.mubr.f32.gmra.mrb[16].mxu1 %v8428_v19  ;;  %v20629_v19 = vsub.f32 %v20534_v30, %v20560_v32  ;;  %v8177_v30 = vsel %vm1017_vm14, %v5765_v60, 0  ;;  %v20653_v13 = vsub.f32 %v20567_v20, %v20590_v51  ;;  %v20662_v17 = vand.u32 4294901760, %v8174_v23 }
 0x8bb   : > { %12418 = vmatprep.mubr.f32.mxu1 %v8438_v38  ;;  %v5767_v38 = vsel %vm5587_vm2, %v23636_v14, %v11530_v46  ;;  %v8497_v58 = vsub.f32 %v20611_v2, %v22547_v54  ;;  %v22548_v14 = vand.u32 4294901760, %v20637_v33  ;;  %vm5588_vm15 = vcmp.gt.f32.partialorder %v23641_v27, 0.0 }
 0x8bc   : > { %v22549_v31 = vand.u32 4294901760, %v20629_v19  ;;  %23656 = vst [vmem:[#allocation90_spill] sm:$0xff] %v20662_v17  ;;  %v20665_v46 = vand.u32 4294901760, %v8177_v30  ;;  %v8180_v20 = vsel %vm1017_vm14, %v5766_v52, 0  ;;  %v8183_v60 = vsel %vm1017_vm14, %v5767_v38, 0 }
 0x8bd   : > { %v5768_v35 = vsel %vm5588_vm15, %v23641_v27, %v11531_v3  ;;  %v8488_v63 = vand.u32 4294901760, %v8487_v9  ;;  %v20675_v54 = vsub.f32 %v8168_v21, %v20615_v47  ;;  %v8517_v52 = vsub.f32 %v20637_v33, %v22548_v14 }
 0x8be   : > { %12419 = vmatmul.mubr.f32.gmra.mrb[18].mxu1 %v8448_v1  ;;  %v8478_v1 = vand.u32 4294901760, %v8477_v62  ;;  %23657 = vst [vmem:[#allocation88_spill] sm:$0xff] %v20665_v46  ;;  %v22551_v62 = vand.u32 4294901760, %v20653_v13  ;;  %v20682_v27 = vsub.f32 %v8171_v24, %v20639_v11  ;;  %v20684_v3 = vand.u32 4294901760, %v8180_v20 }
 0x8bf   : > { %12421 = vmatprep.mubr.f32.mxu1 %v8458_v55  ;;  %v20660_v55 = vsub.f32 %v8165_v53, %v20613_v10  ;;  %v8507_v53 = vsub.f32 %v20629_v19, %v22549_v31  ;;  %v20686_v9 = vand.u32 4294901760, %v8183_v60  ;;  %v22555_v14 = vand.u32 4294901760, %v20675_v54 }
 0x8c0   : > { %23658 = vst [vmem:[#allocation94_spill] sm:$0xff] %v20684_v3  ;;  %v20694_v31 = vsub.f32 %v8174_v23, %v20662_v17  ;;  %v8518_v24 = vand.u32 4294901760, %v8517_v52  ;;  %v22556_v40 = vand.u32 4294901760, %v20682_v27 }
 0x8c1   : > { %23655 = vst [vmem:[#allocation84_spill] sm:$0xff] %v20660_v55  ;;  %v22552_v38 = vand.u32 4294901760, %v20660_v55  ;;  %23659 = vst [vmem:[#allocation92_spill] sm:$0xff] %v20686_v9  ;;  %v8508_v21 = vand.u32 4294901760, %v8507_v53  ;;  %v8547_v23 = vsub.f32 %v20675_v54, %v22555_v14 }
 0x8c2   : > { %12422 = vmatmul.mubr.f32.gmra.mrb[20].mxu1 %v8468_v15  ;;  %v8498_v15 = vand.u32 4294901760, %v8497_v58  ;;  %v8527_v58 = vsub.f32 %v20653_v13, %v22551_v62  ;;  %v22557_v52 = vand.u32 4294901760, %v20694_v31  ;;  %v20710_v62 = vsub.f32 %v8180_v20, %v20684_v3 }
 0x8c3   : > { %12424 = vmatprep.mubr.f32.mxu1 %v8478_v1  ;;  %v8186_v1 = vsel %vm1017_vm14, %v5768_v35, 0  ;;  %v20701_v35 = vsub.f32 %v8177_v30, %v20665_v46  ;;  %v8557_v30 = vsub.f32 %v20682_v27, %v22556_v40 }
 0x8c4   : > { %v20703_v53 = vand.u32 4294901760, %v8186_v1  ;;  %v22560_v20 = vand.u32 4294901760, %v20710_v62 }
 0x8c5   : > { %v8558_v14 = vand.u32 4294901760, %v8557_v30 }
 0x8c6   : > { %12425 = vmatmul.mubr.f32.gmra.mrb[22].mxu1 %v8488_v63  ;;  %v8537_v63 = vsub.f32 %v20660_v55, %v22552_v38  ;;  %23660 = vst [vmem:[#allocation99_spill] sm:$0xff] %v20703_v53  ;;  %v20717_v55 = vsub.f32 %v8183_v60, %v20686_v9 }
 0x8c7   : > { %12427 = vmatprep.mubr.f32.mxu1 %v8498_v15  ;;  %v8528_v15 = vand.u32 4294901760, %v8527_v58  ;;  %v8548_v58 = vand.u32 4294901760, %v8547_v23 }
 0x8c8   : > { %v8538_v38 = vand.u32 4294901760, %v8537_v63  ;;  %v20724_v63 = vsub.f32 %v8186_v1, %v20703_v53  ;;  %v22559_v60 = vand.u32 4294901760, %v20717_v55 }
 0x8ca   : > { %12428 = vmatmul.mubr.f32.gmra.mrb[24].mxu1 %v8508_v21  ;;  %v22561_v21 = vand.u32 4294901760, %v20701_v35  ;;  %v22558_v23 = vand.u32 4294901760, %v20724_v63  ;;  %v8597_v1 = vsub.f32 %v20717_v55, %v22559_v60  ;;  %v23672_v60 = vld [vmem:[#allocation47_spill] sm:$0xff] }
 0x8cb   : > { %12430 = vmatprep.mubr.f32.mxu1 %v8518_v24  ;;  %v8567_v24 = vsub.f32 %v20694_v31, %v22557_v52 }
 0x8cc   : > { %v8577_v40 = vsub.f32 %v20701_v35, %v22561_v21  ;;  %v23674_v21 = vld [vmem:[#allocation53_spill] sm:$0xff] }
 0x8ce   : > { %12431 = vmatmul.mubr.f32.gmra.mrb[26].mxu1 %v8528_v15  ;;  %v8587_v15 = vsub.f32 %v20710_v62, %v22560_v20  ;;  %v8578_v52 = vand.u32 4294901760, %v8577_v40  ;;  %v23661_v40 = vld [vmem:[#allocation31_spill] sm:$0xff]  ;;  %v23673_v20 = vld [vmem:[#allocation18_spill] sm:$0xff] }
 0x8cf   : > { %12433 = vmatprep.mubr.f32.mxu1 %v8538_v38  ;;  %v8568_v38 = vand.u32 4294901760, %v8567_v24 }
 0x8d0   : > { %v8588_v30 = vand.u32 4294901760, %v8587_v15  ;;  %v23664_v15 = vld [vmem:[#allocation39_spill] sm:$0xff] }
 0x8d2   : > { %12434 = vmatmul.mubr.f32.gmra.mrb[28].mxu1 %v8548_v58  ;;  %v8607_v58 = vsub.f32 %v20724_v63, %v22558_v23  ;;  %v23671_v23 = vld [vmem:[#allocation37_spill] sm:$0xff] }
 0x8d3   : > { %12436 = vmatprep.mubr.f32.mxu1 %v8558_v14  ;;  %v8598_v14 = vand.u32 4294901760, %v8597_v1  ;;  %v23666_v1 = vld [vmem:[#allocation43_spill] sm:$0xff] }
 0x8d4   : > { %v8608_v24 = vand.u32 4294901760, %v8607_v58  ;;  %v23668_v58 = vld [vmem:[#allocation45_spill] sm:$0xff] }
 0x8d6   : > { %12437 = vmatmul.mubr.f32.gmra.mrb[30].mxu1 %v8568_v38  ;;  %v23663_v38 = vld [vmem:[#allocation41_spill] sm:$0xff] }
 0x8d7   : > { %12439 = vmatprep.mubr.f32.mxu1 %v8578_v52  ;;  %v23662_v52 = vld [vmem:[#allocation7_spill] sm:$0xff] }
 0x8da   : > { %12440 = vmatmul.mubr.f32.gmra.mrb[32].mxu1 %v8588_v30  ;;  %v23667_v30 = vld [vmem:[#allocation15_spill] sm:$0xff] }
 0x8db   : > { %12442 = vmatprep.mubr.f32.mxu1 %v8598_v14  ;;  %v23669_v14 = vld [vmem:[#allocation35_spill] sm:$0xff] }
 0x8de   : > { %12443 = vmatmul.mubr.f32.gmra.mrb[34].mxu1 %v8608_v24  ;;  %v23670_v24 = vld [vmem:[#allocation49_spill] sm:$0xff] }
 0x8df   : > { %12447 = vmatprep.mubr.f32.mxu1 %v20149_v49 }
 0x8e2   : > { %12448 = vmatmul.mubr.f32.vlgmr.msra.gmra.mrb[0].mxu1 %v20152_v43 }
 0x8e3   : > { %12502 = vmatpush3.msra.mxu1 %v20086_v37  ;;  %12450 = vmatprep.mubr.f32.mxu1 %v20171_v12  ;;  %v23665_v37 = vld [vmem:[#allocation11_spill] sm:$0xff] }
 0x8e4   : > { %12557 = vmatprep.subr.mxu1 %v23661_v40 }
 0x8e6   : > { %12451 = vmatmul.mubr.f32.gmra.mrb[2].mxu1 %v20210_v42 }
 0x8e7   : > { %12453 = vmatprep.mubr.f32.mxu1 %v23662_v52 }
 0x8ea   : > { %12454 = vmatmul.mubr.f32.gmra.mrb[4].mxu1 %v23663_v38 }
 0x8eb   : > { %12456 = vmatprep.mubr.f32.mxu1 %v23664_v15 }
 0x8ee   : > { %12457 = vmatmul.mubr.f32.gmra.mrb[6].mxu1 %v20226_v45 }
 0x8ef   : > { %12459 = vmatprep.mubr.f32.mxu1 %v20242_v56 }
 0x8f2   : > { %12460 = vmatmul.mubr.f32.gmra.mrb[8].mxu1 %v20245_v0 }
 0x8f3   : > { %12462 = vmatprep.mubr.f32.mxu1 %v20250_v18 }
 0x8f6   : > { %12463 = vmatmul.mubr.f32.gmra.mrb[10].mxu1 %v23665_v37 }
 0x8f7   : > { %12465 = vmatprep.mubr.f32.mxu1 %v23666_v1 }
 0x8fa   : > { %12466 = vmatmul.mubr.f32.gmra.mrb[12].mxu1 %v20300_v61 }
 0x8fb   : > { %12468 = vmatprep.mubr.f32.mxu1 %v23667_v30 }
 0x8fe   : > { %12469 = vmatmul.mubr.f32.gmra.mrb[14].mxu1 %v20310_v48 }
 0x8ff   : > { %12471 = vmatprep.mubr.f32.mxu1 %v20318_v44 }
 0x902   : > { %12472 = vmatmul.mubr.f32.gmra.mrb[16].mxu1 %v20326_v22 }
 0x903   : > { %12474 = vmatprep.mubr.f32.mxu1 %v20341_v4 }
 0x906   : > { %12475 = vmatmul.mubr.f32.gmra.mrb[18].mxu1 %v20352_v50 }
 0x907   : > { %12477 = vmatprep.mubr.f32.mxu1 %v20380_v28  ;;  %v23690_v28 = vand.u32 4294901760, %v23674_v21 }
 0x90a   : > { %12478 = vmatmul.mubr.f32.gmra.mrb[20].mxu1 %v20410_v34  ;;  %v23689_v34 = vand.u32 4294901760, %v23673_v20 }
 0x90b   : > { %12480 = vmatprep.mubr.f32.mxu1 %v20437_v7  ;;  %v23688_v7 = vand.u32 4294901760, %v23672_v60 }
 0x90e   : > { %12481 = vmatmul.mubr.f32.gmra.mrb[22].mxu1 %v20464_v5  ;;  %v23687_v5 = vand.u32 4294901760, %v23670_v24 }
 0x90f   : > { %12483 = vmatprep.mubr.f32.mxu1 %v20508_v16  ;;  %v23686_v16 = vand.u32 4294901760, %v23669_v14 }
 0x912   : > { %12484 = vmatmul.mubr.f32.gmra.mrb[24].mxu1 %v20560_v32  ;;  %v23685_v32 = vand.u32 4294901760, %v23668_v58 }
 0x913   : > { %12486 = vmatprep.mubr.f32.mxu1 %v20563_v26  ;;  %v23684_v26 = vld [vmem:[#allocation84_spill] sm:$0xff] }
 0x916   : > { %12487 = vmatmul.mubr.f32.gmra.mrb[26].mxu1 %v20590_v51  ;;  %v23683_v51 = vld [vmem:[#allocation73_spill] sm:$0xff] }
 0x917   : > { %12489 = vmatprep.mubr.f32.mxu1 %v20613_v10  ;;  %v23682_v10 = vld [vmem:[#allocation67_spill] sm:$0xff] }
 0x91a   : > { %12490 = vmatmul.mubr.f32.gmra.mrb[28].mxu1 %v20615_v47  ;;  %v23681_v47 = vld [vmem:[#allocation69_spill] sm:$0xff] }
 0x91b   : > { %12492 = vmatprep.mubr.f32.mxu1 %v20639_v11  ;;  %v23680_v11 = vld [vmem:[#allocation63_spill] sm:$0xff] }
 0x91e   : > { %12493 = vmatmul.mubr.f32.gmra.mrb[30].mxu1 %v20662_v17  ;;  %v23679_v17 = vld [vmem:[#allocation59_spill] sm:$0xff] }
 0x91f   : > { %12495 = vmatprep.mubr.f32.mxu1 %v20665_v46  ;;  %v23678_v46 = vld [vmem:[#allocation61_spill] sm:$0xff] }
 0x922   : > { %12496 = vmatmul.mubr.f32.gmra.mrb[32].mxu1 %v20684_v3  ;;  %v23675_v3 = vld [vmem:[#allocation51_spill] sm:$0xff] }
 0x923   : > { %12498 = vmatprep.mubr.f32.mxu1 %v20686_v9  ;;  %v23676_v9 = vld [vmem:[#allocation57_spill] sm:$0xff] }
 0x926   : > { %12499 = vmatmul.mubr.f32.gmra.mrb[34].mxu1 %v20703_v53  ;;  %v23677_v53 = vld [vmem:[#allocation55_spill] sm:$0xff] }
 0x927   : > { %12503 = vmatprep.mubr.f32.mxu1 %v23668_v58  ;;  %v23732_v58 = vld [vmem:[#allocation90_spill] sm:$0xff] }
 0x92a   : > { %12504 = vmatmul.mubr.f32.vlgmr.msra.gmra.mrb[0].mxu1 %v23669_v14  ;;  %v23733_v14 = vld [vmem:[#allocation88_spill] sm:$0xff] }
 0x92b   : > { %12558 = vmatpush3.msra.mxu1 %v23661_v40  ;;  %12506 = vmatprep.mubr.f32.mxu1 %v23670_v24  ;;  %v23734_v24 = vld [vmem:[#allocation94_spill] sm:$0xff] }
 0x92c   : > { %12613 = vmatprep.subr.mxu1 %v23671_v23 }
 0x92e   : > { %12507 = vmatmul.mubr.f32.gmra.mrb[2].mxu1 %v23672_v60  ;;  %v23730_v60 = vld [vmem:[#allocation80_spill] sm:$0xff] }
 0x92f   : > { %12509 = vmatprep.mubr.f32.mxu1 %v23673_v20  ;;  %v23728_v20 = vld [vmem:[#allocation75_spill] sm:$0xff] }
 0x932   : > { %12510 = vmatmul.mubr.f32.gmra.mrb[4].mxu1 %v23674_v21  ;;  %v23727_v21 = vld [vmem:[#allocation77_spill] sm:$0xff] }
 0x933   : > { %12512 = vmatprep.mubr.f32.mxu1 %v23675_v3 }
 0x936   : > { %12513 = vmatmul.mubr.f32.gmra.mrb[6].mxu1 %v23676_v9 }
 0x937   : > { %12515 = vmatprep.mubr.f32.mxu1 %v23677_v53 }
 0x93a   : > { %12516 = vmatmul.mubr.f32.gmra.mrb[8].mxu1 %v23678_v46 }
 0x93b   : > { %12518 = vmatprep.mubr.f32.mxu1 %v23679_v17 }
 0x93e   : > { %12519 = vmatmul.mubr.f32.gmra.mrb[10].mxu1 %v20450_v25 }
 0x93f   : > { %12521 = vmatprep.mubr.f32.mxu1 %v20458_v57 }
 0x942   : > { %12522 = vmatmul.mubr.f32.gmra.mrb[12].mxu1 %v20476_v39 }
 0x943   : > { %12524 = vmatprep.mubr.f32.mxu1 %v20484_v59 }
 0x946   : > { %12525 = vmatmul.mubr.f32.gmra.mrb[14].mxu1 %v20497_v8 }
 0x947   : > { %12527 = vmatprep.mubr.f32.mxu1 %v23680_v11 }
 0x94a   : > { %12528 = vmatmul.mubr.f32.gmra.mrb[16].mxu1 %v20523_v6 }
 0x94b   : > { %12530 = vmatprep.mubr.f32.mxu1 %v23681_v47 }
 0x94e   : > { %12531 = vmatmul.mubr.f32.gmra.mrb[18].mxu1 %v23682_v10 }
 0x94f   : > { %12533 = vmatprep.mubr.f32.mxu1 %v23683_v51 }
 0x952   : > { %12534 = vmatmul.mubr.f32.gmra.mrb[20].mxu1 %v20579_v36 }
 0x953   : > { %12536 = vmatprep.mubr.f32.mxu1 %v20587_v29 }
 0x956   : > { %12537 = vmatmul.mubr.f32.gmra.mrb[22].mxu1 %v20603_v41 }
 0x957   : > { %12539 = vmatprep.mubr.f32.mxu1 %v20611_v2 }
 0x95a   : > { %12540 = vmatmul.mubr.f32.gmra.mrb[24].mxu1 %v20629_v19 }
 0x95b   : > { %12542 = vmatprep.mubr.f32.mxu1 %v20637_v33 }
 0x95e   : > { %12543 = vmatmul.mubr.f32.gmra.mrb[26].mxu1 %v20653_v13 }
 0x95f   : > { %12545 = vmatprep.mubr.f32.mxu1 %v23684_v26 }
 0x962   : > { %12546 = vmatmul.mubr.f32.gmra.mrb[28].mxu1 %v20675_v54 }
 0x963   : > { %12548 = vmatprep.mubr.f32.mxu1 %v20682_v27 }
 0x966   : > { %12549 = vmatmul.mubr.f32.gmra.mrb[30].mxu1 %v20694_v31 }
 0x967   : > { %12551 = vmatprep.mubr.f32.mxu1 %v20701_v35 }
 0x96a   : > { %12552 = vmatmul.mubr.f32.gmra.mrb[32].mxu1 %v20710_v62 }
 0x96b   : > { %12554 = vmatprep.mubr.f32.mxu1 %v20717_v55 }
 0x96e   : > { %12555 = vmatmul.mubr.f32.gmra.mrb[34].mxu1 %v20724_v63 }
 0x96f   : > { %12559 = vmatprep.mubr.f32.mxu1 %v23685_v32  ;;  %v23691_v32 = vand.u32 4294901760, %v23675_v3  ;;  %v23698_v3 = vand.u32 4294901760, %v20476_v39  ;;  %v23705_v39 = vand.u32 4294901760, %v23683_v51  ;;  %v23712_v51 = vand.u32 4294901760, %v20653_v13 }
 0x970   : > { %v23719_v13 = vand.u32 4294901760, %v20717_v55  ;;  %v23723_v55 = vld [vmem:[#allocation29_spill] sm:$0xff] }
 0x972   : > { %12560 = vmatmul.mubr.f32.vlgmr.msra.gmra.mrb[0].mxu1 %v23686_v16  ;;  %v23692_v16 = vand.u32 4294901760, %v23676_v9  ;;  %v23699_v9 = vand.u32 4294901760, %v20484_v59  ;;  %v23706_v59 = vand.u32 4294901760, %v20579_v36  ;;  %v23713_v36 = vand.u32 4294901760, %v23684_v26 }
 0x973   : > { %12614 = vmatpush3.msra.mxu1 %v23671_v23  ;;  %12562 = vmatprep.mubr.f32.mxu1 %v23687_v5  ;;  %v23693_v23 = vand.u32 4294901760, %v23677_v53  ;;  %v23694_v5 = vand.u32 4294901760, %v23678_v46  ;;  %v23700_v53 = vand.u32 4294901760, %v20497_v8  ;;  %v23701_v46 = vand.u32 4294901760, %v23680_v11 }
 0x974   : > { %12669 = vmatprep.subr.mxu1 %v23661_v40  ;;  %v23707_v8 = vand.u32 4294901760, %v20587_v29  ;;  %v23708_v11 = vand.u32 4294901760, %v20603_v41  ;;  %v23714_v29 = vand.u32 4294901760, %v20675_v54  ;;  %v23715_v41 = vand.u32 4294901760, %v20682_v27  ;;  %v23721_v54 = vld [vmem:[#allocation23_spill] sm:$0xff]  ;;  %v23725_v27 = vld [vmem:[#allocation30_spill] sm:$0xff] }
 0x975   : > { %v23720_v26 = vand.u32 4294901760, %v20724_v63  ;;  %v23729_v63 = vld [vmem:[#allocation82_spill] sm:$0xff] }
 0x976   : > { %12563 = vmatmul.mubr.f32.gmra.mrb[2].mxu1 %v23688_v7  ;;  %v23695_v7 = vand.u32 4294901760, %v23679_v17  ;;  %v23702_v17 = vand.u32 4294901760, %v20523_v6  ;;  %v23709_v6 = vand.u32 4294901760, %v20611_v2  ;;  %v23716_v2 = vand.u32 4294901760, %v20694_v31  ;;  %v23722_v31 = vld [vmem:[#allocation28_spill] sm:$0xff] }
 0x977   : > { %12565 = vmatprep.mubr.f32.mxu1 %v23689_v34  ;;  %v23696_v34 = vand.u32 4294901760, %v20450_v25  ;;  %v23703_v25 = vand.u32 4294901760, %v23681_v47  ;;  %v23710_v47 = vand.u32 4294901760, %v20629_v19  ;;  %v23717_v19 = vand.u32 4294901760, %v20701_v35  ;;  %v23726_v35 = vld [vmem:[#allocation71_spill] sm:$0xff] }
 0x97a   : > { %12566 = vmatmul.mubr.f32.gmra.mrb[4].mxu1 %v23690_v28  ;;  %v23697_v28 = vand.u32 4294901760, %v20458_v57  ;;  %v23704_v57 = vand.u32 4294901760, %v23682_v10  ;;  %v23711_v10 = vand.u32 4294901760, %v20637_v33  ;;  %v23718_v33 = vand.u32 4294901760, %v20710_v62  ;;  %v23724_v62 = vld [vmem:[#allocation65_spill] sm:$0xff] }
 0x97b   : > { %12568 = vmatprep.mubr.f32.mxu1 %v23691_v32  ;;  %v23735_v32 = vld [vmem:[#allocation92_spill] sm:$0xff] }
 0x97e   : > { %12569 = vmatmul.mubr.f32.gmra.mrb[6].mxu1 %v23692_v16  ;;  %v23736_v16 = vld [vmem:[#allocation99_spill] sm:$0xff] }
 0x97f   : > { %12571 = vmatprep.mubr.f32.mxu1 %v23693_v23 }
 0x982   : > { %12572 = vmatmul.mubr.f32.gmra.mrb[8].mxu1 %v23694_v5 }
 0x983   : > { %12574 = vmatprep.mubr.f32.mxu1 %v23695_v7 }
 0x986   : > { %12575 = vmatmul.mubr.f32.gmra.mrb[10].mxu1 %v23696_v34 }
 0x987   : > { %12577 = vmatprep.mubr.f32.mxu1 %v23697_v28 }
 0x98a   : > { %12578 = vmatmul.mubr.f32.gmra.mrb[12].mxu1 %v23698_v3 }
 0x98b   : > { %12580 = vmatprep.mubr.f32.mxu1 %v23699_v9 }
 0x98e   : > { %12581 = vmatmul.mubr.f32.gmra.mrb[14].mxu1 %v23700_v53 }
 0x98f   : > { %12583 = vmatprep.mubr.f32.mxu1 %v23701_v46 }
 0x992   : > { %12584 = vmatmul.mubr.f32.gmra.mrb[16].mxu1 %v23702_v17 }
 0x993   : > { %12586 = vmatprep.mubr.f32.mxu1 %v23703_v25 }
 0x996   : > { %12587 = vmatmul.mubr.f32.gmra.mrb[18].mxu1 %v23704_v57 }
 0x997   : > { %12589 = vmatprep.mubr.f32.mxu1 %v23705_v39 }
 0x99a   : > { %12590 = vmatmul.mubr.f32.gmra.mrb[20].mxu1 %v23706_v59 }
 0x99b   : > { %12592 = vmatprep.mubr.f32.mxu1 %v23707_v8 }
 0x99e   : > { %12593 = vmatmul.mubr.f32.gmra.mrb[22].mxu1 %v23708_v11 }
 0x99f   : > { %12595 = vmatprep.mubr.f32.mxu1 %v23709_v6 }
 0x9a2   : > { %12596 = vmatmul.mubr.f32.gmra.mrb[24].mxu1 %v23710_v47 }
 0x9a3   : > { %12598 = vmatprep.mubr.f32.mxu1 %v23711_v10 }
 0x9a6   : > { %12599 = vmatmul.mubr.f32.gmra.mrb[26].mxu1 %v23712_v51 }
 0x9a7   : > { %12601 = vmatprep.mubr.f32.mxu1 %v23713_v36 }
 0x9aa   : > { %12602 = vmatmul.mubr.f32.gmra.mrb[28].mxu1 %v23714_v29 }
 0x9ab   : > { %12604 = vmatprep.mubr.f32.mxu1 %v23715_v41 }
 0x9ae   : > { %12605 = vmatmul.mubr.f32.gmra.mrb[30].mxu1 %v23716_v2 }
 0x9af   : > { %12607 = vmatprep.mubr.f32.mxu1 %v23717_v19 }
 0x9b2   : > { %12608 = vmatmul.mubr.f32.gmra.mrb[32].mxu1 %v23718_v33 }
 0x9b3   : > { %12610 = vmatprep.mubr.f32.mxu1 %v23719_v13 }
 0x9b6   : > { %12611 = vmatmul.mubr.f32.gmra.mrb[34].mxu1 %v23720_v26 }
 0x9b7   : > { %12615 = vmatprep.mubr.f32.mxu1 %v20149_v49 }
 0x9ba   : > { %12616 = vmatmul.mubr.f32.vlgmr.msra.gmra.mrb[0].mxu1 %v20152_v43 }
 0x9bb   : > { %12670 = vmatpush3.msra.mxu1 %v23661_v40  ;;  %12618 = vmatprep.mubr.f32.mxu1 %v20171_v12  ;;  %v23731_v40 = vld [vmem:[#allocation86_spill] sm:$0xff] }
 0x9be   : > { %12619 = vmatmul.mubr.f32.gmra.mrb[2].mxu1 %v20210_v42 }
 0x9bf   : > { %12621 = vmatprep.mubr.f32.mxu1 %v23662_v52 }
 0x9c2   : > { %12622 = vmatmul.mubr.f32.gmra.mrb[4].mxu1 %v23663_v38 }
 0x9c3   : > { %12624 = vmatprep.mubr.f32.mxu1 %v23664_v15 }
 0x9c6   : > { %12625 = vmatmul.mubr.f32.gmra.mrb[6].mxu1 %v20226_v45 }
 0x9c7   : > { %12627 = vmatprep.mubr.f32.mxu1 %v20242_v56 }
 0x9ca   : > { %12628 = vmatmul.mubr.f32.gmra.mrb[8].mxu1 %v20245_v0 }
 0x9cb   : > { %12630 = vmatprep.mubr.f32.mxu1 %v20250_v18 }
 0x9ce   : > { %12631 = vmatmul.mubr.f32.gmra.mrb[10].mxu1 %v23665_v37 }
 0x9cf   : > { %12633 = vmatprep.mubr.f32.mxu1 %v23666_v1 }
 0x9d2   : > { %12634 = vmatmul.mubr.f32.gmra.mrb[12].mxu1 %v20300_v61 }
 0x9d3   : > { %12636 = vmatprep.mubr.f32.mxu1 %v23667_v30 }
 0x9d6   : > { %12637 = vmatmul.mubr.f32.gmra.mrb[14].mxu1 %v20310_v48 }
 0x9d7   : > { %12639 = vmatprep.mubr.f32.mxu1 %v20318_v44 }
 0x9da   : > { %12640 = vmatmul.mubr.f32.gmra.mrb[16].mxu1 %v20326_v22 }
 0x9db   : > { %12642 = vmatprep.mubr.f32.mxu1 %v20341_v4 }
 0x9de   : > { %12643 = vmatmul.mubr.f32.gmra.mrb[18].mxu1 %v20352_v50 }
 0x9df   : > { %12645 = vmatprep.mubr.f32.mxu1 %v23721_v54 }
 0x9e2   : > { %12646 = vmatmul.mubr.f32.gmra.mrb[20].mxu1 %v23722_v31 }
 0x9e3   : > { %12648 = vmatprep.mubr.f32.mxu1 %v23723_v55 }
 0x9e6   : > { %12649 = vmatmul.mubr.f32.gmra.mrb[22].mxu1 %v23724_v62 }
 0x9e7   : > { %12651 = vmatprep.mubr.f32.mxu1 %v23725_v27 }
 0x9ea   : > { %12652 = vmatmul.mubr.f32.gmra.mrb[24].mxu1 %v23726_v35 }
 0x9eb   : > { %12654 = vmatprep.mubr.f32.mxu1 %v23727_v21 }
 0x9ee   : > { %12655 = vmatmul.mubr.f32.gmra.mrb[26].mxu1 %v23728_v20 }
 0x9ef   : > { %12657 = vmatprep.mubr.f32.mxu1 %v23729_v63 }
 0x9f2   : > { %12658 = vmatmul.mubr.f32.gmra.mrb[28].mxu1 %v23730_v60 }
 0x9f3   : > { %12660 = vmatprep.mubr.f32.mxu1 %v23731_v40 }
 0x9f6   : > { %12661 = vmatmul.mubr.f32.gmra.mrb[30].mxu1 %v23732_v58 }
 0x9f7   : > { %12663 = vmatprep.mubr.f32.mxu1 %v23733_v14 }
 0x9fa   : > { %12664 = vmatmul.mubr.f32.gmra.mrb[32].mxu1 %v23734_v24 }
 0x9fb   : > { %12666 = vmatprep.mubr.f32.mxu1 %v23735_v32 }
 0x9fe   : > { %12667 = vmatmul.mubr.f32.gmra.mrb[34].mxu1 %v23736_v16 }
 0x9ff   : > { %12671 = vmatprep.mubr.f32.mxu1 %v20149_v49  ;;  %v20966_v49 = vld [vmem:[%s21820_s4] ss:$0 sm:$0xff] }
 0xa02   : > { %12672 = vmatmul.mubr.f32.vlgmr.msra.gmra.mrb[0].mxu1 %v20152_v43 }
 0xa03   : > { %12674 = vmatprep.mubr.f32.mxu1 %v20171_v12 }
 0xa06   : > { %12675 = vmatmul.mubr.f32.gmra.mrb[2].mxu1 %v20210_v42 }
 0xa07   : > { %12677 = vmatprep.mubr.f32.mxu1 %v23662_v52 }
 0xa0a   : > { %12678 = vmatmul.mubr.f32.gmra.mrb[4].mxu1 %v23663_v38 }
 0xa0b   : > { %12680 = vmatprep.mubr.f32.mxu1 %v23664_v15 }
 0xa0e   : > { %12681 = vmatmul.mubr.f32.gmra.mrb[6].mxu1 %v20226_v45 }
 0xa0f   : > { %12683 = vmatprep.mubr.f32.mxu1 %v20242_v56 }
 0xa12   : > { %12684 = vmatmul.mubr.f32.gmra.mrb[8].mxu1 %v20245_v0 }
 0xa13   : > { %12686 = vmatprep.mubr.f32.mxu1 %v20250_v18 }
 0xa16   : > { %12687 = vmatmul.mubr.f32.gmra.mrb[10].mxu1 %v23665_v37 }
 0xa17   : > { %12689 = vmatprep.mubr.f32.mxu1 %v23666_v1 }
 0xa1a   : > { %12690 = vmatmul.mubr.f32.gmra.mrb[12].mxu1 %v20300_v61 }
 0xa1b   : > { %12692 = vmatprep.mubr.f32.mxu1 %v23667_v30 }
 0xa1e   : > { %12693 = vmatmul.mubr.f32.gmra.mrb[14].mxu1 %v20310_v48 }
 0xa1f   : > { %12695 = vmatprep.mubr.f32.mxu1 %v20318_v44 }
 0xa22   : > { %12696 = vmatmul.mubr.f32.gmra.mrb[16].mxu1 %v20326_v22 }
 0xa23   : > { %12698 = vmatprep.mubr.f32.mxu1 %v20341_v4 }
 0xa26   : > { %12699 = vmatmul.mubr.f32.gmra.mrb[18].mxu1 %v20352_v50 }
 0xa27   : > { %12701 = vmatprep.mubr.f32.mxu1 %v23721_v54 }
 0xa2a   : > { %12702 = vmatmul.mubr.f32.gmra.mrb[20].mxu1 %v23722_v31 }
 0xa2b   : > { %12704 = vmatprep.mubr.f32.mxu1 %v23723_v55 }
 0xa2e   : > { %12705 = vmatmul.mubr.f32.gmra.mrb[22].mxu1 %v23724_v62 }
 0xa2f   : > { %12707 = vmatprep.mubr.f32.mxu1 %v23725_v27 }
 0xa32   : > { %12708 = vmatmul.mubr.f32.gmra.mrb[24].mxu1 %v23726_v35 }
 0xa33   : > { %12710 = vmatprep.mubr.f32.mxu1 %v23727_v21 }
 0xa36   : > { %12711 = vmatmul.mubr.f32.gmra.mrb[26].mxu1 %v23728_v20 }
 0xa37   : > { %12713 = vmatprep.mubr.f32.mxu1 %v23729_v63 }
 0xa3a   : > { %12714 = vmatmul.mubr.f32.gmra.mrb[28].mxu1 %v23730_v60 }
 0xa3b   : > { %12716 = vmatprep.mubr.f32.mxu1 %v23731_v40 }
 0xa3e   : > { %12717 = vmatmul.mubr.f32.gmra.mrb[30].mxu1 %v23732_v58 }
 0xa3f   : > { %12719 = vmatprep.mubr.f32.mxu1 %v23733_v14 }
 0xa42   : > { %12720 = vmatmul.mubr.f32.gmra.mrb[32].mxu1 %v23734_v24 }
 0xa43   : > { %12722 = vmatprep.mubr.f32.mxu1 %v23735_v32 }
 0xa46   : > { %12723 = vmatmul.mubr.f32.gmra.mrb[34].mxu1 %v23736_v16 }
 0xad5   : > { %v12673_v43 = vpop.f32.mrb[0].mxu1 }
 0xad6   : > { %v20969_v12 = vadd.f32 %v12673_v43, %v20966_v49  ;;  %v9925_v42 = vpop.f32.mrb[1].mxu1 }
 0xad7   : > { %v20972_v45 = vadd.f32 %v20966_v49, %v9925_v42 }
 0xad8   : > { %v11570_v56 = vmul.f32 -1.442695, %v20969_v12 }
 0xad9   : > { %v11569_v0 = vmul.f32 -1.442695, %v20972_v45  ;;  %v12676_v18 = vpop.f32.mrb[2].mxu1 }
 0xada   : > { %14007 = vpow2.f32 %v11570_v56  ;;  %v20977_v61 = vadd.f32 %v12676_v18, %v20966_v49  ;;  %v9937_v48 = vpop.f32.mrb[3].mxu1 }
 0xadb   : > { %14009 = vpow2.f32 %v11569_v0  ;;  %v20980_v44 = vadd.f32 %v20966_v49, %v9937_v48 }
 0xadc   : > { %v11572_v22 = vmul.f32 -1.442695, %v20977_v61 }
 0xadd   : > { %v11571_v4 = vmul.f32 -1.442695, %v20980_v44  ;;  %v12679_v50 = vpop.f32.mrb[4].mxu1 }
 0xade   : > { %14011 = vpow2.f32 %v11572_v22  ;;  %v20985_v52 = vadd.f32 %v12679_v50, %v20966_v49  ;;  %v9949_v38 = vpop.f32.mrb[5].mxu1 }
 0xadf   : > { %14013 = vpow2.f32 %v11571_v4  ;;  %v20988_v15 = vadd.f32 %v20966_v49, %v9949_v38 }
 0xae0   : > { %v11574_v37 = vmul.f32 -1.442695, %v20985_v52 }
 0xae1   : > { %v11573_v1 = vmul.f32 -1.442695, %v20988_v15  ;;  %v12682_v30 = vpop.f32.mrb[6].mxu1 }
 0xae2   : > { %14015 = vpow2.f32 %v11574_v37  ;;  %v20993_v23 = vadd.f32 %v12682_v30, %v20966_v49  ;;  %v9961_v5 = vpop.f32.mrb[7].mxu1 }
 0xae3   : > { %14017 = vpow2.f32 %v11573_v1  ;;  %v20996_v7 = vadd.f32 %v20966_v49, %v9961_v5 }
 0xae4   : > { %v14008_v34 = vpop.eup %14007  ;;  %v11576_v28 = vmul.f32 -1.442695, %v20993_v23 }
 0xae5   : > { %v14010_v3 = vpop.eup %14009  ;;  %v10291_v9 = vadd.f32 1.0, %v14008_v34  ;;  %v11575_v53 = vmul.f32 -1.442695, %v20996_v7  ;;  %v12685_v46 = vpop.f32.mrb[8].mxu1 }
 0xae6   : > { %v10290_v17 = vadd.f32 1.0, %v14010_v3  ;;  %14019 = vpow2.f32 %v11576_v28  ;;  %v21001_v25 = vadd.f32 %v12685_v46, %v20966_v49  ;;  %v9973_v57 = vpop.f32.mrb[9].mxu1 }
 0xae7   : > { %14021 = vrcp.f32 %v10291_v9  ;;  %v21004_v39 = vadd.f32 %v20966_v49, %v9973_v57 }
 0xae8   : > { %v14012_v59 = vpop.eup %14011  ;;  %14023 = vrcp.f32 %v10290_v17  ;;  %v11578_v8 = vmul.f32 -1.442695, %v21001_v25 }
 0xae9   : > { %v14014_v11 = vpop.eup %14013  ;;  %v10293_v6 = vadd.f32 1.0, %v14012_v59  ;;  %14025 = vpow2.f32 %v11575_v53  ;;  %v11577_v47 = vmul.f32 -1.442695, %v21004_v39  ;;  %v12688_v10 = vpop.f32.mrb[10].mxu1 }
 0xaea   : > { %v10292_v51 = vadd.f32 1.0, %v14014_v11  ;;  %14027 = vpow2.f32 %v11578_v8  ;;  %v21009_v36 = vadd.f32 %v12688_v10, %v20966_v49  ;;  %v9985_v29 = vpop.f32.mrb[11].mxu1 }
 0xaeb   : > { %14029 = vrcp.f32 %v10293_v6  ;;  %v21012_v41 = vadd.f32 %v20966_v49, %v9985_v29 }
 0xaec   : > { %v14016_v2 = vpop.eup %14015  ;;  %14031 = vrcp.f32 %v10292_v51  ;;  %v11580_v19 = vmul.f32 -1.442695, %v21009_v36 }
 0xaed   : > { %v14018_v33 = vpop.eup %14017  ;;  %v10295_v13 = vadd.f32 1.0, %v14016_v2  ;;  %14033 = vpow2.f32 %v11577_v47  ;;  %v11579_v26 = vmul.f32 -1.442695, %v21012_v41  ;;  %v12691_v54 = vpop.f32.mrb[12].mxu1 }
 0xaee   : > { %v10294_v31 = vadd.f32 1.0, %v14018_v33  ;;  %14035 = vpow2.f32 %v11580_v19  ;;  %v21017_v55 = vadd.f32 %v12691_v54, %v20966_v49  ;;  %v9997_v62 = vpop.f32.mrb[13].mxu1 }
 0xaef   : > { %14037 = vrcp.f32 %v10295_v13  ;;  %v21020_v27 = vadd.f32 %v20966_v49, %v9997_v62 }
 0xaf0   : > { %v14020_v35 = vpop.eup %14019  ;;  %14039 = vrcp.f32 %v10294_v31  ;;  %v11582_v21 = vmul.f32 -1.442695, %v21017_v55 }
 0xaf1   : > { %v14022_v20 = vpop.eup %14021  ;;  %v10297_v63 = vadd.f32 1.0, %v14020_v35  ;;  %14041 = vpow2.f32 %v11579_v26  ;;  %v11581_v60 = vmul.f32 -1.442695, %v21020_v27  ;;  %v12694_v40 = vpop.f32.mrb[14].mxu1 }
 0xaf2   : > { %v14024_v58 = vpop.eup %14023  ;;  %14043 = vpow2.f32 %v11582_v21  ;;  %v21025_v14 = vadd.f32 %v12694_v40, %v20966_v49  ;;  %10436 = vrot.lane.b32.xlu1 %v14022_v20, %s14310_s17  ;;  %v10009_v24 = vpop.f32.mrb[15].mxu1 }
 0xaf3   : > { %v14026_v32 = vpop.eup %14025  ;;  %14045 = vrcp.f32 %v10297_v63  ;;  %v21029_v16 = vadd.f32 %v20966_v49, %v10009_v24  ;;  %10434 = vrot.lane.b32.xlu0 %v14024_v58, %s14310_s17 }
 0xaf4   : > { %v14028_v43 = vpop.eup %14027  ;;  %v10296_v42 = vadd.f32 1.0, %v14026_v32  ;;  %14047 = vpow2.f32 %v11581_v60  ;;  %v11584_v56 = vmul.f32 -1.442695, %v21025_v14 }
 0xaf5   : > { %v14030_v0 = vpop.eup %14029  ;;  %v10299_v18 = vadd.f32 1.0, %v14028_v43  ;;  %v11583_v48 = vmul.f32 -1.442695, %v21029_v16  ;;  %v12697_v22 = vpop.f32.mrb[16].mxu1 }
 0xaf6   : > { %v14032_v4 = vpop.eup %14031  ;;  %14049 = vrcp.f32 %v10296_v42  ;;  %v21035_v50 = vadd.f32 %v12697_v22, %v20966_v49  ;;  %10440 = vrot.lane.b32.xlu1 %v14030_v0, %s14310_s17  ;;  %v10021_v38 = vpop.f32.mrb[17].mxu1 }
 0xaf7   : > { %v14034_v37 = vpop.eup %14033  ;;  %14051 = vrcp.f32 %v10299_v18  ;;  %v21039_v1 = vadd.f32 %v20966_v49, %v10021_v38  ;;  %10438 = vrot.lane.b32.xlu0 %v14032_v4, %s14310_s17 }
 0xaf8   : > { %v14036_v30 = vpop.eup %14035  ;;  %v10298_v5 = vadd.f32 1.0, %v14034_v37  ;;  %14053 = vpow2.f32 %v11584_v56  ;;  %v11586_v34 = vmul.f32 -1.442695, %v21035_v50 }
 0xaf9   : > { %v14038_v28 = vpop.eup %14037  ;;  %v10301_v3 = vadd.f32 1.0, %v14036_v30  ;;  %14055 = vpow2.f32 %v11583_v48  ;;  %v11585_v9 = vmul.f32 -1.442695, %v21039_v1  ;;  %v12700_v53 = vpop.f32.mrb[18].mxu1 }
 0xafa   : > { %v14040_v46 = vpop.eup %14039  ;;  %14057 = vrcp.f32 %v10298_v5  ;;  %v21045_v17 = vadd.f32 %v12700_v53, %v20966_v49  ;;  %10444 = vrot.lane.b32.xlu1 %v14038_v28, %s14310_s17  ;;  %v10033_v57 = vpop.f32.mrb[19].mxu1 }
 0xafb   : > { %v14042_v59 = vpop.eup %14041  ;;  %14059 = vrcp.f32 %v10301_v3  ;;  %v21049_v8 = vadd.f32 %v20966_v49, %v10033_v57  ;;  %10442 = vrot.lane.b32.xlu0 %v14040_v46, %s14310_s17 }
 0xafc   : > { %v14044_v11 = vpop.eup %14043  ;;  %v10300_v6 = vadd.f32 1.0, %v14042_v59  ;;  %14061 = vpow2.f32 %v11586_v34  ;;  %v11588_v47 = vmul.f32 -1.442695, %v21045_v17 }
 0xafd   : > { %v14046_v10 = vpop.eup %14045  ;;  %v10303_v51 = vadd.f32 1.0, %v14044_v11  ;;  %14063 = vpow2.f32 %v11585_v9  ;;  %v12703_v29 = vpop.f32.mrb[20].mxu1  ;;  %v11587_v19 = vmul.f32 -1.442695, %v21049_v8 }
 0xafe   : > { %v14048_v2 = vpop.eup %14047  ;;  %14065 = vrcp.f32 %v10300_v6  ;;  %v21055_v33 = vadd.f32 %v12703_v29, %v20966_v49  ;;  %10448 = vrot.lane.b32.xlu1 %v14046_v10, %s14310_s17  ;;  %v10045_v13 = vpop.f32.mrb[21].mxu1 }
 0xaff   : > { %14067 = vrcp.f32 %v10303_v51  ;;  %v10302_v26 = vadd.f32 1.0, %v14048_v2  ;;  %v21059_v54 = vadd.f32 %v20966_v49, %v10045_v13 }
 0xb00   : > { %v14050_v31 = vpop.eup %14049  ;;  %14069 = vpow2.f32 %v11588_v47  ;;  %v11590_v62 = vmul.f32 -1.442695, %v21055_v33 }
 0xb01   : > { %v14052_v35 = vpop.eup %14051  ;;  %14071 = vrcp.f32 %v10302_v26  ;;  %v11589_v21 = vmul.f32 -1.442695, %v21059_v54  ;;  %10446 = vrot.lane.b32.xlu0 %v14050_v31, %s14310_s17  ;;  %v12706_v20 = vpop.f32.mrb[22].mxu1 }
 0xb02   : > { %v14054_v63 = vpop.eup %14053  ;;  %14073 = vpow2.f32 %v11587_v19  ;;  %v21065_v60 = vadd.f32 %v12706_v20, %v20966_v49  ;;  %10452 = vrot.lane.b32.xlu1 %v14052_v35, %s14310_s17  ;;  %v10057_v40 = vpop.f32.mrb[23].mxu1 }
 0xb03   : > { %v14056_v58 = vpop.eup %14055  ;;  %v10305_v24 = vadd.f32 1.0, %v14054_v63  ;;  %14075 = vpow2.f32 %v11590_v62  ;;  %v21069_v32 = vadd.f32 %v20966_v49, %v10057_v40 }
 0xb04   : > { %v14058_v43 = vpop.eup %14057  ;;  %v10304_v42 = vadd.f32 1.0, %v14056_v58  ;;  %14077 = vpow2.f32 %v11589_v21  ;;  %v11592_v56 = vmul.f32 -1.442695, %v21065_v60 }
 0xb05   : > { %v14060_v0 = vpop.eup %14059  ;;  %14079 = vrcp.f32 %v10305_v24  ;;  %v11591_v18 = vmul.f32 -1.442695, %v21069_v32  ;;  %10450 = vrot.lane.b32.xlu0 %v14058_v43, %s14310_s17  ;;  %v12709_v48 = vpop.f32.mrb[24].mxu1 }
 0xb06   : > { %v14062_v22 = vpop.eup %14061  ;;  %14081 = vrcp.f32 %v10304_v42  ;;  %v21075_v4 = vadd.f32 %v12709_v48, %v20966_v49  ;;  %10456 = vrot.lane.b32.xlu1 %v14060_v0, %s14310_s17  ;;  %v10069_v38 = vpop.f32.mrb[25].mxu1 }
 0xb07   : > { %v14064_v37 = vpop.eup %14063  ;;  %v10307_v30 = vadd.f32 1.0, %v14062_v22  ;;  %14083 = vpow2.f32 %v11592_v56  ;;  %v21079_v5 = vadd.f32 %v20966_v49, %v10069_v38 }
 0xb08   : > { %v14066_v34 = vpop.eup %14065  ;;  %v10306_v28 = vadd.f32 1.0, %v14064_v37  ;;  %14085 = vpow2.f32 %v11591_v18  ;;  %v11594_v3 = vmul.f32 -1.442695, %v21075_v4 }
 0xb09   : > { %v14068_v9 = vpop.eup %14067  ;;  %14087 = vrcp.f32 %v10307_v30  ;;  %v11593_v53 = vmul.f32 -1.442695, %v21079_v5  ;;  %10454 = vrot.lane.b32.xlu0 %v14066_v34, %s14310_s17  ;;  %v12712_v46 = vpop.f32.mrb[26].mxu1 }
 0xb0a   : > { %v14070_v57 = vpop.eup %14069  ;;  %14089 = vrcp.f32 %v10306_v28  ;;  %v21085_v59 = vadd.f32 %v12712_v46, %v20966_v49  ;;  %10460 = vrot.lane.b32.xlu1 %v14068_v9, %s14310_s17  ;;  %v10081_v11 = vpop.f32.mrb[27].mxu1 }
 0xb0b   : > { %v14072_v6 = vpop.eup %14071  ;;  %v10309_v47 = vadd.f32 1.0, %v14070_v57  ;;  %14091 = vpow2.f32 %v11594_v3  ;;  %v21089_v10 = vadd.f32 %v20966_v49, %v10081_v11 }
 0xb0c   : > { %v14074_v51 = vpop.eup %14073  ;;  %14093 = vpow2.f32 %v11593_v53  ;;  %v11596_v29 = vmul.f32 -1.442695, %v21085_v59 }
 0xb0d   : > { %v14076_v2 = vpop.eup %14075  ;;  %14095 = vrcp.f32 %v10309_v47  ;;  %v10308_v19 = vadd.f32 1.0, %v14074_v51  ;;  %10458 = vrot.lane.b32.xlu0 %v14072_v6, %s14310_s17  ;;  %v12715_v13 = vpop.f32.mrb[28].mxu1  ;;  %v11595_v62 = vmul.f32 -1.442695, %v21089_v10 }
 0xb0e   : > { %v14078_v26 = vpop.eup %14077  ;;  %v10311_v31 = vadd.f32 1.0, %v14076_v2  ;;  %14097 = vpow2.f32 %v11596_v29  ;;  %v21095_v35 = vadd.f32 %v12715_v13, %v20966_v49  ;;  %v10093_v21 = vpop.f32.mrb[29].mxu1 }
 0xb0f   : > { %v14080_v20 = vpop.eup %14079  ;;  %14099 = vrcp.f32 %v10308_v19  ;;  %v10310_v63 = vadd.f32 1.0, %v14078_v26  ;;  %v21098_v40 = vadd.f32 %v20966_v49, %v10093_v21 }
 0xb10   : > { %v14082_v58 = vpop.eup %14081  ;;  %14101 = vrcp.f32 %v10311_v31  ;;  %v11598_v24 = vmul.f32 -1.442695, %v21095_v35  ;;  %10464 = vrot.lane.b32.xlu1 %v14080_v20, %s14310_s17 }
 0xb11   : > { %v14084_v43 = vpop.eup %14083  ;;  %14103 = vrcp.f32 %v10310_v63  ;;  %10462 = vrot.lane.b32.xlu0 %v14082_v58, %s14310_s17  ;;  %v12718_v42 = vpop.f32.mrb[30].mxu1  ;;  %v11597_v18 = vmul.f32 -1.442695, %v21098_v40 }
 0xb12   : > { %v14086_v56 = vpop.eup %14085  ;;  %v10313_v0 = vadd.f32 1.0, %v14084_v43  ;;  %14105 = vpow2.f32 %v11595_v62  ;;  %v21105_v48 = vadd.f32 %v12718_v42, %v20966_v49  ;;  %v10105_v22 = vpop.f32.mrb[31].mxu1 }
 0xb13   : > { %v14088_v38 = vpop.eup %14087  ;;  %v10312_v37 = vadd.f32 1.0, %v14086_v56  ;;  %14107 = vpow2.f32 %v11598_v24  ;;  %v21108_v30 = vadd.f32 %v20966_v49, %v10105_v22 }
 0xb14   : > { %v14090_v34 = vpop.eup %14089  ;;  %14109 = vrcp.f32 %v10313_v0  ;;  %v11600_v28 = vmul.f32 -1.442695, %v21105_v48  ;;  %10468 = vrot.lane.b32.xlu1 %v14088_v38, %s14310_s17 }
 0xb15   : > { %v14092_v3 = vpop.eup %14091  ;;  %14111 = vrcp.f32 %v10312_v37  ;;  %10466 = vrot.lane.b32.xlu0 %v14090_v34, %s14310_s17  ;;  %v12721_v9 = vpop.f32.mrb[32].mxu1  ;;  %v11599_v57 = vmul.f32 -1.442695, %v21108_v30 }
 0xb16   : > { %v14094_v53 = vpop.eup %14093  ;;  %v10315_v46 = vadd.f32 1.0, %v14092_v3  ;;  %14113 = vpow2.f32 %v11597_v18  ;;  %v21115_v11 = vadd.f32 %v12721_v9, %v20966_v49  ;;  %v10117_v6 = vpop.f32.mrb[33].mxu1 }
 0xb17   : > { %v14096_v47 = vpop.eup %14095  ;;  %v10314_v51 = vadd.f32 1.0, %v14094_v53  ;;  %14115 = vpow2.f32 %v11600_v28  ;;  %v21118_v29 = vadd.f32 %v20966_v49, %v10117_v6 }
 0xb18   : > { %v14098_v2 = vpop.eup %14097  ;;  %14117 = vrcp.f32 %v10315_v46  ;;  %v11602_v19 = vmul.f32 -1.442695, %v21115_v11  ;;  %10472 = vrot.lane.b32.xlu1 %v14096_v47, %s14310_s17 }
 0xb19   : > { %v14100_v13 = vpop.eup %14099  ;;  %14119 = vrcp.f32 %v10314_v51  ;;  %v10317_v26 = vadd.f32 1.0, %v14098_v2  ;;  %v11601_v31 = vmul.f32 -1.442695, %v21118_v29  ;;  %v12724_v62 = vpop.f32.mrb[34].mxu1 }
 0xb1a   : > { %v14102_v21 = vpop.eup %14101  ;;  %14121 = vpow2.f32 %v11599_v57  ;;  %10470 = vrot.lane.b32.xlu0 %v14100_v13, %s14310_s17  ;;  %v21125_v20 = vadd.f32 %v12724_v62, %v20966_v49  ;;  %v10129_v63 = vpop.f32.mrb[35].mxu1 }
 0xb1b   : > { %v14104_v58 = vpop.eup %14103  ;;  %14123 = vrcp.f32 %v10317_v26  ;;  %v21128_v24 = vadd.f32 %v20966_v49, %v10129_v63 }
 0xb1c   : > { %v14106_v43 = vpop.eup %14105  ;;  %14125 = vpow2.f32 %v11602_v19  ;;  %v11604_v42 = vmul.f32 -1.442695, %v21125_v20  ;;  %10476 = vrot.lane.b32.xlu1 %v14102_v21, %s14310_s17 }
 0xb1d   : > { %v14108_v56 = vpop.eup %14107  ;;  %v10316_v0 = vadd.f32 1.0, %v14106_v43  ;;  %14127 = vpow2.f32 %v11601_v31  ;;  %v11603_v18 = vmul.f32 -1.442695, %v21128_v24 }
 0xb1e   : > { %v14110_v22 = vpop.eup %14109  ;;  %v10319_v38 = vadd.f32 1.0, %v14108_v56  ;;  %14129 = vpow2.f32 %v11604_v42  ;;  %10474 = vrot.lane.b32.xlu0 %v14104_v58, %s14310_s17 }
 0xb1f   : > { %v14112_v37 = vpop.eup %14111  ;;  %14131 = vrcp.f32 %v10316_v0 }
 0xb20   : > { %v14114_v49 = vpop.eup %14113  ;;  %14133 = vrcp.f32 %v10319_v38  ;;  %10480 = vrot.lane.b32.xlu1 %v14110_v22, %s14310_s17  ;;  %v14256_v38 = vld [vmem:[%s14365_s29 + $0x28] sm:$0xff] }
 0xb21   : > { %v14116_v34 = vpop.eup %14115  ;;  %v10318_v28 = vadd.f32 1.0, %v14114_v49  ;;  %14135 = vpow2.f32 %v11603_v18  ;;  %v14257_v49 = vld [vmem:[%s14365_s29 + $0x30] sm:$0xff] }
 0xb22   : > { %v14118_v3 = vpop.eup %14117  ;;  %v10321_v9 = vadd.f32 1.0, %v14116_v34  ;;  %10478 = vrot.lane.b32.xlu0 %v14112_v37, %s14310_s17  ;;  %v10616_v37 = vrot.slane %v14256_v38, 4  ;;  %v10618_v34 = vrot.slane %v14257_v49, 4 }
 0xb23   : > { %v14120_v53 = vpop.eup %14119  ;;  %14137 = vrcp.f32 %v10318_v28  ;;  %v14258_v28 = vld [vmem:[%s14365_s29 + $0x20] sm:$0xff] }
 0xb24   : > { %v14122_v46 = vpop.eup %14121  ;;  %14139 = vrcp.f32 %v10321_v9  ;;  %10484 = vrot.lane.b32.xlu1 %v14118_v3, %s14310_s17  ;;  %v10615_v3 = vrot.slane %v14258_v28, 4 }
 0xb25   : > { %v14124_v57 = vpop.eup %14123  ;;  %v10320_v6 = vadd.f32 1.0, %v14122_v46  ;;  %v14259_v46 = vld [vmem:[%s14365_s29 + $0x38] sm:$0xff] }
 0xb26   : > { %v14126_v47 = vpop.eup %14125  ;;  %10482 = vrot.lane.b32.xlu0 %v14120_v53, %s14310_s17  ;;  %v10619_v53 = vsel %vm1768_vm8, %v10616_v37, %v10618_v34 }
 0xb27   : > { %v14128_v51 = vpop.eup %14127  ;;  %14141 = vrcp.f32 %v10320_v6  ;;  %v10323_v2 = vadd.f32 1.0, %v14126_v47  ;;  %v14260_v6 = vld [vmem:[%s14365_s29 + $0x40] sm:$0xff] }
 0xb28   : > { %v14130_v19 = vpop.eup %14129  ;;  %v10322_v13 = vadd.f32 1.0, %v14128_v51  ;;  %10488 = vrot.lane.b32.xlu1 %v14124_v57, %s14310_s17  ;;  %v10620_v57 = vrot.slane %v14259_v46, 4  ;;  %v10622_v47 = vrot.slane %v14260_v6, 4 }
 0xb29   : > { %v14132_v26 = vpop.eup %14131  ;;  %14143 = vrcp.f32 %v10323_v2  ;;  %v10325_v31 = vadd.f32 1.0, %v14130_v19  ;;  %v10617_v19 = vsel %vm1768_vm8, %v10615_v3, %v10616_v37 }
 0xb2a   : > { %v14134_v62 = vpop.eup %14133  ;;  %14145 = vrcp.f32 %v10322_v13  ;;  %10486 = vrot.lane.b32.xlu0 %v14132_v26, %s14310_s17 }
 0xb2b   : > { %v14136_v21 = vpop.eup %14135  ;;  %14147 = vrcp.f32 %v10325_v31 }
 0xb2c   : > { %v10324_v63 = vadd.f32 1.0, %v14136_v21  ;;  %10492 = vrot.lane.b32.xlu1 %v14134_v62, %s14310_s17  ;;  %v10623_v21 = vsel %vm1768_vm8, %v10620_v57, %v10622_v47 }
 0xb2d   : > { %v14138_v58 = vpop.eup %14137 }
 0xb2e   : > { %v14140_v43 = vpop.eup %14139  ;;  %14149 = vrcp.f32 %v10324_v63  ;;  %10490 = vrot.lane.b32.xlu0 %v14138_v58, %s14310_s17 }
 0xb30   : > { %10496 = vrot.lane.b32.xlu1 %v14140_v43, %s14310_s17 }
 0xb31   : > { %v14142_v42 = vpop.eup %14141 }
 0xb32   : > { %10494 = vrot.lane.b32.xlu0 %v14142_v42, %s14310_s17 }
 0xb33   : > { %v14144_v56 = vpop.eup %14143 }
 0xb34   : > { %v14146_v0 = vpop.eup %14145  ;;  %10500 = vrot.lane.b32.xlu1 %v14144_v56, %s14310_s17 }
 0xb35   : > { %v14148_v18 = vpop.eup %14147 }
 0xb36   : > { %10498 = vrot.lane.b32.xlu0 %v14146_v0, %s14310_s17 }
 0xb38   : > { %v14150_v22 = vpop.eup %14149  ;;  %10504 = vrot.lane.b32.xlu1 %v14148_v18, %s14310_s17  ;;  %v10621_v18 = vsel %vm1768_vm8, %v10618_v34, %v10620_v57  ;;  %v14264_v57 = vld [vmem:[%s14365_s29 + $0x60] sm:$0xff] }
 0xb39   : > { %v10630_v6 = vrot.slane %v14264_v57, 4 }
 0xb3a   : > { %10502 = vrot.lane.b32.xlu0 %v14150_v22, %s14310_s17 }
 0xb64   : > { %v10437_v9 = vpop.permute.xlu1 %10436 }
 0xb65   : > { %v10543_v51 = vmul.f32 %v10437_v9, %v20969_v12  ;;  %v10435_v2 = vpop.permute.xlu0 %10434  ;;  %v14261_v12 = vld [vmem:[%s14365_s29 + $0x48] sm:$0xff] }
 0xb66   : > { %v10542_v13 = vmul.f32 %v10435_v2, %v20972_v45  ;;  %v10624_v42 = vrot.slane %v14261_v12, 4 }
 0xb67   : > { %v21157_v26 = vadd.f32 %v10619_v53, %v10543_v51  ;;  %v14263_v53 = vld [vmem:[%s14365_s29 + $0x58] sm:$0xff] }
 0xb68   : > { %v10441_v31 = vpop.permute.xlu1 %10440  ;;  %v21159_v62 = vadd.f32 %v10617_v19, %v10542_v13  ;;  %v10628_v34 = vrot.slane %v14263_v53, 4 }
 0xb69   : > { %v10545_v63 = vmul.f32 %v10441_v31, %v20977_v61  ;;  %v10439_v58 = vpop.permute.xlu0 %10438  ;;  %v10763_v43 = vsel %vm1017_vm14, %v21157_v26, 0.0  ;;  %v14262_v61 = vld [vmem:[%s14365_s29 + $0x50] sm:$0xff]  ;;  %v14265_v31 = vld [vmem:[%s14365_s29 + $0x68] sm:$0xff] }
 0xb6a   : > { %v10544_v56 = vmul.f32 %v10439_v58, %v20980_v44  ;;  %10764 = vadd.xlane.f32.xlu1 %v10763_v43  ;;  %v10760_v45 = vsel %vm1017_vm14, %v21159_v62, 0.0  ;;  %v10626_v22 = vrot.slane %v14262_v61, 4  ;;  %v10625_v44 = vsel %vm1768_vm8, %v10622_v47, %v10624_v42 }
 0xb6b   : > { %10761 = vadd.xlane.f32.xlu0 %v10760_v45  ;;  %v21169_v0 = vadd.f32 %v10623_v21, %v10545_v63  ;;  %v10632_v21 = vrot.slane %v14265_v31, 4  ;;  %v14266_v63 = vld [vmem:[%s14365_s29 + $0x70] sm:$0xff] }
 0xb6c   : > { %v10445_v38 = vpop.permute.xlu1 %10444  ;;  %v21178_v9 = vadd.f32 %v10621_v18, %v10544_v56  ;;  %v10627_v46 = vsel %vm1768_vm8, %v10624_v42, %v10626_v22  ;;  %v10634_v58 = vrot.slane %v14266_v63, 4  ;;  %v10629_v43 = vsel %vm1768_vm8, %v10626_v22, %v10628_v34 }
 0xb6d   : > { %v10443_v37 = vpop.permute.xlu0 %10442  ;;  %v10769_v49 = vsel %vm1017_vm14, %v21169_v0, 0.0  ;;  %v10547_v28 = vmul.f32 %v10445_v38, %v20985_v52 }
 0xb6e   : > { %v10546_v3 = vmul.f32 %v10443_v37, %v20988_v15  ;;  %v10766_v15 = vsel %vm1017_vm14, %v21178_v9, 0.0  ;;  %v10635_v38 = vsel %vm1768_vm8, %v10632_v21, %v10634_v58 }
 0xb6f   : > { %10770 = vadd.xlane.f32.xlu0 %v10769_v49  ;;  %v21190_v19 = vadd.f32 %v10627_v46, %v10547_v28  ;;  %v14267_v49 = vld [vmem:[%s14365_s29 + $0x78] sm:$0xff]  ;;  %v10633_v28 = vsel %vm1768_vm8, %v10630_v6, %v10632_v21 }
 0xb70   : > { %v10449_v51 = vpop.permute.xlu1 %10448  ;;  %v21183_v2 = vadd.f32 %v10625_v44, %v10546_v3  ;;  %v10636_v22 = vrot.slane %v14267_v49, 4  ;;  %v14268_v44 = vld [vmem:[%s14365_s29 + $0x80] sm:$0xff] }
 0xb71   : > { %v10549_v47 = vmul.f32 %v10449_v51, %v20993_v23  ;;  %v10631_v23 = vsel %vm1768_vm8, %v10628_v34, %v10630_v6  ;;  %v10775_v18 = vsel %vm1017_vm14, %v21190_v19, 0.0  ;;  %v14269_v6 = vld [vmem:[%s14365_s29 + $0x88] sm:$0xff] }
 0xb72   : > { %v10772_v52 = vsel %vm1017_vm14, %v21183_v2, 0.0  ;;  %v10637_v31 = vsel %vm1768_vm8, %v10634_v58, %v10636_v22 }
 0xb73   : > { %v10447_v13 = vpop.permute.xlu0 %10446  ;;  %10773 = vadd.xlane.f32.xlu1 %v10772_v52  ;;  %10767 = vadd.xlane.f32.xlu0 %v10766_v15  ;;  %v21202_v61 = vadd.f32 %v10631_v23, %v10549_v47  ;;  %v14270_v15 = vld [vmem:[%s14365_s29 + $0x90] sm:$0xff] }
 0xb74   : > { %v10548_v12 = vmul.f32 %v10447_v13, %v20996_v7  ;;  %v10453_v42 = vpop.permute.xlu1 %10452  ;;  %v10638_v7 = vrot.slane %v14268_v44, 4  ;;  %v10642_v13 = vrot.slane %v14270_v15, 4  ;;  %v14273_v44 = vld [vmem:[%s14365_s29 + $0xa8] sm:$0xff] }
 0xb75   : > { %v10551_v56 = vmul.f32 %v10453_v42, %v21001_v25  ;;  %v10781_v51 = vsel %vm1017_vm14, %v21202_v61, 0.0 }
 0xb76   : > { %v21198_v45 = vadd.f32 %v10629_v43, %v10548_v12  ;;  %v10639_v47 = vsel %vm1768_vm8, %v10636_v22, %v10638_v7 }
 0xb77   : > { %v10451_v37 = vpop.permute.xlu0 %10450  ;;  %10776 = vadd.xlane.f32.xlu0 %v10775_v18  ;;  %v21211_v34 = vadd.f32 %v10635_v38, %v10551_v56  ;;  %v14271_v18 = vld [vmem:[%s14365_s29 + $0x98] sm:$0xff] }
 0xb78   : > { %v10550_v25 = vmul.f32 %v10451_v37, %v21004_v39  ;;  %v10778_v3 = vsel %vm1017_vm14, %v21198_v45, 0.0  ;;  %v10457_v53 = vpop.permute.xlu1 %10456  ;;  %v10640_v39 = vrot.slane %v14269_v6, 4  ;;  %v10644_v38 = vrot.slane %v14271_v18, 4  ;;  %v14272_v37 = vld [vmem:[%s14365_s29 + $0xa0] sm:$0xff] }
 0xb79   : > { %10779 = vadd.xlane.f32.xlu1 %v10778_v3  ;;  %v10553_v46 = vmul.f32 %v10457_v53, %v21009_v36  ;;  %v10787_v42 = vsel %vm1017_vm14, %v21211_v34, 0.0  ;;  %v10646_v49 = vrot.slane %v14272_v37, 4  ;;  %v14277_v37 = vld [vmem:[%s14365_s29 + $0xc8] sm:$0xff] }
 0xb7a   : > { %v21214_v57 = vadd.f32 %v10633_v28, %v10550_v25  ;;  %v10643_v56 = vsel %vm1768_vm8, %v10640_v39, %v10642_v13  ;;  %v10641_v58 = vsel %vm1768_vm8, %v10638_v7, %v10640_v39  ;;  %v10648_v28 = vrot.slane %v14273_v44, 4 }
 0xb7b   : > { %v10455_v52 = vpop.permute.xlu0 %10454  ;;  %10782 = vadd.xlane.f32.xlu0 %v10781_v51  ;;  %v21225_v43 = vadd.f32 %v10639_v47, %v10553_v46  ;;  %v14274_v46 = vld [vmem:[%s14365_s29 + $0xb0] sm:$0xff]  ;;  %v10647_v47 = vsel %vm1768_vm8, %v10644_v38, %v10646_v49 }
 0xb7c   : > { %v10552_v21 = vmul.f32 %v10455_v52, %v21012_v41  ;;  %v10784_v36 = vsel %vm1017_vm14, %v21214_v57, 0.0  ;;  %v10461_v63 = vpop.permute.xlu1 %10460  ;;  %v10650_v51 = vrot.slane %v14274_v46, 4  ;;  %v10645_v52 = vsel %vm1768_vm8, %v10642_v13, %v10644_v38 }
 0xb7d   : > { %10785 = vadd.xlane.f32.xlu1 %v10784_v36  ;;  %v10555_v23 = vmul.f32 %v10461_v63, %v21017_v55  ;;  %v10793_v53 = vsel %vm1017_vm14, %v21225_v43, 0.0 }
 0xb7e   : > { %v21228_v12 = vadd.f32 %v10637_v31, %v10552_v21  ;;  %v10651_v36 = vsel %vm1768_vm8, %v10648_v28, %v10650_v51 }
 0xb7f   : > { %v10459_v41 = vpop.permute.xlu0 %10458  ;;  %10788 = vadd.xlane.f32.xlu0 %v10787_v42  ;;  %v21240_v25 = vadd.f32 %v10643_v56, %v10555_v23  ;;  %v10649_v23 = vsel %vm1768_vm8, %v10646_v49, %v10648_v28  ;;  %v14275_v42 = vld [vmem:[%s14365_s29 + $0xb8] sm:$0xff]  ;;  %v14278_v28 = vld [vmem:[%s14365_s29 + $0xd0] sm:$0xff] }
 0xb80   : > { %v10554_v22 = vmul.f32 %v10459_v41, %v21020_v27  ;;  %v10790_v55 = vsel %vm1017_vm14, %v21228_v12, 0.0  ;;  %v10652_v56 = vrot.slane %v14275_v42, 4 }
 0xb81   : > { %10791 = vadd.xlane.f32.xlu1 %v10790_v55  ;;  %v10799_v13 = vsel %vm1017_vm14, %v21240_v25, 0.0 }
 0xb82   : > { %v21242_v3 = vadd.f32 %v10641_v58, %v10554_v22  ;;  %v10465_v7 = vpop.permute.xlu1 %10464  ;;  %v14276_v58 = vld [vmem:[%s14365_s29 + $0xc0] sm:$0xff]  ;;  %v10656_v22 = vrot.slane %v14277_v37, 4  ;;  %v10653_v46 = vsel %vm1768_vm8, %v10650_v51, %v10652_v56 }
 0xb83   : > { %v10557_v27 = vmul.f32 %v10465_v7, %v21025_v14  ;;  %v10463_v6 = vpop.permute.xlu0 %10462  ;;  %10794 = vadd.xlane.f32.xlu0 %v10793_v53  ;;  %v10654_v41 = vrot.slane %v14276_v58, 4  ;;  %v10658_v7 = vrot.slane %v14278_v28, 4 }
 0xb84   : > { %v10556_v39 = vmul.f32 %v10463_v6, %v21029_v16  ;;  %v10796_v15 = vsel %vm1017_vm14, %v21242_v3, 0.0 }
 0xb85   : > { %10797 = vadd.xlane.f32.xlu1 %v10796_v15  ;;  %v21253_v31 = vadd.f32 %v10647_v47, %v10557_v27  ;;  %v10655_v53 = vsel %vm1768_vm8, %v10652_v56, %v10654_v41 }
 0xb86   : > { %v21255_v21 = vadd.f32 %v10645_v52, %v10556_v39  ;;  %v10469_v14 = vpop.permute.xlu1 %10468  ;;  %v10659_v39 = vsel %vm1768_vm8, %v10656_v22, %v10658_v7 }
 0xb87   : > { %v10559_v63 = vmul.f32 %v10469_v14, %v21035_v50  ;;  %v10467_v16 = vpop.permute.xlu0 %10466  ;;  %10800 = vadd.xlane.f32.xlu0 %v10799_v13  ;;  %v10805_v44 = vsel %vm1017_vm14, %v21253_v31, 0.0  ;;  %v14279_v14 = vld [vmem:[%s14365_s29 + $0xd8] sm:$0xff] }
 0xb88   : > { %v10558_v18 = vmul.f32 %v10467_v16, %v21039_v1  ;;  %v10802_v38 = vsel %vm1017_vm14, %v21255_v21, 0.0  ;;  %v10660_v13 = vrot.slane %v14279_v14, 4 }
 0xb89   : > { %10803 = vadd.xlane.f32.xlu1 %v10802_v38  ;;  %v21268_v55 = vadd.f32 %v10651_v36, %v10559_v63  ;;  %v14280_v63 = vld [vmem:[%s14365_s29 + $0xe0] sm:$0xff]  ;;  %v14281_v38 = vld [vmem:[%s14365_s29 + $0xe8] sm:$0xff] }
 0xb8a   : > { %v21270_v50 = vadd.f32 %v10649_v23, %v10558_v18  ;;  %v10473_v49 = vpop.permute.xlu1 %10472  ;;  %v10657_v23 = vsel %vm1768_vm8, %v10654_v41, %v10656_v22  ;;  %v10664_v37 = vrot.slane %v14281_v38, 4  ;;  %v10661_v22 = vsel %vm1768_vm8, %v10658_v7, %v10660_v13 }
 0xb8b   : > { %v10561_v1 = vmul.f32 %v10473_v49, %v21045_v17  ;;  %10806 = vadd.xlane.f32.xlu0 %v10805_v44  ;;  %v10811_v36 = vsel %vm1017_vm14, %v21268_v55, 0.0  ;;  %v14282_v49 = vld [vmem:[%s14365_s29 + $0xf0] sm:$0xff] }
 0xb8c   : > { %v10471_v47 = vpop.permute.xlu0 %10470  ;;  %v10808_v27 = vsel %vm1017_vm14, %v21270_v50, 0.0  ;;  %v10666_v44 = vrot.slane %v14282_v49, 4 }
 0xb8d   : > { %v10560_v52 = vmul.f32 %v10471_v47, %v21049_v8  ;;  %10809 = vadd.xlane.f32.xlu1 %v10808_v27  ;;  %v21281_v6 = vadd.f32 %v10655_v53, %v10561_v1  ;;  %v10662_v8 = vrot.slane %v14280_v63, 4 }
 0xb8e   : > { %v10477_v15 = vpop.permute.xlu1 %10476  ;;  %v10667_v27 = vsel %vm1768_vm8, %v10664_v37, %v10666_v44 }
 0xb8f   : > { %v21286_v17 = vadd.f32 %v10653_v46, %v10560_v52  ;;  %v10563_v51 = vmul.f32 %v10477_v15, %v21055_v33  ;;  %10812 = vadd.xlane.f32.xlu0 %v10811_v36  ;;  %v10817_v33 = vsel %vm1017_vm14, %v21281_v6, 0.0  ;;  %v10663_v41 = vsel %vm1768_vm8, %v10660_v13, %v10662_v8  ;;  %v14284_v36 = vld [vmem:[%s14365_s29 + $0x100] sm:$0xff] }
 0xb90   : > { %v10475_v16 = vpop.permute.xlu0 %10474  ;;  %v10665_v14 = vsel %vm1768_vm8, %v10662_v8, %v10664_v37 }
 0xb91   : > { %v10562_v42 = vmul.f32 %v10475_v16, %v21059_v54  ;;  %v10814_v56 = vsel %vm1017_vm14, %v21286_v17, 0.0  ;;  %v21295_v58 = vadd.f32 %v10659_v39, %v10563_v51  ;;  %v10670_v51 = vrot.slane %v14284_v36, 4 }
 0xb92   : > { %10815 = vadd.xlane.f32.xlu1 %v10814_v56  ;;  %v10481_v18 = vpop.permute.xlu1 %10480  ;;  %v14285_v56 = vld [vmem:[%s14365_s29 + $0x108] sm:$0xff] }
 0xb93   : > { %v21301_v28 = vadd.f32 %v10657_v23, %v10562_v42  ;;  %v10565_v54 = vmul.f32 %v10481_v18, %v21065_v60  ;;  %10818 = vadd.xlane.f32.xlu0 %v10817_v33  ;;  %v10823_v39 = vsel %vm1017_vm14, %v21295_v58, 0.0  ;;  %v10672_v18 = vrot.slane %v14285_v56, 4  ;;  %v14286_v33 = vld [vmem:[%s14365_s29 + $0x110] sm:$0xff] }
 0xb94   : > { %v10479_v53 = vpop.permute.xlu0 %10478  ;;  %v10674_v38 = vrot.slane %v14286_v33, 4 }
 0xb95   : > { %v10564_v1 = vmul.f32 %v10479_v53, %v21069_v32  ;;  %v10820_v46 = vsel %vm1017_vm14, %v21301_v28, 0.0  ;;  %v21309_v47 = vadd.f32 %v10663_v41, %v10565_v54  ;;  %v14283_v32 = vld [vmem:[%s14365_s29 + $0xf8] sm:$0xff] }
 0xb96   : > { %10821 = vadd.xlane.f32.xlu1 %v10820_v46  ;;  %v10485_v52 = vpop.permute.xlu1 %10484  ;;  %v10668_v15 = vrot.slane %v14283_v32, 4  ;;  %v10673_v32 = vsel %vm1768_vm8, %v10670_v51, %v10672_v18 }
 0xb97   : > { %v21314_v60 = vadd.f32 %v10661_v22, %v10564_v1  ;;  %v10567_v7 = vmul.f32 %v10485_v52, %v21075_v4  ;;  %10824 = vadd.xlane.f32.xlu0 %v10823_v39  ;;  %v10829_v4 = vsel %vm1017_vm14, %v21309_v47, 0.0  ;;  %v10675_v1 = vsel %vm1768_vm8, %v10672_v18, %v10674_v38  ;;  %v14288_v39 = vld [vmem:[%s14365_s29 + $0x120] sm:$0xff] }
 0xb98   : > { %v10483_v13 = vpop.permute.xlu0 %10482  ;;  %v10671_v8 = vsel %vm1768_vm8, %v10668_v15, %v10670_v51  ;;  %v10669_v37 = vsel %vm1768_vm8, %v10666_v44, %v10668_v15 }
 0xb99   : > { %v10566_v63 = vmul.f32 %v10483_v13, %v21079_v5  ;;  %v10826_v23 = vsel %vm1017_vm14, %v21314_v60, 0.0  ;;  %v21323_v16 = vadd.f32 %v10667_v27, %v10567_v7  ;;  %v10678_v7 = vrot.slane %v14288_v39, 4 }
 0xb9a   : > { %10827 = vadd.xlane.f32.xlu1 %v10826_v23  ;;  %v10489_v42 = vpop.permute.xlu1 %10488  ;;  %v14289_v23 = vld [vmem:[%s14365_s29 + $0x128] sm:$0xff] }
 0xb9b   : > { %v21329_v49 = vadd.f32 %v10665_v14, %v10566_v63  ;;  %v10569_v5 = vmul.f32 %v10489_v42, %v21085_v59  ;;  %10830 = vadd.xlane.f32.xlu0 %v10829_v4  ;;  %v10835_v27 = vsel %vm1017_vm14, %v21323_v16, 0.0  ;;  %v10680_v42 = vrot.slane %v14289_v23, 4  ;;  %v14290_v4 = vld [vmem:[%s14365_s29 + $0x130] sm:$0xff] }
 0xb9c   : > { %v10487_v41 = vpop.permute.xlu0 %10486  ;;  %v10682_v56 = vrot.slane %v14290_v4, 4 }
 0xb9d   : > { %v10568_v54 = vmul.f32 %v10487_v41, %v21089_v10  ;;  %v10832_v22 = vsel %vm1017_vm14, %v21329_v49, 0.0  ;;  %v21337_v53 = vadd.f32 %v10671_v8, %v10569_v5  ;;  %v14287_v10 = vld [vmem:[%s14365_s29 + $0x118] sm:$0xff] }
 0xb9e   : > { %10833 = vadd.xlane.f32.xlu1 %v10832_v22  ;;  %v10493_v46 = vpop.permute.xlu1 %10492  ;;  %v10676_v52 = vrot.slane %v14287_v10, 4  ;;  %v10681_v10 = vsel %vm1768_vm8, %v10678_v7, %v10680_v42 }
 0xb9f   : > { %v21342_v59 = vadd.f32 %v10669_v37, %v10568_v54  ;;  %v10571_v44 = vmul.f32 %v10493_v46, %v21095_v35  ;;  %10836 = vadd.xlane.f32.xlu0 %v10835_v27  ;;  %v10841_v35 = vsel %vm1017_vm14, %v21337_v53, 0.0  ;;  %v10683_v54 = vsel %vm1768_vm8, %v10680_v42, %v10682_v56 }
 0xba0   : > { %v10491_v15 = vpop.permute.xlu0 %10490  ;;  %v10679_v51 = vsel %vm1768_vm8, %v10676_v52, %v10678_v7  ;;  %v10677_v18 = vsel %vm1768_vm8, %v10674_v38, %v10676_v52  ;;  %v14291_v38 = vld [vmem:[%s14365_s29 + $0x138] sm:$0xff] }
 0xba1   : > { %v10570_v36 = vmul.f32 %v10491_v15, %v21098_v40  ;;  %v10838_v14 = vsel %vm1017_vm14, %v21342_v59, 0.0  ;;  %v21351_v13 = vadd.f32 %v10675_v1, %v10571_v44  ;;  %v10684_v27 = vrot.slane %v14291_v38, 4 }
 0xba2   : > { %10839 = vadd.xlane.f32.xlu1 %v10838_v14  ;;  %v10497_v63 = vpop.permute.xlu1 %10496 }
 0xba3   : > { %v21357_v33 = vadd.f32 %v10673_v32, %v10570_v36  ;;  %v10573_v40 = vmul.f32 %v10497_v63, %v21105_v48  ;;  %10842 = vadd.xlane.f32.xlu0 %v10841_v35  ;;  %v10847_v1 = vsel %vm1017_vm14, %v21351_v13, 0.0  ;;  %v10685_v7 = vsel %vm1768_vm8, %v10682_v56, %v10684_v27 }
 0xba4   : > { %v10495_v8 = vpop.permute.xlu0 %10494 }
 0xba5   : > { %v10572_v5 = vmul.f32 %v10495_v8, %v21108_v30  ;;  %v10844_v37 = vsel %vm1017_vm14, %v21357_v33, 0.0  ;;  %v21365_v41 = vadd.f32 %v10679_v51, %v10573_v40  ;;  %v14292_v30 = vld [vmem:[%s14365_s29 + $0x140] sm:$0xff]  ;;  %s13680_s29 = smul.u32 288, %s23738_s25 }
 0xba6   : > { %10845 = vadd.xlane.f32.xlu1 %v10844_v37  ;;  %v10501_v22 = vpop.permute.xlu1 %10500  ;;  %v10686_v44 = vrot.slane %v14292_v30, 4 }
 0xba7   : > { %v21370_v48 = vadd.f32 %v10677_v18, %v10572_v5  ;;  %v10575_v46 = vmul.f32 %v10501_v22, %v21115_v11  ;;  %10848 = vadd.xlane.f32.xlu0 %v10847_v1  ;;  %v10853_v11 = vsel %vm1017_vm14, %v21365_v41, 0.0  ;;  %s21634_s23 = scalar_lea.vmem %s21823_s7, %s13680_s29 }
 0xba8   : > { %v10499_v52 = vpop.permute.xlu0 %10498  ;;  %v10687_v63 = vsel %vm1768_vm8, %v10684_v27, %v10686_v44 }
 0xba9   : > { %v10574_v39 = vmul.f32 %v10499_v52, %v21118_v29  ;;  %v10850_v32 = vsel %vm1017_vm14, %v21370_v48, 0.0  ;;  %v21379_v15 = vadd.f32 %v10683_v54, %v10575_v46 }
 0xbaa   : > { %10851 = vadd.xlane.f32.xlu1 %v10850_v32  ;;  %v10505_v36 = vpop.permute.xlu1 %10504 }
 0xbab   : > { %v21383_v14 = vadd.f32 %v10681_v10, %v10574_v39  ;;  %v10577_v35 = vmul.f32 %v10505_v36, %v21125_v20  ;;  %10854 = vadd.xlane.f32.xlu0 %v10853_v11  ;;  %v10859_v51 = vsel %vm1017_vm14, %v21379_v15, 0.0 }
 0xbac   : > { %v10503_v29 = vpop.permute.xlu0 %10502 }
 0xbad   : > { %v10576_v23 = vmul.f32 %v10503_v29, %v21128_v24  ;;  %v10856_v42 = vsel %vm1017_vm14, %v21383_v14, 0.0  ;;  %v21391_v4 = vadd.f32 %v10687_v63, %v10577_v35 }
 0xbae   : > { %10857 = vadd.xlane.f32.xlu1 %v10856_v42 }
 0xbaf   : > { %v21395_v40 = vadd.f32 %v10685_v7, %v10576_v23  ;;  %10860 = vadd.xlane.f32.xlu0 %v10859_v51  ;;  %v10865_v56 = vsel %vm1017_vm14, %v21391_v4, 0.0 }
 0xbb1   : > { %v10862_v20 = vsel %vm1017_vm14, %v21395_v40, 0.0 }
 0xbb2   : > { %10863 = vadd.xlane.f32.xlu1 %v10862_v20 }
 0xbb3   : > { %10866 = vadd.xlane.f32.xlu0 %v10865_v56 }
 0xbf7   : > { %v10765_v24 = vpop.xlane.xlu1 %10764 }
 0xbf8   : > { %v10870_v18 = vmul.f32 0.125, %v10765_v24  ;;  %v10762_v8 = vpop.xlane.xlu0 %10761 }
 0xbf9   : > { %v10869_v5 = vmul.f32 0.125, %v10762_v8 }
 0xbfa   : > { %v21402_v37 = vsub.f32 %v21157_v26, %v10870_v18 }
 0xbfb   : > { %v21405_v54 = vsub.f32 %v21159_v62, %v10869_v5 }
 0xbfc   : > { %v10771_v22 = vpop.xlane.xlu0 %10770  ;;  %v10942_v1 = vmul.f32 %v21402_v37, %v21402_v37 }
 0xbfd   : > { %v10872_v46 = vmul.f32 0.125, %v10771_v22  ;;  %v10941_v38 = vmul.f32 %v21405_v54, %v21405_v54 }
 0xbfe   : > { %v10980_v27 = vsel %vm1017_vm14, %v10942_v1, 0.0 }
 0xbff   : > { %v21413_v30 = vsub.f32 %v21169_v0, %v10872_v46  ;;  %10981 = vadd.xlane.f32.xlu0 %v10980_v27  ;;  %v10977_v26 = vsel %vm1017_vm14, %v10941_v38, 0.0 }
 0xc00   : > { %v10774_v44 = vpop.xlane.xlu1 %10773  ;;  %10978 = vadd.xlane.f32.xlu1 %v10977_v26  ;;  %v10768_v62 = vpop.xlane.xlu0 %10767 }
 0xc01   : > { %v10873_v10 = vmul.f32 0.125, %v10774_v44  ;;  %v10871_v52 = vmul.f32 0.125, %v10768_v62  ;;  %v10944_v39 = vmul.f32 %v21413_v30, %v21413_v30 }
 0xc03   : > { %v21419_v32 = vsub.f32 %v21183_v2, %v10873_v10  ;;  %v21422_v36 = vsub.f32 %v21178_v9, %v10871_v52  ;;  %v10986_v0 = vsel %vm1017_vm14, %v10944_v39, 0.0 }
 0xc04   : > { %10987 = vadd.xlane.f32.xlu0 %v10986_v0  ;;  %v10777_v11 = vpop.xlane.xlu0 %10776 }
 0xc05   : > { %v10874_v63 = vmul.f32 0.125, %v10777_v11  ;;  %v10943_v35 = vmul.f32 %v21422_v36, %v21422_v36  ;;  %v10945_v29 = vmul.f32 %v21419_v32, %v21419_v32 }
 0xc06   : > { %v10780_v7 = vpop.xlane.xlu1 %10779 }
 0xc07   : > { %v10875_v23 = vmul.f32 0.125, %v10780_v7  ;;  %v21430_v42 = vsub.f32 %v21190_v19, %v10874_v63  ;;  %v10983_v2 = vsel %vm1017_vm14, %v10943_v35, 0.0  ;;  %v10989_v18 = vsel %vm1017_vm14, %v10945_v29, 0.0 }
 0xc08   : > { %10984 = vadd.xlane.f32.xlu1 %v10983_v2  ;;  %v10783_v9 = vpop.xlane.xlu0 %10782 }
 0xc09   : > { %v21434_v51 = vsub.f32 %v21198_v45, %v10875_v23  ;;  %v10876_v20 = vmul.f32 0.125, %v10783_v9  ;;  %v10946_v56 = vmul.f32 %v21430_v42, %v21430_v42 }
 0xc0a   : > { %v10786_v24 = vpop.xlane.xlu1 %10785 }
 0xc0b   : > { %v10877_v8 = vmul.f32 0.125, %v10786_v24  ;;  %v21440_v5 = vsub.f32 %v21202_v61, %v10876_v20  ;;  %v10992_v19 = vsel %vm1017_vm14, %v10946_v56, 0.0  ;;  %v10947_v22 = vmul.f32 %v21434_v51, %v21434_v51 }
 0xc0c   : > { %10990 = vadd.xlane.f32.xlu1 %v10989_v18  ;;  %10993 = vadd.xlane.f32.xlu0 %v10992_v19  ;;  %v10789_v45 = vpop.xlane.xlu0 %10788 }
 0xc0d   : > { %v21446_v1 = vsub.f32 %v21214_v57, %v10877_v8  ;;  %v10878_v46 = vmul.f32 0.125, %v10789_v45  ;;  %v10948_v38 = vmul.f32 %v21440_v5, %v21440_v5  ;;  %v10995_v26 = vsel %vm1017_vm14, %v10947_v22, 0.0 }
 0xc0e   : > { %v10792_v27 = vpop.xlane.xlu1 %10791 }
 0xc0f   : > { %v10879_v61 = vmul.f32 0.125, %v10792_v27  ;;  %v21452_v44 = vsub.f32 %v21211_v34, %v10878_v46  ;;  %v10998_v62 = vsel %vm1017_vm14, %v10948_v38, 0.0  ;;  %v10949_v10 = vmul.f32 %v21446_v1, %v21446_v1 }
 0xc10   : > { %10996 = vadd.xlane.f32.xlu1 %v10995_v26  ;;  %10999 = vadd.xlane.f32.xlu0 %v10998_v62  ;;  %v10795_v57 = vpop.xlane.xlu0 %10794 }
 0xc11   : > { %v21458_v52 = vsub.f32 %v21228_v12, %v10879_v61  ;;  %v10880_v39 = vmul.f32 0.125, %v10795_v57  ;;  %v10950_v0 = vmul.f32 %v21452_v44, %v21452_v44  ;;  %v11001_v63 = vsel %vm1017_vm14, %v10949_v10, 0.0 }
 0xc12   : > { %v10798_v11 = vpop.xlane.xlu1 %10797 }
 0xc13   : > { %v10881_v34 = vmul.f32 0.125, %v10798_v11  ;;  %v21464_v35 = vsub.f32 %v21225_v43, %v10880_v39  ;;  %v11004_v7 = vsel %vm1017_vm14, %v10950_v0, 0.0  ;;  %v10951_v29 = vmul.f32 %v21458_v52, %v21458_v52 }
 0xc14   : > { %11002 = vadd.xlane.f32.xlu1 %v11001_v63  ;;  %11005 = vadd.xlane.f32.xlu0 %v11004_v7  ;;  %v10801_v12 = vpop.xlane.xlu0 %10800 }
 0xc15   : > { %v21470_v23 = vsub.f32 %v21242_v3, %v10881_v34  ;;  %v10882_v2 = vmul.f32 0.125, %v10801_v12  ;;  %v10952_v9 = vmul.f32 %v21464_v35, %v21464_v35  ;;  %v11007_v56 = vsel %vm1017_vm14, %v10951_v29, 0.0 }
 0xc16   : > { %v10804_v20 = vpop.xlane.xlu1 %10803 }
 0xc17   : > { %v10883_v43 = vmul.f32 0.125, %v10804_v20  ;;  %v21476_v24 = vsub.f32 %v21240_v25, %v10882_v2  ;;  %v11010_v18 = vsel %vm1017_vm14, %v10952_v9, 0.0  ;;  %v10953_v8 = vmul.f32 %v21470_v23, %v21470_v23 }
 0xc18   : > { %11008 = vadd.xlane.f32.xlu1 %v11007_v56  ;;  %11011 = vadd.xlane.f32.xlu0 %v11010_v18  ;;  %v10807_v3 = vpop.xlane.xlu0 %10806 }
 0xc19   : > { %v21482_v19 = vsub.f32 %v21255_v21, %v10883_v43  ;;  %v10884_v22 = vmul.f32 0.125, %v10807_v3  ;;  %v10954_v45 = vmul.f32 %v21476_v24, %v21476_v24  ;;  %v11013_v38 = vsel %vm1017_vm14, %v10953_v8, 0.0 }
 0xc1a   : > { %v10810_v46 = vpop.xlane.xlu1 %10809 }
 0xc1b   : > { %v10885_v25 = vmul.f32 0.125, %v10810_v46  ;;  %v21488_v27 = vsub.f32 %v21253_v31, %v10884_v22  ;;  %v11016_v26 = vsel %vm1017_vm14, %v10954_v45, 0.0  ;;  %v10955_v61 = vmul.f32 %v21482_v19, %v21482_v19 }
 0xc1c   : > { %11014 = vadd.xlane.f32.xlu1 %v11013_v38  ;;  %11017 = vadd.xlane.f32.xlu0 %v11016_v26  ;;  %v10813_v21 = vpop.xlane.xlu0 %10812 }
 0xc1d   : > { %v21494_v62 = vsub.f32 %v21270_v50, %v10885_v25  ;;  %v10886_v10 = vmul.f32 0.125, %v10813_v21  ;;  %v10956_v57 = vmul.f32 %v21488_v27, %v21488_v27  ;;  %v11019_v31 = vsel %vm1017_vm14, %v10955_v61, 0.0 }
 0xc1f   : > { %v10816_v39 = vpop.xlane.xlu1 %10815  ;;  %v21499_v0 = vsub.f32 %v21268_v55, %v10886_v10  ;;  %v11022_v11 = vsel %vm1017_vm14, %v10956_v57, 0.0  ;;  %v10957_v63 = vmul.f32 %v21494_v62, %v21494_v62 }
 0xc20   : > { %v10887_v34 = vmul.f32 0.125, %v10816_v39  ;;  %11020 = vadd.xlane.f32.xlu1 %v11019_v31  ;;  %11023 = vadd.xlane.f32.xlu0 %v11022_v11  ;;  %v10819_v50 = vpop.xlane.xlu0 %10818 }
 0xc21   : > { %v10888_v7 = vmul.f32 0.125, %v10819_v50  ;;  %v10958_v29 = vmul.f32 %v21499_v0, %v21499_v0  ;;  %v11025_v9 = vsel %vm1017_vm14, %v10957_v63, 0.0 }
 0xc22   : > { %v21508_v12 = vsub.f32 %v21286_v17, %v10887_v34 }
 0xc23   : > { %v10822_v55 = vpop.xlane.xlu1 %10821  ;;  %v21511_v2 = vsub.f32 %v21281_v6, %v10888_v7  ;;  %v11028_v20 = vsel %vm1017_vm14, %v10958_v29, 0.0 }
 0xc24   : > { %v10889_v56 = vmul.f32 0.125, %v10822_v55  ;;  %11026 = vadd.xlane.f32.xlu1 %v11025_v9  ;;  %11029 = vadd.xlane.f32.xlu0 %v11028_v20  ;;  %v10825_v43 = vpop.xlane.xlu0 %10824  ;;  %v10959_v18 = vmul.f32 %v21508_v12, %v21508_v12 }
 0xc25   : > { %v10890_v8 = vmul.f32 0.125, %v10825_v43  ;;  %v10960_v17 = vmul.f32 %v21511_v2, %v21511_v2 }
 0xc26   : > { %v21520_v3 = vsub.f32 %v21301_v28, %v10889_v56  ;;  %v11031_v45 = vsel %vm1017_vm14, %v10959_v18, 0.0 }
 0xc27   : > { %v10828_v6 = vpop.xlane.xlu1 %10827  ;;  %v21523_v22 = vsub.f32 %v21295_v58, %v10890_v8  ;;  %v11034_v46 = vsel %vm1017_vm14, %v10960_v17, 0.0 }
 0xc28   : > { %v10891_v38 = vmul.f32 0.125, %v10828_v6  ;;  %11032 = vadd.xlane.f32.xlu1 %v11031_v45  ;;  %11035 = vadd.xlane.f32.xlu0 %v11034_v46  ;;  %v10831_v25 = vpop.xlane.xlu0 %10830  ;;  %v10961_v26 = vmul.f32 %v21520_v3, %v21520_v3 }
 0xc29   : > { %v10892_v61 = vmul.f32 0.125, %v10831_v25  ;;  %v10962_v28 = vmul.f32 %v21523_v22, %v21523_v22 }
 0xc2a   : > { %v21532_v21 = vsub.f32 %v21314_v60, %v10891_v38  ;;  %v11037_v57 = vsel %vm1017_vm14, %v10961_v26, 0.0 }
 0xc2b   : > { %v10834_v58 = vpop.xlane.xlu1 %10833  ;;  %v21535_v10 = vsub.f32 %v21309_v47, %v10892_v61  ;;  %v11040_v39 = vsel %vm1017_vm14, %v10962_v28, 0.0 }
 0xc2c   : > { %v10893_v31 = vmul.f32 0.125, %v10834_v58  ;;  %11038 = vadd.xlane.f32.xlu1 %v11037_v57  ;;  %11041 = vadd.xlane.f32.xlu0 %v11040_v39  ;;  %v10837_v11 = vpop.xlane.xlu0 %10836  ;;  %v10963_v63 = vmul.f32 %v21532_v21, %v21532_v21 }
 0xc2d   : > { %v10894_v34 = vmul.f32 0.125, %v10837_v11  ;;  %v10964_v60 = vmul.f32 %v21535_v10, %v21535_v10 }
 0xc2e   : > { %v21544_v50 = vsub.f32 %v21329_v49, %v10893_v31  ;;  %v11043_v29 = vsel %vm1017_vm14, %v10963_v63, 0.0 }
 0xc2f   : > { %v10840_v47 = vpop.xlane.xlu1 %10839  ;;  %v21547_v7 = vsub.f32 %v21323_v16, %v10894_v34  ;;  %v11046_v55 = vsel %vm1017_vm14, %v10964_v60, 0.0 }
 0xc30   : > { %v10895_v9 = vmul.f32 0.125, %v10840_v47  ;;  %11044 = vadd.xlane.f32.xlu1 %v11043_v29  ;;  %11047 = vadd.xlane.f32.xlu0 %v11046_v55  ;;  %v10843_v20 = vpop.xlane.xlu0 %10842  ;;  %v10965_v56 = vmul.f32 %v21544_v50, %v21544_v50 }
 0xc31   : > { %v10896_v43 = vmul.f32 0.125, %v10843_v20  ;;  %v10966_v49 = vmul.f32 %v21547_v7, %v21547_v7 }
 0xc32   : > { %v21556_v18 = vsub.f32 %v21342_v59, %v10895_v9  ;;  %v11049_v17 = vsel %vm1017_vm14, %v10965_v56, 0.0 }
 0xc33   : > { %v10846_v16 = vpop.xlane.xlu1 %10845  ;;  %v21559_v8 = vsub.f32 %v21337_v53, %v10896_v43  ;;  %v11052_v6 = vsel %vm1017_vm14, %v10966_v49, 0.0 }
 0xc34   : > { %v10897_v45 = vmul.f32 0.125, %v10846_v16  ;;  %11050 = vadd.xlane.f32.xlu1 %v11049_v17  ;;  %11053 = vadd.xlane.f32.xlu0 %v11052_v6  ;;  %v10849_v46 = vpop.xlane.xlu0 %10848  ;;  %v10967_v38 = vmul.f32 %v21556_v18, %v21556_v18 }
 0xc35   : > { %v10898_v25 = vmul.f32 0.125, %v10849_v46  ;;  %v10968_v59 = vmul.f32 %v21559_v8, %v21559_v8 }
 0xc36   : > { %v21568_v26 = vsub.f32 %v21357_v33, %v10897_v45  ;;  %v11055_v28 = vsel %vm1017_vm14, %v10967_v38, 0.0 }
 0xc37   : > { %v10852_v53 = vpop.xlane.xlu1 %10851  ;;  %v21571_v61 = vsub.f32 %v21351_v13, %v10898_v25  ;;  %v11058_v58 = vsel %vm1017_vm14, %v10968_v59, 0.0 }
 0xc38   : > { %v10899_v57 = vmul.f32 0.125, %v10852_v53  ;;  %11056 = vadd.xlane.f32.xlu1 %v11055_v28  ;;  %11059 = vadd.xlane.f32.xlu0 %v11058_v58  ;;  %v10855_v39 = vpop.xlane.xlu0 %10854  ;;  %v10969_v31 = vmul.f32 %v21568_v26, %v21568_v26 }
 0xc39   : > { %v10900_v11 = vmul.f32 0.125, %v10855_v39  ;;  %v10970_v33 = vmul.f32 %v21571_v61, %v21571_v61 }
 0xc3a   : > { %v21580_v63 = vsub.f32 %v21370_v48, %v10899_v57  ;;  %v11061_v60 = vsel %vm1017_vm14, %v10969_v31, 0.0 }
 0xc3b   : > { %v10858_v13 = vpop.xlane.xlu1 %10857  ;;  %v21583_v34 = vsub.f32 %v21365_v41, %v10900_v11  ;;  %v11064_v47 = vsel %vm1017_vm14, %v10970_v33, 0.0 }
 0xc3c   : > { %v10901_v29 = vmul.f32 0.125, %v10858_v13  ;;  %11062 = vadd.xlane.f32.xlu1 %v11061_v60  ;;  %11065 = vadd.xlane.f32.xlu0 %v11064_v47  ;;  %v10861_v55 = vpop.xlane.xlu0 %10860  ;;  %v10971_v9 = vmul.f32 %v21580_v63, %v21580_v63 }
 0xc3d   : > { %v10902_v20 = vmul.f32 0.125, %v10861_v55  ;;  %v10972_v48 = vmul.f32 %v21583_v34, %v21583_v34 }
 0xc3e   : > { %v21592_v56 = vsub.f32 %v21383_v14, %v10901_v29  ;;  %v11067_v49 = vsel %vm1017_vm14, %v10971_v9, 0.0 }
 0xc3f   : > { %v10864_v41 = vpop.xlane.xlu1 %10863  ;;  %v21595_v43 = vsub.f32 %v21379_v15, %v10902_v20  ;;  %v11070_v16 = vsel %vm1017_vm14, %v10972_v48, 0.0 }
 0xc40   : > { %v10903_v17 = vmul.f32 0.125, %v10864_v41  ;;  %11068 = vadd.xlane.f32.xlu1 %v11067_v49  ;;  %11071 = vadd.xlane.f32.xlu0 %v11070_v16  ;;  %v10867_v6 = vpop.xlane.xlu0 %10866  ;;  %v10973_v45 = vmul.f32 %v21592_v56, %v21592_v56 }
 0xc41   : > { %v10904_v46 = vmul.f32 0.125, %v10867_v6  ;;  %v10974_v14 = vmul.f32 %v21595_v43, %v21595_v43 }
 0xc42   : > { %v21604_v38 = vsub.f32 %v21395_v40, %v10903_v17  ;;  %v11073_v25 = vsel %vm1017_vm14, %v10973_v45, 0.0  ;;  %v21621_v17 = vld [vmem:[%s21821_s5] ss:$0 sm:$0xff] }
 0xc43   : > { %v21607_v15 = vsub.f32 %v21391_v4, %v10904_v46  ;;  %v11076_v59 = vsel %vm1017_vm14, %v10974_v14, 0.0 }
 0xc44   : > { %11074 = vadd.xlane.f32.xlu1 %v11073_v25  ;;  %11077 = vadd.xlane.f32.xlu0 %v11076_v59  ;;  %v10975_v53 = vmul.f32 %v21604_v38, %v21604_v38  ;;  %v21627_v25 = vld [vmem:[%s21822_s6] ss:$0 sm:$0xff] }
 0xc45   : > { %v10976_v28 = vmul.f32 %v21607_v15, %v21607_v15 }
 0xc46   : > { %v11079_v58 = vsel %vm1017_vm14, %v10975_v53, 0.0 }
 0xc47   : > { %v11082_v40 = vsel %vm1017_vm14, %v10976_v28, 0.0 }
 0xc48   : > { %11080 = vadd.xlane.f32.xlu1 %v11079_v58  ;;  %11083 = vadd.xlane.f32.xlu0 %v11082_v40 }
 0xc8c   : > { %v10982_v4 = vpop.xlane.xlu0 %10981 }
 0xc8d   : > { %v11086_v57 = vmul.f32 0.125, %v10982_v4  ;;  %v10979_v39 = vpop.xlane.xlu1 %10978 }
 0xc8e   : > { %v11085_v31 = vmul.f32 0.125, %v10979_v39 }
 0xc8f   : > { %v11122_v11 = vadd.f32 1e-05, %v11086_v57 }
 0xc90   : > { %v11121_v33 = vadd.f32 1e-05, %v11085_v31 }
 0xc91   : > { %14151 = vrsqrt.f32 %v11122_v11  ;;  %v10988_v13 = vpop.xlane.xlu0 %10987 }
 0xc92   : > { %14153 = vrsqrt.f32 %v11121_v33  ;;  %v11088_v60 = vmul.f32 0.125, %v10988_v13 }
 0xc94   : > { %v11124_v47 = vadd.f32 1e-05, %v11088_v60 }
 0xc95   : > { %v10985_v29 = vpop.xlane.xlu1 %10984 }
 0xc96   : > { %14155 = vrsqrt.f32 %v11124_v47  ;;  %v11087_v55 = vmul.f32 0.125, %v10985_v29 }
 0xc98   : > { %v11123_v9 = vadd.f32 1e-05, %v11087_v55 }
 0xc99   : > { %v10991_v20 = vpop.xlane.xlu1 %10990  ;;  %v10994_v48 = vpop.xlane.xlu0 %10993 }
 0xc9a   : > { %14157 = vrsqrt.f32 %v11123_v9  ;;  %v11089_v41 = vmul.f32 0.125, %v10991_v20  ;;  %v11090_v49 = vmul.f32 0.125, %v10994_v48 }
 0xc9b   : > { %v14152_v16 = vpop.eup %14151 }
 0xc9c   : > { %v14154_v6 = vpop.eup %14153  ;;  %v11194_v45 = vmul.f32 %v14152_v16, %v21402_v37  ;;  %v11125_v46 = vadd.f32 1e-05, %v11089_v41  ;;  %v11126_v14 = vadd.f32 1e-05, %v11090_v49 }
 0xc9d   : > { %v11193_v59 = vmul.f32 %v14154_v6, %v21405_v54  ;;  %v10997_v53 = vpop.xlane.xlu1 %10996  ;;  %v11000_v28 = vpop.xlane.xlu0 %10999 }
 0xc9e   : > { %v11237_v58 = vmul.f32 %v21621_v17, %v11194_v45  ;;  %14159 = vrsqrt.f32 %v11125_v46  ;;  %v11091_v40 = vmul.f32 0.125, %v10997_v53  ;;  %v11092_v4 = vmul.f32 0.125, %v11000_v28 }
 0xc9f   : > { %v11236_v37 = vmul.f32 %v21621_v17, %v11193_v59  ;;  %14161 = vrsqrt.f32 %v11126_v14 }
 0xca0   : > { %v14156_v57 = vpop.eup %14155  ;;  %v11280_v54 = vadd.f32 %v21627_v25, %v11237_v58  ;;  %v11127_v39 = vadd.f32 1e-05, %v11091_v40  ;;  %v11128_v31 = vadd.f32 1e-05, %v11092_v4 }
 0xca1   : > { %v11279_v11 = vadd.f32 %v21627_v25, %v11236_v37  ;;  %v11196_v33 = vmul.f32 %v14156_v57, %v21413_v30  ;;  %v11003_v13 = vpop.xlane.xlu1 %11002  ;;  %v11006_v60 = vpop.xlane.xlu0 %11005 }
 0xca2   : > { %11316 = vst.msk [vmem:[%s21634_s23 + $0x8] sm:$0xff] %vm1017_vm14, %v11280_v54  ;;  %14163 = vrsqrt.f32 %v11127_v39  ;;  %v11093_v47 = vmul.f32 0.125, %v11003_v13  ;;  %v11094_v29 = vmul.f32 0.125, %v11006_v60 }
 0xca3   : > { %11315 = vst.msk [vmem:[%s21634_s23] sm:$0xff] %vm1017_vm14, %v11279_v11  ;;  %v11239_v55 = vmul.f32 %v21621_v17, %v11196_v33  ;;  %14165 = vrsqrt.f32 %v11128_v31 }
 0xca4   : > { %v14158_v9 = vpop.eup %14157  ;;  %v11129_v20 = vadd.f32 1e-05, %v11093_v47  ;;  %v11130_v48 = vadd.f32 1e-05, %v11094_v29 }
 0xca5   : > { %v11282_v41 = vadd.f32 %v21627_v25, %v11239_v55  ;;  %v11195_v30 = vmul.f32 %v14158_v9, %v21422_v36  ;;  %v11009_v49 = vpop.xlane.xlu1 %11008  ;;  %v11012_v16 = vpop.xlane.xlu0 %11011 }
 0xca6   : > { %14167 = vrsqrt.f32 %v11129_v20  ;;  %v11095_v6 = vmul.f32 0.125, %v11009_v49  ;;  %v11096_v45 = vmul.f32 0.125, %v11012_v16 }
 0xca7   : > { %11318 = vst.msk [vmem:[%s21634_s23 + $0x18] sm:$0xff] %vm1017_vm14, %v11282_v41  ;;  %v11238_v46 = vmul.f32 %v21621_v17, %v11195_v30  ;;  %14169 = vrsqrt.f32 %v11130_v48 }
 0xca8   : > { %v14160_v14 = vpop.eup %14159  ;;  %v11131_v59 = vadd.f32 1e-05, %v11095_v6  ;;  %v11132_v53 = vadd.f32 1e-05, %v11096_v45 }
 0xca9   : > { %v14162_v28 = vpop.eup %14161  ;;  %v11281_v58 = vadd.f32 %v21627_v25, %v11238_v46  ;;  %v11197_v40 = vmul.f32 %v14160_v14, %v21419_v32  ;;  %v11015_v36 = vpop.xlane.xlu1 %11014 }
 0xcaa   : > { %v11018_v4 = vpop.xlane.xlu0 %11017  ;;  %v11198_v37 = vmul.f32 %v14162_v28, %v21430_v42  ;;  %14171 = vrsqrt.f32 %v11131_v59  ;;  %v11097_v57 = vmul.f32 0.125, %v11015_v36 }
 0xcab   : > { %v11098_v54 = vmul.f32 0.125, %v11018_v4  ;;  %11317 = vst.msk [vmem:[%s21634_s23 + $0x10] sm:$0xff] %vm1017_vm14, %v11281_v58  ;;  %v11240_v39 = vmul.f32 %v21621_v17, %v11197_v40  ;;  %14173 = vrsqrt.f32 %v11132_v53 }
 0xcac   : > { %v14164_v31 = vpop.eup %14163  ;;  %v11241_v11 = vmul.f32 %v21621_v17, %v11198_v37  ;;  %v11133_v33 = vadd.f32 1e-05, %v11097_v57 }
 0xcad   : > { %v11134_v13 = vadd.f32 1e-05, %v11098_v54  ;;  %v14166_v32 = vpop.eup %14165  ;;  %v11283_v60 = vadd.f32 %v21627_v25, %v11240_v39  ;;  %v11199_v42 = vmul.f32 %v14164_v31, %v21434_v51  ;;  %v11021_v47 = vpop.xlane.xlu1 %11020 }
 0xcae   : > { %v11024_v29 = vpop.xlane.xlu0 %11023  ;;  %v11284_v55 = vadd.f32 %v21627_v25, %v11241_v11  ;;  %v11200_v9 = vmul.f32 %v14166_v32, %v21440_v5  ;;  %14175 = vrsqrt.f32 %v11133_v33  ;;  %v11099_v20 = vmul.f32 0.125, %v11021_v47 }
 0xcaf   : > { %11319 = vst.msk [vmem:[%s21634_s23 + $0x20] sm:$0xff] %vm1017_vm14, %v11283_v60  ;;  %v11242_v48 = vmul.f32 %v21621_v17, %v11199_v42  ;;  %14177 = vrsqrt.f32 %v11134_v13  ;;  %v11100_v41 = vmul.f32 0.125, %v11024_v29 }
 0xcb0   : > { %v14168_v30 = vpop.eup %14167  ;;  %11320 = vst.msk [vmem:[%s21634_s23 + $0x28] sm:$0xff] %vm1017_vm14, %v11284_v55  ;;  %v11243_v51 = vmul.f32 %v21621_v17, %v11200_v9  ;;  %v11135_v49 = vadd.f32 1e-05, %v11099_v20 }
 0xcb1   : > { %v14170_v16 = vpop.eup %14169  ;;  %v11285_v6 = vadd.f32 %v21627_v25, %v11242_v48  ;;  %v11201_v5 = vmul.f32 %v14168_v30, %v21446_v1  ;;  %v11136_v45 = vadd.f32 1e-05, %v11100_v41  ;;  %v11027_v46 = vpop.xlane.xlu1 %11026 }
 0xcb2   : > { %v11030_v14 = vpop.xlane.xlu0 %11029  ;;  %v11286_v59 = vadd.f32 %v21627_v25, %v11243_v51  ;;  %v11202_v53 = vmul.f32 %v14170_v16, %v21452_v44  ;;  %14179 = vrsqrt.f32 %v11135_v49  ;;  %v11101_v28 = vmul.f32 0.125, %v11027_v46 }
 0xcb3   : > { %11321 = vst.msk [vmem:[%s21634_s23 + $0x30] sm:$0xff] %vm1017_vm14, %v11285_v6  ;;  %v11244_v58 = vmul.f32 %v21621_v17, %v11201_v5  ;;  %14181 = vrsqrt.f32 %v11136_v45  ;;  %v11102_v40 = vmul.f32 0.125, %v11030_v14 }
 0xcb4   : > { %v14172_v36 = vpop.eup %14171  ;;  %11322 = vst.msk [vmem:[%s21634_s23 + $0x38] sm:$0xff] %vm1017_vm14, %v11286_v59  ;;  %v11245_v1 = vmul.f32 %v21621_v17, %v11202_v53  ;;  %v11137_v4 = vadd.f32 1e-05, %v11101_v28 }
 0xcb5   : > { %v14174_v37 = vpop.eup %14173  ;;  %v11287_v57 = vadd.f32 %v21627_v25, %v11244_v58  ;;  %v11203_v44 = vmul.f32 %v14172_v36, %v21458_v52  ;;  %v11138_v54 = vadd.f32 1e-05, %v11102_v40  ;;  %v11033_v39 = vpop.xlane.xlu1 %11032 }
 0xcb6   : > { %v11036_v31 = vpop.xlane.xlu0 %11035  ;;  %v11288_v11 = vadd.f32 %v21627_v25, %v11245_v1  ;;  %v11204_v33 = vmul.f32 %v14174_v37, %v21464_v35  ;;  %14183 = vrsqrt.f32 %v11137_v4  ;;  %v11103_v13 = vmul.f32 0.125, %v11033_v39 }
 0xcb7   : > { %11323 = vst.msk [vmem:[%s21634_s23 + $0x40] sm:$0xff] %vm1017_vm14, %v11287_v57  ;;  %v11246_v32 = vmul.f32 %v21621_v17, %v11203_v44  ;;  %14185 = vrsqrt.f32 %v11138_v54  ;;  %v11104_v60 = vmul.f32 0.125, %v11036_v31 }
 0xcb8   : > { %v14176_v42 = vpop.eup %14175  ;;  %11324 = vst.msk [vmem:[%s21634_s23 + $0x48] sm:$0xff] %vm1017_vm14, %v11288_v11  ;;  %v11247_v52 = vmul.f32 %v21621_v17, %v11204_v33  ;;  %v11139_v47 = vadd.f32 1e-05, %v11103_v13 }
 0xcb9   : > { %v14178_v29 = vpop.eup %14177  ;;  %v11289_v55 = vadd.f32 %v21627_v25, %v11246_v32  ;;  %v11205_v35 = vmul.f32 %v14176_v42, %v21470_v23  ;;  %v11140_v9 = vadd.f32 1e-05, %v11104_v60  ;;  %v11039_v20 = vpop.xlane.xlu1 %11038 }
 0xcba   : > { %v11042_v48 = vpop.xlane.xlu0 %11041  ;;  %v11290_v41 = vadd.f32 %v21627_v25, %v11247_v52  ;;  %v11206_v30 = vmul.f32 %v14178_v29, %v21476_v24  ;;  %14187 = vrsqrt.f32 %v11139_v47  ;;  %v11105_v51 = vmul.f32 0.125, %v11039_v20 }
 0xcbb   : > { %11325 = vst.msk [vmem:[%s21634_s23 + $0x50] sm:$0xff] %vm1017_vm14, %v11289_v55  ;;  %v11248_v49 = vmul.f32 %v21621_v17, %v11205_v35  ;;  %14189 = vrsqrt.f32 %v11140_v9  ;;  %v11106_v16 = vmul.f32 0.125, %v11042_v48 }
 0xcbc   : > { %v14180_v6 = vpop.eup %14179  ;;  %11326 = vst.msk [vmem:[%s21634_s23 + $0x58] sm:$0xff] %vm1017_vm14, %v11290_v41  ;;  %v11249_v23 = vmul.f32 %v21621_v17, %v11206_v30  ;;  %v11141_v5 = vadd.f32 1e-05, %v11105_v51 }
 0xcbd   : > { %v14182_v45 = vpop.eup %14181  ;;  %v11291_v46 = vadd.f32 %v21627_v25, %v11248_v49  ;;  %v11207_v24 = vmul.f32 %v14180_v6, %v21482_v19  ;;  %v11142_v14 = vadd.f32 1e-05, %v11106_v16  ;;  %v11045_v59 = vpop.xlane.xlu1 %11044 }
 0xcbe   : > { %v11048_v53 = vpop.xlane.xlu0 %11047  ;;  %v11292_v28 = vadd.f32 %v21627_v25, %v11249_v23  ;;  %v11208_v58 = vmul.f32 %v14182_v45, %v21488_v27  ;;  %14191 = vrsqrt.f32 %v11141_v5  ;;  %v11107_v40 = vmul.f32 0.125, %v11045_v59 }
 0xcbf   : > { %11327 = vst.msk [vmem:[%s21634_s23 + $0x60] sm:$0xff] %vm1017_vm14, %v11291_v46  ;;  %v11250_v36 = vmul.f32 %v21621_v17, %v11207_v24  ;;  %14193 = vrsqrt.f32 %v11142_v14  ;;  %v11108_v1 = vmul.f32 0.125, %v11048_v53 }
 0xcc0   : > { %v14184_v4 = vpop.eup %14183  ;;  %11328 = vst.msk [vmem:[%s21634_s23 + $0x68] sm:$0xff] %vm1017_vm14, %v11292_v28  ;;  %v11251_v19 = vmul.f32 %v21621_v17, %v11208_v58  ;;  %v11143_v37 = vadd.f32 1e-05, %v11107_v40 }
 0xcc1   : > { %v14186_v57 = vpop.eup %14185  ;;  %v11293_v44 = vadd.f32 %v21627_v25, %v11250_v36  ;;  %v11209_v27 = vmul.f32 %v14184_v4, %v21494_v62  ;;  %v11144_v54 = vadd.f32 1e-05, %v11108_v1  ;;  %v11051_v39 = vpop.xlane.xlu1 %11050 }
 0xcc2   : > { %v11054_v31 = vpop.xlane.xlu0 %11053  ;;  %v11294_v11 = vadd.f32 %v21627_v25, %v11251_v19  ;;  %v11210_v33 = vmul.f32 %v14186_v57, %v21499_v0  ;;  %14195 = vrsqrt.f32 %v11143_v37  ;;  %v11109_v13 = vmul.f32 0.125, %v11051_v39 }
 0xcc3   : > { %11329 = vst.msk [vmem:[%s21634_s23 + $0x70] sm:$0xff] %vm1017_vm14, %v11293_v44  ;;  %v11252_v32 = vmul.f32 %v21621_v17, %v11209_v27  ;;  %14197 = vrsqrt.f32 %v11144_v54  ;;  %v11110_v60 = vmul.f32 0.125, %v11054_v31 }
 0xcc4   : > { %v14188_v42 = vpop.eup %14187  ;;  %11330 = vst.msk [vmem:[%s21634_s23 + $0x78] sm:$0xff] %vm1017_vm14, %v11294_v11  ;;  %v11253_v62 = vmul.f32 %v21621_v17, %v11210_v33  ;;  %v11145_v52 = vadd.f32 1e-05, %v11109_v13 }
 0xcc5   : > { %v14190_v47 = vpop.eup %14189  ;;  %v11295_v29 = vadd.f32 %v21627_v25, %v11252_v32  ;;  %v11211_v0 = vmul.f32 %v14188_v42, %v21508_v12  ;;  %v11146_v55 = vadd.f32 1e-05, %v11110_v60  ;;  %v11057_v35 = vpop.xlane.xlu1 %11056 }
 0xcc6   : > { %v11060_v9 = vpop.xlane.xlu0 %11059  ;;  %v11296_v20 = vadd.f32 %v21627_v25, %v11253_v62  ;;  %v11212_v48 = vmul.f32 %v14190_v47, %v21511_v2  ;;  %14199 = vrsqrt.f32 %v11145_v52  ;;  %v11111_v41 = vmul.f32 0.125, %v11057_v35 }
 0xcc7   : > { %11331 = vst.msk [vmem:[%s21634_s23 + $0x80] sm:$0xff] %vm1017_vm14, %v11295_v29  ;;  %v11254_v30 = vmul.f32 %v21621_v17, %v11211_v0  ;;  %14201 = vrsqrt.f32 %v11146_v55  ;;  %v11112_v51 = vmul.f32 0.125, %v11060_v9 }
 0xcc8   : > { %v14192_v49 = vpop.eup %14191  ;;  %11332 = vst.msk [vmem:[%s21634_s23 + $0x88] sm:$0xff] %vm1017_vm14, %v11296_v20  ;;  %v11255_v12 = vmul.f32 %v21621_v17, %v11212_v48  ;;  %v11147_v16 = vadd.f32 1e-05, %v11111_v41 }
 0xcc9   : > { %v14194_v6 = vpop.eup %14193  ;;  %v11297_v23 = vadd.f32 %v21627_v25, %v11254_v30  ;;  %v11213_v2 = vmul.f32 %v14192_v49, %v21520_v3  ;;  %v11148_v5 = vadd.f32 1e-05, %v11112_v51  ;;  %v11063_v45 = vpop.xlane.xlu1 %11062 }
 0xcca   : > { %v11066_v46 = vpop.xlane.xlu0 %11065  ;;  %v11298_v24 = vadd.f32 %v21627_v25, %v11255_v12  ;;  %v11214_v14 = vmul.f32 %v14194_v6, %v21523_v22  ;;  %14203 = vrsqrt.f32 %v11147_v16  ;;  %v11113_v59 = vmul.f32 0.125, %v11063_v45 }
 0xccb   : > { %11333 = vst.msk [vmem:[%s21634_s23 + $0x90] sm:$0xff] %vm1017_vm14, %v11297_v23  ;;  %v11256_v53 = vmul.f32 %v21621_v17, %v11213_v2  ;;  %14205 = vrsqrt.f32 %v11148_v5  ;;  %v11114_v28 = vmul.f32 0.125, %v11066_v46 }
 0xccc   : > { %v14196_v58 = vpop.eup %14195  ;;  %11334 = vst.msk [vmem:[%s21634_s23 + $0x98] sm:$0xff] %vm1017_vm14, %v11298_v24  ;;  %v11257_v3 = vmul.f32 %v21621_v17, %v11214_v14  ;;  %v11149_v40 = vadd.f32 1e-05, %v11113_v59 }
 0xccd   : > { %v14198_v36 = vpop.eup %14197  ;;  %v11299_v1 = vadd.f32 %v21627_v25, %v11256_v53  ;;  %v11215_v22 = vmul.f32 %v14196_v58, %v21532_v21  ;;  %v11150_v4 = vadd.f32 1e-05, %v11114_v28  ;;  %v11069_v19 = vpop.xlane.xlu1 %11068 }
 0xcce   : > { %v11072_v37 = vpop.xlane.xlu0 %11071  ;;  %v11300_v57 = vadd.f32 %v21627_v25, %v11257_v3  ;;  %v11216_v44 = vmul.f32 %v14198_v36, %v21535_v10  ;;  %14207 = vrsqrt.f32 %v11149_v40  ;;  %v11115_v27 = vmul.f32 0.125, %v11069_v19 }
 0xccf   : > { %11335 = vst.msk [vmem:[%s21634_s23 + $0xa0] sm:$0xff] %vm1017_vm14, %v11299_v1  ;;  %v11258_v54 = vmul.f32 %v21621_v17, %v11215_v22  ;;  %14209 = vrsqrt.f32 %v11150_v4  ;;  %v11116_v39 = vmul.f32 0.125, %v11072_v37 }
 0xcd0   : > { %v14200_v31 = vpop.eup %14199  ;;  %11336 = vst.msk [vmem:[%s21634_s23 + $0xa8] sm:$0xff] %vm1017_vm14, %v11300_v57  ;;  %v11259_v21 = vmul.f32 %v21621_v17, %v11216_v44  ;;  %v11151_v11 = vadd.f32 1e-05, %v11115_v27 }
 0xcd1   : > { %v14202_v33 = vpop.eup %14201  ;;  %v11301_v13 = vadd.f32 %v21627_v25, %v11258_v54  ;;  %v11217_v10 = vmul.f32 %v14200_v31, %v21544_v50  ;;  %v11152_v32 = vadd.f32 1e-05, %v11116_v39  ;;  %v11075_v60 = vpop.xlane.xlu1 %11074 }
 0xcd2   : > { %v11078_v42 = vpop.xlane.xlu0 %11077  ;;  %v11302_v62 = vadd.f32 %v21627_v25, %v11259_v21  ;;  %v11218_v52 = vmul.f32 %v14202_v33, %v21547_v7  ;;  %14211 = vrsqrt.f32 %v11151_v11  ;;  %v11117_v47 = vmul.f32 0.125, %v11075_v60 }
 0xcd3   : > { %11337 = vst.msk [vmem:[%s21634_s23 + $0xb0] sm:$0xff] %vm1017_vm14, %v11301_v13  ;;  %v11260_v29 = vmul.f32 %v21621_v17, %v11217_v10  ;;  %14213 = vrsqrt.f32 %v11152_v32  ;;  %v11118_v0 = vmul.f32 0.125, %v11078_v42 }
 0xcd4   : > { %v14204_v55 = vpop.eup %14203  ;;  %11338 = vst.msk [vmem:[%s21634_s23 + $0xb8] sm:$0xff] %vm1017_vm14, %v11302_v62  ;;  %v11261_v50 = vmul.f32 %v21621_v17, %v11218_v52  ;;  %v11153_v35 = vadd.f32 1e-05, %v11117_v47 }
 0xcd5   : > { %v14206_v9 = vpop.eup %14205  ;;  %v11303_v20 = vadd.f32 %v21627_v25, %v11260_v29  ;;  %v11219_v7 = vmul.f32 %v14204_v55, %v21556_v18  ;;  %v11154_v48 = vadd.f32 1e-05, %v11118_v0  ;;  %v11081_v41 = vpop.xlane.xlu1 %11080 }
 0xcd6   : > { %v11084_v30 = vpop.xlane.xlu0 %11083  ;;  %v11304_v51 = vadd.f32 %v21627_v25, %v11261_v50  ;;  %v11220_v49 = vmul.f32 %v14206_v9, %v21559_v8  ;;  %14215 = vrsqrt.f32 %v11153_v35  ;;  %v11119_v12 = vmul.f32 0.125, %v11081_v41 }
 0xcd7   : > { %11339 = vst.msk [vmem:[%s21634_s23 + $0xc0] sm:$0xff] %vm1017_vm14, %v11303_v20  ;;  %v11262_v16 = vmul.f32 %v21621_v17, %v11219_v7  ;;  %14217 = vrsqrt.f32 %v11154_v48  ;;  %v11120_v6 = vmul.f32 0.125, %v11084_v30 }
 0xcd8   : > { %v14208_v23 = vpop.eup %14207  ;;  %11340 = vst.msk [vmem:[%s21634_s23 + $0xc8] sm:$0xff] %vm1017_vm14, %v11304_v51  ;;  %v11263_v18 = vmul.f32 %v21621_v17, %v11220_v49  ;;  %v11155_v2 = vadd.f32 1e-05, %v11119_v12 }
 0xcd9   : > { %v14210_v5 = vpop.eup %14209  ;;  %v11305_v45 = vadd.f32 %v21627_v25, %v11262_v16  ;;  %v11221_v8 = vmul.f32 %v14208_v23, %v21568_v26  ;;  %v11156_v46 = vadd.f32 1e-05, %v11120_v6 }
 0xcda   : > { %v11306_v24 = vadd.f32 %v21627_v25, %v11263_v18  ;;  %v11222_v14 = vmul.f32 %v14210_v5, %v21571_v61  ;;  %14219 = vrsqrt.f32 %v11155_v2 }
 0xcdb   : > { %11341 = vst.msk [vmem:[%s21634_s23 + $0xd0] sm:$0xff] %vm1017_vm14, %v11305_v45  ;;  %v11264_v59 = vmul.f32 %v21621_v17, %v11221_v8  ;;  %14221 = vrsqrt.f32 %v11156_v46 }
 0xcdc   : > { %v14212_v53 = vpop.eup %14211  ;;  %11342 = vst.msk [vmem:[%s21634_s23 + $0xd8] sm:$0xff] %vm1017_vm14, %v11306_v24  ;;  %v11265_v28 = vmul.f32 %v21621_v17, %v11222_v14 }
 0xcdd   : > { %v14214_v26 = vpop.eup %14213  ;;  %v11307_v58 = vadd.f32 %v21627_v25, %v11264_v59  ;;  %v11223_v3 = vmul.f32 %v14212_v53, %v21580_v63 }
 0xcde   : > { %v11308_v61 = vadd.f32 %v21627_v25, %v11265_v28  ;;  %v11224_v40 = vmul.f32 %v14214_v26, %v21583_v34 }
 0xcdf   : > { %11343 = vst.msk [vmem:[%s21634_s23 + $0xe0] sm:$0xff] %vm1017_vm14, %v11307_v58  ;;  %v11266_v36 = vmul.f32 %v21621_v17, %v11223_v3 }
 0xce0   : > { %v14216_v1 = vpop.eup %14215  ;;  %11344 = vst.msk [vmem:[%s21634_s23 + $0xe8] sm:$0xff] %vm1017_vm14, %v11308_v61  ;;  %v11267_v22 = vmul.f32 %v21621_v17, %v11224_v40 }
 0xce1   : > { %v14218_v4 = vpop.eup %14217  ;;  %v11309_v19 = vadd.f32 %v21627_v25, %v11266_v36  ;;  %v11225_v63 = vmul.f32 %v14216_v1, %v21592_v56 }
 0xce2   : > { %v11310_v37 = vadd.f32 %v21627_v25, %v11267_v22  ;;  %v11226_v34 = vmul.f32 %v14218_v4, %v21595_v43 }
 0xce3   : > { %11345 = vst.msk [vmem:[%s21634_s23 + $0xf0] sm:$0xff] %vm1017_vm14, %v11309_v19  ;;  %v11268_v57 = vmul.f32 %v21621_v17, %v11225_v63 }
 0xce4   : > { %v14220_v44 = vpop.eup %14219  ;;  %11346 = vst.msk [vmem:[%s21634_s23 + $0xf8] sm:$0xff] %vm1017_vm14, %v11310_v37  ;;  %v11269_v27 = vmul.f32 %v21621_v17, %v11226_v34 }
 0xce5   : > { %v14222_v54 = vpop.eup %14221  ;;  %v11311_v39 = vadd.f32 %v21627_v25, %v11268_v57  ;;  %v11227_v56 = vmul.f32 %v14220_v44, %v21604_v38 }
 0xce6   : > { %v11312_v31 = vadd.f32 %v21627_v25, %v11269_v27  ;;  %v11228_v43 = vmul.f32 %v14222_v54, %v21607_v15 }
 0xce7   : > { %11347 = vst.msk [vmem:[%s21634_s23 + $0x100] sm:$0xff] %vm1017_vm14, %v11311_v39  ;;  %v11270_v21 = vmul.f32 %v21621_v17, %v11227_v56 }
 0xce8   : > { %11348 = vst.msk [vmem:[%s21634_s23 + $0x108] sm:$0xff] %vm1017_vm14, %v11312_v31  ;;  %v11271_v11 = vmul.f32 %v21621_v17, %v11228_v43 }
 0xce9   : > { %v11313_v33 = vadd.f32 %v21627_v25, %v11270_v21 }
 0xcea   : > { %v11314_v13 = vadd.f32 %v21627_v25, %v11271_v11 }
 0xceb   : > { %11349 = vst.msk [vmem:[%s21634_s23 + $0x110] sm:$0xff] %vm1017_vm14, %v11313_v33 }
 0xcec   : > { %11350 = vst.msk [vmem:[%s21634_s23 + $0x118] sm:$0xff] %vm1017_vm14, %v11314_v13 }
 0xced PF: > { %s17_s24 = sadd.s32 1, %s14299_s24  }
 0xcee   : > { %p14_p4 = scmp.ge.s32.totalorder %s17_s24, 4  }
 0xcf0   :  { %16 = sbr.rel (!%p14_p4) target bundleno = 1 (0x1), region = 78 }

</bundles_post_ra>
